<compile_context>
chip_gen: v7x
topology: tpu7x:2x2x1
jax: 0.10.0
libtpu: 0.0.40
codegen_flags: <defaults>
</compile_context>

<pallas_src>
import functools

import jax
import jax.numpy as jnp
from jax.experimental import pallas as pl
from jax.experimental.pallas import tpu as pltpu

EPS = 1e-5
LANE = 128


def _round_up(x, m):
    return (x + m - 1) // m * m


def _pick_tile_h(h, w, target_rows=256):
    """Largest divisor of h whose row band has ~target_rows matmul rows."""
    best = 1
    for th in range(1, h + 1):
        if h % th == 0 and th * w <= max(target_rows, w):
            best = th
    return best


# ----------------------------- Pallas kernels ------------------------------ #
def _conv3x3_stats_kernel(x_ref, w_ref, scale_ref, bias_ref,
                          out_ref, s1_ref, s2_ref, xbuf, slab,
                          *, H, W, TH, apply_input_bn_relu):
    """3x3 conv (stride 1, pad 1) on one image + per-image BN partial stats.

    x_ref:      (1, H, W, Cin)    f32/bf16 unpadded activations
    w_ref:      (9*Cin, Cout)     bf16     im2col-ordered weights (t = kh*3+kw)
    scale/bias: (1, Cin)          f32      folded BN affine for the *input*
                                           (used only when apply_input_bn_relu)
    out_ref:    (1, H*W, Cout)    bf16     raw (pre-BN) conv output
    s1_ref:     (1, 1, Cout)      f32      per-image sum over the H*W rows
    s2_ref:     (1, 1, Cout)      f32      per-image sum of squares
    xbuf:       VMEM (H+2, W+2, Cin) bf16  zero-bordered (optionally bn+ReLU'd)
    slab:       VMEM (TH*W, 9*Cin)   bf16  im2col slab for one row band
    """
    cin = x_ref.shape[3]
    cout = w_ref.shape[1]
    tm = TH * W

    xb = x_ref[0]
    if apply_input_bn_relu:
        # y1 = relu(bn1(conv1_raw)) applied to the interior only; the border is
        # kept at exactly 0 below so the implicit conv zero-padding survives
        # the affine shift.
        y = jnp.maximum(xb.astype(jnp.float32) * scale_ref[...] + bias_ref[...], 0.0)
        xbuf[1:H + 1, 1:W + 1, :] = y.astype(jnp.bfloat16)
    else:
        xbuf[1:H + 1, 1:W + 1, :] = xb.astype(jnp.bfloat16)

    # Zero the 1-pixel border with four thin stores (cheap; done every step so
    # it is correct even when the grid is split across TensorCores).
    zrow = jnp.zeros((1, W + 2, cin), jnp.bfloat16)
    zcol = jnp.zeros((H + 2, 1, cin), jnp.bfloat16)
    xbuf[0:1, :, :] = zrow
    xbuf[H + 1:H + 2, :, :] = zrow
    xbuf[:, 0:1, :] = zcol
    xbuf[:, W + 1:W + 2, :] = zcol

    # Conv as row bands: build an im2col slab (tm, 9*Cin) in VMEM and do a
    # single K=9*Cin MXU matmul per band (bf16 operands, f32 accumulation).
    s1 = jnp.zeros((1, cout), jnp.float32)
    s2 = jnp.zeros((1, cout), jnp.float32)
    nb = H // TH
    for band in range(nb):
        r0 = band * TH
        for kh in range(3):
            for kw in range(3):
                t = kh * 3 + kw
                xt = xbuf[r0 + kh:r0 + kh + TH, kw:kw + W, :].reshape(tm, cin)
                slab[:, t * cin:(t + 1) * cin] = xt
        acc = jnp.dot(slab[...], w_ref[...], preferred_element_type=jnp.float32)
        out_ref[0, r0 * W:(r0 + TH) * W, :] = acc.astype(out_ref.dtype)
        s1 = s1 + jnp.sum(acc, axis=0, keepdims=True)
        s2 = s2 + jnp.sum(acc * acc, axis=0, keepdims=True)

    s1_ref[0] = s1
    s2_ref[0] = s2


def _bn_residual_relu_kernel(r_ref, scale_ref, bias_ref, res_ref, out_ref):
    # out = relu(bn2(conv2_raw) + residual); r is bf16, math in f32.
    y = r_ref[0].astype(jnp.float32) * scale_ref[...] + bias_ref[...] + res_ref[0]
    out_ref[0] = jnp.maximum(y, 0.0)


# --------------------------- pallas_call wrappers --------------------------- #
def _conv3x3_bn_stats(x, w9, scale_in, bias_in, *, H, W, TH, apply_input_bn_relu):
    n = x.shape[0]
    cin = x.shape[3]
    cout = w9.shape[1]
    m = H * W
    kernel = functools.partial(_conv3x3_stats_kernel, H=H, W=W, TH=TH,
                               apply_input_bn_relu=apply_input_bn_relu)
    flops = 2 * n * m * 9 * cin * cout
    bytes_accessed = (x.size * x.dtype.itemsize + w9.size * 2
                      + n * m * cout * 2 + 2 * n * cout * 4 + 2 * cin * 4)
    conv_out, s1, s2 = pl.pallas_call(
        kernel,
        grid=(n,),
        in_specs=[
            pl.BlockSpec((1, H, W, cin), lambda i: (i, 0, 0, 0)),
            pl.BlockSpec((9 * cin, cout), lambda i: (0, 0)),
            pl.BlockSpec((1, cin), lambda i: (0, 0)),
            pl.BlockSpec((1, cin), lambda i: (0, 0)),
        ],
        out_specs=[
            pl.BlockSpec((1, m, cout), lambda i: (i, 0, 0)),
            pl.BlockSpec((1, 1, cout), lambda i: (i, 0, 0)),
            pl.BlockSpec((1, 1, cout), lambda i: (i, 0, 0)),
        ],
        out_shape=[
            jax.ShapeDtypeStruct((n, m, cout), jnp.bfloat16),
            jax.ShapeDtypeStruct((n, 1, cout), jnp.float32),
            jax.ShapeDtypeStruct((n, 1, cout), jnp.float32),
        ],
        scratch_shapes=[
            pltpu.VMEM((H + 2, W + 2, cin), jnp.bfloat16),
            pltpu.VMEM((TH * W, 9 * cin), jnp.bfloat16),
        ],
        compiler_params=pltpu.CompilerParams(
            dimension_semantics=("parallel",)),
        cost_estimate=pl.CostEstimate(flops=flops, transcendentals=0,
                                      bytes_accessed=bytes_accessed),
    )(x, w9, scale_in, bias_in)
    return conv_out, s1, s2


def _bn_residual_relu(r, scale, bias, res):
    n, m, cp = r.shape
    return pl.pallas_call(
        _bn_residual_relu_kernel,
        grid=(n,),
        in_specs=[
            pl.BlockSpec((1, m, cp), lambda i: (i, 0, 0)),
            pl.BlockSpec((1, cp), lambda i: (0, 0)),
            pl.BlockSpec((1, cp), lambda i: (0, 0)),
            pl.BlockSpec((1, m, cp), lambda i: (i, 0, 0)),
        ],
        out_specs=pl.BlockSpec((1, m, cp), lambda i: (i, 0, 0)),
        out_shape=jax.ShapeDtypeStruct((n, m, cp), jnp.float32),
        compiler_params=pltpu.CompilerParams(
            dimension_semantics=("parallel",)),
        cost_estimate=pl.CostEstimate(flops=3 * n * m * cp, transcendentals=0,
                                      bytes_accessed=n * m * cp * (2 + 4 + 4)),
    )(r, scale, bias, res)


# ------------------------------- JAX glue ---------------------------------- #
def _finalize_bn(s1, s2, gamma_p, beta_p, count):
    # Tiny per-channel finalize: fold gamma/rsqrt(var+eps) and beta - mean*scale.
    total = jnp.sum(s1, axis=0)[0]
    total_sq = jnp.sum(s2, axis=0)[0]
    mean = total / count
    var = jnp.maximum(total_sq / count - mean * mean, 0.0)
    scale = gamma_p * jax.lax.rsqrt(var + EPS)
    bias = beta_p - mean * scale
    return scale.reshape(1, -1), bias.reshape(1, -1)


def _pack_conv_weights(w_oihw, cin_p, cout_p):
    co, ci, kh, kw = w_oihw.shape
    w9 = jnp.transpose(w_oihw.astype(jnp.float32), (2, 3, 1, 0)).reshape(kh * kw, ci, co)
    w9 = jnp.pad(w9, ((0, 0), (0, cin_p - ci), (0, cout_p - co)))
    return w9.reshape(kh * kw * cin_p, cout_p).astype(jnp.bfloat16)


def _pad_channels_vec(v, cp):
    return jnp.pad(v.astype(jnp.float32), (0, cp - v.shape[0]))


@jax.jit
def basic_block_forward(x_nchw, params):
    w1, g1, b1 = params["w1"], params["g1"], params["b1"]
    w2, g2, b2 = params["w2"], params["g2"], params["b2"]
    n, c_in, h, w_dim = x_nchw.shape
    planes = w1.shape[0]
    # TODO(synk): downsample branch / stride>1 not implemented (module is
    # instantiated with downsample=None, stride=1, so the residual is identity).
    cp = _round_up(max(c_in, planes), LANE)
    m = n * h * w_dim
    th = _pick_tile_h(h, w_dim)

    # NHWC, channel-padded to a lane-dense width.
    # TODO(synk): in a full ResNet chain the NCHW<->NHWC transposes should be
    # hoisted to the network boundary; kept here to match the module interface.
    x_nhwc = jnp.transpose(x_nchw, (0, 2, 3, 1)).astype(jnp.float32)
    xcp = jnp.pad(x_nhwc, ((0, 0), (0, 0), (0, 0), (0, cp - c_in)))
    residual = xcp.reshape(n, h * w_dim, cp)

    w1_k = _pack_conv_weights(w1, cp, cp)
    w2_k = _pack_conv_weights(w2, cp, cp)
    g1p, b1p = _pad_channels_vec(g1, cp), _pad_channels_vec(b1, cp)
    g2p, b2p = _pad_channels_vec(g2, cp), _pad_channels_vec(b2, cp)
    ones = jnp.ones((1, cp), jnp.float32)
    zeros = jnp.zeros((1, cp), jnp.float32)

    # ---- conv1 (raw bf16 output) + per-image BN1 partial stats (f32) ----
    r1, s1a, s1b = _conv3x3_bn_stats(xcp, w1_k, ones, zeros,
                                     H=h, W=w_dim, TH=th,
                                     apply_input_bn_relu=False)
    scale1, bias1 = _finalize_bn(s1a, s1b, g1p, b1p, m)

    # ---- conv2 consumes the raw bf16 conv1 output; bn1-affine + ReLU and the
    #      zero border are fused into the conv2 kernel; BN2 partial stats out ----
    r2, s2a, s2b = _conv3x3_bn_stats(r1.reshape(n, h, w_dim, cp), w2_k,
                                     scale1, bias1,
                                     H=h, W=w_dim, TH=th,
                                     apply_input_bn_relu=True)
    scale2, bias2 = _finalize_bn(s2a, s2b, g2p, b2p, m)

    # ---- bn2-apply + residual add + ReLU ----
    out_flat = _bn_residual_relu(r2, scale2, bias2, residual)
    out = out_flat.reshape(n, h, w_dim, cp)[..., :planes]
    return jnp.transpose(out, (0, 3, 1, 2))


# ---------------------------- reference (checks) ---------------------------- #
def _reference_forward(x_nchw, params):
    def conv(x, w):
        return jax.lax.conv_general_dilated(
            x, w, window_strides=(1, 1), padding=((1, 1), (1, 1)),
            dimension_numbers=("NCHW", "OIHW", "NCHW"),
            precision=jax.lax.Precision.HIGHEST)

    def bn(x, g, b):
        mean = jnp.mean(x, axis=(0, 2, 3), keepdims=True)
        var = jnp.var(x, axis=(0, 2, 3), keepdims=True)
        return (x - mean) * jax.lax.rsqrt(var + EPS) * g.reshape(1, -1, 1, 1) \
            + b.reshape(1, -1, 1, 1)

    out = jax.nn.relu(bn(conv(x_nchw, params["w1"]), params["g1"], params["b1"]))
    out = bn(conv(out, params["w2"]), params["g2"], params["b2"]) + x_nchw
    return jax.nn.relu(out)


def init_params(key, inplanes, planes):
    ks = jax.random.split(key, 6)
    fan1, fan2 = inplanes * 9, planes * 9
    return {
        "w1": jax.random.normal(ks[0], (planes, inplanes, 3, 3), jnp.float32) * (2.0 / fan1) ** 0.5,
        "w2": jax.random.normal(ks[1], (planes, planes, 3, 3), jnp.float32) * (2.0 / fan2) ** 0.5,
        "g1": 1.0 + 0.1 * jax.random.normal(ks[2], (planes,), jnp.float32),
        "b1": 0.1 * jax.random.normal(ks[3], (planes,), jnp.float32),
        "g2": 1.0 + 0.1 * jax.random.normal(ks[4], (planes,), jnp.float32),
        "b2": 0.1 * jax.random.normal(ks[5], (planes,), jnp.float32),
    }


if __name__ == "__main__":
    key = jax.random.PRNGKey(0)
    k_x, k_p = jax.random.split(key)

    N, C, H, W = 2, 4, 16, 16          # inplanes = planes = 4, stride = 1
    x = jax.random.normal(k_x, (N, C, H, W), jnp.float32)
    params = init_params(k_p, inplanes=C, planes=C)

    out = jax.block_until_ready(basic_block_forward(x, params))

    ref = _reference_forward(x, params)
    assert out.shape == ref.shape == (N, C, H, W)
    # bf16 MXU operands and bf16-stored conv intermediates (f32 accumulation and
    # f32 BN stats) -> slightly loose tolerance.
    if not jnp.allclose(out, ref, atol=3e-2, rtol=3e-2):
        raise AssertionError(
            f"mismatch vs reference: max abs diff = {float(jnp.max(jnp.abs(out - ref)))}")

    print("KERNEL_OK")
</pallas_src>

<mosaic_0001>
module attributes {stable_mosaic.version = 11 : i64} {
  func.func @_conv3x3_stats_kernel(%arg0: i32, %arg1: memref<1x16x16x128xf32, #tpu.memory_space<vmem>>, %arg2: memref<1152x128xbf16, #tpu.memory_space<vmem>>, %arg3: memref<1x128xf32, #tpu.memory_space<vmem>>, %arg4: memref<1x128xf32, #tpu.memory_space<vmem>>, %arg5: memref<1x256x128xbf16, #tpu.memory_space<vmem>>, %arg6: memref<1x1x128xf32, #tpu.memory_space<vmem>>, %arg7: memref<1x1x128xf32, #tpu.memory_space<vmem>>, %arg8: memref<18x18x128xbf16, #tpu.memory_space<vmem>>, %arg9: memref<256x1152xbf16, #tpu.memory_space<vmem>>) attributes {dimension_semantics = [#tpu.dimension_semantics<parallel>], iteration_bounds = array<i64: 2>, scalar_prefetch = 0 : i64, scratch_operands = 2 : i64, tpu.core_type = #tpu.core_type<tc>, window_params = [{transform_indices = @transform_0, window_bounds = array<i64: 1, 16, 16, 128>}, {pipeline_mode = #tpu.pipeline_mode<synchronous>, transform_indices = @transform_1, window_bounds = array<i64: 1152, 128>}, {pipeline_mode = #tpu.pipeline_mode<synchronous>, transform_indices = @transform_2, window_bounds = array<i64: 1, 128>}, {pipeline_mode = #tpu.pipeline_mode<synchronous>, transform_indices = @transform_3, window_bounds = array<i64: 1, 128>}, {transform_indices = @transform_4, window_bounds = array<i64: 1, 256, 128>}, {transform_indices = @transform_5, window_bounds = array<i64: 1, 1, 128>}, {transform_indices = @transform_6, window_bounds = array<i64: 1, 1, 128>}]} {
    %c0 = arith.constant 0 : index
    %c0_0 = arith.constant 0 : index
    %c0_1 = arith.constant 0 : index
    %c0_2 = arith.constant 0 : index
    %0 = vector.load %arg1[%c0, %c0_0, %c0_1, %c0_2] : memref<1x16x16x128xf32, #tpu.memory_space<vmem>>, vector<1x16x16x128xf32>
    %1 = vector.shape_cast %0 : vector<1x16x16x128xf32> to vector<16x16x128xf32>
    %2 = arith.truncf %1 : vector<16x16x128xf32> to vector<16x16x128xbf16>
    %c1 = arith.constant 1 : index
    %c1_3 = arith.constant 1 : index
    %c0_4 = arith.constant 0 : index
    %3 = vector.load %arg8[%c1, %c1_3, %c0_4] : memref<18x18x128xbf16, #tpu.memory_space<vmem>>, vector<16x16x128xbf16>
    tpu.vector_store %arg8[%c1, %c1_3, %c0_4], %2 {strides = array<i32>} : memref<18x18x128xbf16, #tpu.memory_space<vmem>>, vector<16x16x128xbf16>,
    %cst = arith.constant 0.000000e+00 : bf16
    %4 = vector.broadcast %cst : bf16 to vector<1x18x128xbf16>
    %cst_5 = arith.constant 0.000000e+00 : bf16
    %5 = vector.broadcast %cst_5 : bf16 to vector<18x1x128xbf16>
    %c0_6 = arith.constant 0 : index
    %c0_7 = arith.constant 0 : index
    %c0_8 = arith.constant 0 : index
    %6 = vector.load %arg8[%c0_6, %c0_7, %c0_8] : memref<18x18x128xbf16, #tpu.memory_space<vmem>>, vector<1x18x128xbf16>
    tpu.vector_store %arg8[%c0_6, %c0_7, %c0_8], %4 {strides = array<i32>} : memref<18x18x128xbf16, #tpu.memory_space<vmem>>, vector<1x18x128xbf16>,
    %c17 = arith.constant 17 : index
    %c0_9 = arith.constant 0 : index
    %c0_10 = arith.constant 0 : index
    %7 = vector.load %arg8[%c17, %c0_9, %c0_10] : memref<18x18x128xbf16, #tpu.memory_space<vmem>>, vector<1x18x128xbf16>
    tpu.vector_store %arg8[%c17, %c0_9, %c0_10], %4 {strides = array<i32>} : memref<18x18x128xbf16, #tpu.memory_space<vmem>>, vector<1x18x128xbf16>,
    %c0_11 = arith.constant 0 : index
    %c0_12 = arith.constant 0 : index
    %c0_13 = arith.constant 0 : index
    %8 = vector.load %arg8[%c0_11, %c0_12, %c0_13] : memref<18x18x128xbf16, #tpu.memory_space<vmem>>, vector<18x1x128xbf16>
    tpu.vector_store %arg8[%c0_11, %c0_12, %c0_13], %5 {strides = array<i32>} : memref<18x18x128xbf16, #tpu.memory_space<vmem>>, vector<18x1x128xbf16>,
    %c0_14 = arith.constant 0 : index
    %c17_15 = arith.constant 17 : index
    %c0_16 = arith.constant 0 : index
    %9 = vector.load %arg8[%c0_14, %c17_15, %c0_16] : memref<18x18x128xbf16, #tpu.memory_space<vmem>>, vector<18x1x128xbf16>
    tpu.vector_store %arg8[%c0_14, %c17_15, %c0_16], %5 {strides = array<i32>} : memref<18x18x128xbf16, #tpu.memory_space<vmem>>, vector<18x1x128xbf16>,
    %cst_17 = arith.constant 0.000000e+00 : f32
    %10 = vector.broadcast %cst_17 : f32 to vector<1x128xf32>
    %cst_18 = arith.constant 0.000000e+00 : f32
    %11 = vector.broadcast %cst_18 : f32 to vector<1x128xf32>
    %c0_19 = arith.constant 0 : index
    %c0_20 = arith.constant 0 : index
    %c0_21 = arith.constant 0 : index
    %12 = vector.load %arg8[%c0_19, %c0_20, %c0_21] : memref<18x18x128xbf16, #tpu.memory_space<vmem>>, vector<16x16x128xbf16>
    %13 = vector.shape_cast %12 : vector<16x16x128xbf16> to vector<256x128xbf16>
    %c0_22 = arith.constant 0 : index
    %c0_23 = arith.constant 0 : index
    %14 = vector.load %arg9[%c0_22, %c0_23] : memref<256x1152xbf16, #tpu.memory_space<vmem>>, vector<256x128xbf16>
    tpu.vector_store %arg9[%c0_22, %c0_23], %13 {strides = array<i32>} : memref<256x1152xbf16, #tpu.memory_space<vmem>>, vector<256x128xbf16>,
    %c0_24 = arith.constant 0 : index
    %c1_25 = arith.constant 1 : index
    %c0_26 = arith.constant 0 : index
    %15 = vector.load %arg8[%c0_24, %c1_25, %c0_26] : memref<18x18x128xbf16, #tpu.memory_space<vmem>>, vector<16x16x128xbf16>
    %16 = vector.shape_cast %15 : vector<16x16x128xbf16> to vector<256x128xbf16>
    %c0_27 = arith.constant 0 : index
    %c128 = arith.constant 128 : index
    %17 = vector.load %arg9[%c0_27, %c128] : memref<256x1152xbf16, #tpu.memory_space<vmem>>, vector<256x128xbf16>
    tpu.vector_store %arg9[%c0_27, %c128], %16 {strides = array<i32>} : memref<256x1152xbf16, #tpu.memory_space<vmem>>, vector<256x128xbf16>,
    %c0_28 = arith.constant 0 : index
    %c2 = arith.constant 2 : index
    %c0_29 = arith.constant 0 : index
    %18 = vector.load %arg8[%c0_28, %c2, %c0_29] : memref<18x18x128xbf16, #tpu.memory_space<vmem>>, vector<16x16x128xbf16>
    %19 = vector.shape_cast %18 : vector<16x16x128xbf16> to vector<256x128xbf16>
    %c0_30 = arith.constant 0 : index
    %c256 = arith.constant 256 : index
    %20 = vector.load %arg9[%c0_30, %c256] : memref<256x1152xbf16, #tpu.memory_space<vmem>>, vector<256x128xbf16>
    tpu.vector_store %arg9[%c0_30, %c256], %19 {strides = array<i32>} : memref<256x1152xbf16, #tpu.memory_space<vmem>>, vector<256x128xbf16>,
    %c1_31 = arith.constant 1 : index
    %c0_32 = arith.constant 0 : index
    %c0_33 = arith.constant 0 : index
    %21 = vector.load %arg8[%c1_31, %c0_32, %c0_33] : memref<18x18x128xbf16, #tpu.memory_space<vmem>>, vector<16x16x128xbf16>
    %22 = vector.shape_cast %21 : vector<16x16x128xbf16> to vector<256x128xbf16>
    %c0_34 = arith.constant 0 : index
    %c384 = arith.constant 384 : index
    %23 = vector.load %arg9[%c0_34, %c384] : memref<256x1152xbf16, #tpu.memory_space<vmem>>, vector<256x128xbf16>
    tpu.vector_store %arg9[%c0_34, %c384], %22 {strides = array<i32>} : memref<256x1152xbf16, #tpu.memory_space<vmem>>, vector<256x128xbf16>,
    %c1_35 = arith.constant 1 : index
    %c1_36 = arith.constant 1 : index
    %c0_37 = arith.constant 0 : index
    %24 = vector.load %arg8[%c1_35, %c1_36, %c0_37] : memref<18x18x128xbf16, #tpu.memory_space<vmem>>, vector<16x16x128xbf16>
    %25 = vector.shape_cast %24 : vector<16x16x128xbf16> to vector<256x128xbf16>
    %c0_38 = arith.constant 0 : index
    %c512 = arith.constant 512 : index
    %26 = vector.load %arg9[%c0_38, %c512] : memref<256x1152xbf16, #tpu.memory_space<vmem>>, vector<256x128xbf16>
    tpu.vector_store %arg9[%c0_38, %c512], %25 {strides = array<i32>} : memref<256x1152xbf16, #tpu.memory_space<vmem>>, vector<256x128xbf16>,
    %c1_39 = arith.constant 1 : index
    %c2_40 = arith.constant 2 : index
    %c0_41 = arith.constant 0 : index
    %27 = vector.load %arg8[%c1_39, %c2_40, %c0_41] : memref<18x18x128xbf16, #tpu.memory_space<vmem>>, vector<16x16x128xbf16>
    %28 = vector.shape_cast %27 : vector<16x16x128xbf16> to vector<256x128xbf16>
    %c0_42 = arith.constant 0 : index
    %c640 = arith.constant 640 : index
    %29 = vector.load %arg9[%c0_42, %c640] : memref<256x1152xbf16, #tpu.memory_space<vmem>>, vector<256x128xbf16>
    tpu.vector_store %arg9[%c0_42, %c640], %28 {strides = array<i32>} : memref<256x1152xbf16, #tpu.memory_space<vmem>>, vector<256x128xbf16>,
    %c2_43 = arith.constant 2 : index
    %c0_44 = arith.constant 0 : index
    %c0_45 = arith.constant 0 : index
    %30 = vector.load %arg8[%c2_43, %c0_44, %c0_45] : memref<18x18x128xbf16, #tpu.memory_space<vmem>>, vector<16x16x128xbf16>
    %31 = vector.shape_cast %30 : vector<16x16x128xbf16> to vector<256x128xbf16>
    %c0_46 = arith.constant 0 : index
    %c768 = arith.constant 768 : index
    %32 = vector.load %arg9[%c0_46, %c768] : memref<256x1152xbf16, #tpu.memory_space<vmem>>, vector<256x128xbf16>
    tpu.vector_store %arg9[%c0_46, %c768], %31 {strides = array<i32>} : memref<256x1152xbf16, #tpu.memory_space<vmem>>, vector<256x128xbf16>,
    %c2_47 = arith.constant 2 : index
    %c1_48 = arith.constant 1 : index
    %c0_49 = arith.constant 0 : index
    %33 = vector.load %arg8[%c2_47, %c1_48, %c0_49] : memref<18x18x128xbf16, #tpu.memory_space<vmem>>, vector<16x16x128xbf16>
    %34 = vector.shape_cast %33 : vector<16x16x128xbf16> to vector<256x128xbf16>
    %c0_50 = arith.constant 0 : index
    %c896 = arith.constant 896 : index
    %35 = vector.load %arg9[%c0_50, %c896] : memref<256x1152xbf16, #tpu.memory_space<vmem>>, vector<256x128xbf16>
    tpu.vector_store %arg9[%c0_50, %c896], %34 {strides = array<i32>} : memref<256x1152xbf16, #tpu.memory_space<vmem>>, vector<256x128xbf16>,
    %c2_51 = arith.constant 2 : index
    %c2_52 = arith.constant 2 : index
    %c0_53 = arith.constant 0 : index
    %36 = vector.load %arg8[%c2_51, %c2_52, %c0_53] : memref<18x18x128xbf16, #tpu.memory_space<vmem>>, vector<16x16x128xbf16>
    %37 = vector.shape_cast %36 : vector<16x16x128xbf16> to vector<256x128xbf16>
    %c0_54 = arith.constant 0 : index
    %c1024 = arith.constant 1024 : index
    %38 = vector.load %arg9[%c0_54, %c1024] : memref<256x1152xbf16, #tpu.memory_space<vmem>>, vector<256x128xbf16>
    tpu.vector_store %arg9[%c0_54, %c1024], %37 {strides = array<i32>} : memref<256x1152xbf16, #tpu.memory_space<vmem>>, vector<256x128xbf16>,
    %c0_55 = arith.constant 0 : index
    %c0_56 = arith.constant 0 : index
    %39 = vector.load %arg9[%c0_55, %c0_56] : memref<256x1152xbf16, #tpu.memory_space<vmem>>, vector<256x1152xbf16>
    %c0_57 = arith.constant 0 : index
    %c0_58 = arith.constant 0 : index
    %40 = vector.load %arg2[%c0_57, %c0_58] : memref<1152x128xbf16, #tpu.memory_space<vmem>>, vector<1152x128xbf16>
    %cst_59 = arith.constant dense<0.000000e+00> : vector<256x128xf32>
    %41 = tpu.matmul %39, %40, %cst_59 {dimension_numbers = #tpu.dot_dimension_numbers<[1], [0], [0], [1], [0, 0, 1, 1], [], []>} : vector<256x1152xbf16>, vector<1152x128xbf16>, vector<256x128xf32> -> vector<256x128xf32>
    %42 = arith.truncf %41 : vector<256x128xf32> to vector<256x128xbf16>
    %c0_60 = arith.constant 0 : index
    %c0_61 = arith.constant 0 : index
    %c0_62 = arith.constant 0 : index
    %43 = vector.load %arg5[%c0_60, %c0_61, %c0_62] : memref<1x256x128xbf16, #tpu.memory_space<vmem>>, vector<1x256x128xbf16>
    %44 = vector.shape_cast %43 : vector<1x256x128xbf16> to vector<256x128xbf16>
    %45 = vector.shape_cast %42 : vector<256x128xbf16> to vector<1x256x128xbf16>
    tpu.vector_store %arg5[%c0_60, %c0_61, %c0_62], %45 {strides = array<i32>} : memref<1x256x128xbf16, #tpu.memory_space<vmem>>, vector<1x256x128xbf16>,
    %cst_63 = arith.constant dense<0.000000e+00> : vector<128xf32>
    %46 = vector.multi_reduction <add>, %41, %cst_63 [0] : vector<256x128xf32> to vector<128xf32>
    %47 = vector.shape_cast %46 : vector<128xf32> to vector<1x128xf32>
    %48 = arith.addf %10, %47 : vector<1x128xf32>
    %49 = arith.mulf %41, %41 : vector<256x128xf32>
    %cst_64 = arith.constant dense<0.000000e+00> : vector<128xf32>
    %50 = vector.multi_reduction <add>, %49, %cst_64 [0] : vector<256x128xf32> to vector<128xf32>
    %51 = vector.shape_cast %50 : vector<128xf32> to vector<1x128xf32>
    %52 = arith.addf %11, %51 : vector<1x128xf32>
    %c0_65 = arith.constant 0 : index
    %c0_66 = arith.constant 0 : index
    %c0_67 = arith.constant 0 : index
    %53 = vector.load %arg6[%c0_65, %c0_66, %c0_67] : memref<1x1x128xf32, #tpu.memory_space<vmem>>, vector<1x1x128xf32>
    %54 = vector.shape_cast %53 : vector<1x1x128xf32> to vector<1x128xf32>
    %55 = vector.shape_cast %48 : vector<1x128xf32> to vector<1x1x128xf32>
    tpu.vector_store %arg6[%c0_65, %c0_66, %c0_67], %55 {strides = array<i32>} : memref<1x1x128xf32, #tpu.memory_space<vmem>>, vector<1x1x128xf32>,
    %c0_68 = arith.constant 0 : index
    %c0_69 = arith.constant 0 : index
    %c0_70 = arith.constant 0 : index
    %56 = vector.load %arg7[%c0_68, %c0_69, %c0_70] : memref<1x1x128xf32, #tpu.memory_space<vmem>>, vector<1x1x128xf32>
    %57 = vector.shape_cast %56 : vector<1x1x128xf32> to vector<1x128xf32>
    %58 = vector.shape_cast %52 : vector<1x128xf32> to vector<1x1x128xf32>
    tpu.vector_store %arg7[%c0_68, %c0_69, %c0_70], %58 {strides = array<i32>} : memref<1x1x128xf32, #tpu.memory_space<vmem>>, vector<1x1x128xf32>,
    return
  }
  func.func @transform_0(%arg0: i32) -> (i32, i32, i32, i32) {
    %c0_i32 = arith.constant 0 : i32
    %c0_i32_0 = arith.constant 0 : i32
    %c0_i32_1 = arith.constant 0 : i32
    %c0_i32_2 = arith.constant 0 : i32
    return %arg0, %c0_i32, %c0_i32_0, %c0_i32_1 : i32, i32, i32, i32
  }
  func.func @transform_1(%arg0: i32) -> (i32, i32) {
    %c0_i32 = arith.constant 0 : i32
    %c0_i32_0 = arith.constant 0 : i32
    %c0_i32_1 = arith.constant 0 : i32
    return %c0_i32, %c0_i32_0 : i32, i32
  }
  func.func @transform_2(%arg0: i32) -> (i32, i32) {
    %c0_i32 = arith.constant 0 : i32
    %c0_i32_0 = arith.constant 0 : i32
    %c0_i32_1 = arith.constant 0 : i32
    return %c0_i32, %c0_i32_0 : i32, i32
  }
  func.func @transform_3(%arg0: i32) -> (i32, i32) {
    %c0_i32 = arith.constant 0 : i32
    %c0_i32_0 = arith.constant 0 : i32
    %c0_i32_1 = arith.constant 0 : i32
    return %c0_i32, %c0_i32_0 : i32, i32
  }
  func.func @transform_4(%arg0: i32) -> (i32, i32, i32) {
    %c0_i32 = arith.constant 0 : i32
    %c0_i32_0 = arith.constant 0 : i32
    %c0_i32_1 = arith.constant 0 : i32
    return %arg0, %c0_i32, %c0_i32_0 : i32, i32, i32
  }
  func.func @transform_5(%arg0: i32) -> (i32, i32, i32) {
    %c0_i32 = arith.constant 0 : i32
    %c0_i32_0 = arith.constant 0 : i32
    %c0_i32_1 = arith.constant 0 : i32
    return %arg0, %c0_i32, %c0_i32_0 : i32, i32, i32
  }
  func.func @transform_6(%arg0: i32) -> (i32, i32, i32) {
    %c0_i32 = arith.constant 0 : i32
    %c0_i32_0 = arith.constant 0 : i32
    %c0_i32_1 = arith.constant 0 : i32
    return %arg0, %c0_i32, %c0_i32_0 : i32, i32, i32
  }
}

module attributes {stable_mosaic.version = 11 : i64} {
  func.func @_bn_residual_relu_kernel(%arg0: i32, %arg1: memref<1x256x128xbf16, #tpu.memory_space<vmem>>, %arg2: memref<1x128xf32, #tpu.memory_space<vmem>>, %arg3: memref<1x128xf32, #tpu.memory_space<vmem>>, %arg4: memref<1x256x128xf32, #tpu.memory_space<vmem>>, %arg5: memref<1x256x128xf32, #tpu.memory_space<vmem>>) attributes {dimension_semantics = [#tpu.dimension_semantics<parallel>], iteration_bounds = array<i64: 2>, scalar_prefetch = 0 : i64, scratch_operands = 0 : i64, tpu.core_type = #tpu.core_type<tc>, window_params = [{transform_indices = @transform_0, window_bounds = array<i64: 1, 256, 128>}, {pipeline_mode = #tpu.pipeline_mode<synchronous>, transform_indices = @transform_1, window_bounds = array<i64: 1, 128>}, {pipeline_mode = #tpu.pipeline_mode<synchronous>, transform_indices = @transform_2, window_bounds = array<i64: 1, 128>}, {transform_indices = @transform_3, window_bounds = array<i64: 1, 256, 128>}, {transform_indices = @transform_4, window_bounds = array<i64: 1, 256, 128>}]} {
    %c0 = arith.constant 0 : index
    %c0_0 = arith.constant 0 : index
    %c0_1 = arith.constant 0 : index
    %0 = vector.load %arg1[%c0, %c0_0, %c0_1] : memref<1x256x128xbf16, #tpu.memory_space<vmem>>, vector<1x256x128xbf16>
    %1 = vector.shape_cast %0 : vector<1x256x128xbf16> to vector<256x128xbf16>
    %2 = arith.extf %1 : vector<256x128xbf16> to vector<256x128xf32>
    %c0_2 = arith.constant 0 : index
    %c0_3 = arith.constant 0 : index
    %3 = vector.load %arg2[%c0_2, %c0_3] : memref<1x128xf32, #tpu.memory_space<vmem>>, vector<1x128xf32>
    %4 = vector.broadcast %3 : vector<1x128xf32> to vector<256x128xf32>
    %5 = arith.mulf %2, %4 : vector<256x128xf32>
    %c0_4 = arith.constant 0 : index
    %c0_5 = arith.constant 0 : index
    %6 = vector.load %arg3[%c0_4, %c0_5] : memref<1x128xf32, #tpu.memory_space<vmem>>, vector<1x128xf32>
    %7 = vector.broadcast %6 : vector<1x128xf32> to vector<256x128xf32>
    %8 = arith.addf %5, %7 : vector<256x128xf32>
    %c0_6 = arith.constant 0 : index
    %c0_7 = arith.constant 0 : index
    %c0_8 = arith.constant 0 : index
    %9 = vector.load %arg4[%c0_6, %c0_7, %c0_8] : memref<1x256x128xf32, #tpu.memory_space<vmem>>, vector<1x256x128xf32>
    %10 = vector.shape_cast %9 : vector<1x256x128xf32> to vector<256x128xf32>
    %11 = arith.addf %8, %10 : vector<256x128xf32>
    %cst = arith.constant 0.000000e+00 : f32
    %12 = vector.broadcast %cst : f32 to vector<256x128xf32>
    %13 = arith.maximumf %11, %12 : vector<256x128xf32>
    %c0_9 = arith.constant 0 : index
    %c0_10 = arith.constant 0 : index
    %c0_11 = arith.constant 0 : index
    %14 = vector.load %arg5[%c0_9, %c0_10, %c0_11] : memref<1x256x128xf32, #tpu.memory_space<vmem>>, vector<1x256x128xf32>
    %15 = vector.shape_cast %14 : vector<1x256x128xf32> to vector<256x128xf32>
    %16 = vector.shape_cast %13 : vector<256x128xf32> to vector<1x256x128xf32>
    tpu.vector_store %arg5[%c0_9, %c0_10, %c0_11], %16 {strides = array<i32>} : memref<1x256x128xf32, #tpu.memory_space<vmem>>, vector<1x256x128xf32>,
    return
  }
  func.func @transform_0(%arg0: i32) -> (i32, i32, i32) {
    %c0_i32 = arith.constant 0 : i32
    %c0_i32_0 = arith.constant 0 : i32
    %c0_i32_1 = arith.constant 0 : i32
    return %arg0, %c0_i32, %c0_i32_0 : i32, i32, i32
  }
  func.func @transform_1(%arg0: i32) -> (i32, i32) {
    %c0_i32 = arith.constant 0 : i32
    %c0_i32_0 = arith.constant 0 : i32
    %c0_i32_1 = arith.constant 0 : i32
    return %c0_i32, %c0_i32_0 : i32, i32
  }
  func.func @transform_2(%arg0: i32) -> (i32, i32) {
    %c0_i32 = arith.constant 0 : i32
    %c0_i32_0 = arith.constant 0 : i32
    %c0_i32_1 = arith.constant 0 : i32
    return %c0_i32, %c0_i32_0 : i32, i32
  }
  func.func @transform_3(%arg0: i32) -> (i32, i32, i32) {
    %c0_i32 = arith.constant 0 : i32
    %c0_i32_0 = arith.constant 0 : i32
    %c0_i32_1 = arith.constant 0 : i32
    return %arg0, %c0_i32, %c0_i32_0 : i32, i32, i32
  }
  func.func @transform_4(%arg0: i32) -> (i32, i32, i32) {
    %c0_i32 = arith.constant 0 : i32
    %c0_i32_0 = arith.constant 0 : i32
    %c0_i32_1 = arith.constant 0 : i32
    return %arg0, %c0_i32, %c0_i32_0 : i32, i32, i32
  }
}

module attributes {stable_mosaic.version = 11 : i64} {
  func.func @_conv3x3_stats_kernel(%arg0: i32, %arg1: memref<1x16x16x128xbf16, #tpu.memory_space<vmem>>, %arg2: memref<1152x128xbf16, #tpu.memory_space<vmem>>, %arg3: memref<1x128xf32, #tpu.memory_space<vmem>>, %arg4: memref<1x128xf32, #tpu.memory_space<vmem>>, %arg5: memref<1x256x128xbf16, #tpu.memory_space<vmem>>, %arg6: memref<1x1x128xf32, #tpu.memory_space<vmem>>, %arg7: memref<1x1x128xf32, #tpu.memory_space<vmem>>, %arg8: memref<18x18x128xbf16, #tpu.memory_space<vmem>>, %arg9: memref<256x1152xbf16, #tpu.memory_space<vmem>>) attributes {dimension_semantics = [#tpu.dimension_semantics<parallel>], iteration_bounds = array<i64: 2>, scalar_prefetch = 0 : i64, scratch_operands = 2 : i64, tpu.core_type = #tpu.core_type<tc>, window_params = [{transform_indices = @transform_0, window_bounds = array<i64: 1, 16, 16, 128>}, {pipeline_mode = #tpu.pipeline_mode<synchronous>, transform_indices = @transform_1, window_bounds = array<i64: 1152, 128>}, {pipeline_mode = #tpu.pipeline_mode<synchronous>, transform_indices = @transform_2, window_bounds = array<i64: 1, 128>}, {pipeline_mode = #tpu.pipeline_mode<synchronous>, transform_indices = @transform_3, window_bounds = array<i64: 1, 128>}, {transform_indices = @transform_4, window_bounds = array<i64: 1, 256, 128>}, {transform_indices = @transform_5, window_bounds = array<i64: 1, 1, 128>}, {transform_indices = @transform_6, window_bounds = array<i64: 1, 1, 128>}]} {
    %c0 = arith.constant 0 : index
    %c0_0 = arith.constant 0 : index
    %c0_1 = arith.constant 0 : index
    %c0_2 = arith.constant 0 : index
    %0 = vector.load %arg1[%c0, %c0_0, %c0_1, %c0_2] : memref<1x16x16x128xbf16, #tpu.memory_space<vmem>>, vector<1x16x16x128xbf16>
    %1 = vector.shape_cast %0 : vector<1x16x16x128xbf16> to vector<16x16x128xbf16>
    %2 = arith.extf %1 : vector<16x16x128xbf16> to vector<16x16x128xf32>
    %c0_3 = arith.constant 0 : index
    %c0_4 = arith.constant 0 : index
    %3 = vector.load %arg3[%c0_3, %c0_4] : memref<1x128xf32, #tpu.memory_space<vmem>>, vector<1x128xf32>
    %4 = vector.shape_cast %3 : vector<1x128xf32> to vector<1x1x128xf32>
    %5 = vector.broadcast %4 : vector<1x1x128xf32> to vector<16x16x128xf32>
    %6 = arith.mulf %2, %5 : vector<16x16x128xf32>
    %c0_5 = arith.constant 0 : index
    %c0_6 = arith.constant 0 : index
    %7 = vector.load %arg4[%c0_5, %c0_6] : memref<1x128xf32, #tpu.memory_space<vmem>>, vector<1x128xf32>
    %8 = vector.shape_cast %7 : vector<1x128xf32> to vector<1x1x128xf32>
    %9 = vector.broadcast %8 : vector<1x1x128xf32> to vector<16x16x128xf32>
    %10 = arith.addf %6, %9 : vector<16x16x128xf32>
    %cst = arith.constant 0.000000e+00 : f32
    %11 = vector.broadcast %cst : f32 to vector<16x16x128xf32>
    %12 = arith.maximumf %10, %11 : vector<16x16x128xf32>
    %13 = arith.truncf %12 : vector<16x16x128xf32> to vector<16x16x128xbf16>
    %c1 = arith.constant 1 : index
    %c1_7 = arith.constant 1 : index
    %c0_8 = arith.constant 0 : index
    %14 = vector.load %arg8[%c1, %c1_7, %c0_8] : memref<18x18x128xbf16, #tpu.memory_space<vmem>>, vector<16x16x128xbf16>
    tpu.vector_store %arg8[%c1, %c1_7, %c0_8], %13 {strides = array<i32>} : memref<18x18x128xbf16, #tpu.memory_space<vmem>>, vector<16x16x128xbf16>,
    %cst_9 = arith.constant 0.000000e+00 : bf16
    %15 = vector.broadcast %cst_9 : bf16 to vector<1x18x128xbf16>
    %cst_10 = arith.constant 0.000000e+00 : bf16
    %16 = vector.broadcast %cst_10 : bf16 to vector<18x1x128xbf16>
    %c0_11 = arith.constant 0 : index
    %c0_12 = arith.constant 0 : index
    %c0_13 = arith.constant 0 : index
    %17 = vector.load %arg8[%c0_11, %c0_12, %c0_13] : memref<18x18x128xbf16, #tpu.memory_space<vmem>>, vector<1x18x128xbf16>
    tpu.vector_store %arg8[%c0_11, %c0_12, %c0_13], %15 {strides = array<i32>} : memref<18x18x128xbf16, #tpu.memory_space<vmem>>, vector<1x18x128xbf16>,
    %c17 = arith.constant 17 : index
    %c0_14 = arith.constant 0 : index
    %c0_15 = arith.constant 0 : index
    %18 = vector.load %arg8[%c17, %c0_14, %c0_15] : memref<18x18x128xbf16, #tpu.memory_space<vmem>>, vector<1x18x128xbf16>
    tpu.vector_store %arg8[%c17, %c0_14, %c0_15], %15 {strides = array<i32>} : memref<18x18x128xbf16, #tpu.memory_space<vmem>>, vector<1x18x128xbf16>,
    %c0_16 = arith.constant 0 : index
    %c0_17 = arith.constant 0 : index
    %c0_18 = arith.constant 0 : index
    %19 = vector.load %arg8[%c0_16, %c0_17, %c0_18] : memref<18x18x128xbf16, #tpu.memory_space<vmem>>, vector<18x1x128xbf16>
    tpu.vector_store %arg8[%c0_16, %c0_17, %c0_18], %16 {strides = array<i32>} : memref<18x18x128xbf16, #tpu.memory_space<vmem>>, vector<18x1x128xbf16>,
    %c0_19 = arith.constant 0 : index
    %c17_20 = arith.constant 17 : index
    %c0_21 = arith.constant 0 : index
    %20 = vector.load %arg8[%c0_19, %c17_20, %c0_21] : memref<18x18x128xbf16, #tpu.memory_space<vmem>>, vector<18x1x128xbf16>
    tpu.vector_store %arg8[%c0_19, %c17_20, %c0_21], %16 {strides = array<i32>} : memref<18x18x128xbf16, #tpu.memory_space<vmem>>, vector<18x1x128xbf16>,
    %cst_22 = arith.constant 0.000000e+00 : f32
    %21 = vector.broadcast %cst_22 : f32 to vector<1x128xf32>
    %cst_23 = arith.constant 0.000000e+00 : f32
    %22 = vector.broadcast %cst_23 : f32 to vector<1x128xf32>
    %c0_24 = arith.constant 0 : index
    %c0_25 = arith.constant 0 : index
    %c0_26 = arith.constant 0 : index
    %23 = vector.load %arg8[%c0_24, %c0_25, %c0_26] : memref<18x18x128xbf16, #tpu.memory_space<vmem>>, vector<16x16x128xbf16>
    %24 = vector.shape_cast %23 : vector<16x16x128xbf16> to vector<256x128xbf16>
    %c0_27 = arith.constant 0 : index
    %c0_28 = arith.constant 0 : index
    %25 = vector.load %arg9[%c0_27, %c0_28] : memref<256x1152xbf16, #tpu.memory_space<vmem>>, vector<256x128xbf16>
    tpu.vector_store %arg9[%c0_27, %c0_28], %24 {strides = array<i32>} : memref<256x1152xbf16, #tpu.memory_space<vmem>>, vector<256x128xbf16>,
    %c0_29 = arith.constant 0 : index
    %c1_30 = arith.constant 1 : index
    %c0_31 = arith.constant 0 : index
    %26 = vector.load %arg8[%c0_29, %c1_30, %c0_31] : memref<18x18x128xbf16, #tpu.memory_space<vmem>>, vector<16x16x128xbf16>
    %27 = vector.shape_cast %26 : vector<16x16x128xbf16> to vector<256x128xbf16>
    %c0_32 = arith.constant 0 : index
    %c128 = arith.constant 128 : index
    %28 = vector.load %arg9[%c0_32, %c128] : memref<256x1152xbf16, #tpu.memory_space<vmem>>, vector<256x128xbf16>
    tpu.vector_store %arg9[%c0_32, %c128], %27 {strides = array<i32>} : memref<256x1152xbf16, #tpu.memory_space<vmem>>, vector<256x128xbf16>,
    %c0_33 = arith.constant 0 : index
    %c2 = arith.constant 2 : index
    %c0_34 = arith.constant 0 : index
    %29 = vector.load %arg8[%c0_33, %c2, %c0_34] : memref<18x18x128xbf16, #tpu.memory_space<vmem>>, vector<16x16x128xbf16>
    %30 = vector.shape_cast %29 : vector<16x16x128xbf16> to vector<256x128xbf16>
    %c0_35 = arith.constant 0 : index
    %c256 = arith.constant 256 : index
    %31 = vector.load %arg9[%c0_35, %c256] : memref<256x1152xbf16, #tpu.memory_space<vmem>>, vector<256x128xbf16>
    tpu.vector_store %arg9[%c0_35, %c256], %30 {strides = array<i32>} : memref<256x1152xbf16, #tpu.memory_space<vmem>>, vector<256x128xbf16>,
    %c1_36 = arith.constant 1 : index
    %c0_37 = arith.constant 0 : index
    %c0_38 = arith.constant 0 : index
    %32 = vector.load %arg8[%c1_36, %c0_37, %c0_38] : memref<18x18x128xbf16, #tpu.memory_space<vmem>>, vector<16x16x128xbf16>
    %33 = vector.shape_cast %32 : vector<16x16x128xbf16> to vector<256x128xbf16>
    %c0_39 = arith.constant 0 : index
    %c384 = arith.constant 384 : index
    %34 = vector.load %arg9[%c0_39, %c384] : memref<256x1152xbf16, #tpu.memory_space<vmem>>, vector<256x128xbf16>
    tpu.vector_store %arg9[%c0_39, %c384], %33 {strides = array<i32>} : memref<256x1152xbf16, #tpu.memory_space<vmem>>, vector<256x128xbf16>,
    %c1_40 = arith.constant 1 : index
    %c1_41 = arith.constant 1 : index
    %c0_42 = arith.constant 0 : index
    %35 = vector.load %arg8[%c1_40, %c1_41, %c0_42] : memref<18x18x128xbf16, #tpu.memory_space<vmem>>, vector<16x16x128xbf16>
    %36 = vector.shape_cast %35 : vector<16x16x128xbf16> to vector<256x128xbf16>
    %c0_43 = arith.constant 0 : index
    %c512 = arith.constant 512 : index
    %37 = vector.load %arg9[%c0_43, %c512] : memref<256x1152xbf16, #tpu.memory_space<vmem>>, vector<256x128xbf16>
    tpu.vector_store %arg9[%c0_43, %c512], %36 {strides = array<i32>} : memref<256x1152xbf16, #tpu.memory_space<vmem>>, vector<256x128xbf16>,
    %c1_44 = arith.constant 1 : index
    %c2_45 = arith.constant 2 : index
    %c0_46 = arith.constant 0 : index
    %38 = vector.load %arg8[%c1_44, %c2_45, %c0_46] : memref<18x18x128xbf16, #tpu.memory_space<vmem>>, vector<16x16x128xbf16>
    %39 = vector.shape_cast %38 : vector<16x16x128xbf16> to vector<256x128xbf16>
    %c0_47 = arith.constant 0 : index
    %c640 = arith.constant 640 : index
    %40 = vector.load %arg9[%c0_47, %c640] : memref<256x1152xbf16, #tpu.memory_space<vmem>>, vector<256x128xbf16>
    tpu.vector_store %arg9[%c0_47, %c640], %39 {strides = array<i32>} : memref<256x1152xbf16, #tpu.memory_space<vmem>>, vector<256x128xbf16>,
    %c2_48 = arith.constant 2 : index
    %c0_49 = arith.constant 0 : index
    %c0_50 = arith.constant 0 : index
    %41 = vector.load %arg8[%c2_48, %c0_49, %c0_50] : memref<18x18x128xbf16, #tpu.memory_space<vmem>>, vector<16x16x128xbf16>
    %42 = vector.shape_cast %41 : vector<16x16x128xbf16> to vector<256x128xbf16>
    %c0_51 = arith.constant 0 : index
    %c768 = arith.constant 768 : index
    %43 = vector.load %arg9[%c0_51, %c768] : memref<256x1152xbf16, #tpu.memory_space<vmem>>, vector<256x128xbf16>
    tpu.vector_store %arg9[%c0_51, %c768], %42 {strides = array<i32>} : memref<256x1152xbf16, #tpu.memory_space<vmem>>, vector<256x128xbf16>,
    %c2_52 = arith.constant 2 : index
    %c1_53 = arith.constant 1 : index
    %c0_54 = arith.constant 0 : index
    %44 = vector.load %arg8[%c2_52, %c1_53, %c0_54] : memref<18x18x128xbf16, #tpu.memory_space<vmem>>, vector<16x16x128xbf16>
    %45 = vector.shape_cast %44 : vector<16x16x128xbf16> to vector<256x128xbf16>
    %c0_55 = arith.constant 0 : index
    %c896 = arith.constant 896 : index
    %46 = vector.load %arg9[%c0_55, %c896] : memref<256x1152xbf16, #tpu.memory_space<vmem>>, vector<256x128xbf16>
    tpu.vector_store %arg9[%c0_55, %c896], %45 {strides = array<i32>} : memref<256x1152xbf16, #tpu.memory_space<vmem>>, vector<256x128xbf16>,
    %c2_56 = arith.constant 2 : index
    %c2_57 = arith.constant 2 : index
    %c0_58 = arith.constant 0 : index
    %47 = vector.load %arg8[%c2_56, %c2_57, %c0_58] : memref<18x18x128xbf16, #tpu.memory_space<vmem>>, vector<16x16x128xbf16>
    %48 = vector.shape_cast %47 : vector<16x16x128xbf16> to vector<256x128xbf16>
    %c0_59 = arith.constant 0 : index
    %c1024 = arith.constant 1024 : index
    %49 = vector.load %arg9[%c0_59, %c1024] : memref<256x1152xbf16, #tpu.memory_space<vmem>>, vector<256x128xbf16>
    tpu.vector_store %arg9[%c0_59, %c1024], %48 {strides = array<i32>} : memref<256x1152xbf16, #tpu.memory_space<vmem>>, vector<256x128xbf16>,
    %c0_60 = arith.constant 0 : index
    %c0_61 = arith.constant 0 : index
    %50 = vector.load %arg9[%c0_60, %c0_61] : memref<256x1152xbf16, #tpu.memory_space<vmem>>, vector<256x1152xbf16>
    %c0_62 = arith.constant 0 : index
    %c0_63 = arith.constant 0 : index
    %51 = vector.load %arg2[%c0_62, %c0_63] : memref<1152x128xbf16, #tpu.memory_space<vmem>>, vector<1152x128xbf16>
    %cst_64 = arith.constant dense<0.000000e+00> : vector<256x128xf32>
    %52 = tpu.matmul %50, %51, %cst_64 {dimension_numbers = #tpu.dot_dimension_numbers<[1], [0], [0], [1], [0, 0, 1, 1], [], []>} : vector<256x1152xbf16>, vector<1152x128xbf16>, vector<256x128xf32> -> vector<256x128xf32>
    %53 = arith.truncf %52 : vector<256x128xf32> to vector<256x128xbf16>
    %c0_65 = arith.constant 0 : index
    %c0_66 = arith.constant 0 : index
    %c0_67 = arith.constant 0 : index
    %54 = vector.load %arg5[%c0_65, %c0_66, %c0_67] : memref<1x256x128xbf16, #tpu.memory_space<vmem>>, vector<1x256x128xbf16>
    %55 = vector.shape_cast %54 : vector<1x256x128xbf16> to vector<256x128xbf16>
    %56 = vector.shape_cast %53 : vector<256x128xbf16> to vector<1x256x128xbf16>
    tpu.vector_store %arg5[%c0_65, %c0_66, %c0_67], %56 {strides = array<i32>} : memref<1x256x128xbf16, #tpu.memory_space<vmem>>, vector<1x256x128xbf16>,
    %cst_68 = arith.constant dense<0.000000e+00> : vector<128xf32>
    %57 = vector.multi_reduction <add>, %52, %cst_68 [0] : vector<256x128xf32> to vector<128xf32>
    %58 = vector.shape_cast %57 : vector<128xf32> to vector<1x128xf32>
    %59 = arith.addf %21, %58 : vector<1x128xf32>
    %60 = arith.mulf %52, %52 : vector<256x128xf32>
    %cst_69 = arith.constant dense<0.000000e+00> : vector<128xf32>
    %61 = vector.multi_reduction <add>, %60, %cst_69 [0] : vector<256x128xf32> to vector<128xf32>
    %62 = vector.shape_cast %61 : vector<128xf32> to vector<1x128xf32>
    %63 = arith.addf %22, %62 : vector<1x128xf32>
    %c0_70 = arith.constant 0 : index
    %c0_71 = arith.constant 0 : index
    %c0_72 = arith.constant 0 : index
    %64 = vector.load %arg6[%c0_70, %c0_71, %c0_72] : memref<1x1x128xf32, #tpu.memory_space<vmem>>, vector<1x1x128xf32>
    %65 = vector.shape_cast %64 : vector<1x1x128xf32> to vector<1x128xf32>
    %66 = vector.shape_cast %59 : vector<1x128xf32> to vector<1x1x128xf32>
    tpu.vector_store %arg6[%c0_70, %c0_71, %c0_72], %66 {strides = array<i32>} : memref<1x1x128xf32, #tpu.memory_space<vmem>>, vector<1x1x128xf32>,
    %c0_73 = arith.constant 0 : index
    %c0_74 = arith.constant 0 : index
    %c0_75 = arith.constant 0 : index
    %67 = vector.load %arg7[%c0_73, %c0_74, %c0_75] : memref<1x1x128xf32, #tpu.memory_space<vmem>>, vector<1x1x128xf32>
    %68 = vector.shape_cast %67 : vector<1x1x128xf32> to vector<1x128xf32>
    %69 = vector.shape_cast %63 : vector<1x128xf32> to vector<1x1x128xf32>
    tpu.vector_store %arg7[%c0_73, %c0_74, %c0_75], %69 {strides = array<i32>} : memref<1x1x128xf32, #tpu.memory_space<vmem>>, vector<1x1x128xf32>,
    return
  }
  func.func @transform_0(%arg0: i32) -> (i32, i32, i32, i32) {
    %c0_i32 = arith.constant 0 : i32
    %c0_i32_0 = arith.constant 0 : i32
    %c0_i32_1 = arith.constant 0 : i32
    %c0_i32_2 = arith.constant 0 : i32
    return %arg0, %c0_i32, %c0_i32_0, %c0_i32_1 : i32, i32, i32, i32
  }
  func.func @transform_1(%arg0: i32) -> (i32, i32) {
    %c0_i32 = arith.constant 0 : i32
    %c0_i32_0 = arith.constant 0 : i32
    %c0_i32_1 = arith.constant 0 : i32
    return %c0_i32, %c0_i32_0 : i32, i32
  }
  func.func @transform_2(%arg0: i32) -> (i32, i32) {
    %c0_i32 = arith.constant 0 : i32
    %c0_i32_0 = arith.constant 0 : i32
    %c0_i32_1 = arith.constant 0 : i32
    return %c0_i32, %c0_i32_0 : i32, i32
  }
  func.func @transform_3(%arg0: i32) -> (i32, i32) {
    %c0_i32 = arith.constant 0 : i32
    %c0_i32_0 = arith.constant 0 : i32
    %c0_i32_1 = arith.constant 0 : i32
    return %c0_i32, %c0_i32_0 : i32, i32
  }
  func.func @transform_4(%arg0: i32) -> (i32, i32, i32) {
    %c0_i32 = arith.constant 0 : i32
    %c0_i32_0 = arith.constant 0 : i32
    %c0_i32_1 = arith.constant 0 : i32
    return %arg0, %c0_i32, %c0_i32_0 : i32, i32, i32
  }
  func.func @transform_5(%arg0: i32) -> (i32, i32, i32) {
    %c0_i32 = arith.constant 0 : i32
    %c0_i32_0 = arith.constant 0 : i32
    %c0_i32_1 = arith.constant 0 : i32
    return %arg0, %c0_i32, %c0_i32_0 : i32, i32, i32
  }
  func.func @transform_6(%arg0: i32) -> (i32, i32, i32) {
    %c0_i32 = arith.constant 0 : i32
    %c0_i32_0 = arith.constant 0 : i32
    %c0_i32_1 = arith.constant 0 : i32
    return %arg0, %c0_i32, %c0_i32_0 : i32, i32, i32
  }
}

</mosaic_0001>

<bundles_post_ra>
// kernel: basic_block_forward.5
= control target key start
LH: loop header
LB: loop body
LE: loop exit
PB: predicated region body
PF: predicated region fallthrough
CT: control target
= control target key end

     0   :  { %s693_s15 = smov 0   ;;  %s881_s0 = inlined_call_operand.vmem [shape: bf16[2,256,128], index: 0, kind: input, shape index: {}]   ;;  %s882_s1 = inlined_call_operand.vmem [shape: f32[1,128], index: 1, kind: input, shape index: {}]   ;;  %s883_s2 = inlined_call_operand.vmem [shape: f32[1,128], index: 2, kind: input, shape index: {}]   ;;  %s884_s3 = inlined_call_operand.vmem [shape: f32[2,256,128], index: 3, kind: input, shape index: {}]   ;;  %s885_s4 = inlined_call_operand.vmem [shape: f32[2,256,128], index: 4, kind: output, shape index: {}]  }
   0x1 LB: > { %s555_s16 = sadd.s32 4294967295, %s666_s15   ;;  %p559_p0 = scmp.ge.s32.totalorder %s666_s15, 1  ;;  %s666_s15 = sphi %s693_s15, %s14_s15  }
   0x2   : > { %p172_p1 = scmp.lt.s32.totalorder %s666_s15, 3 }
   0x4   : > { %p173_p2 = pnand %p559_p0, %p172_p1 }
   0x5   : > { %p203_p3 = scmp.lt.s32.totalorder (!%p173_p2), %s555_s16, 1  ;;  %v714_v1 = vld [vmem:[%s882_s1] ss:$0 sm:$0xff] (!%p173_p2) }
   0x6   : > { %176 = sbr.rel (%p173_p2) target bundleno = 60 (0x3c), region = 36  ;;  %v727_v5 = vld [vmem:[%s883_s2] ss:$0 sm:$0xff] (!%p173_p2) }
   0xd   : > { %s887_s16 = smov (!%p203_p3, %s555_s16), 1 }
   0xe   : > { %s570_s17 = sshll.u32 %s887_s16, 7  ;;  %s571_s18 = sshll.u32 %s887_s16, 8 }
   0xf   : > { %s708_s21 = scalar_lea.vmem %s881_s0, %s570_s17  ;;  %s721_s26 = scalar_lea.vmem %s884_s3, %s571_s18 }
  0x10   : > { %v574_v0 = vld [vmem:[%s708_s21] sm:$0xff]   ;;  %v637_v4 = vld [vmem:[%s708_s21 + $0x8] sm:$0xff]   ;;  %v638_v8 = vld [vmem:[%s708_s21 + $0x10] sm:$0xff]   ;;  %s758_s5 = scalar_lea.vmem %s885_s4, %s571_s18 }
  0x11   : > { %v575_v2 = vunpack.c.l.bf16 %v574_v0  ;;  %v576_v3 = vunpack.c.h.bf16 %v574_v0  ;;  %v579_v6 = vunpack.c.l.bf16 %v637_v4  ;;  %v580_v7 = vunpack.c.h.bf16 %v637_v4  ;;  %v639_v13 = vld [vmem:[%s708_s21 + $0x18] sm:$0xff]   ;;  %v360_v14 = vld [vmem:[%s721_s26] sm:$0xff]  ;;  %v361_v15 = vld [vmem:[%s721_s26 + $0x8] sm:$0xff] }
  0x12   : > { %v583_v11 = vunpack.c.l.bf16 %v638_v8  ;;  %v584_v12 = vunpack.c.h.bf16 %v638_v8  ;;  %v587_v18 = vunpack.c.l.bf16 %v639_v13  ;;  %v588_v19 = vunpack.c.h.bf16 %v639_v13  ;;  %v362_v22 = vld [vmem:[%s721_s26 + $0x10] sm:$0xff]  ;;  %v363_v23 = vld [vmem:[%s721_s26 + $0x18] sm:$0xff]  ;;  %v364_v28 = vld [vmem:[%s721_s26 + $0x20] sm:$0xff] }
  0x13   : > { %v289_v9 = vmul.f32 %v575_v2, %v714_v1  ;;  %v290_v10 = vmul.f32 %v576_v3, %v714_v1  ;;  %v291_v16 = vmul.f32 %v579_v6, %v714_v1  ;;  %v292_v17 = vmul.f32 %v580_v7, %v714_v1  ;;  %v365_v29 = vld [vmem:[%s721_s26 + $0x28] sm:$0xff]  ;;  %v366_v36 = vld [vmem:[%s721_s26 + $0x30] sm:$0xff]  ;;  %v367_v37 = vld [vmem:[%s721_s26 + $0x38] sm:$0xff] }
  0x14   : > { %v293_v24 = vmul.f32 %v583_v11, %v714_v1  ;;  %v294_v25 = vmul.f32 %v584_v12, %v714_v1  ;;  %v295_v30 = vmul.f32 %v587_v18, %v714_v1  ;;  %v296_v31 = vmul.f32 %v588_v19, %v714_v1  ;;  %v640_v42 = vld [vmem:[%s708_s21 + $0x20] sm:$0xff]   ;;  %v641_v47 = vld [vmem:[%s708_s21 + $0x28] sm:$0xff]   ;;  %v642_v52 = vld [vmem:[%s708_s21 + $0x30] sm:$0xff]  }
  0x15   : > { %v328_v20 = vadd.f32 %v727_v5, %v289_v9  ;;  %v329_v21 = vadd.f32 %v727_v5, %v290_v10  ;;  %v330_v26 = vadd.f32 %v727_v5, %v291_v16  ;;  %v331_v27 = vadd.f32 %v727_v5, %v292_v17  ;;  %v643_v57 = vld [vmem:[%s708_s21 + $0x38] sm:$0xff]   ;;  %v368_v3 = vld [vmem:[%s721_s26 + $0x40] sm:$0xff]  ;;  %v369_v4 = vld [vmem:[%s721_s26 + $0x48] sm:$0xff] }
  0x16   : > { %v332_v34 = vadd.f32 %v727_v5, %v293_v24  ;;  %v333_v35 = vadd.f32 %v727_v5, %v294_v25  ;;  %v334_v40 = vadd.f32 %v727_v5, %v295_v30  ;;  %v335_v41 = vadd.f32 %v727_v5, %v296_v31  ;;  %v370_v12 = vld [vmem:[%s721_s26 + $0x50] sm:$0xff]  ;;  %v371_v13 = vld [vmem:[%s721_s26 + $0x58] sm:$0xff]  ;;  %v372_v18 = vld [vmem:[%s721_s26 + $0x60] sm:$0xff] }
  0x17   : > { %v392_v32 = vadd.f32 %v360_v14, %v328_v20  ;;  %v393_v33 = vadd.f32 %v361_v15, %v329_v21  ;;  %v394_v38 = vadd.f32 %v362_v22, %v330_v26  ;;  %v395_v39 = vadd.f32 %v363_v23, %v331_v27  ;;  %v373_v19 = vld [vmem:[%s721_s26 + $0x68] sm:$0xff]  ;;  %v374_v26 = vld [vmem:[%s721_s26 + $0x70] sm:$0xff]  ;;  %v375_v27 = vld [vmem:[%s721_s26 + $0x78] sm:$0xff] }
  0x18   : > { %v396_v45 = vadd.f32 %v364_v28, %v332_v34  ;;  %v397_v46 = vadd.f32 %v365_v29, %v333_v35  ;;  %v398_v50 = vadd.f32 %v366_v36, %v334_v40  ;;  %v399_v51 = vadd.f32 %v367_v37, %v335_v41  ;;  %v645_v37 = vld [vmem:[%s708_s21 + $0x48] sm:$0xff]  }
  0x19   : > { %v424_v43 = vmax.f32 %v392_v32, 0.0  ;;  %v425_v44 = vmax.f32 %v393_v33, 0.0  ;;  %v426_v48 = vmax.f32 %v394_v38, 0.0  ;;  %v427_v49 = vmax.f32 %v395_v39, 0.0  ;;  %v644_v32 = vld [vmem:[%s708_s21 + $0x40] sm:$0xff]  }
  0x1a   : > { %v428_v53 = vmax.f32 %v396_v45, 0.0  ;;  %v429_v54 = vmax.f32 %v397_v46, 0.0  ;;  %v591_v55 = vunpack.c.l.bf16 %v640_v42  ;;  %v592_v56 = vunpack.c.h.bf16 %v640_v42  ;;  %v646_v42 = vld [vmem:[%s708_s21 + $0x50] sm:$0xff]  }
  0x1b   : > { %456 = vst [vmem:[%s758_s5] sm:$0xff] %v424_v43  ;;  %457 = vst [vmem:[%s758_s5 + $0x8] sm:$0xff] %v425_v44  ;;  %v430_v58 = vmax.f32 %v398_v50, 0.0  ;;  %v431_v59 = vmax.f32 %v399_v51, 0.0  ;;  %v595_v60 = vunpack.c.l.bf16 %v641_v47  ;;  %v596_v61 = vunpack.c.h.bf16 %v641_v47  ;;  %v647_v47 = vld [vmem:[%s708_s21 + $0x58] sm:$0xff]  }
  0x1c   : > { %458 = vst [vmem:[%s758_s5 + $0x10] sm:$0xff] %v426_v48  ;;  %459 = vst [vmem:[%s758_s5 + $0x18] sm:$0xff] %v427_v49  ;;  %v297_v62 = vmul.f32 %v591_v55, %v714_v1  ;;  %v298_v63 = vmul.f32 %v592_v56, %v714_v1  ;;  %v599_v0 = vunpack.c.l.bf16 %v642_v52  ;;  %v600_v2 = vunpack.c.h.bf16 %v642_v52  ;;  %v376_v56 = vld [vmem:[%s721_s26 + $0x80] sm:$0xff] }
  0x1d   : > { %460 = vst [vmem:[%s758_s5 + $0x20] sm:$0xff] %v428_v53  ;;  %461 = vst [vmem:[%s758_s5 + $0x28] sm:$0xff] %v429_v54  ;;  %v299_v6 = vmul.f32 %v595_v60, %v714_v1  ;;  %v300_v7 = vmul.f32 %v596_v61, %v714_v1  ;;  %v603_v8 = vunpack.c.l.bf16 %v643_v57  ;;  %v604_v9 = vunpack.c.h.bf16 %v643_v57  ;;  %v377_v57 = vld [vmem:[%s721_s26 + $0x88] sm:$0xff] }
  0x1e   : > { %462 = vst [vmem:[%s758_s5 + $0x30] sm:$0xff] %v430_v58  ;;  %463 = vst [vmem:[%s758_s5 + $0x38] sm:$0xff] %v431_v59  ;;  %v336_v10 = vadd.f32 %v727_v5, %v297_v62  ;;  %v337_v11 = vadd.f32 %v727_v5, %v298_v63  ;;  %v301_v14 = vmul.f32 %v599_v0, %v714_v1  ;;  %v607_v45 = vunpack.c.l.bf16 %v644_v32  ;;  %v378_v0 = vld [vmem:[%s721_s26 + $0x90] sm:$0xff] }
  0x1f   : > { %v302_v15 = vmul.f32 %v600_v2, %v714_v1  ;;  %v338_v16 = vadd.f32 %v727_v5, %v299_v6  ;;  %v339_v17 = vadd.f32 %v727_v5, %v300_v7  ;;  %v303_v20 = vmul.f32 %v603_v8, %v714_v1  ;;  %v379_v2 = vld [vmem:[%s721_s26 + $0x98] sm:$0xff]  ;;  %v380_v8 = vld [vmem:[%s721_s26 + $0xa0] sm:$0xff] }
  0x20   : > { %v304_v21 = vmul.f32 %v604_v9, %v714_v1  ;;  %v400_v22 = vadd.f32 %v368_v3, %v336_v10  ;;  %v401_v23 = vadd.f32 %v369_v4, %v337_v11  ;;  %v340_v24 = vadd.f32 %v727_v5, %v301_v14  ;;  %v381_v9 = vld [vmem:[%s721_s26 + $0xa8] sm:$0xff] }
  0x21   : > { %v341_v25 = vadd.f32 %v727_v5, %v302_v15  ;;  %v402_v28 = vadd.f32 %v370_v12, %v338_v16  ;;  %v403_v29 = vadd.f32 %v371_v13, %v339_v17  ;;  %v342_v30 = vadd.f32 %v727_v5, %v303_v20  ;;  %v382_v16 = vld [vmem:[%s721_s26 + $0xb0] sm:$0xff]  ;;  %v383_v17 = vld [vmem:[%s721_s26 + $0xb8] sm:$0xff] }
  0x22   : > { %v343_v31 = vadd.f32 %v727_v5, %v304_v21  ;;  %v432_v33 = vmax.f32 %v400_v22, 0.0  ;;  %v433_v34 = vmax.f32 %v401_v23, 0.0  ;;  %v404_v35 = vadd.f32 %v372_v18, %v340_v24  ;;  %v648_v22 = vld [vmem:[%s708_s21 + $0x60] sm:$0xff]  }
  0x23   : > { %v405_v36 = vadd.f32 %v373_v19, %v341_v25  ;;  %v434_v38 = vmax.f32 %v402_v28, 0.0  ;;  %v435_v39 = vmax.f32 %v403_v29, 0.0  ;;  %v406_v40 = vadd.f32 %v374_v26, %v342_v30 }
  0x24   : > { %v407_v41 = vadd.f32 %v375_v27, %v343_v31  ;;  %464 = vst [vmem:[%s758_s5 + $0x40] sm:$0xff] %v432_v33  ;;  %465 = vst [vmem:[%s758_s5 + $0x48] sm:$0xff] %v433_v34  ;;  %v436_v43 = vmax.f32 %v404_v35, 0.0  ;;  %v608_v46 = vunpack.c.h.bf16 %v644_v32  ;;  %v611_v50 = vunpack.c.l.bf16 %v645_v37  ;;  %v649_v27 = vld [vmem:[%s708_s21 + $0x68] sm:$0xff]   ;;  %v650_v32 = vld [vmem:[%s708_s21 + $0x70] sm:$0xff]  }
  0x25   : > { %v437_v44 = vmax.f32 %v405_v36, 0.0  ;;  %466 = vst [vmem:[%s758_s5 + $0x50] sm:$0xff] %v434_v38  ;;  %467 = vst [vmem:[%s758_s5 + $0x58] sm:$0xff] %v435_v39  ;;  %v438_v48 = vmax.f32 %v406_v40, 0.0  ;;  %v612_v51 = vunpack.c.h.bf16 %v645_v37  ;;  %v305_v52 = vmul.f32 %v607_v45, %v714_v1  ;;  %v651_v37 = vld [vmem:[%s708_s21 + $0x78] sm:$0xff]  }
  0x26   : > { %v439_v49 = vmax.f32 %v407_v41, 0.0  ;;  %468 = vst [vmem:[%s758_s5 + $0x60] sm:$0xff] %v436_v43  ;;  %v306_v53 = vmul.f32 %v608_v46, %v714_v1  ;;  %v615_v54 = vunpack.c.l.bf16 %v646_v42  ;;  %v616_v55 = vunpack.c.h.bf16 %v646_v42  ;;  %v384_v46 = vld [vmem:[%s721_s26 + $0xc0] sm:$0xff] }
  0x27   : > { %469 = vst [vmem:[%s758_s5 + $0x68] sm:$0xff] %v437_v44  ;;  %470 = vst [vmem:[%s758_s5 + $0x70] sm:$0xff] %v438_v48  ;;  %v307_v58 = vmul.f32 %v611_v50, %v714_v1  ;;  %v308_v59 = vmul.f32 %v612_v51, %v714_v1  ;;  %v619_v60 = vunpack.c.l.bf16 %v647_v47  ;;  %v620_v61 = vunpack.c.h.bf16 %v647_v47  ;;  %v385_v47 = vld [vmem:[%s721_s26 + $0xc8] sm:$0xff] }
  0x28   : > { %471 = vst [vmem:[%s758_s5 + $0x78] sm:$0xff] %v439_v49  ;;  %v344_v62 = vadd.f32 %v727_v5, %v305_v52  ;;  %v345_v63 = vadd.f32 %v727_v5, %v306_v53  ;;  %v309_v3 = vmul.f32 %v615_v54, %v714_v1  ;;  %v310_v4 = vmul.f32 %v616_v55, %v714_v1  ;;  %v386_v54 = vld [vmem:[%s721_s26 + $0xd0] sm:$0xff]  ;;  %v387_v55 = vld [vmem:[%s721_s26 + $0xd8] sm:$0xff] }
  0x29   : > { %v346_v6 = vadd.f32 %v727_v5, %v307_v58  ;;  %v347_v7 = vadd.f32 %v727_v5, %v308_v59  ;;  %v311_v10 = vmul.f32 %v619_v60, %v714_v1  ;;  %v312_v11 = vmul.f32 %v620_v61, %v714_v1  ;;  %v388_v60 = vld [vmem:[%s721_s26 + $0xe0] sm:$0xff]  ;;  %v389_v61 = vld [vmem:[%s721_s26 + $0xe8] sm:$0xff] }
  0x2a   : > { %v408_v12 = vadd.f32 %v376_v56, %v344_v62  ;;  %v409_v13 = vadd.f32 %v377_v57, %v345_v63  ;;  %v348_v14 = vadd.f32 %v727_v5, %v309_v3  ;;  %v349_v15 = vadd.f32 %v727_v5, %v310_v4 }
  0x2b   : > { %v410_v18 = vadd.f32 %v378_v0, %v346_v6  ;;  %v411_v19 = vadd.f32 %v379_v2, %v347_v7  ;;  %v350_v20 = vadd.f32 %v727_v5, %v311_v10  ;;  %v351_v21 = vadd.f32 %v727_v5, %v312_v11  ;;  %v390_v6 = vld [vmem:[%s721_s26 + $0xf0] sm:$0xff]  ;;  %v391_v7 = vld [vmem:[%s721_s26 + $0xf8] sm:$0xff] }
  0x2c   : > { %v440_v23 = vmax.f32 %v408_v12, 0.0  ;;  %v441_v24 = vmax.f32 %v409_v13, 0.0  ;;  %v412_v25 = vadd.f32 %v380_v8, %v348_v14  ;;  %v413_v26 = vadd.f32 %v381_v9, %v349_v15 }
  0x2d   : > { %v442_v28 = vmax.f32 %v410_v18, 0.0  ;;  %v443_v29 = vmax.f32 %v411_v19, 0.0  ;;  %v414_v30 = vadd.f32 %v382_v16, %v350_v20  ;;  %v415_v31 = vadd.f32 %v383_v17, %v351_v21 }
  0x2e   : > { %472 = vst [vmem:[%s758_s5 + $0x80] sm:$0xff] %v440_v23  ;;  %473 = vst [vmem:[%s758_s5 + $0x88] sm:$0xff] %v441_v24  ;;  %v444_v33 = vmax.f32 %v412_v25, 0.0  ;;  %v445_v34 = vmax.f32 %v413_v26, 0.0  ;;  %v623_v35 = vunpack.c.l.bf16 %v648_v22  ;;  %v624_v36 = vunpack.c.h.bf16 %v648_v22 }
  0x2f   : > { %474 = vst [vmem:[%s758_s5 + $0x90] sm:$0xff] %v442_v28  ;;  %475 = vst [vmem:[%s758_s5 + $0x98] sm:$0xff] %v443_v29  ;;  %v446_v38 = vmax.f32 %v414_v30, 0.0  ;;  %v447_v39 = vmax.f32 %v415_v31, 0.0  ;;  %v627_v40 = vunpack.c.l.bf16 %v649_v27  ;;  %v628_v41 = vunpack.c.h.bf16 %v649_v27 }
  0x30   : > { %476 = vst [vmem:[%s758_s5 + $0xa0] sm:$0xff] %v444_v33  ;;  %477 = vst [vmem:[%s758_s5 + $0xa8] sm:$0xff] %v445_v34  ;;  %v313_v42 = vmul.f32 %v623_v35, %v714_v1  ;;  %v314_v43 = vmul.f32 %v624_v36, %v714_v1  ;;  %v631_v44 = vunpack.c.l.bf16 %v650_v32  ;;  %v632_v45 = vunpack.c.h.bf16 %v650_v32 }
  0x31   : > { %478 = vst [vmem:[%s758_s5 + $0xb0] sm:$0xff] %v446_v38  ;;  %479 = vst [vmem:[%s758_s5 + $0xb8] sm:$0xff] %v447_v39  ;;  %v315_v48 = vmul.f32 %v627_v40, %v714_v1  ;;  %v316_v49 = vmul.f32 %v628_v41, %v714_v1  ;;  %v635_v50 = vunpack.c.l.bf16 %v651_v37  ;;  %v636_v51 = vunpack.c.h.bf16 %v651_v37 }
  0x32   : > { %v352_v52 = vadd.f32 %v727_v5, %v313_v42  ;;  %v353_v53 = vadd.f32 %v727_v5, %v314_v43  ;;  %v317_v56 = vmul.f32 %v631_v44, %v714_v1  ;;  %v318_v57 = vmul.f32 %v632_v45, %v714_v1 }
  0x33   : > { %v354_v58 = vadd.f32 %v727_v5, %v315_v48  ;;  %v355_v59 = vadd.f32 %v727_v5, %v316_v49  ;;  %v319_v62 = vmul.f32 %v635_v50, %v714_v1  ;;  %v320_v63 = vmul.f32 %v636_v51, %v714_v1 }
  0x34   : > { %v416_v0 = vadd.f32 %v384_v46, %v352_v52  ;;  %v417_v2 = vadd.f32 %v385_v47, %v353_v53  ;;  %v356_v3 = vadd.f32 %v727_v5, %v317_v56  ;;  %v357_v4 = vadd.f32 %v727_v5, %v318_v57 }
  0x35   : > { %v418_v8 = vadd.f32 %v386_v54, %v354_v58  ;;  %v419_v9 = vadd.f32 %v387_v55, %v355_v59  ;;  %v358_v10 = vadd.f32 %v727_v5, %v319_v62  ;;  %v359_v11 = vadd.f32 %v727_v5, %v320_v63 }
  0x36   : > { %v448_v12 = vmax.f32 %v416_v0, 0.0  ;;  %v449_v1 = vmax.f32 %v417_v2, 0.0  ;;  %v420_v13 = vadd.f32 %v388_v60, %v356_v3  ;;  %v421_v14 = vadd.f32 %v389_v61, %v357_v4 }
  0x37   : > { %v450_v15 = vmax.f32 %v418_v8, 0.0  ;;  %v451_v16 = vmax.f32 %v419_v9, 0.0  ;;  %v422_v17 = vadd.f32 %v390_v6, %v358_v10  ;;  %v423_v18 = vadd.f32 %v391_v7, %v359_v11 }
  0x38   : > { %480 = vst [vmem:[%s758_s5 + $0xc0] sm:$0xff] %v448_v12  ;;  %481 = vst [vmem:[%s758_s5 + $0xc8] sm:$0xff] %v449_v1  ;;  %v452_v19 = vmax.f32 %v420_v13, 0.0  ;;  %v453_v20 = vmax.f32 %v421_v14, 0.0 }
  0x39   : > { %482 = vst [vmem:[%s758_s5 + $0xd0] sm:$0xff] %v450_v15  ;;  %483 = vst [vmem:[%s758_s5 + $0xd8] sm:$0xff] %v451_v16  ;;  %v454_v21 = vmax.f32 %v422_v17, 0.0  ;;  %v455_v5 = vmax.f32 %v423_v18, 0.0 }
  0x3a   : > { %484 = vst [vmem:[%s758_s5 + $0xe0] sm:$0xff] %v452_v19  ;;  %485 = vst [vmem:[%s758_s5 + $0xe8] sm:$0xff] %v453_v20 }
  0x3b   : > { %486 = vst [vmem:[%s758_s5 + $0xf0] sm:$0xff] %v454_v21  ;;  %487 = vst [vmem:[%s758_s5 + $0xf8] sm:$0xff] %v455_v5 }
  0x3c PF: > { %s14_s15 = sadd.s32 1, %s666_s15  }
  0x3d   : > { %p11_p4 = scmp.ge.s32.totalorder %s14_s15, 4  }
  0x3f   :  { %13 = sbr.rel (!%p11_p4) target bundleno = 1 (0x1), region = 69 }

// kernel: basic_block_forward.3
= control target key start
LH: loop header
LB: loop body
LE: loop exit
PB: predicated region body
PF: predicated region fallthrough
CT: control target
= control target key end

     0   :  { %s6903_s21 = smov 0   ;;  %s8589_s0 = inlined_call_operand.vmem [shape: f32[2,16,16,128], index: 0, kind: input, shape index: {}]   ;;  %s8590_s1 = inlined_call_operand.vmem [shape: bf16[1152,128], index: 1, kind: input, shape index: {}]   ;;  %s8591_s2 = inlined_call_operand.vmem [shape: f32[1,128], index: 2, kind: input, shape index: {}]   ;;  %s8592_s3 = inlined_call_operand.vmem [shape: f32[1,128], index: 3, kind: input, shape index: {}]   ;;  %s8593_s4 = inlined_call_operand.vmem [shape: bf16[2,256,128], index: 4, kind: output, shape index: {0}]   ;;  %s8594_s5 = inlined_call_operand.vmem [shape: f32[2,1,128], index: 5, kind: output, shape index: {1}]   ;;  %s8595_s6 = inlined_call_operand.vmem [shape: f32[2,1,128], index: 6, kind: output, shape index: {2}]  }
   0x1 LB: > { %s5694_s2 = sadd.s32 4294967295, %s6865_s21   ;;  %p5698_p0 = scmp.ge.s32.totalorder %s6865_s21, 1  ;;  %s6865_s21 = sphi %s6903_s21, %s17_s21  }
   0x2   : > { %p217_p1 = scmp.lt.s32.totalorder %s6865_s21, 3 }
   0x4   : > { %p218_p2 = pnand %p5698_p0, %p217_p1 }
   0x6   : > { %221 = sbr.rel (%p218_p2) target bundleno = 657 (0x291), region = 36 }
   0xd   : > { %v6739_v0 = vld [vmem:[%s8590_s1 + $0x40] sm:$0xff]   ;;  %v6741_v2 = vld [vmem:[%s8590_s1 + $0x48] sm:$0xff]   ;;  %v6867_v3 = vmov 0   ;;  %v6743_v5 = vld [vmem:[%s8590_s1 + $0x50] sm:$0xff]   ;;  %p253_p3 = scmp.lt.s32.totalorder %s5694_s2, 1  ;;  %vm729_vm0 = vcmask 1040384  }
   0xe   : > { %v6740_v1 = vld [vmem:[%s8590_s1] sm:$0xff]   ;;  %6194 = vmatprep.subr.bf16.mxu0 %v6739_v0  ;;  %6714 = vmatprep.subr.bf16.mxu1 %v6739_v0  ;;  %839 = vst [vmem:[#allocation2] sm:$0xf] %v6867_v3  ;;  %840 = vst [vmem:[#allocation2 + $0x4] sm:$0xf] %v6867_v3  ;;  %v6742_v4 = vld [vmem:[%s8590_s1 + $0x8] sm:$0xff]  }
   0xf   : > { %841 = vst [vmem:[#allocation2 + $0x8] sm:$0x1] %v6867_v3  ;;  %843 = vst [vmem:[#allocation2 + $0xcc] sm:$0xf] %v6867_v3  ;;  %6195 = vmatpush3.bf16.msra.mxu0 %v6740_v1  ;;  %6722 = vmatpush3.bf16.msra.mxu1 %v6740_v1  ;;  %v6744_v6 = vld [vmem:[%s8590_s1 + $0x10] sm:$0xff]   ;;  %v6745_v7 = vld [vmem:[%s8590_s1 + $0x58] sm:$0xff]  }
  0x10   : > { %844 = vst [vmem:[#allocation2 + $0xd0] sm:$0xf] %v6867_v3  ;;  %845 = vst [vmem:[#allocation2 + $0xd4] sm:$0x1] %v6867_v3  ;;  %6196 = vmatprep.subr.bf16.mxu0 %v6741_v2  ;;  %6715 = vmatprep.subr.bf16.mxu1 %v6741_v2  ;;  %s8647_s2 = smov (!%p253_p3, %s5694_s2), 1  ;;  %v6746_v8 = vld [vmem:[%s8590_s1 + $0x18] sm:$0xff]  }
  0x11   : > { %v6747_v9 = vld [vmem:[%s8590_s1 + $0x60] sm:$0xff]   ;;  %s6033_s15 = sshll.u32 %s8647_s2, 8  ;;  %v6749_v11 = vld [vmem:[%s8590_s1 + $0x68] sm:$0xff]   ;;  %vm398_vm1 = vsmask.f32 256  ;;  %v8598_v13 = vmov 0  ;;  %s265_s11 = scalar_lea.vmem %s8594_s5, %s8647_s2 }
  0x12   : > { %v6748_v10 = vld [vmem:[%s8590_s1 + $0x20] sm:$0xff]   ;;  %s6951_s20 = scalar_lea.vmem %s8589_s0, %s6033_s15  ;;  %vm723_vm2 = vsmask.f32 7938  ;;  %vm6958_vm3 = vmand %vm729_vm0, %vm398_vm1  ;;  %v6750_v16 = vld [vmem:[%s8590_s1 + $0x28] sm:$0xff]   ;;  %v8601_v18 = vmov 0  ;;  %vm722_vm5 = vcmask 1043456   ;;  %s268_s14 = scalar_lea.vmem %s8595_s6, %s8647_s2 }
  0x13   : > { %6197 = vmatpush3.bf16.msra.mxu0 %v6742_v4  ;;  %6723 = vmatpush3.bf16.msra.mxu1 %v6742_v4  ;;  %v8599_v13 = vsel %vm6958_vm3, 4294967295, %v8598_v13  ;;  %vm6969_vm4 = vmand %vm729_vm0, %vm723_vm2  ;;  %v270_v21 = vld [vmem:[%s6951_s20] sm:$0xff]  ;;  %vm1147_vm6 = vsmask.f32 3328  ;;  %v271_v23 = vld [vmem:[%s6951_s20 + $0x8] sm:$0xff]  ;;  %vm1710_vm12 = vcmask 1042432  }
  0x14   : > { %6198 = vmatprep.subr.bf16.mxu0 %v6743_v5  ;;  %6716 = vmatprep.subr.bf16.mxu1 %v6743_v5  ;;  %8600 = vst [vmem:[#allocation4_spill] sm:$0xff] %v8599_v13  ;;  %v8602_v18 = vsel %vm6969_vm4, 4294967295, %v8601_v18  ;;  %v6035_v24 = vpack.c.bf16 %v270_v21, %v270_v21  ;;  %v6751_v25 = vld [vmem:[%s8590_s1 + $0x70] sm:$0xff]   ;;  %vm1148_vm7 = vsmask.f32 7440  ;;  %v6036_v28 = vpack.c.bf16 %v271_v23, %v271_v23  ;;  %v293_v32 = vld [vmem:[%s6951_s20 + $0xb8] sm:$0xff]  ;;  %vm6995_vm9 = vmand %vm722_vm5, %vm723_vm2 }
  0x15   : > { %v846_v12 = vld [vmem:[#allocation2] sm:$0x1]  ;;  %v1100_v15 = vld [vmem:[#allocation2 + $0x4] sm:$0xf]  ;;  %8603 = vst [vmem:[#allocation5_spill] sm:$0xff] %v8602_v18  ;;  %v292_v31 = vld [vmem:[%s6951_s20 + $0xb0] sm:$0xff]  ;;  %v6058_v41 = vpack.c.bf16 %v293_v32, %v293_v32 }
  0x16   : > { %v901_v14 = vld [vmem:[#allocation2 + $0x8] sm:$0x1]  ;;  %v847_v17 = vsel %vm6958_vm3, 0, %v846_v12  ;;  %v1160_v19 = vshll.u32 %v1100_v15, 16  ;;  %v1164_v20 = vshrl.u32 %v1100_v15, 16  ;;  %v402_v29 = vshrl.u32 %v6035_v24, 16  ;;  %vm7022_vm11 = vmor %vm1147_vm6, %vm1148_vm7 }
  0x17   : > { %6199 = vmatpush3.bf16.msra.mxu0 %v6744_v6  ;;  %6724 = vmatpush3.bf16.msra.mxu1 %v6744_v6  ;;  %848 = vst [vmem:[#allocation2] sm:$0x1] %v847_v17  ;;  %v902_v22 = vsel %vm6969_vm4, 0, %v901_v14  ;;  %vm399_vm8 = vsmask.f32 4368  ;;  %v405_v30 = vshll.u32 %v6035_v24, 16  ;;  %v6057_v37 = vpack.c.bf16 %v292_v31, %v292_v31 }
  0x18   : > { %6200 = vmatprep.subr.bf16.mxu0 %v6745_v7  ;;  %6717 = vmatprep.subr.bf16.mxu1 %v6745_v7  ;;  %903 = vst [vmem:[#allocation2 + $0x8] sm:$0x1] %v902_v22  ;;  %v6980_v26 = vrot.slane %v1160_v19, 5  ;;  %v1166_v27 = vrot.slane %v1164_v20, 4  ;;  %v410_v34 = vshrl.u32 %v6036_v28, 16  ;;  %v413_v35 = vshll.u32 %v6036_v28, 16  ;;  %vm7004_vm10 = vmor %vm398_vm1, %vm399_vm8 }
  0x19   : > { %v725_v36 = vld [vmem:[#allocation2 + $0xc] sm:$0xf]  ;;  %v6752_v38 = vld [vmem:[%s8590_s1 + $0x30] sm:$0xff]   ;;  %v404_v39 = vrot.slane %v402_v29, 7  ;;  %v6753_v42 = vld [vmem:[%s8590_s1 + $0x78] sm:$0xff]   ;;  %v589_v46 = vshrl.u32 %v6057_v37, 16 }
  0x1a   : > { %v1167_v33 = vor.u32 %v1166_v27, %v6980_v26  ;;  %v731_v40 = vld [vmem:[#allocation2 + $0x14] sm:$0x1]  ;;  %v412_v44 = vrot.slane %v410_v34, 7  ;;  %v6754_v47 = vld [vmem:[%s8590_s1 + $0x38] sm:$0xff]   ;;  %v592_v51 = vshll.u32 %v6057_v37, 16  ;;  %v597_v52 = vshrl.u32 %v6058_v41, 16 }
  0x1b   : > { %6201 = vmatpush3.bf16.msra.mxu0 %v6746_v8  ;;  %6725 = vmatpush3.bf16.msra.mxu1 %v6746_v8  ;;  %v407_v49 = vor.u32 %v405_v30, %v404_v39  ;;  %v408_v50 = vrot.slane %v404_v39, 4  ;;  %v600_v56 = vshll.u32 %v6058_v41, 16  ;;  %v804_v57 = vld [vmem:[#allocation2 + $0x90] sm:$0xf]  ;;  %v6756_v58 = vld [vmem:[%s8590_s1 + $0xc0] sm:$0xff]   ;;  %v591_v63 = vrot.slane %v589_v46, 7 }
  0x1c   : > { %6202 = vmatprep.subr.bf16.mxu0 %v6747_v9  ;;  %6718 = vmatprep.subr.bf16.mxu1 %v6747_v9  ;;  %v6991_v43 = vrot.slane %v1167_v33, 4  ;;  %v415_v54 = vor.u32 %v413_v35, %v412_v44  ;;  %v417_v55 = vrot.slane %v412_v44, 4  ;;  %v808_v0 = vld [vmem:[#allocation2 + $0x98] sm:$0x1]  ;;  %v6757_v1 = vld [vmem:[%s8590_s1 + $0x140] sm:$0xff]   ;;  %v599_v5 = vrot.slane %v597_v52, 7 }
  0x1d   : > { %v726_v62 = vsel %vm6995_vm9, %v407_v49, %v725_v36  ;;  %v594_v8 = vor.u32 %v592_v51, %v591_v63  ;;  %v595_v9 = vrot.slane %v591_v63, 4  ;;  %v272_v20 = vld [vmem:[%s6951_s20 + $0x10] sm:$0xff]  ;;  %v273_v23 = vld [vmem:[%s6951_s20 + $0x18] sm:$0xff]  ;;  %v294_v27 = vld [vmem:[%s6951_s20 + $0xc0] sm:$0xff]  ;;  %vm1711_vm13 = vcmask 1046532   ;;  %s6034_s29 = sshll.u32 %s8647_s2, 7 }
  0x1e   : > { %v1099_v53 = vld [vmem:[#allocation2] sm:$0xf]  ;;  %v416_v3 = vsel %vm7004_vm10, %v408_v50, %v415_v54  ;;  %727 = vst [vmem:[#allocation2 + $0xc] sm:$0xf] %v726_v62  ;;  %v732_v4 = vsel %vm6958_vm3, %v417_v55, %v731_v40  ;;  %v602_v12 = vor.u32 %v600_v56, %v599_v5  ;;  %v604_v14 = vrot.slane %v599_v5, 4  ;;  %v295_v28 = vld [vmem:[%s6951_s20 + $0xc8] sm:$0xff]  ;;  %vm7279_vm14 = vmor %vm1710_vm12, %vm1711_vm13  ;;  %s8519_s8 = scalar_lea.vmem %s8593_s4, %s6034_s29 }
  0x1f   : > { %6203 = vmatpush3.bf16.msra.mxu0 %v6748_v10  ;;  %6726 = vmatpush3.bf16.msra.mxu1 %v6748_v10  ;;  %v1101_v59 = vld [vmem:[#allocation2 + $0x8] sm:$0x1]  ;;  %v1151_v60 = vshrl.u32 %v1099_v53, 16  ;;  %v1154_v61 = vshll.u32 %v1099_v53, 16  ;;  %728 = vst [vmem:[#allocation2 + $0x10] sm:$0xf] %v416_v3  ;;  %v6037_v24 = vpack.c.bf16 %v272_v20, %v272_v20  ;;  %v6059_v35 = vpack.c.bf16 %v294_v27, %v294_v27 }
  0x20   : > { %6204 = vmatprep.subr.bf16.mxu0 %v6749_v11  ;;  %6719 = vmatprep.subr.bf16.mxu1 %v6749_v11  ;;  %v1170_v2 = vshll.u32 %v1101_v59, 16  ;;  %733 = vst [vmem:[#allocation2 + $0x14] sm:$0x1] %v732_v4  ;;  %v603_v17 = vsel %vm7004_vm10, %v595_v9, %v602_v12  ;;  %v809_v19 = vsel %vm6958_vm3, %v604_v14, %v808_v0  ;;  %v6755_v30 = vld [vmem:[#allocation2] sm:$0xff]   ;;  %v734_v46 = vld [vmem:[#allocation2 + $0x18] sm:$0xf] }
  0x21   : > { %v1153_v6 = vrot.slane %v1151_v60, 4  ;;  %v1156_v7 = vrot.slane %v1154_v61, 5  ;;  %807 = vst [vmem:[#allocation2 + $0x94] sm:$0xf] %v603_v17  ;;  %810 = vst [vmem:[#allocation2 + $0x98] sm:$0x1] %v809_v19  ;;  %v7047_v41 = vpack.c.bf16 %v295_v28, %v295_v28 }
  0x22   : > { %v1172_v11 = vrot.slane %v1170_v2, 5  ;;  %v6761_v32 = vld [vmem:[%s8590_s1 + $0x100] sm:$0xff]   ;;  %v419_v33 = vshrl.u32 %v6037_v24, 16  ;;  %v422_v34 = vshll.u32 %v6037_v24, 16  ;;  %v606_v51 = vshrl.u32 %v6059_v35, 16 }
  0x23   : > { %6205 = vmatpush3.bf16.msra.mxu0 %v6750_v16  ;;  %6727 = vmatpush3.bf16.msra.mxu1 %v6750_v16  ;;  %v1157_v15 = vor.u32 %v1156_v7, %v1153_v6  ;;  %v805_v16 = vsel %vm6995_vm9, %v594_v8, %v804_v57  ;;  %v609_v52 = vshll.u32 %v6059_v35, 16  ;;  %v811_v3 = vld [vmem:[#allocation2 + $0x9c] sm:$0xf]  ;;  %v815_v17 = vld [vmem:[#allocation2 + $0xa4] sm:$0x1]  ;;  %v617_v27 = vshll.u32 %v7047_v41, 16 }
  0x24   : > { %6206 = vmatprep.subr.bf16.mxu0 %v6751_v25  ;;  %6720 = vmatprep.subr.bf16.mxu1 %v6751_v25  ;;  %806 = vst [vmem:[#allocation2 + $0x90] sm:$0xf] %v805_v16  ;;  %v1173_v22 = vsel %vm7022_vm11, %v6991_v43, %v1172_v11  ;;  %v6038_v25 = vpack.c.bf16 %v273_v23, %v273_v23  ;;  %v421_v44 = vrot.slane %v419_v33, 7  ;;  %v608_v7 = vrot.slane %v606_v51, 7  ;;  %v6769_v23 = vld [vmem:[%s8590_s1 + $0x148] sm:$0xff]  }
  0x25   : > { %v1158_v21 = vrot.slane %v1157_v15, 4  ;;  %v849_v31 = vld [vmem:[#allocation2 + $0xc] sm:$0x1]  ;;  %v614_v11 = vshrl.u32 %v7047_v41, 16 }
  0x26   : > { %v850_v37 = vsel %vm6958_vm3, 0, %v849_v31  ;;  %v1103_v39 = vld [vmem:[#allocation2 + $0x10] sm:$0xf]  ;;  %v427_v40 = vshrl.u32 %v6038_v25, 16  ;;  %v430_v50 = vshll.u32 %v6038_v25, 16  ;;  %v424_v56 = vor.u32 %v422_v34, %v421_v44 }
  0x27   : > { %6207 = vmatpush3.bf16.msra.mxu0 %v6752_v38  ;;  %6728 = vmatpush3.bf16.msra.mxu1 %v6752_v38  ;;  %v1163_v29 = vsel %vm7022_vm11, %v1158_v21, %v6980_v26  ;;  %v904_v38 = vld [vmem:[#allocation2 + $0x14] sm:$0x1]  ;;  %851 = vst [vmem:[#allocation2 + $0xc] sm:$0x1] %v850_v37  ;;  %v1188_v43 = vshrl.u32 %v1103_v39, 16  ;;  %v425_v57 = vrot.slane %v421_v44, 4  ;;  %v611_v15 = vor.u32 %v609_v52, %v608_v7 }
  0x28   : > { %6208 = vmatprep.subr.bf16.mxu0 %v6753_v42  ;;  %6721 = vmatprep.subr.bf16.mxu1 %v6753_v42  ;;  %v5751_v36 = vcombine.low %v1163_v29, %v1173_v22  ;;  %v905_v26 = vsel %vm6969_vm4, 0, %v904_v38  ;;  %v1184_v42 = vshll.u32 %v1103_v39, 16  ;;  %v429_v49 = vrot.slane %v427_v40, 7  ;;  %v937_v59 = vld [vmem:[#allocation2 + $0x98] sm:$0x1] }
  0x29   : > { %906 = vst [vmem:[#allocation2 + $0x14] sm:$0x1] %v905_v26  ;;  %v1190_v54 = vrot.slane %v1188_v43, 4  ;;  %v1136_v60 = vld [vmem:[#allocation2 + $0x94] sm:$0xf]  ;;  %v938_v0 = vsel %vm6969_vm4, 0, %v937_v59  ;;  %v735_v5 = vsel %vm6995_vm9, %v424_v56, %v734_v46  ;;  %v812_v28 = vsel %vm6995_vm9, %v611_v15, %v811_v3 }
  0x2a   : > { %4546 = vmatprep.mubr.bf16.mxu0 %v5751_v36  ;;  %v7051_v53 = vrot.slane %v1184_v42, 5  ;;  %v432_v61 = vor.u32 %v430_v50, %v429_v49  ;;  %v434_v62 = vrot.slane %v429_v49, 4  ;;  %v1452_v2 = vshrl.u32 %v1136_v60, 16  ;;  %939 = vst [vmem:[#allocation2 + $0x98] sm:$0x1] %v938_v0  ;;  %v6771_v3 = vld [vmem:[%s8590_s1 + $0x108] sm:$0xff]  }
  0x2b   : > { %6209 = vmatpush3.bf16.msra.mxu0 %v6754_v47  ;;  %6729 = vmatpush3.bf16.msra.mxu1 %v6754_v47  ;;  %v738_v47 = vld [vmem:[#allocation2 + $0x20] sm:$0x1]  ;;  %v882_v55 = vld [vmem:[#allocation2 + $0x90] sm:$0x1]  ;;  %736 = vst [vmem:[#allocation2 + $0x18] sm:$0xf] %v735_v5 }
  0x2c   : > { %6306 = vmatprep.subr.bf16.mxu1 %v6756_v58  ;;  %6418 = vmatprep.subr.bf16.mxu0 %v6757_v1  ;;  %v883_v58 = vsel %vm6958_vm3, 0, %v882_v55  ;;  %v1191_v63 = vor.u32 %v1190_v54, %v7051_v53  ;;  %v1448_v1 = vshll.u32 %v1136_v60, 16  ;;  %v433_v4 = vsel %vm7004_vm10, %v425_v57, %v432_v61  ;;  %813 = vst [vmem:[#allocation2 + $0x9c] sm:$0xf] %v812_v28  ;;  %v6760_v5 = vld [vmem:[%s8590_s1 + $0x80] sm:$0xff]  }
  0x2d   : > { %884 = vst [vmem:[#allocation2 + $0x90] sm:$0x1] %v883_v58  ;;  %v739_v6 = vsel %vm6958_vm3, %v434_v62, %v738_v47  ;;  %v1454_v9 = vrot.slane %v1452_v2, 4  ;;  %737 = vst [vmem:[#allocation2 + $0x1c] sm:$0xf] %v433_v4  ;;  %v612_v16 = vrot.slane %v608_v7, 4 }
  0x2e   : > { %4547 = vmatmul.mubr.bf16.vlgmr.msra.gmra.mrb[0].mxu0 %v6755_v30  ;;  %v7064_v8 = vrot.slane %v1448_v1, 5  ;;  %740 = vst [vmem:[#allocation2 + $0x20] sm:$0x1] %v739_v6  ;;  %v1102_v12 = vld [vmem:[#allocation2 + $0xc] sm:$0xf]  ;;  %v1192_v14 = vrot.slane %v1191_v63, 4 }
  0x2f   : > { %6419 = vmatpush3.bf16.msra.mxu0 %v6761_v32  ;;  %v1175_v20 = vshrl.u32 %v1102_v12, 16  ;;  %v1178_v21 = vshll.u32 %v1102_v12, 16  ;;  %v616_v22 = vrot.slane %v614_v11, 7  ;;  %v6758_v50 = vld [vmem:[#allocation2 + $0xc] sm:$0xff]   ;;  %v274_v4 = vld [vmem:[%s6951_s20 + $0x20] sm:$0xff] }
  0x30   : > { %v1104_v19 = vld [vmem:[#allocation2 + $0x14] sm:$0x1]  ;;  %v1455_v25 = vor.u32 %v1454_v9, %v7064_v8  ;;  %6420 = vmatprep.subr.bf16.mxu0 %v6769_v23  ;;  %v6039_v7 = vpack.c.bf16 %v274_v4, %v274_v4  ;;  %v6762_v12 = vld [vmem:[%s8590_s1 + $0xc8] sm:$0xff]  }
  0x31   : > { %v1194_v24 = vshll.u32 %v1104_v19, 16  ;;  %v1177_v29 = vrot.slane %v1175_v20, 4  ;;  %v1180_v30 = vrot.slane %v1178_v21, 5  ;;  %v621_v31 = vrot.slane %v616_v22, 4  ;;  %v1137_v36 = vld [vmem:[#allocation2 + $0x98] sm:$0x1] }
  0x32   : > { %v619_v34 = vor.u32 %v617_v27, %v616_v22  ;;  %v1456_v41 = vrot.slane %v1455_v25, 4  ;;  %v1458_v26 = vshll.u32 %v1137_v36, 16  ;;  %v852_v42 = vld [vmem:[#allocation2 + $0x18] sm:$0x1]  ;;  %v296_v20 = vld [vmem:[%s6951_s20 + $0xd0] sm:$0xff] }
  0x33   : > { %v1196_v32 = vrot.slane %v1194_v24, 5  ;;  %v1181_v35 = vor.u32 %v1180_v30, %v1177_v29  ;;  %v816_v39 = vsel %vm6958_vm3, %v621_v31, %v815_v17  ;;  %v853_v51 = vsel %vm6958_vm3, 0, %v852_v42  ;;  %v885_v63 = vld [vmem:[#allocation2 + $0x9c] sm:$0x1]  ;;  %6421 = vmatpush3.bf16.msra.mxu0 %v6771_v3  ;;  %v6763_v30 = vld [vmem:[%s8590_s1 + $0x88] sm:$0xff]   ;;  %v6764_v42 = vld [vmem:[%s8590_s1 + $0xd0] sm:$0xff]  }
  0x34   : > { %v1135_v33 = vld [vmem:[#allocation2 + $0x90] sm:$0xf]  ;;  %v620_v44 = vsel %vm7004_vm10, %v612_v16, %v619_v34  ;;  %817 = vst [vmem:[#allocation2 + $0xa4] sm:$0x1] %v816_v39  ;;  %v1106_v52 = vld [vmem:[#allocation2 + $0x1c] sm:$0xf] }
  0x35   : > { %v1439_v37 = vshrl.u32 %v1135_v33, 16  ;;  %v1442_v38 = vshll.u32 %v1135_v33, 16  ;;  %v1197_v40 = vsel %vm7022_vm11, %v1192_v14, %v1196_v32  ;;  %v907_v43 = vld [vmem:[#allocation2 + $0x20] sm:$0x1]  ;;  %v1182_v46 = vrot.slane %v1181_v35, 4  ;;  %v6759_v11 = vld [vmem:[#allocation2 + $0x90] sm:$0xff]  }
  0x36   : > { %814 = vst [vmem:[#allocation2 + $0xa0] sm:$0xf] %v620_v44  ;;  %v1460_v54 = vrot.slane %v1458_v26, 5  ;;  %854 = vst [vmem:[#allocation2 + $0x18] sm:$0x1] %v853_v51  ;;  %v908_v55 = vsel %vm6969_vm4, 0, %v907_v43  ;;  %v6061_v43 = vpack.c.bf16 %v296_v20, %v296_v20 }
  0x37   : > { %v1441_v47 = vrot.slane %v1439_v37, 4  ;;  %v1444_v49 = vrot.slane %v1442_v38, 5  ;;  %v1208_v56 = vshll.u32 %v1106_v52, 16  ;;  %v1212_v57 = vshrl.u32 %v1106_v52, 16  ;;  %909 = vst [vmem:[#allocation2 + $0x20] sm:$0x1] %v908_v55 }
  0x38   : > { %v1187_v58 = vsel %vm7022_vm11, %v1182_v46, %v7051_v53  ;;  %v1461_v1 = vsel %vm7022_vm11, %v1456_v41, %v1460_v54  ;;  %v886_v2 = vsel %vm6958_vm3, 0, %v885_v63  ;;  %v275_v53 = vld [vmem:[%s6951_s20 + $0x28] sm:$0xff]  ;;  %v297_v21 = vld [vmem:[%s6951_s20 + $0xd8] sm:$0xff]  ;;  %v436_v29 = vshrl.u32 %v6039_v7, 16  ;;  %v741_v39 = vld [vmem:[#allocation2 + $0x24] sm:$0xf] }
  0x39   : > { %v1445_v59 = vor.u32 %v1444_v49, %v1441_v47  ;;  %v5752_v60 = vcombine.low %v1187_v58, %v1197_v40  ;;  %v7087_v61 = vrot.slane %v1208_v56, 5  ;;  %v1214_v62 = vrot.slane %v1212_v57, 4  ;;  %887 = vst [vmem:[#allocation2 + $0x9c] sm:$0x1] %v886_v2  ;;  %v745_v52 = vld [vmem:[#allocation2 + $0x2c] sm:$0x1] }
  0x3a   : > { %v6040_v19 = vpack.c.bf16 %v275_v53, %v275_v53  ;;  %v439_v34 = vshll.u32 %v6039_v7, 16  ;;  %v438_v37 = vrot.slane %v436_v29, 7  ;;  %v7121_v44 = vpack.c.bf16 %v297_v21, %v297_v21  ;;  %v6768_v56 = vld [vmem:[%s8590_s1 + $0xd8] sm:$0xff]  }
  0x3b   : > { %v1446_v0 = vrot.slane %v1445_v59, 4  ;;  %4554 = vmatprep.mubr.bf16.mxu0 %v5752_v60  ;;  %v1215_v6 = vor.u32 %v1214_v62, %v7087_v61  ;;  %v940_v14 = vld [vmem:[#allocation2 + $0xa4] sm:$0x1]  ;;  %v623_v53 = vshrl.u32 %v6061_v43, 16  ;;  %v6770_v7 = vld [vmem:[%s8590_s1 + $0x98] sm:$0xff]  }
  0x3c   : > { %4555 = vmatmul.mubr.bf16.gmra.mrb[4].mxu0 %v6758_v50  ;;  %v941_v16 = vsel %vm6969_vm4, 0, %v940_v14  ;;  %v444_v38 = vshrl.u32 %v6040_v19, 16  ;;  %v6767_v50 = vld [vmem:[%s8590_s1 + $0x90] sm:$0xff]   ;;  %v441_v51 = vor.u32 %v439_v34, %v438_v37  ;;  %v442_v57 = vrot.slane %v438_v37, 4  ;;  %v299_v37 = vld [vmem:[%s6951_s20 + $0xe8] sm:$0xff] }
  0x3d   : > { %v1451_v9 = vsel %vm7022_vm11, %v1446_v0, %v7064_v8  ;;  %v1139_v17 = vld [vmem:[#allocation2 + $0xa0] sm:$0xf]  ;;  %v1105_v22 = vld [vmem:[#allocation2 + $0x18] sm:$0xf]  ;;  %942 = vst [vmem:[#allocation2 + $0xa4] sm:$0x1] %v941_v16 }
  0x3e   : > { %v5763_v15 = vcombine.low %v1451_v9, %v1461_v1  ;;  %v1472_v23 = vshll.u32 %v1139_v17, 16  ;;  %v1476_v8 = vshrl.u32 %v1139_v17, 16  ;;  %v1107_v24 = vld [vmem:[#allocation2 + $0x20] sm:$0x1]  ;;  %v1199_v25 = vshrl.u32 %v1105_v22, 16  ;;  %v6765_v2 = vld [vmem:[#allocation2 + $0x18] sm:$0xff]  }
  0x3f   : > { %v1202_v27 = vshll.u32 %v1105_v22, 16  ;;  %v1216_v28 = vrot.slane %v1215_v6, 4  ;;  %v1218_v31 = vshll.u32 %v1107_v24, 16  ;;  %v446_v58 = vrot.slane %v444_v38, 7  ;;  %v818_v22 = vld [vmem:[#allocation2 + $0xa8] sm:$0xf] }
  0x40   : > { %4642 = vmatprep.mubr.bf16.mxu1 %v5763_v15  ;;  %v7115_v32 = vrot.slane %v1472_v23, 5  ;;  %v1478_v33 = vrot.slane %v1476_v8, 4  ;;  %v1201_v35 = vrot.slane %v1199_v25, 4  ;;  %v1138_v41 = vld [vmem:[#allocation2 + $0x9c] sm:$0xf]  ;;  %v447_v0 = vshll.u32 %v6040_v19, 16 }
  0x41   : > { %4643 = vmatmul.mubr.bf16.vlgmr.msra.gmra.mrb[0].mxu1 %v6759_v11  ;;  %v1204_v36 = vrot.slane %v1202_v27, 5  ;;  %v1220_v40 = vrot.slane %v1218_v31, 5  ;;  %v1463_v47 = vshrl.u32 %v1138_v41, 16  ;;  %v1466_v49 = vshll.u32 %v1138_v41, 16  ;;  %v277_v23 = vld [vmem:[%s6951_s20 + $0x38] sm:$0xff] }
  0x42   : > { %6307 = vmatpush3.bf16.msra.mxu1 %v6760_v5  ;;  %v1479_v26 = vor.u32 %v1478_v33, %v7115_v32  ;;  %v451_v3 = vrot.slane %v446_v58, 4  ;;  %v742_v4 = vsel %vm6995_vm9, %v441_v51, %v741_v39  ;;  %v449_v9 = vor.u32 %v447_v0, %v446_v58  ;;  %v822_v27 = vld [vmem:[#allocation2 + $0xb0] sm:$0x1]  ;;  %v6766_v33 = vld [vmem:[#allocation2 + $0x9c] sm:$0xff]  }
  0x43   : > { %6308 = vmatprep.subr.bf16.mxu1 %v6762_v12  ;;  %v1205_v46 = vor.u32 %v1204_v36, %v1201_v35  ;;  %v1221_v54 = vsel %vm7022_vm11, %v1216_v28, %v1220_v40  ;;  %v1465_v62 = vrot.slane %v1463_v47, 4  ;;  %v1468_v63 = vrot.slane %v1466_v49, 5  ;;  %743 = vst [vmem:[#allocation2 + $0x24] sm:$0xf] %v742_v4  ;;  %v276_v12 = vld [vmem:[%s6951_s20 + $0x30] sm:$0xff]  ;;  %v6772_v28 = vld [vmem:[%s8590_s1 + $0xe0] sm:$0xff]  }
  0x44   : > { %v1480_v55 = vrot.slane %v1479_v26, 4  ;;  %v1140_v60 = vld [vmem:[#allocation2 + $0xa4] sm:$0x1]  ;;  %v626_v11 = vshll.u32 %v6061_v43, 16  ;;  %v746_v16 = vsel %vm6958_vm3, %v451_v3, %v745_v52  ;;  %v625_v17 = vrot.slane %v623_v53, 7  ;;  %v6779_v47 = vld [vmem:[%s8590_s1 + $0x150] sm:$0xff]  }
  0x45   : > { %v1206_v59 = vrot.slane %v1205_v46, 4  ;;  %v1482_v1 = vshll.u32 %v1140_v60, 16  ;;  %v1469_v6 = vor.u32 %v1468_v63, %v1465_v62  ;;  %747 = vst [vmem:[#allocation2 + $0x2c] sm:$0x1] %v746_v16  ;;  %v631_v20 = vshrl.u32 %v7121_v44, 16  ;;  %v6775_v35 = vld [vmem:[%s8590_s1 + $0xa0] sm:$0xff]   ;;  %6422 = vmatprep.subr.bf16.mxu0 %v6779_v47 }
  0x46   : > { %6309 = vmatpush3.bf16.msra.mxu1 %v6763_v30  ;;  %v634_v21 = vshll.u32 %v7121_v44, 16  ;;  %v628_v24 = vor.u32 %v626_v11, %v625_v17  ;;  %v629_v25 = vrot.slane %v625_v17, 4  ;;  %v6041_v29 = vpack.c.bf16 %v276_v12, %v276_v12  ;;  %v298_v30 = vld [vmem:[%s6951_s20 + $0xe0] sm:$0xff]  ;;  %v748_v46 = vld [vmem:[#allocation2 + $0x30] sm:$0xf]  ;;  %v6777_v60 = vld [vmem:[%s8590_s1 + $0xa8] sm:$0xff]  }
  0x47   : > { %6310 = vmatprep.subr.bf16.mxu1 %v6764_v42  ;;  %v1211_v5 = vsel %vm7022_vm11, %v1206_v59, %v7087_v61  ;;  %v1484_v15 = vrot.slane %v1482_v1, 5  ;;  %v1470_v19 = vrot.slane %v1469_v6, 4  ;;  %v450_v61 = vsel %vm7004_vm10, %v442_v57, %v449_v9  ;;  %v752_v52 = vld [vmem:[#allocation2 + $0x38] sm:$0x1]  ;;  %v825_v63 = vld [vmem:[#allocation2 + $0xb4] sm:$0xf] }
  0x48   : > { %v5753_v14 = vcombine.low %v1211_v5, %v1221_v54  ;;  %744 = vst [vmem:[#allocation2 + $0x28] sm:$0xf] %v450_v61  ;;  %v633_v34 = vrot.slane %v631_v20, 7  ;;  %v6042_v36 = vpack.c.bf16 %v277_v23, %v277_v23  ;;  %v6063_v38 = vpack.c.bf16 %v298_v30, %v298_v30  ;;  %v6778_v53 = vld [vmem:[%s8590_s1 + $0xf0] sm:$0xff]   ;;  %v829_v17 = vld [vmem:[#allocation2 + $0xbc] sm:$0x1] }
  0x49   : > { %v1485_v8 = vsel %vm7022_vm11, %v1480_v55, %v1484_v15  ;;  %v1475_v31 = vsel %vm7022_vm11, %v1470_v19, %v7115_v32  ;;  %v819_v40 = vsel %vm6995_vm9, %v628_v24, %v818_v22  ;;  %v453_v41 = vshrl.u32 %v6041_v29, 16  ;;  %v6783_v5 = vld [vmem:[%s8590_s1 + $0x110] sm:$0xff]  }
  0x4a   : > { %6311 = vmatpush3.bf16.msra.mxu1 %v6767_v50  ;;  %4562 = vmatprep.mubr.bf16.mxu0 %v5753_v14  ;;  %v5764_v39 = vcombine.low %v1475_v31, %v1485_v8  ;;  %v456_v26 = vshll.u32 %v6041_v29, 16  ;;  %v636_v42 = vor.u32 %v634_v21, %v633_v34  ;;  %v638_v43 = vrot.slane %v633_v34, 4  ;;  %820 = vst [vmem:[#allocation2 + $0xa8] sm:$0xf] %v819_v40  ;;  %v855_v49 = vld [vmem:[#allocation2 + $0x24] sm:$0x1] }
  0x4b   : > { %6312 = vmatprep.subr.bf16.mxu1 %v6768_v56  ;;  %4563 = vmatmul.mubr.bf16.gmra.mrb[8].mxu0 %v6765_v2  ;;  %v461_v32 = vshrl.u32 %v6042_v36, 16  ;;  %v464_v44 = vshll.u32 %v6042_v36, 16  ;;  %v6776_v50 = vld [vmem:[%s8590_s1 + $0xe8] sm:$0xff]   ;;  %v455_v51 = vrot.slane %v453_v41, 7  ;;  %v6064_v54 = vpack.c.bf16 %v299_v37, %v299_v37  ;;  %v6785_v41 = vld [vmem:[%s8590_s1 + $0xb8] sm:$0xff]  }
  0x4c   : > { %4650 = vmatprep.mubr.bf16.mxu1 %v5764_v39  ;;  %v640_v55 = vshrl.u32 %v6063_v38, 16  ;;  %v643_v56 = vshll.u32 %v6063_v38, 16  ;;  %v856_v57 = vsel %vm6958_vm3, 0, %v855_v49  ;;  %v637_v58 = vsel %vm7004_vm10, %v629_v25, %v636_v42  ;;  %v910_v0 = vld [vmem:[#allocation2 + $0x2c] sm:$0x1]  ;;  %6423 = vmatpush3.bf16.msra.mxu0 %v6783_v5 }
  0x4d   : > { %4651 = vmatmul.mubr.bf16.gmra.mrb[4].mxu1 %v6766_v33  ;;  %v823_v59 = vsel %vm6958_vm3, %v638_v43, %v822_v27  ;;  %v463_v62 = vrot.slane %v461_v32, 7  ;;  %857 = vst [vmem:[#allocation2 + $0x24] sm:$0x1] %v856_v57  ;;  %821 = vst [vmem:[#allocation2 + $0xac] sm:$0xf] %v637_v58  ;;  %v458_v1 = vor.u32 %v456_v26, %v455_v51  ;;  %v459_v2 = vrot.slane %v455_v51, 4 }
  0x4e   : > { %6313 = vmatpush3.bf16.msra.mxu1 %v6770_v7  ;;  %824 = vst [vmem:[#allocation2 + $0xb0] sm:$0x1] %v823_v59  ;;  %v642_v3 = vrot.slane %v640_v55, 7  ;;  %v648_v4 = vshrl.u32 %v6064_v54, 16  ;;  %v911_v6 = vsel %vm6969_vm4, 0, %v910_v0  ;;  %v651_v24 = vshll.u32 %v6064_v54, 16 }
  0x4f   : > { %6314 = vmatprep.subr.bf16.mxu1 %v6772_v28  ;;  %v1109_v7 = vld [vmem:[#allocation2 + $0x28] sm:$0xf]  ;;  %v466_v9 = vor.u32 %v464_v44, %v463_v62  ;;  %v468_v11 = vrot.slane %v463_v62, 4  ;;  %912 = vst [vmem:[#allocation2 + $0x2c] sm:$0x1] %v911_v6  ;;  %v749_v15 = vsel %vm6995_vm9, %v458_v1, %v748_v46  ;;  %v6782_v27 = vld [vmem:[%s8590_s1 + $0xb0] sm:$0xff]  }
  0x50   : > { %v1232_v12 = vshll.u32 %v1109_v7, 16  ;;  %v1236_v14 = vshrl.u32 %v1109_v7, 16  ;;  %v645_v16 = vor.u32 %v643_v56, %v642_v3  ;;  %750 = vst [vmem:[#allocation2 + $0x30] sm:$0xf] %v749_v15  ;;  %v646_v20 = vrot.slane %v642_v3, 4  ;;  %v6784_v33 = vld [vmem:[%s8590_s1 + $0xf8] sm:$0xff]  }
  0x51   : > { %v467_v19 = vsel %vm7004_vm10, %v459_v2, %v466_v9  ;;  %v753_v61 = vsel %vm6958_vm3, %v468_v11, %v752_v52  ;;  %v650_v21 = vrot.slane %v648_v4, 7  ;;  %v888_v8 = vld [vmem:[#allocation2 + $0xa8] sm:$0x1]  ;;  %v278_v46 = vld [vmem:[%s6951_s20 + $0x40] sm:$0xff] }
  0x52   : > { %6315 = vmatpush3.bf16.msra.mxu1 %v6775_v35  ;;  %v7191_v22 = vrot.slane %v1232_v12, 5  ;;  %v1238_v23 = vrot.slane %v1236_v14, 4  ;;  %751 = vst [vmem:[#allocation2 + $0x34] sm:$0xf] %v467_v19  ;;  %754 = vst [vmem:[#allocation2 + $0x38] sm:$0x1] %v753_v61  ;;  %v826_v25 = vsel %vm6995_vm9, %v645_v16, %v825_v63  ;;  %v7225_v3 = vpack.c.bf16 %v278_v46, %v278_v46 }
  0x53   : > { %6316 = vmatprep.subr.bf16.mxu1 %v6776_v50  ;;  %v889_v28 = vsel %vm6958_vm3, 0, %v888_v8  ;;  %v655_v29 = vrot.slane %v650_v21, 4  ;;  %827 = vst [vmem:[#allocation2 + $0xb4] sm:$0xf] %v826_v25  ;;  %v653_v31 = vor.u32 %v651_v24, %v650_v21  ;;  %v279_v51 = vld [vmem:[%s6951_s20 + $0x48] sm:$0xff]  ;;  %v6787_v63 = vld [vmem:[%s8590_s1 + $0x1c0] sm:$0xff]  }
  0x54   : > { %v1239_v30 = vor.u32 %v1238_v23, %v7191_v22  ;;  %890 = vst [vmem:[#allocation2 + $0xa8] sm:$0x1] %v889_v28  ;;  %v1108_v34 = vld [vmem:[#allocation2 + $0x24] sm:$0xf]  ;;  %v1142_v36 = vld [vmem:[#allocation2 + $0xac] sm:$0xf]  ;;  %v7227_v4 = vpack.c.bf16 %v279_v51, %v279_v51 }
  0x55   : > { %v943_v35 = vld [vmem:[#allocation2 + $0xb0] sm:$0x1]  ;;  %v830_v37 = vsel %vm6958_vm3, %v655_v29, %v829_v17  ;;  %v1223_v38 = vshrl.u32 %v1108_v34, 16  ;;  %v1226_v39 = vshll.u32 %v1108_v34, 16  ;;  %v1496_v43 = vshll.u32 %v1142_v36, 16  ;;  %v6773_v9 = vld [vmem:[#allocation2 + $0x24] sm:$0xff]  }
  0x56   : > { %6317 = vmatpush3.bf16.msra.mxu1 %v6777_v60  ;;  %v944_v40 = vsel %vm6969_vm4, 0, %v943_v35  ;;  %831 = vst [vmem:[#allocation2 + $0xbc] sm:$0x1] %v830_v37  ;;  %v1110_v26 = vld [vmem:[#allocation2 + $0x2c] sm:$0x1]  ;;  %v1240_v42 = vrot.slane %v1239_v30, 4  ;;  %v654_v44 = vsel %vm7004_vm10, %v646_v20, %v653_v31 }
  0x57   : > { %6318 = vmatprep.subr.bf16.mxu1 %v6778_v53  ;;  %945 = vst [vmem:[#allocation2 + $0xb0] sm:$0x1] %v944_v40  ;;  %v1500_v32 = vshrl.u32 %v1142_v36, 16  ;;  %v1225_v47 = vrot.slane %v1223_v38, 4  ;;  %v1228_v49 = vrot.slane %v1226_v39, 5  ;;  %v1242_v50 = vshll.u32 %v1110_v26, 16 }
  0x58   : > { %828 = vst [vmem:[#allocation2 + $0xb8] sm:$0xf] %v654_v44  ;;  %v7215_v52 = vrot.slane %v1496_v43, 5  ;;  %v858_v55 = vld [vmem:[#allocation2 + $0x30] sm:$0x1]  ;;  %v6790_v8 = vld [vmem:[%s8590_s1 + $0x158] sm:$0xff]  }
  0x59   : > { %v1502_v54 = vrot.slane %v1500_v32, 4  ;;  %v913_v56 = vld [vmem:[#allocation2 + $0x38] sm:$0x1]  ;;  %v1229_v57 = vor.u32 %v1228_v49, %v1225_v47  ;;  %v1244_v58 = vrot.slane %v1242_v50, 5  ;;  %v859_v59 = vsel %vm6958_vm3, 0, %v858_v55  ;;  %6424 = vmatprep.subr.bf16.mxu0 %v6790_v8  ;;  %v280_v38 = vld [vmem:[%s6951_s20 + $0x50] sm:$0xff] }
  0x5a   : > { %6319 = vmatpush3.bf16.msra.mxu1 %v6782_v27  ;;  %v914_v60 = vsel %vm6969_vm4, 0, %v913_v56  ;;  %v1112_v62 = vld [vmem:[#allocation2 + $0x34] sm:$0xf]  ;;  %860 = vst [vmem:[#allocation2 + $0x30] sm:$0x1] %v859_v59  ;;  %v470_v31 = vshrl.u32 %v7225_v3, 16  ;;  %v7258_v59 = vpack.c.bf16 %v280_v38, %v280_v38 }
  0x5b   : > { %6320 = vmatprep.subr.bf16.mxu1 %v6784_v33  ;;  %v1141_v0 = vld [vmem:[#allocation2 + $0xa8] sm:$0xf]  ;;  %v1503_v1 = vor.u32 %v1502_v54, %v7215_v52  ;;  %915 = vst [vmem:[#allocation2 + $0x38] sm:$0x1] %v914_v60  ;;  %v1256_v2 = vshll.u32 %v1112_v62, 16  ;;  %v1230_v53 = vrot.slane %v1229_v57, 4  ;;  %v1245_v5 = vsel %vm7022_vm11, %v1240_v42, %v1244_v58 }
  0x5c   : > { %v1487_v6 = vshrl.u32 %v1141_v0, 16  ;;  %v1490_v7 = vshll.u32 %v1141_v0, 16  ;;  %v891_v11 = vld [vmem:[#allocation2 + $0xb4] sm:$0x1]  ;;  %v1260_v15 = vshrl.u32 %v1112_v62, 16  ;;  %v6791_v33 = vld [vmem:[%s8590_s1 + $0x118] sm:$0xff]  }
  0x5d   : > { %v1504_v12 = vrot.slane %v1503_v1, 4  ;;  %v7231_v14 = vrot.slane %v1256_v2, 5  ;;  %v892_v16 = vsel %vm6958_vm3, 0, %v891_v11  ;;  %v946_v17 = vld [vmem:[#allocation2 + $0xbc] sm:$0x1]  ;;  %v1235_v19 = vsel %vm7022_vm11, %v1230_v53, %v7191_v22  ;;  %6425 = vmatpush3.bf16.msra.mxu0 %v6791_v33  ;;  %v6774_v47 = vld [vmem:[#allocation2 + $0xa8] sm:$0xff]  }
  0x5e   : > { %6321 = vmatpush3.bf16.msra.mxu1 %v6785_v41  ;;  %v1143_v61 = vld [vmem:[#allocation2 + $0xb0] sm:$0x1]  ;;  %v1489_v20 = vrot.slane %v1487_v6, 4  ;;  %v1492_v21 = vrot.slane %v1490_v7, 5  ;;  %893 = vst [vmem:[#allocation2 + $0xb4] sm:$0x1] %v892_v16  ;;  %v5754_v24 = vcombine.low %v1235_v19, %v1245_v5 }
  0x5f   : > { %6530 = vmatprep.subr.bf16.mxu1 %v6787_v63  ;;  %v947_v23 = vsel %vm6969_vm4, 0, %v946_v17  ;;  %v1506_v25 = vshll.u32 %v1143_v61, 16  ;;  %v1262_v27 = vrot.slane %v1260_v15, 4  ;;  %v1145_v28 = vld [vmem:[#allocation2 + $0xb8] sm:$0xf]  ;;  %v473_v36 = vshll.u32 %v7225_v3, 16 }
  0x60   : > { %948 = vst [vmem:[#allocation2 + $0xbc] sm:$0x1] %v947_v23  ;;  %v1493_v29 = vor.u32 %v1492_v21, %v1489_v20  ;;  %v1520_v30 = vshll.u32 %v1145_v28, 16  ;;  %v1524_v22 = vshrl.u32 %v1145_v28, 16  ;;  %4570 = vmatprep.mubr.bf16.mxu0 %v5754_v24  ;;  %v478_v37 = vshrl.u32 %v7227_v4, 16  ;;  %v281_v2 = vld [vmem:[%s6951_s20 + $0x58] sm:$0xff] }
  0x61   : > { %v1508_v34 = vrot.slane %v1506_v25, 5  ;;  %v1263_v35 = vor.u32 %v1262_v27, %v7231_v14  ;;  %4571 = vmatmul.mubr.bf16.gmra.mrb[12].mxu0 %v6773_v9  ;;  %v1111_v40 = vld [vmem:[#allocation2 + $0x30] sm:$0xf]  ;;  %v472_v51 = vrot.slane %v470_v31, 7  ;;  %v755_v58 = vld [vmem:[#allocation2 + $0x3c] sm:$0xf]  ;;  %v6046_v24 = vpack.c.bf16 %v281_v2, %v281_v2 }
  0x62   : > { %v1494_v39 = vrot.slane %v1493_v29, 4  ;;  %v1113_v41 = vld [vmem:[#allocation2 + $0x38] sm:$0x1]  ;;  %v7251_v26 = vrot.slane %v1520_v30, 5  ;;  %v1247_v43 = vshrl.u32 %v1111_v40, 16  ;;  %v1250_v32 = vshll.u32 %v1111_v40, 16 }
  0x63   : > { %v1509_v42 = vsel %vm7022_vm11, %v1504_v12, %v1508_v34  ;;  %v1264_v44 = vrot.slane %v1263_v35, 4  ;;  %v1266_v49 = vshll.u32 %v1113_v41, 16  ;;  %v1526_v50 = vrot.slane %v1524_v22, 4  ;;  %v759_v12 = vld [vmem:[#allocation2 + $0x44] sm:$0x1]  ;;  %v6780_v28 = vld [vmem:[#allocation2 + $0x30] sm:$0xff]  }
  0x64   : > { %v1499_v46 = vsel %vm7022_vm11, %v1494_v39, %v7215_v52  ;;  %v1249_v55 = vrot.slane %v1247_v43, 4  ;;  %v1252_v56 = vrot.slane %v1250_v32, 5  ;;  %v475_v53 = vor.u32 %v473_v36, %v472_v51  ;;  %v1614_v21 = vld [vmem:[#allocation2] sm:$0xe]  ;;  %v1615_v23 = vld [vmem:[#allocation2 + $0x4] sm:$0xf] }
  0x65   : > { %v5765_v54 = vcombine.low %v1499_v46, %v1509_v42  ;;  %v1144_v57 = vld [vmem:[#allocation2 + $0xb4] sm:$0xf]  ;;  %v1268_v60 = vrot.slane %v1266_v49, 5  ;;  %v1527_v1 = vor.u32 %v1526_v50, %v7251_v26  ;;  %v476_v5 = vrot.slane %v472_v51, 4  ;;  %v1616_v8 = vld [vmem:[#allocation2 + $0x8] sm:$0x1] }
  0x66   : > { %v1511_v63 = vshrl.u32 %v1144_v57, 16  ;;  %v1514_v0 = vshll.u32 %v1144_v57, 16  ;;  %v1253_v52 = vor.u32 %v1252_v56, %v1249_v55  ;;  %v480_v17 = vrot.slane %v478_v37, 7  ;;  %v282_v34 = vld [vmem:[%s6951_s20 + $0x60] sm:$0xff]  ;;  %v6781_v40 = vld [vmem:[#allocation2 + $0xb4] sm:$0xff]   ;;  %v283_v43 = vld [vmem:[%s6951_s20 + $0x68] sm:$0xff] }
  0x67   : > { %v1146_v62 = vld [vmem:[#allocation2 + $0xbc] sm:$0x1]  ;;  %4658 = vmatprep.mubr.bf16.mxu1 %v5765_v54  ;;  %v1269_v6 = vsel %vm7022_vm11, %v1264_v44, %v1268_v60  ;;  %v1528_v11 = vrot.slane %v1527_v1, 4  ;;  %v481_v19 = vshll.u32 %v7227_v4, 16  ;;  %v756_v20 = vsel %vm6995_vm9, %v475_v53, %v755_v58  ;;  %v6786_v44 = vld [vmem:[#allocation2 + $0xc] sm:$0xff]  }
  0x68   : > { %v1530_v3 = vshll.u32 %v1146_v62, 16  ;;  %4659 = vmatmul.mubr.bf16.gmra.mrb[8].mxu1 %v6774_v47  ;;  %v1513_v7 = vrot.slane %v1511_v63, 4  ;;  %v1516_v9 = vrot.slane %v1514_v0, 5  ;;  %v1254_v15 = vrot.slane %v1253_v52, 4  ;;  %757 = vst [vmem:[#allocation2 + $0x3c] sm:$0xf] %v756_v20 }
  0x69   : > { %v483_v29 = vor.u32 %v481_v19, %v480_v17  ;;  %v485_v30 = vrot.slane %v480_v17, 4  ;;  %v5767_v31 = vrot.slane %v1614_v21, 9  ;;  %v1715_v33 = vrot.slane %v1615_v23, 5  ;;  %v762_v50 = vld [vmem:[#allocation2 + $0x48] sm:$0xf]  ;;  %v6789_v20 = vld [vmem:[%s8590_s1 + $0x180] sm:$0xff]  }
  0x6a   : > { %v1532_v16 = vrot.slane %v1530_v3, 5  ;;  %v1517_v61 = vor.u32 %v1516_v9, %v1513_v7  ;;  %v1259_v25 = vsel %vm7022_vm11, %v1254_v15, %v7231_v14  ;;  %v1718_v37 = vrot.slane %v1616_v8, 5  ;;  %v766_v54 = vld [vmem:[#allocation2 + $0x50] sm:$0x1]  ;;  %v1617_v55 = vld [vmem:[#allocation2 + $0xc] sm:$0xe] }
  0x6b   : > { %v5755_v4 = vcombine.low %v1259_v25, %v1269_v6  ;;  %v484_v35 = vsel %vm7004_vm10, %v476_v5, %v483_v29  ;;  %v760_v36 = vsel %vm6958_vm3, %v485_v30, %v759_v12  ;;  %v487_v38 = vshrl.u32 %v7258_v59, 16  ;;  %v1618_v60 = vld [vmem:[#allocation2 + $0x10] sm:$0xf]  ;;  %v1619_v62 = vld [vmem:[#allocation2 + $0x14] sm:$0x1]  ;;  %v6792_v8 = vld [vmem:[#allocation2 + $0x18] sm:$0xff]  }
  0x6c   : > { %v1533_v27 = vsel %vm7022_vm11, %v1528_v11, %v1532_v16  ;;  %v1518_v22 = vrot.slane %v1517_v61, 4  ;;  %758 = vst [vmem:[#allocation2 + $0x40] sm:$0xf] %v484_v35  ;;  %761 = vst [vmem:[#allocation2 + $0x44] sm:$0x1] %v760_v36  ;;  %v1717_v41 = vrot.slane %v1715_v33, 4  ;;  %v1716_v51 = vsel %vm7279_vm14, %v5767_v31, %v1715_v33 }
  0x6d   : > { %4578 = vmatprep.mubr.bf16.mxu0 %v5755_v4  ;;  %v490_v42 = vshll.u32 %v7258_v59, 16  ;;  %v489_v46 = vrot.slane %v487_v38, 7  ;;  %v495_v47 = vshrl.u32 %v6046_v24, 16  ;;  %v498_v49 = vshll.u32 %v6046_v24, 16  ;;  %v769_v15 = vld [vmem:[#allocation2 + $0x54] sm:$0xf] }
  0x6e   : > { %v1523_v39 = vsel %vm7022_vm11, %v1518_v22, %v7251_v26  ;;  %4579 = vmatmul.mubr.bf16.gmra.mrb[16].mxu0 %v6780_v28  ;;  %v1719_v26 = vsel %vm7279_vm14, %v1717_v41, %v1718_v37  ;;  %v6047_v56 = vpack.c.bf16 %v282_v34, %v282_v34  ;;  %v6048_v63 = vpack.c.bf16 %v283_v43, %v283_v43  ;;  %v6795_v16 = vld [vmem:[%s8590_s1 + $0x160] sm:$0xff]   ;;  %v6796_v29 = vld [vmem:[%s8590_s1 + $0x1c8] sm:$0xff]   ;;  %v773_v36 = vld [vmem:[#allocation2 + $0x5c] sm:$0x1] }
  0x6f   : > { %v5766_v32 = vcombine.low %v1523_v39, %v1533_v27  ;;  %v492_v57 = vor.u32 %v490_v42, %v489_v46  ;;  %v493_v58 = vrot.slane %v489_v46, 4  ;;  %v497_v59 = vrot.slane %v495_v47, 7  ;;  %v861_v0 = vld [vmem:[#allocation2 + $0x3c] sm:$0x1]  ;;  %6426 = vmatprep.subr.bf16.mxu0 %v6795_v16  ;;  %v6798_v37 = vld [vmem:[%s8590_s1 + $0x120] sm:$0xff]   ;;  %v6799_v41 = vld [vmem:[%s8590_s1 + $0x188] sm:$0xff]  }
  0x70   : > { %v5768_v1 = vrot.slane %v1617_v55, 9  ;;  %v1722_v2 = vrot.slane %v1618_v60, 5  ;;  %v1725_v52 = vrot.slane %v1619_v62, 5  ;;  %v504_v3 = vshrl.u32 %v6047_v56, 16  ;;  %6427 = vmatpush3.bf16.msra.mxu0 %v6798_v37  ;;  %v284_v46 = vld [vmem:[%s6951_s20 + $0x70] sm:$0xff] }
  0x71   : > { %4666 = vmatprep.mubr.bf16.mxu1 %v5766_v32  ;;  %v862_v53 = vsel %vm6958_vm3, 0, %v861_v0  ;;  %v500_v5 = vor.u32 %v498_v49, %v497_v59  ;;  %v502_v6 = vrot.slane %v497_v59, 4  ;;  %v763_v7 = vsel %vm6995_vm9, %v492_v57, %v762_v50  ;;  %v1621_v32 = vld [vmem:[#allocation2 + $0x1c] sm:$0xf] }
  0x72   : > { %4667 = vmatmul.mubr.bf16.gmra.mrb[12].mxu1 %v6781_v40  ;;  %863 = vst [vmem:[#allocation2 + $0x3c] sm:$0x1] %v862_v53  ;;  %764 = vst [vmem:[#allocation2 + $0x48] sm:$0xf] %v763_v7  ;;  %v1724_v9 = vrot.slane %v1722_v2, 4  ;;  %v506_v11 = vrot.slane %v504_v3, 7  ;;  %v5783_v61 = vcombine.low %v1716_v51, %v1719_v26  ;;  %v7311_v28 = vsel %vm7279_vm14, %v5768_v1, %v1722_v2 }
  0x73   : > { %4707 = vmatprep.mubr.bf16.mxu1 %v6786_v44  ;;  %v507_v12 = vshll.u32 %v6047_v56, 16  ;;  %v916_v17 = vld [vmem:[#allocation2 + $0x44] sm:$0x1]  ;;  %v1115_v19 = vld [vmem:[#allocation2 + $0x40] sm:$0xf]  ;;  %v501_v21 = vsel %vm7004_vm10, %v493_v58, %v500_v5  ;;  %v767_v23 = vsel %vm6958_vm3, %v502_v6, %v766_v54  ;;  %v512_v31 = vshrl.u32 %v6048_v63, 16 }
  0x74   : > { %v917_v24 = vsel %vm6969_vm4, 0, %v916_v17  ;;  %v1280_v25 = vshll.u32 %v1115_v19, 16  ;;  %v1284_v27 = vshrl.u32 %v1115_v19, 16  ;;  %765 = vst [vmem:[#allocation2 + $0x4c] sm:$0xf] %v501_v21  ;;  %v7318_v30 = vsel %vm7279_vm14, %v1724_v9, %v1725_v52  ;;  %v6794_v1 = vld [vmem:[#allocation2 + $0x24] sm:$0xff]  }
  0x75   : > { %768 = vst [vmem:[#allocation2 + $0x50] sm:$0x1] %v767_v23  ;;  %918 = vst [vmem:[#allocation2 + $0x44] sm:$0x1] %v917_v24  ;;  %v509_v4 = vor.u32 %v507_v12, %v506_v11  ;;  %v510_v22 = vrot.slane %v506_v11, 4  ;;  %v515_v35 = vshll.u32 %v6048_v63, 16  ;;  %v5784_v43 = vcombine.low %v7311_v28, %v7318_v30 }
  0x76   : > { %v7320_v33 = vrot.slane %v1280_v25, 5  ;;  %v1286_v34 = vrot.slane %v1284_v27, 4  ;;  %v514_v38 = vrot.slane %v512_v31, 7  ;;  %v1620_v40 = vld [vmem:[#allocation2 + $0x18] sm:$0xe]  ;;  %v6049_v26 = vpack.c.bf16 %v284_v46, %v284_v46 }
  0x77   : > { %v770_v39 = vsel %vm6995_vm9, %v509_v4, %v769_v15  ;;  %v1622_v44 = vld [vmem:[#allocation2 + $0x20] sm:$0x1]  ;;  %v5769_v51 = vrot.slane %v1620_v40, 9  ;;  %v1729_v58 = vrot.slane %v1621_v32, 5  ;;  %v285_v12 = vld [vmem:[%s6951_s20 + $0x78] sm:$0xff] }
  0x78   : > { %v1287_v42 = vor.u32 %v1286_v34, %v7320_v33  ;;  %771 = vst [vmem:[#allocation2 + $0x54] sm:$0xf] %v770_v39  ;;  %v517_v49 = vor.u32 %v515_v35, %v514_v38  ;;  %v519_v50 = vrot.slane %v514_v38, 4  ;;  %v1732_v2 = vrot.slane %v1622_v44, 5 }
  0x79   : > { %v1114_v47 = vld [vmem:[#allocation2 + $0x3c] sm:$0xf]  ;;  %v864_v57 = vld [vmem:[#allocation2 + $0x48] sm:$0x1]  ;;  %v1731_v11 = vrot.slane %v1729_v58, 4  ;;  %v6050_v17 = vpack.c.bf16 %v285_v12, %v285_v12  ;;  %v521_v19 = vshrl.u32 %v6049_v26, 16  ;;  %v1730_v24 = vsel %vm7279_vm14, %v5769_v51, %v1729_v58 }
  0x7a   : > { %4708 = vmatmul.mubr.bf16.vlgmr.msra.gmra.mrb[16].mxu1 %v5783_v61  ;;  %v1271_v54 = vshrl.u32 %v1114_v47, 16  ;;  %v1274_v55 = vshll.u32 %v1114_v47, 16  ;;  %v1288_v56 = vrot.slane %v1287_v42, 4  ;;  %v865_v59 = vsel %vm6958_vm3, 0, %v864_v57  ;;  %v6788_v28 = vld [vmem:[#allocation2 + $0x3c] sm:$0xff]  }
  0x7b   : > { %6531 = vmatpush3.bf16.msra.mxu1 %v6789_v20  ;;  %4715 = vmatprep.mubr.bf16.mxu1 %v6792_v8  ;;  %v1118_v62 = vld [vmem:[#allocation2 + $0x4c] sm:$0xf]  ;;  %v518_v63 = vsel %vm7004_vm10, %v510_v22, %v517_v49  ;;  %v774_v0 = vsel %vm6958_vm3, %v519_v50, %v773_v36  ;;  %866 = vst [vmem:[#allocation2 + $0x48] sm:$0x1] %v865_v59  ;;  %v523_v25 = vrot.slane %v521_v19, 7  ;;  %v524_v4 = vshll.u32 %v6049_v26, 16 }
  0x7c   : > { %6532 = vmatprep.subr.bf16.mxu1 %v6796_v29  ;;  %v919_v60 = vld [vmem:[#allocation2 + $0x50] sm:$0x1]  ;;  %v1116_v52 = vld [vmem:[#allocation2 + $0x44] sm:$0x1]  ;;  %v1273_v3 = vrot.slane %v1271_v54, 4  ;;  %v1276_v53 = vrot.slane %v1274_v55, 5  ;;  %v1733_v30 = vsel %vm7279_vm14, %v1731_v11, %v1732_v2 }
  0x7d   : > { %v920_v5 = vsel %vm6969_vm4, 0, %v919_v60  ;;  %v1304_v6 = vshll.u32 %v1118_v62, 16  ;;  %772 = vst [vmem:[#allocation2 + $0x58] sm:$0xf] %v518_v63  ;;  %775 = vst [vmem:[#allocation2 + $0x5c] sm:$0x1] %v774_v0  ;;  %v526_v39 = vor.u32 %v524_v4, %v523_v25  ;;  %v5785_v46 = vcombine.low %v1730_v24, %v1733_v30 }
  0x7e   : > { %v1290_v7 = vshll.u32 %v1116_v52, 16  ;;  %921 = vst [vmem:[#allocation2 + $0x50] sm:$0x1] %v920_v5  ;;  %v1308_v9 = vshrl.u32 %v1118_v62, 16  ;;  %v1277_v15 = vor.u32 %v1276_v53, %v1273_v3  ;;  %v776_v22 = vld [vmem:[#allocation2 + $0x60] sm:$0xf] }
  0x7f   : > { %6533 = vmatpush3.bf16.msra.mxu1 %v6799_v41  ;;  %v7343_v16 = vrot.slane %v1304_v6, 5  ;;  %v867_v21 = vld [vmem:[#allocation2 + $0x54] sm:$0x1]  ;;  %v527_v34 = vrot.slane %v523_v25, 4  ;;  %v529_v35 = vshrl.u32 %v6050_v17, 16  ;;  %v532_v40 = vshll.u32 %v6050_v17, 16 }
  0x80   : > { %v1292_v61 = vrot.slane %v1290_v7, 5  ;;  %v1310_v20 = vrot.slane %v1308_v9, 4  ;;  %v1278_v23 = vrot.slane %v1277_v15, 4  ;;  %v868_v8 = vsel %vm6958_vm3, 0, %v867_v21  ;;  %v6800_v41 = vld [vmem:[#allocation2 + $0x30] sm:$0xff]   ;;  %v6802_v6 = vld [vmem:[%s8590_s1 + $0x168] sm:$0xff]  }
  0x81   : > { %869 = vst [vmem:[#allocation2 + $0x54] sm:$0x1] %v868_v8  ;;  %v531_v58 = vrot.slane %v529_v35, 7  ;;  %v780_v59 = vld [vmem:[#allocation2 + $0x68] sm:$0x1]  ;;  %6428 = vmatprep.subr.bf16.mxu0 %v6802_v6  ;;  %v286_v21 = vld [vmem:[%s6951_s20 + $0x80] sm:$0xff] }
  0x82   : > { %4716 = vmatmul.mubr.bf16.gmra.mrb[20].mxu1 %v5784_v43  ;;  %v1293_v27 = vsel %vm7022_vm11, %v1288_v56, %v1292_v61  ;;  %v1311_v29 = vor.u32 %v1310_v20, %v7343_v16  ;;  %v1283_v31 = vsel %vm7022_vm11, %v1278_v23, %v7320_v33  ;;  %v1117_v37 = vld [vmem:[#allocation2 + $0x48] sm:$0xf]  ;;  %v777_v33 = vsel %vm6995_vm9, %v526_v39, %v776_v22  ;;  %v1623_v56 = vld [vmem:[#allocation2 + $0x24] sm:$0xe]  ;;  %v1625_v62 = vld [vmem:[#allocation2 + $0x2c] sm:$0x1] }
  0x83   : > { %4723 = vmatprep.mubr.bf16.mxu1 %v6794_v1  ;;  %v5756_v36 = vcombine.low %v1283_v31, %v1293_v27  ;;  %v1295_v43 = vshrl.u32 %v1117_v37, 16  ;;  %v1298_v32 = vshll.u32 %v1117_v37, 16  ;;  %778 = vst [vmem:[#allocation2 + $0x60] sm:$0xf] %v777_v33  ;;  %v1624_v60 = vld [vmem:[#allocation2 + $0x28] sm:$0xf]  ;;  %v534_v5 = vor.u32 %v532_v40, %v531_v58 }
  0x84   : > { %v1312_v38 = vrot.slane %v1311_v29, 4  ;;  %v922_v44 = vld [vmem:[#allocation2 + $0x5c] sm:$0x1]  ;;  %v1121_v50 = vld [vmem:[#allocation2 + $0x58] sm:$0xf]  ;;  %v536_v11 = vrot.slane %v531_v58, 4  ;;  %v6051_v37 = vpack.c.bf16 %v286_v21, %v286_v21 }
  0x85   : > { %v1119_v42 = vld [vmem:[#allocation2 + $0x50] sm:$0x1]  ;;  %4586 = vmatprep.mubr.bf16.mxu0 %v5756_v36  ;;  %v923_v49 = vsel %vm6969_vm4, 0, %v922_v44  ;;  %v1297_v51 = vrot.slane %v1295_v43, 4  ;;  %v1300_v26 = vrot.slane %v1298_v32, 5  ;;  %v1328_v54 = vshll.u32 %v1121_v50, 16 }
  0x86   : > { %v1314_v47 = vshll.u32 %v1119_v42, 16  ;;  %4587 = vmatmul.mubr.bf16.gmra.mrb[20].mxu0 %v6788_v28  ;;  %924 = vst [vmem:[#allocation2 + $0x5c] sm:$0x1] %v923_v49  ;;  %v1332_v55 = vshrl.u32 %v1121_v50, 16  ;;  %v5770_v12 = vrot.slane %v1623_v56, 9  ;;  %v6803_v15 = vld [vmem:[%s8590_s1 + $0x128] sm:$0xff]   ;;  %v535_v61 = vsel %vm7004_vm10, %v527_v34, %v534_v5 }
  0x87   : > { %v1301_v63 = vor.u32 %v1300_v26, %v1297_v51  ;;  %v7361_v1 = vrot.slane %v1328_v54, 5  ;;  %v1736_v20 = vrot.slane %v1624_v60, 5  ;;  %v6793_v8 = vld [vmem:[#allocation2 + $0x48] sm:$0xff]   ;;  %779 = vst [vmem:[#allocation2 + $0x64] sm:$0xf] %v535_v61  ;;  %v781_v25 = vsel %vm6958_vm3, %v536_v11, %v780_v59  ;;  %6429 = vmatpush3.bf16.msra.mxu0 %v6803_v15  ;;  %v6804_v39 = vld [vmem:[#allocation2 + $0x3c] sm:$0xff]  }
  0x88   : > { %v1316_v57 = vrot.slane %v1314_v47, 5  ;;  %v1120_v0 = vld [vmem:[#allocation2 + $0x54] sm:$0xf]  ;;  %v1334_v2 = vrot.slane %v1332_v55, 4  ;;  %v1739_v27 = vrot.slane %v1625_v62, 5  ;;  %v287_v28 = vld [vmem:[%s6951_s20 + $0x88] sm:$0xff] }
  0x89   : > { %v1319_v3 = vshrl.u32 %v1120_v0, 16  ;;  %v1322_v53 = vshll.u32 %v1120_v0, 16  ;;  %v1302_v7 = vrot.slane %v1301_v63, 4  ;;  %782 = vst [vmem:[#allocation2 + $0x68] sm:$0x1] %v781_v25  ;;  %v1737_v31 = vsel %vm7279_vm14, %v5770_v12, %v1736_v20  ;;  %v6807_v42 = vld [vmem:[%s8590_s1 + $0x190] sm:$0xff]  }
  0x8a   : > { %4724 = vmatmul.mubr.bf16.gmra.mrb[24].mxu1 %v5785_v46  ;;  %v1317_v52 = vsel %vm7022_vm11, %v1312_v38, %v1316_v57  ;;  %v1335_v9 = vor.u32 %v1334_v2, %v7361_v1  ;;  %v870_v22 = vld [vmem:[#allocation2 + $0x60] sm:$0x1]  ;;  %v1738_v34 = vrot.slane %v1736_v20, 4  ;;  %v6052_v38 = vpack.c.bf16 %v287_v28, %v287_v28  ;;  %v288_v47 = vld [vmem:[%s6951_s20 + $0x90] sm:$0xff]  ;;  %v783_v51 = vld [vmem:[#allocation2 + $0x6c] sm:$0xf] }
  0x8b   : > { %4731 = vmatprep.mubr.bf16.mxu1 %v6800_v41  ;;  %v1321_v17 = vrot.slane %v1319_v3, 4  ;;  %v1324_v19 = vrot.slane %v1322_v53, 5  ;;  %v1307_v23 = vsel %vm7022_vm11, %v1302_v7, %v7343_v16  ;;  %v6805_v16 = vld [vmem:[%s8590_s1 + $0x1d0] sm:$0xff]   ;;  %v871_v36 = vsel %vm6958_vm3, 0, %v870_v22  ;;  %v1628_v0 = vld [vmem:[#allocation2 + $0x38] sm:$0x1] }
  0x8c   : > { %v1336_v24 = vrot.slane %v1335_v9, 4  ;;  %v5757_v29 = vcombine.low %v1307_v23, %v1317_v52  ;;  %872 = vst [vmem:[#allocation2 + $0x60] sm:$0x1] %v871_v36  ;;  %v1740_v41 = vsel %vm7279_vm14, %v1738_v34, %v1739_v27  ;;  %6534 = vmatprep.subr.bf16.mxu1 %v6805_v16  ;;  %v538_v44 = vshrl.u32 %v6051_v37, 16  ;;  %v1626_v26 = vld [vmem:[#allocation2 + $0x30] sm:$0xe] }
  0x8d   : > { %v1122_v30 = vld [vmem:[#allocation2 + $0x5c] sm:$0x1]  ;;  %v1325_v4 = vor.u32 %v1324_v19, %v1321_v17  ;;  %v5786_v32 = vcombine.low %v1737_v31, %v1740_v41  ;;  %v541_v46 = vshll.u32 %v6051_v37, 16  ;;  %v546_v50 = vshrl.u32 %v6052_v38, 16  ;;  %6535 = vmatpush3.bf16.msra.mxu1 %v6807_v42  ;;  %v6797_v55 = vld [vmem:[#allocation2 + $0x54] sm:$0xff]  }
  0x8e   : > { %v1338_v35 = vshll.u32 %v1122_v30, 16  ;;  %4594 = vmatprep.mubr.bf16.mxu0 %v5757_v29  ;;  %v549_v33 = vshll.u32 %v6052_v38, 16  ;;  %v540_v56 = vrot.slane %v538_v44, 7  ;;  %v787_v57 = vld [vmem:[#allocation2 + $0x74] sm:$0x1]  ;;  %v5771_v59 = vrot.slane %v1626_v26, 9 }
  0x8f   : > { %v1326_v40 = vrot.slane %v1325_v4, 4  ;;  %4595 = vmatmul.mubr.bf16.gmra.mrb[24].mxu0 %v6793_v8  ;;  %v1627_v58 = vld [vmem:[#allocation2 + $0x34] sm:$0xf]  ;;  %v1124_v62 = vld [vmem:[#allocation2 + $0x64] sm:$0xf]  ;;  %v548_v63 = vrot.slane %v546_v50, 7  ;;  %v6053_v2 = vpack.c.bf16 %v288_v47, %v288_v47 }
  0x90   : > { %v1340_v43 = vrot.slane %v1338_v35, 5  ;;  %v925_v52 = vld [vmem:[#allocation2 + $0x68] sm:$0x1]  ;;  %v1352_v3 = vshll.u32 %v1124_v62, 16  ;;  %v1356_v53 = vshrl.u32 %v1124_v62, 16  ;;  %v543_v5 = vor.u32 %v541_v46, %v540_v56  ;;  %v289_v7 = vld [vmem:[%s6951_s20 + $0x98] sm:$0xff] }
  0x91   : > { %v1331_v49 = vsel %vm7022_vm11, %v1326_v40, %v7361_v1  ;;  %v1743_v1 = vrot.slane %v1627_v58, 5  ;;  %v544_v6 = vrot.slane %v540_v56, 4  ;;  %v926_v9 = vsel %vm6969_vm4, 0, %v925_v52  ;;  %v6808_v4 = vld [vmem:[#allocation2 + $0x48] sm:$0xff]   ;;  %v6809_v22 = vld [vmem:[%s8590_s1 + $0x170] sm:$0xff]   ;;  %v290_v46 = vld [vmem:[%s6951_s20 + $0xa0] sm:$0xff] }
  0x92   : > { %v1341_v54 = vsel %vm7022_vm11, %v1336_v24, %v1340_v43  ;;  %4732 = vmatmul.mubr.bf16.gmra.mrb[28].mxu1 %v5786_v32  ;;  %v551_v11 = vor.u32 %v549_v33, %v548_v63  ;;  %v553_v12 = vrot.slane %v548_v63, 4  ;;  %927 = vst [vmem:[#allocation2 + $0x68] sm:$0x1] %v926_v9  ;;  %v7404_v19 = vrot.slane %v1352_v3, 5  ;;  %v790_v36 = vld [vmem:[#allocation2 + $0x78] sm:$0xf]  ;;  %6430 = vmatprep.subr.bf16.mxu0 %v6809_v22 }
  0x93   : > { %v5758_v60 = vcombine.low %v1331_v49, %v1341_v54  ;;  %4739 = vmatprep.mubr.bf16.mxu1 %v6804_v39  ;;  %v1744_v15 = vsel %vm7279_vm14, %v5771_v59, %v1743_v1  ;;  %v1123_v17 = vld [vmem:[#allocation2 + $0x60] sm:$0xf]  ;;  %v1358_v61 = vrot.slane %v1356_v53, 4  ;;  %v784_v20 = vsel %vm6995_vm9, %v543_v5, %v783_v51  ;;  %v6811_v42 = vld [vmem:[%s8590_s1 + $0x130] sm:$0xff]   ;;  %v1629_v50 = vld [vmem:[#allocation2 + $0x3c] sm:$0xe] }
  0x94   : > { %v6054_v21 = vpack.c.bf16 %v289_v7, %v289_v7  ;;  %v1343_v23 = vshrl.u32 %v1123_v17, 16  ;;  %v1346_v8 = vshll.u32 %v1123_v17, 16  ;;  %v552_v24 = vsel %vm7004_vm10, %v544_v6, %v551_v11  ;;  %785 = vst [vmem:[#allocation2 + $0x6c] sm:$0xf] %v784_v20  ;;  %v794_v41 = vld [vmem:[#allocation2 + $0x80] sm:$0x1]  ;;  %6431 = vmatpush3.bf16.msra.mxu0 %v6811_v42 }
  0x95   : > { %4602 = vmatprep.mubr.bf16.mxu0 %v5758_v60  ;;  %v788_v25 = vsel %vm6958_vm3, %v553_v12, %v787_v57  ;;  %v1359_v27 = vor.u32 %v1358_v61, %v7404_v19  ;;  %786 = vst [vmem:[#allocation2 + $0x70] sm:$0xf] %v552_v24  ;;  %v1745_v28 = vrot.slane %v1743_v1, 4  ;;  %v1746_v29 = vrot.slane %v1628_v0, 5  ;;  %v1630_v33 = vld [vmem:[#allocation2 + $0x40] sm:$0xf] }
  0x96   : > { %789 = vst [vmem:[#allocation2 + $0x74] sm:$0x1] %v788_v25  ;;  %v555_v30 = vshrl.u32 %v6053_v2, 16  ;;  %v1345_v31 = vrot.slane %v1343_v23, 4  ;;  %v1348_v34 = vrot.slane %v1346_v8, 5  ;;  %v558_v16 = vshll.u32 %v6053_v2, 16 }
  0x97   : > { %4603 = vmatmul.mubr.bf16.gmra.mrb[28].mxu0 %v6797_v55  ;;  %v563_v35 = vshrl.u32 %v6054_v21, 16  ;;  %v1360_v37 = vrot.slane %v1359_v27, 4  ;;  %v1747_v38 = vsel %vm7279_vm14, %v1745_v28, %v1746_v29  ;;  %v566_v40 = vshll.u32 %v6054_v21, 16  ;;  %v291_v51 = vld [vmem:[%s6951_s20 + $0xa8] sm:$0xff]  ;;  %v1631_v58 = vld [vmem:[#allocation2 + $0x44] sm:$0x1] }
  0x98   : > { %v557_v39 = vrot.slane %v555_v30, 7  ;;  %v1349_v43 = vor.u32 %v1348_v34, %v1345_v31  ;;  %v5787_v32 = vcombine.low %v1744_v15, %v1747_v38  ;;  %v6055_v26 = vpack.c.bf16 %v290_v46, %v290_v46  ;;  %v6813_v7 = vld [vmem:[%s8590_s1 + $0x1d8] sm:$0xff]   ;;  %v6801_v21 = vld [vmem:[#allocation2 + $0x60] sm:$0xff]   ;;  %v1633_v42 = vld [vmem:[#allocation2 + $0x4c] sm:$0xf] }
  0x99   : > { %v565_v44 = vrot.slane %v563_v35, 7  ;;  %v1125_v54 = vld [vmem:[#allocation2 + $0x68] sm:$0x1]  ;;  %v6056_v59 = vpack.c.bf16 %v291_v51, %v291_v51  ;;  %v5772_v0 = vrot.slane %v1629_v50, 9  ;;  %v1750_v1 = vrot.slane %v1630_v33, 5  ;;  %6536 = vmatprep.subr.bf16.mxu1 %v6813_v7  ;;  %v6815_v25 = vld [vmem:[%s8590_s1 + $0x198] sm:$0xff]  }
  0x9a   : > { %v560_v47 = vor.u32 %v558_v16, %v557_v39  ;;  %v561_v49 = vrot.slane %v557_v39, 4  ;;  %v1350_v55 = vrot.slane %v1349_v43, 4  ;;  %4740 = vmatmul.mubr.bf16.gmra.mrb[32].mxu1 %v5787_v32  ;;  %v1362_v60 = vshll.u32 %v1125_v54, 16  ;;  %v6817_v7 = vld [vmem:[%s8590_s1 + $0x138] sm:$0xff]  }
  0x9b   : > { %v568_v56 = vor.u32 %v566_v40, %v565_v44  ;;  %v570_v57 = vrot.slane %v565_v44, 4  ;;  %v873_v62 = vld [vmem:[#allocation2 + $0x6c] sm:$0x1]  ;;  %4747 = vmatprep.mubr.bf16.mxu1 %v6808_v4  ;;  %v1751_v17 = vsel %vm7279_vm14, %v5772_v0, %v1750_v1  ;;  %v1753_v61 = vrot.slane %v1631_v58, 5  ;;  %v6812_v4 = vld [vmem:[#allocation2 + $0x54] sm:$0xff]   ;;  %6537 = vmatpush3.bf16.msra.mxu1 %v6815_v25 }
  0x9c   : > { %v791_v63 = vsel %vm6995_vm9, %v560_v47, %v790_v36  ;;  %v1355_v2 = vsel %vm7022_vm11, %v1350_v55, %v7404_v19  ;;  %v874_v52 = vsel %vm6958_vm3, 0, %v873_v62  ;;  %v1127_v53 = vld [vmem:[#allocation2 + $0x70] sm:$0xf]  ;;  %v1364_v9 = vrot.slane %v1362_v60, 5  ;;  %v797_v36 = vld [vmem:[#allocation2 + $0x84] sm:$0xf] }
  0x9d   : > { %v928_v3 = vld [vmem:[#allocation2 + $0x74] sm:$0x1]  ;;  %v569_v5 = vsel %vm7004_vm10, %v561_v49, %v568_v56  ;;  %792 = vst [vmem:[#allocation2 + $0x78] sm:$0xf] %v791_v63  ;;  %v795_v6 = vsel %vm6958_vm3, %v570_v57, %v794_v41  ;;  %875 = vst [vmem:[#allocation2 + $0x6c] sm:$0x1] %v874_v52 }
  0x9e   : > { %v929_v11 = vsel %vm6969_vm4, 0, %v928_v3  ;;  %v1376_v12 = vshll.u32 %v1127_v53, 16  ;;  %v1380_v15 = vshrl.u32 %v1127_v53, 16  ;;  %793 = vst [vmem:[#allocation2 + $0x7c] sm:$0xf] %v569_v5  ;;  %v1752_v19 = vrot.slane %v1750_v1, 4 }
  0x9f   : > { %796 = vst [vmem:[#allocation2 + $0x80] sm:$0x1] %v795_v6  ;;  %930 = vst [vmem:[#allocation2 + $0x74] sm:$0x1] %v929_v11  ;;  %v1365_v20 = vsel %vm7022_vm11, %v1360_v37, %v1364_v9  ;;  %v572_v24 = vshrl.u32 %v6055_v26, 16  ;;  %v575_v29 = vshll.u32 %v6055_v26, 16 }
  0xa0   : > { %v7443_v23 = vrot.slane %v1376_v12, 5  ;;  %v1382_v8 = vrot.slane %v1380_v15, 4  ;;  %v5759_v27 = vcombine.low %v1355_v2, %v1365_v20  ;;  %v1754_v28 = vsel %vm7279_vm14, %v1752_v19, %v1753_v61  ;;  %v6816_v37 = vld [vmem:[%s8590_s1 + $0x178] sm:$0xff]   ;;  %v1632_v41 = vld [vmem:[#allocation2 + $0x48] sm:$0xe] }
  0xa1   : > { %v580_v30 = vshrl.u32 %v6056_v59, 16  ;;  %v5788_v31 = vcombine.low %v1751_v17, %v1754_v28  ;;  %v574_v34 = vrot.slane %v572_v24, 7  ;;  %v583_v16 = vshll.u32 %v6056_v59, 16  ;;  %6432 = vmatprep.subr.bf16.mxu0 %v6816_v37  ;;  %v801_v26 = vld [vmem:[#allocation2 + $0x8c] sm:$0x1] }
  0xa2   : > { %v1383_v22 = vor.u32 %v1382_v8, %v7443_v23  ;;  %4610 = vmatprep.mubr.bf16.mxu0 %v5759_v27  ;;  %v1634_v63 = vld [vmem:[#allocation2 + $0x50] sm:$0x1]  ;;  %v5773_v2 = vrot.slane %v1632_v41, 9  ;;  %v1757_v52 = vrot.slane %v1633_v42, 5  ;;  %6433 = vmatpush3.bf16.msra.mxu0 %v6817_v7  ;;  %v6818_v8 = vld [vmem:[#allocation2 + $0x60] sm:$0xff]  }
  0xa3   : > { %v582_v35 = vrot.slane %v580_v30, 7  ;;  %4611 = vmatmul.mubr.bf16.gmra.mrb[32].mxu0 %v6801_v21  ;;  %4748 = vmatmul.mubr.bf16.gmra.mrb[36].mxu1 %v5788_v31  ;;  %v577_v39 = vor.u32 %v575_v29, %v574_v34  ;;  %v578_v40 = vrot.slane %v574_v34, 4  ;;  %v1760_v6 = vrot.slane %v1634_v63, 5  ;;  %v6820_v30 = vld [vmem:[%s8590_s1 + $0x1e0] sm:$0xff]   ;;  %v1637_v63 = vld [vmem:[#allocation2 + $0x5c] sm:$0x1] }
  0xa4   : > { %v876_v38 = vld [vmem:[#allocation2 + $0x78] sm:$0x1]  ;;  %v1126_v43 = vld [vmem:[#allocation2 + $0x6c] sm:$0xf]  ;;  %v1384_v32 = vrot.slane %v1383_v22, 4  ;;  %4755 = vmatprep.mubr.bf16.mxu1 %v6812_v4  ;;  %v1759_v11 = vrot.slane %v1757_v52, 4  ;;  %v1758_v61 = vsel %vm7279_vm14, %v5773_v2, %v1757_v52  ;;  %6538 = vmatprep.subr.bf16.mxu1 %v6820_v30 }
  0xa5   : > { %v877_v44 = vsel %vm6958_vm3, 0, %v876_v38  ;;  %v585_v46 = vor.u32 %v583_v16, %v582_v35  ;;  %v1367_v49 = vshrl.u32 %v1126_v43, 16  ;;  %v1370_v50 = vshll.u32 %v1126_v43, 16  ;;  %v1130_v56 = vld [vmem:[#allocation2 + $0x7c] sm:$0xf]  ;;  %v6806_v17 = vld [vmem:[#allocation2 + $0x6c] sm:$0xff]  }
  0xa6   : > { %v1128_v47 = vld [vmem:[#allocation2 + $0x74] sm:$0x1]  ;;  %878 = vst [vmem:[#allocation2 + $0x78] sm:$0x1] %v877_v44  ;;  %v931_v33 = vld [vmem:[#allocation2 + $0x80] sm:$0x1]  ;;  %v798_v51 = vsel %vm6995_vm9, %v577_v39, %v797_v36  ;;  %v1761_v21 = vsel %vm7279_vm14, %v1759_v11, %v1760_v6 }
  0xa7   : > { %v1386_v54 = vshll.u32 %v1128_v47, 16  ;;  %v932_v55 = vsel %vm6969_vm4, 0, %v931_v33  ;;  %v586_v57 = vsel %vm7004_vm10, %v578_v40, %v585_v46  ;;  %799 = vst [vmem:[#allocation2 + $0x84] sm:$0xf] %v798_v51  ;;  %v1369_v58 = vrot.slane %v1367_v49, 4  ;;  %v6822_v40 = vld [vmem:[%s8590_s1 + $0x1a0] sm:$0xff]  }
  0xa8   : > { %v1372_v59 = vrot.slane %v1370_v50, 5  ;;  %933 = vst [vmem:[#allocation2 + $0x80] sm:$0x1] %v932_v55  ;;  %v1400_v60 = vshll.u32 %v1130_v56, 16  ;;  %v1404_v62 = vshrl.u32 %v1130_v56, 16  ;;  %v587_v1 = vrot.slane %v582_v35, 4  ;;  %6539 = vmatpush3.bf16.msra.mxu1 %v6822_v40 }
  0xa9   : > { %800 = vst [vmem:[#allocation2 + $0x88] sm:$0xf] %v586_v57  ;;  %v1388_v0 = vrot.slane %v1386_v54, 5  ;;  %v5789_v16 = vcombine.low %v1758_v61, %v1761_v21  ;;  %v7487_v35 = vld [vmem:[%s8590_s1 + $0x200] sm:$0xff]   ;;  %v7492_v43 = vld [vmem:[#allocation2 + $0xc] sm:$0xe] }
  0xaa   : > { %v1373_v3 = vor.u32 %v1372_v59, %v1369_v58  ;;  %v7462_v53 = vrot.slane %v1400_v60, 5  ;;  %v1406_v5 = vrot.slane %v1404_v62, 4  ;;  %v802_v9 = vsel %vm6958_vm3, %v587_v1, %v801_v26  ;;  %v7498_v49 = vld [vmem:[#allocation2 + $0x14] sm:$0x1]  ;;  %6666 = vmatprep.subr.bf16.mxu0 %v7487_v35  ;;  %v1635_v54 = vld [vmem:[#allocation2 + $0x54] sm:$0xe] }
  0xab   : > { %v1389_v15 = vsel %vm7022_vm11, %v1384_v32, %v1388_v0  ;;  %803 = vst [vmem:[#allocation2 + $0x8c] sm:$0x1] %v802_v9  ;;  %4756 = vmatmul.mubr.bf16.gmra.mrb[40].mxu1 %v5789_v16  ;;  %v7494_v32 = vld [vmem:[#allocation2 + $0x10] sm:$0xf]  ;;  %v5831_v56 = vrot.slane %v7492_v43, 9  ;;  %v2662_v57 = vrot.slane %v7498_v49, 5 }
  0xac   : > { %v1374_v12 = vrot.slane %v1373_v3, 4  ;;  %v1407_v19 = vor.u32 %v1406_v5, %v7462_v53  ;;  %4763 = vmatprep.mubr.bf16.mxu1 %v6818_v8  ;;  %v2659_v26 = vrot.slane %v7494_v32, 5  ;;  %v1636_v58 = vld [vmem:[#allocation2 + $0x58] sm:$0xf]  ;;  %v5774_v59 = vrot.slane %v1635_v54, 9  ;;  %v6825_v30 = vld [vmem:[%s8590_s1 + $0x1e8] sm:$0xff]  }
  0xad   : > { %v1129_v20 = vld [vmem:[#allocation2 + $0x78] sm:$0xf]  ;;  %v1764_v0 = vrot.slane %v1636_v58, 5  ;;  %v2049_v1 = vld [vmem:[#allocation2 + $0xc] sm:$0xf]  ;;  %6540 = vmatprep.subr.bf16.mxu1 %v6825_v30 }
  0xae   : > { %v1379_v24 = vsel %vm7022_vm11, %v1374_v12, %v7443_v23  ;;  %v1391_v25 = vshrl.u32 %v1129_v20, 16  ;;  %v1394_v27 = vshll.u32 %v1129_v20, 16  ;;  %v1408_v28 = vrot.slane %v1407_v19, 4  ;;  %v879_v29 = vld [vmem:[#allocation2 + $0x84] sm:$0x1]  ;;  %v6810_v55 = vld [vmem:[#allocation2 + $0x78] sm:$0xff]  }
  0xaf   : > { %v5760_v4 = vcombine.low %v1379_v24, %v1389_v15  ;;  %v1131_v22 = vld [vmem:[#allocation2 + $0x80] sm:$0x1]  ;;  %v880_v31 = vsel %vm6958_vm3, 0, %v879_v29  ;;  %v2661_v62 = vrot.slane %v2659_v26, 4  ;;  %v2050_v3 = vld [vmem:[#allocation2 + $0x10] sm:$0xf]  ;;  %v1765_v11 = vsel %vm7279_vm14, %v5774_v59, %v1764_v0 }
  0xb0   : > { %v1133_v34 = vld [vmem:[#allocation2 + $0x88] sm:$0xf]  ;;  %v1393_v23 = vrot.slane %v1391_v25, 4  ;;  %v1396_v36 = vrot.slane %v1394_v27, 5  ;;  %v1410_v37 = vshll.u32 %v1131_v22, 16  ;;  %v1766_v12 = vrot.slane %v1764_v0, 4 }
  0xb1   : > { %881 = vst [vmem:[#allocation2 + $0x84] sm:$0x1] %v880_v31  ;;  %v1424_v38 = vshll.u32 %v1133_v34, 16  ;;  %4618 = vmatprep.mubr.bf16.mxu0 %v5760_v4  ;;  %v1428_v39 = vshrl.u32 %v1133_v34, 16  ;;  %v2051_v9 = vld [vmem:[#allocation2 + $0x14] sm:$0x1] }
  0xb2   : > { %4619 = vmatmul.mubr.bf16.gmra.mrb[36].mxu0 %v6806_v17  ;;  %v1397_v41 = vor.u32 %v1396_v36, %v1393_v23  ;;  %v1412_v42 = vrot.slane %v1410_v37, 5  ;;  %v934_v44 = vld [vmem:[#allocation2 + $0x8c] sm:$0x1]  ;;  %v1767_v15 = vrot.slane %v1637_v63, 5  ;;  %v2098_v17 = vshrl.u32 %v2049_v1, 16 }
  0xb3   : > { %v7496_v46 = vrot.slane %v1424_v38, 5  ;;  %v1430_v47 = vrot.slane %v1428_v39, 4  ;;  %v935_v51 = vsel %vm6969_vm4, 0, %v934_v44  ;;  %v2101_v20 = vshll.u32 %v2049_v1, 16  ;;  %v7514_v8 = vld [vmem:[#allocation2 + $0x18] sm:$0xe] }
  0xb4   : > { %v1398_v50 = vrot.slane %v1397_v41, 4  ;;  %v1413_v33 = vsel %vm7022_vm11, %v1408_v28, %v1412_v42  ;;  %936 = vst [vmem:[#allocation2 + $0x8c] sm:$0x1] %v935_v51  ;;  %v2107_v21 = vshll.u32 %v2050_v3, 16  ;;  %v1768_v24 = vsel %vm7279_vm14, %v1766_v12, %v1767_v15  ;;  %v7518_v29 = vld [vmem:[#allocation2 + $0x1c] sm:$0xf] }
  0xb5   : > { %v1431_v7 = vor.u32 %v1430_v47, %v7496_v46  ;;  %v2100_v25 = vrot.slane %v2098_v17, 4  ;;  %v2111_v27 = vshrl.u32 %v2050_v3, 16  ;;  %v2117_v28 = vshll.u32 %v2051_v9, 16  ;;  %v2566_v23 = vld [vmem:[#allocation2 + $0x20] sm:$0x1]  ;;  %v6823_v17 = vld [vmem:[#allocation2 + $0x78] sm:$0xff]  }
  0xb6   : > { %v1403_v60 = vsel %vm7022_vm11, %v1398_v50, %v7462_v53  ;;  %v6819_v53 = vld [vmem:[#allocation2 + $0x6c] sm:$0xff]   ;;  %v5790_v31 = vcombine.low %v1765_v11, %v1768_v24  ;;  %v2103_v34 = vrot.slane %v2101_v20, 5  ;;  %v7523_v16 = vrot.slane %v2107_v21, 5  ;;  %v1639_v58 = vld [vmem:[#allocation2 + $0x64] sm:$0xf] }
  0xb7   : > { %v5761_v2 = vcombine.low %v1403_v60, %v1413_v33  ;;  %v1432_v36 = vrot.slane %v1431_v7, 4  ;;  %v2113_v38 = vrot.slane %v2111_v27, 4  ;;  %v7525_v39 = vrot.slane %v2117_v28, 5  ;;  %v6827_v50 = vld [vmem:[%s8590_s1 + $0x1a8] sm:$0xff]   ;;  %v2053_v3 = vld [vmem:[#allocation2 + $0x1c] sm:$0xf] }
  0xb8   : > { %v1132_v52 = vld [vmem:[#allocation2 + $0x84] sm:$0xf]  ;;  %4764 = vmatmul.mubr.bf16.gmra.mrb[44].mxu1 %v5790_v31  ;;  %v2104_v41 = vor.u32 %v2103_v34, %v2100_v25  ;;  %v5832_v42 = vrot.slane %v7514_v8, 9  ;;  %v2666_v43 = vrot.slane %v7518_v29, 5  ;;  %v2660_v44 = vsel %vm7279_vm14, %v5831_v56, %v2659_v26  ;;  %v1640_v59 = vld [vmem:[#allocation2 + $0x68] sm:$0x1] }
  0xb9   : > { %v1415_v5 = vshrl.u32 %v1132_v52, 16  ;;  %v1418_v6 = vshll.u32 %v1132_v52, 16  ;;  %4626 = vmatprep.mubr.bf16.mxu0 %v5761_v2  ;;  %v2663_v47 = vsel %vm7279_vm14, %v2661_v62, %v2662_v57  ;;  %v2114_v49 = vor.u32 %v2113_v38, %v7523_v16  ;;  %4771 = vmatprep.mubr.bf16.mxu1 %v6819_v53  ;;  %v6814_v56 = vld [vmem:[#allocation2 + $0x84] sm:$0xff]   ;;  %v2052_v52 = vld [vmem:[#allocation2 + $0x18] sm:$0xf]  ;;  %v6830_v7 = vld [vmem:[%s8590_s1 + $0x1f0] sm:$0xff]  }
  0xba   : > { %4627 = vmatmul.mubr.bf16.gmra.mrb[40].mxu0 %v6810_v55  ;;  %v2105_v51 = vrot.slane %v2104_v41, 4  ;;  %v2669_v54 = vrot.slane %v2566_v23, 5  ;;  %v1638_v55 = vld [vmem:[#allocation2 + $0x60] sm:$0xe]  ;;  %v1771_v62 = vrot.slane %v1639_v58, 5  ;;  %6541 = vmatpush3.bf16.msra.mxu1 %v6827_v50  ;;  %v5847_v0 = vcombine.low %v2660_v44, %v2663_v47  ;;  %v6832_v28 = vld [vmem:[%s8590_s1 + $0x1b0] sm:$0xff]  }
  0xbb   : > { %v1417_v19 = vrot.slane %v1415_v5, 4  ;;  %v1420_v61 = vrot.slane %v1418_v6, 5  ;;  %v1134_v4 = vld [vmem:[#allocation2 + $0x8c] sm:$0x1]  ;;  %v2115_v57 = vrot.slane %v2114_v49, 4  ;;  %v5775_v60 = vrot.slane %v1638_v55, 9  ;;  %6542 = vmatprep.subr.bf16.mxu1 %v6830_v7 }
  0xbc   : > { %v1434_v37 = vshll.u32 %v1134_v4, 16  ;;  %v2668_v1 = vrot.slane %v2666_v43, 4  ;;  %v1774_v2 = vrot.slane %v1640_v59, 5  ;;  %v1773_v5 = vrot.slane %v1771_v62, 4  ;;  %v2054_v6 = vld [vmem:[#allocation2 + $0x20] sm:$0x1] }
  0xbd   : > { %v1421_v22 = vor.u32 %v1420_v61, %v1417_v19  ;;  %v2110_v9 = vsel %vm7022_vm11, %v2105_v51, %v7523_v16  ;;  %v2122_v11 = vshrl.u32 %v2052_v52, 16  ;;  %v2125_v12 = vshll.u32 %v2052_v52, 16  ;;  %v2567_v27 = vld [vmem:[#allocation2 + $0x24] sm:$0xe]  ;;  %v2569_v31 = vld [vmem:[#allocation2 + $0x2c] sm:$0x1] }
  0xbe   : > { %v1436_v32 = vrot.slane %v1434_v37, 5  ;;  %v2131_v15 = vshll.u32 %v2053_v3, 16  ;;  %v2120_v53 = vsel %vm7022_vm11, %v2115_v57, %v7525_v39  ;;  %v1775_v19 = vsel %vm7279_vm14, %v1773_v5, %v1774_v2  ;;  %v1641_v37 = vld [vmem:[#allocation2 + $0x6c] sm:$0xe]  ;;  %v1642_v41 = vld [vmem:[#allocation2 + $0x70] sm:$0xf]  ;;  %6543 = vmatpush3.bf16.msra.mxu1 %v6832_v28 }
  0xbf   : > { %v1422_v40 = vrot.slane %v1421_v22, 4  ;;  %v2135_v61 = vshrl.u32 %v2053_v3, 16  ;;  %v2141_v20 = vshll.u32 %v2054_v6, 16  ;;  %v2124_v8 = vrot.slane %v2122_v11, 4  ;;  %v2568_v22 = vld [vmem:[#allocation2 + $0x28] sm:$0xf] }
  0xc0   : > { %v1437_v26 = vsel %vm7022_vm11, %v1432_v36, %v1436_v32  ;;  %v2127_v24 = vrot.slane %v2125_v12, 5  ;;  %v7555_v25 = vrot.slane %v2131_v15, 5  ;;  %v2667_v29 = vsel %vm7279_vm14, %v5832_v42, %v2666_v43  ;;  %v1643_v32 = vld [vmem:[#allocation2 + $0x74] sm:$0x1]  ;;  %v6826_v43 = vld [vmem:[%s8590_s1 + $0x208] sm:$0xff]   ;;  %v6835_v51 = vld [vmem:[%s8590_s1 + $0x1f8] sm:$0xff]  }
  0xc1   : > { %v1427_v33 = vsel %vm7022_vm11, %v1422_v40, %v7496_v46  ;;  %v1772_v46 = vsel %vm7279_vm14, %v5775_v60, %v1771_v62  ;;  %v2670_v30 = vsel %vm7279_vm14, %v2668_v1, %v2669_v54  ;;  %v2137_v4 = vrot.slane %v2135_v61, 4  ;;  %v2056_v58 = vld [vmem:[#allocation2 + $0x28] sm:$0xf]  ;;  %6544 = vmatprep.subr.bf16.mxu1 %v6835_v51  ;;  %v2570_v2 = vld [vmem:[#allocation2 + $0x30] sm:$0xe]  ;;  %v6836_v28 = vld [vmem:[%s8590_s1 + $0x218] sm:$0xff]  }
  0xc2   : > { %v5762_v63 = vcombine.low %v1427_v33, %v1437_v26  ;;  %v5791_v21 = vcombine.low %v1772_v46, %v1775_v19  ;;  %v2128_v34 = vor.u32 %v2127_v24, %v2124_v8  ;;  %v2143_v16 = vrot.slane %v2141_v20, 5  ;;  %v2055_v33 = vld [vmem:[#allocation2 + $0x24] sm:$0xf]  ;;  %v2057_v26 = vld [vmem:[#allocation2 + $0x2c] sm:$0x1]  ;;  %v6831_v3 = vld [vmem:[%s8590_s1 + $0x210] sm:$0xff]  }
  0xc3   : > { %v5833_v23 = vrot.slane %v2567_v27, 9  ;;  %v2673_v36 = vrot.slane %v2568_v22, 5  ;;  %v5815_v38 = vcombine.low %v2110_v9, %v2120_v53  ;;  %v2138_v39 = vor.u32 %v2137_v4, %v7555_v25  ;;  %v6824_v60 = vld [vmem:[#allocation2 + $0x84] sm:$0xff]   ;;  %v2571_v52 = vld [vmem:[#allocation2 + $0x34] sm:$0xf]  ;;  %v6837_v53 = vld [vmem:[%s8590_s1 + $0x1b8] sm:$0xff]  }
  0xc4   : > { %4634 = vmatprep.mubr.bf16.mxu0 %v5762_v63  ;;  %4772 = vmatmul.mubr.bf16.gmra.mrb[48].mxu1 %v5791_v21  ;;  %v2676_v40 = vrot.slane %v2569_v31, 5  ;;  %v5776_v42 = vrot.slane %v1641_v37, 9  ;;  %v5848_v44 = vcombine.low %v2667_v29, %v2670_v30  ;;  %v2129_v47 = vrot.slane %v2128_v34, 4  ;;  %v2572_v9 = vld [vmem:[#allocation2 + $0x38] sm:$0x1] }
  0xc5   : > { %4635 = vmatmul.mubr.bf16.gmra.mrb[44].mxu0 %v6814_v56  ;;  %4779 = vmatprep.mubr.bf16.mxu1 %v6823_v17  ;;  %v2675_v49 = vrot.slane %v2673_v36, 4  ;;  %v1778_v50 = vrot.slane %v1642_v41, 5  ;;  %v2139_v54 = vrot.slane %v2138_v39, 4  ;;  %v1781_v55 = vrot.slane %v1643_v32, 5  ;;  %v1644_v27 = vld [vmem:[#allocation2 + $0x78] sm:$0xe] }
  0xc6   : > { %4868 = vmatprep.mubr.bf16.mxu0 %v5847_v0  ;;  %v7573_v56 = vsel %vm7279_vm14, %v5833_v23, %v2673_v36  ;;  %v2134_v62 = vsel %vm7022_vm11, %v2129_v47, %v7555_v25  ;;  %v2146_v0 = vshrl.u32 %v2055_v33, 16  ;;  %v2149_v1 = vshll.u32 %v2055_v33, 16  ;;  %v1645_v22 = vld [vmem:[#allocation2 + $0x7c] sm:$0xf]  ;;  %v1646_v31 = vld [vmem:[#allocation2 + $0x80] sm:$0x1]  ;;  %6545 = vmatpush3.bf16.msra.mxu1 %v6837_v53 }
  0xc7   : > { %v1779_v57 = vsel %vm7279_vm14, %v5776_v42, %v1778_v50  ;;  %v1780_v59 = vrot.slane %v1778_v50, 4  ;;  %v2677_v63 = vsel %vm7279_vm14, %v2675_v49, %v2676_v40  ;;  %v2144_v46 = vsel %vm7022_vm11, %v2139_v54, %v2143_v16  ;;  %v2058_v37 = vld [vmem:[#allocation2 + $0x30] sm:$0xf]  ;;  %v2059_v41 = vld [vmem:[#allocation2 + $0x34] sm:$0xf] }
  0xc8   : > { %v2155_v6 = vshll.u32 %v2056_v58, 16  ;;  %v2159_v7 = vshrl.u32 %v2056_v58, 16  ;;  %v2148_v12 = vrot.slane %v2146_v0, 4  ;;  %v2151_v15 = vrot.slane %v2149_v1, 5  ;;  %v2060_v32 = vld [vmem:[#allocation2 + $0x38] sm:$0x1] }
  0xc9   : > { %v1782_v5 = vsel %vm7279_vm14, %v1780_v59, %v1781_v55  ;;  %v2165_v17 = vshll.u32 %v2057_v26, 16  ;;  %v5834_v20 = vrot.slane %v2570_v2, 9  ;;  %v2680_v21 = vrot.slane %v2571_v52, 5  ;;  %v6828_v50 = vld [vmem:[#allocation2 + $0x90] sm:$0xff]   ;;  %v6839_v58 = vld [vmem:[%s8590_s1 + $0x220] sm:$0xff]  }
  0xca   : > { %v5792_v11 = vcombine.low %v1779_v57, %v1782_v5  ;;  %v2157_v19 = vrot.slane %v2155_v6, 5  ;;  %v2161_v61 = vrot.slane %v2159_v7, 4  ;;  %v2152_v8 = vor.u32 %v2151_v15, %v2148_v12  ;;  %v2573_v59 = vld [vmem:[#allocation2 + $0x3c] sm:$0xe]  ;;  %v2574_v2 = vld [vmem:[#allocation2 + $0x40] sm:$0xf] }
  0xcb   : > { %v2167_v24 = vrot.slane %v2165_v17, 5  ;;  %v2683_v25 = vrot.slane %v2572_v9, 5  ;;  %v5849_v29 = vcombine.low %v7573_v56, %v2677_v63  ;;  %v2682_v4 = vrot.slane %v2680_v21, 4  ;;  %v2575_v52 = vld [vmem:[#allocation2 + $0x44] sm:$0x1] }
  0xcc   : > { %4780 = vmatmul.mubr.bf16.gmra.mrb[52].mxu1 %v5792_v11  ;;  %v2162_v30 = vor.u32 %v2161_v61, %v2157_v19  ;;  %v5777_v34 = vrot.slane %v1644_v27, 9  ;;  %v2153_v16 = vrot.slane %v2152_v8, 4  ;;  %v1785_v23 = vrot.slane %v1645_v22, 5  ;;  %v1647_v7 = vld [vmem:[#allocation2 + $0x84] sm:$0xe] }
  0xcd   : > { %4869 = vmatmul.mubr.bf16.vlgmr.msra.gmra.mrb[48].mxu0 %v5815_v38  ;;  %4787 = vmatprep.mubr.bf16.mxu1 %v6824_v60  ;;  %v1788_v36 = vrot.slane %v1646_v31, 5  ;;  %v300_v38 = vld [vmem:[%s6951_s20 + $0xf0] sm:$0xff]  ;;  %v2681_v40 = vsel %vm7279_vm14, %v5834_v20, %v2680_v21  ;;  %v2170_v42 = vshrl.u32 %v2058_v37, 16  ;;  %v2173_v54 = vshll.u32 %v2058_v37, 16  ;;  %v1648_v15 = vld [vmem:[#allocation2 + $0x88] sm:$0xf] }
  0xce   : > { %4876 = vmatprep.mubr.bf16.mxu0 %v5848_v44  ;;  %6667 = vmatpush3.bf16.msra.mxu0 %v7487_v35  ;;  %v5816_v35 = vcombine.low %v2134_v62, %v2144_v46  ;;  %v2163_v39 = vrot.slane %v2162_v30, 4  ;;  %v2158_v44 = vsel %vm7022_vm11, %v2153_v16, %v2157_v19  ;;  %v1786_v47 = vsel %vm7279_vm14, %v5777_v34, %v1785_v23  ;;  %v1649_v17 = vld [vmem:[#allocation2 + $0x8c] sm:$0x1]  ;;  %v2062_v8 = vld [vmem:[#allocation2 + $0x40] sm:$0xf] }
  0xcf   : > { %6668 = vmatprep.subr.bf16.mxu0 %v6826_v43  ;;  %v1787_v49 = vrot.slane %v1785_v23, 4  ;;  %v2172_v51 = vrot.slane %v2170_v42, 4  ;;  %v2179_v55 = vshll.u32 %v2059_v41, 16  ;;  %v2183_v56 = vshrl.u32 %v2059_v41, 16  ;;  %v2063_v27 = vld [vmem:[#allocation2 + $0x44] sm:$0x1] }
  0xd0   : > { %v2168_v33 = vsel %vm7022_vm11, %v2163_v39, %v2167_v24  ;;  %v2189_v57 = vshll.u32 %v2060_v32, 16  ;;  %v7613_v60 = vpack.c.bf16 %v300_v38, %v300_v38  ;;  %v2175_v0 = vrot.slane %v2173_v54, 5  ;;  %v6829_v34 = vld [vmem:[#allocation2 + $0x9c] sm:$0xff]   ;;  %v2576_v38 = vld [vmem:[#allocation2 + $0x48] sm:$0xe] }
  0xd1   : > { %v1789_v26 = vsel %vm7279_vm14, %v1787_v49, %v1788_v36  ;;  %v5817_v62 = vcombine.low %v2158_v44, %v2168_v33  ;;  %v2181_v1 = vrot.slane %v2179_v55, 5  ;;  %v5835_v5 = vrot.slane %v2573_v59, 9  ;;  %v2577_v39 = vld [vmem:[#allocation2 + $0x4c] sm:$0xf]  ;;  %v2578_v44 = vld [vmem:[#allocation2 + $0x50] sm:$0x1] }
  0xd2   : > { %6669 = vmatpush3.bf16.msra.mxu0 %v6826_v43  ;;  %v2684_v43 = vsel %vm7279_vm14, %v2682_v4, %v2683_v25  ;;  %v5793_v63 = vcombine.low %v1786_v47, %v1789_v26  ;;  %v2191_v46 = vrot.slane %v2189_v57, 5  ;;  %v2687_v6 = vrot.slane %v2574_v2, 5  ;;  %v1650_v57 = vld [vmem:[#allocation2 + $0x90] sm:$0xe]  ;;  %v1652_v2 = vld [vmem:[#allocation2 + $0x98] sm:$0x1] }
  0xd3   : > { %6670 = vmatprep.subr.bf16.mxu0 %v6831_v3  ;;  %v5850_v9 = vcombine.low %v2681_v40, %v2684_v43  ;;  %v2176_v11 = vor.u32 %v2175_v0, %v2172_v51  ;;  %v2690_v12 = vrot.slane %v2575_v52, 5  ;;  %v5778_v53 = vrot.slane %v1647_v7, 9  ;;  %v2065_v7 = vld [vmem:[#allocation2 + $0x4c] sm:$0xf] }
  0xd4   : > { %4788 = vmatmul.mubr.bf16.gmra.mrb[56].mxu1 %v5793_v63  ;;  %v2688_v61 = vsel %vm7279_vm14, %v5835_v5, %v2687_v6  ;;  %v2689_v20 = vrot.slane %v2687_v6, 4  ;;  %v1792_v21 = vrot.slane %v1648_v15, 5  ;;  %v1795_v25 = vrot.slane %v1649_v17, 5  ;;  %v2064_v6 = vld [vmem:[#allocation2 + $0x48] sm:$0xf] }
  0xd5   : > { %4877 = vmatmul.mubr.bf16.gmra.mrb[52].mxu0 %v5816_v35  ;;  %4795 = vmatprep.mubr.bf16.mxu1 %v6828_v50  ;;  %v2061_v35 = vld [vmem:[#allocation2 + $0x3c] sm:$0xf]  ;;  %v2177_v24 = vrot.slane %v2176_v11, 4  ;;  %v2203_v32 = vshll.u32 %v2062_v8, 16  ;;  %v2207_v42 = vshrl.u32 %v2062_v8, 16  ;;  %v2213_v50 = vshll.u32 %v2063_v27, 16 }
  0xd6   : > { %4884 = vmatprep.mubr.bf16.mxu0 %v5849_v29  ;;  %6671 = vmatpush3.bf16.msra.mxu0 %v6831_v3  ;;  %v2185_v3 = vrot.slane %v2183_v56, 4  ;;  %v2194_v29 = vshrl.u32 %v2061_v35, 16  ;;  %v2197_v30 = vshll.u32 %v2061_v35, 16  ;;  %v1793_v22 = vsel %vm7279_vm14, %v5778_v53, %v1792_v21  ;;  %v6842_v27 = vld [vmem:[%s8590_s1 + $0x228] sm:$0xff]  }
  0xd7   : > { %6672 = vmatprep.subr.bf16.mxu0 %v6836_v28  ;;  %v1794_v31 = vrot.slane %v1792_v21, 4  ;;  %v2182_v16 = vsel %vm7022_vm11, %v2177_v24, %v2181_v1  ;;  %v2205_v33 = vrot.slane %v2203_v32, 5  ;;  %v2209_v51 = vrot.slane %v2207_v42, 4  ;;  %v6833_v21 = vld [vmem:[#allocation2 + $0xa8] sm:$0xff]  }
  0xd8   : > { %v2186_v19 = vor.u32 %v2185_v3, %v2181_v1  ;;  %v2196_v36 = vrot.slane %v2194_v29, 4  ;;  %v2199_v37 = vrot.slane %v2197_v30, 5  ;;  %v5836_v54 = vrot.slane %v2576_v38, 9  ;;  %v1651_v1 = vld [vmem:[#allocation2 + $0x94] sm:$0xf] }
  0xd9   : > { %v1796_v41 = vsel %vm7279_vm14, %v1794_v31, %v1795_v25  ;;  %v2694_v55 = vrot.slane %v2577_v39, 5  ;;  %v2697_v56 = vrot.slane %v2578_v44, 5  ;;  %v657_v59 = vshrl.u32 %v7613_v60, 16 }
  0xda   : > { %6673 = vmatpush3.bf16.msra.mxu0 %v6836_v28  ;;  %v2187_v4 = vrot.slane %v2186_v19, 4  ;;  %v2691_v28 = vsel %vm7279_vm14, %v2689_v20, %v2690_v12  ;;  %v5794_v47 = vcombine.low %v1793_v22, %v1796_v41  ;;  %v2200_v49 = vor.u32 %v2199_v37, %v2196_v36  ;;  %v2066_v12 = vld [vmem:[#allocation2 + $0x50] sm:$0x1]  ;;  %v2579_v22 = vld [vmem:[#allocation2 + $0x54] sm:$0xe] }
  0xdb   : > { %6674 = vmatprep.subr.bf16.mxu0 %v6839_v58  ;;  %v5851_v23 = vcombine.low %v2688_v61, %v2691_v28  ;;  %v7630_v63 = vsel %vm7279_vm14, %v5836_v54, %v2694_v55  ;;  %v2696_v0 = vrot.slane %v2694_v55, 4  ;;  %v5779_v52 = vrot.slane %v1650_v57, 9  ;;  %v2581_v36 = vld [vmem:[#allocation2 + $0x5c] sm:$0x1]  ;;  %v1653_v41 = vld [vmem:[#allocation2 + $0x9c] sm:$0xe] }
  0xdc   : > { %v2192_v40 = vsel %vm7022_vm11, %v2187_v4, %v2191_v46  ;;  %4796 = vmatmul.mubr.bf16.gmra.mrb[60].mxu1 %v5794_v47  ;;  %v2201_v26 = vrot.slane %v2200_v49, 4  ;;  %v1799_v46 = vrot.slane %v1651_v1, 5  ;;  %v1802_v5 = vrot.slane %v1652_v2, 5  ;;  %v1655_v47 = vld [vmem:[#allocation2 + $0xa4] sm:$0x1]  ;;  %v6834_v2 = vld [vmem:[#allocation2 + $0xb4] sm:$0xff]  }
  0xdd   : > { %4885 = vmatmul.mubr.bf16.gmra.mrb[56].mxu0 %v5817_v62  ;;  %v5818_v43 = vcombine.low %v2182_v16, %v2192_v40  ;;  %v2210_v62 = vor.u32 %v2209_v51, %v2205_v33  ;;  %4803 = vmatprep.mubr.bf16.mxu1 %v6829_v34  ;;  %v2698_v11 = vsel %vm7279_vm14, %v2696_v0, %v2697_v56  ;;  %v2218_v15 = vshrl.u32 %v2064_v6, 16  ;;  %v2067_v55 = vld [vmem:[#allocation2 + $0x54] sm:$0xf]  ;;  %v2068_v56 = vld [vmem:[#allocation2 + $0x58] sm:$0xf] }
  0xde   : > { %4892 = vmatprep.mubr.bf16.mxu0 %v5850_v9  ;;  %6675 = vmatpush3.bf16.msra.mxu0 %v6839_v58  ;;  %v2215_v58 = vrot.slane %v2213_v50, 5  ;;  %v2206_v3 = vsel %vm7022_vm11, %v2201_v26, %v2205_v33  ;;  %v2221_v17 = vshll.u32 %v2064_v6, 16  ;;  %v5852_v53 = vcombine.low %v7630_v63, %v2698_v11  ;;  %v2069_v57 = vld [vmem:[#allocation2 + $0x5c] sm:$0x1] }
  0xdf   : > { %v2211_v9 = vrot.slane %v2210_v62, 4  ;;  %v1800_v19 = vsel %vm7279_vm14, %v5779_v52, %v1799_v46  ;;  %v1801_v61 = vrot.slane %v1799_v46, 4  ;;  %v2227_v20 = vshll.u32 %v2065_v7, 16  ;;  %6676 = vmatprep.subr.bf16.mxu0 %v6842_v27  ;;  %v301_v52 = vld [vmem:[%s6951_s20 + $0xf8] sm:$0xff] }
  0xe0   : > { %v2220_v8 = vrot.slane %v2218_v15, 4  ;;  %v2223_v24 = vrot.slane %v2221_v17, 5  ;;  %v2231_v25 = vshrl.u32 %v2065_v7, 16  ;;  %v2237_v28 = vshll.u32 %v2066_v12, 16  ;;  %v2582_v7 = vld [vmem:[#allocation2 + $0x60] sm:$0xe] }
  0xe1   : > { %v2216_v35 = vsel %vm7022_vm11, %v2211_v9, %v2215_v58  ;;  %v1803_v30 = vsel %vm7279_vm14, %v1801_v61, %v1802_v5  ;;  %v2229_v4 = vrot.slane %v2227_v20, 5  ;;  %v5837_v37 = vrot.slane %v2579_v22, 9  ;;  %v2583_v9 = vld [vmem:[#allocation2 + $0x64] sm:$0xf] }
  0xe2   : > { %v5819_v29 = vcombine.low %v2206_v3, %v2216_v35  ;;  %v5795_v31 = vcombine.low %v1800_v19, %v1803_v30  ;;  %v2224_v34 = vor.u32 %v2223_v24, %v2220_v8  ;;  %v2233_v16 = vrot.slane %v2231_v25, 4  ;;  %6677 = vmatpush3.bf16.msra.mxu0 %v6842_v27  ;;  %v6845_v27 = vld [vmem:[%s8590_s1 + $0x230] sm:$0xff]   ;;  %v1656_v30 = vld [vmem:[#allocation2 + $0xa8] sm:$0xe] }
  0xe3   : > { %v2239_v38 = vrot.slane %v2237_v28, 5  ;;  %v2704_v40 = vrot.slane %v2581_v36, 5  ;;  %v7646_v32 = vrot.slane %v657_v59, 7  ;;  %v5780_v49 = vrot.slane %v1653_v41, 9  ;;  %v1658_v36 = vld [vmem:[#allocation2 + $0xb0] sm:$0x1]  ;;  %6678 = vmatprep.subr.bf16.mxu0 %v6845_v27 }
  0xe4   : > { %4804 = vmatmul.mubr.bf16.gmra.mrb[64].mxu1 %v5795_v31  ;;  %v2225_v42 = vrot.slane %v2224_v34, 4  ;;  %v2234_v44 = vor.u32 %v2233_v16, %v2229_v4  ;;  %v1809_v54 = vrot.slane %v1655_v47, 5  ;;  %v2242_v59 = vshrl.u32 %v2067_v55, 16  ;;  %v2072_v47 = vld [vmem:[#allocation2 + $0x68] sm:$0x1] }
  0xe5   : > { %4893 = vmatmul.mubr.bf16.gmra.mrb[60].mxu0 %v5818_v43  ;;  %v1654_v43 = vld [vmem:[#allocation2 + $0xa0] sm:$0xf]  ;;  %4811 = vmatprep.mubr.bf16.mxu1 %v6833_v21  ;;  %v2245_v1 = vshll.u32 %v2067_v55, 16  ;;  %v2251_v6 = vshll.u32 %v2068_v56, 16  ;;  %v2255_v17 = vshrl.u32 %v2068_v56, 16  ;;  %v2261_v20 = vshll.u32 %v2069_v57, 16 }
  0xe6   : > { %4900 = vmatprep.mubr.bf16.mxu0 %v5851_v23  ;;  %v2580_v23 = vld [vmem:[#allocation2 + $0x58] sm:$0xf]  ;;  %v1806_v51 = vrot.slane %v1654_v43, 5  ;;  %v2230_v26 = vsel %vm7022_vm11, %v2225_v42, %v2229_v4  ;;  %v2235_v58 = vrot.slane %v2234_v44, 4  ;;  %v2244_v5 = vrot.slane %v2242_v59, 4  ;;  %6679 = vmatpush3.bf16.msra.mxu0 %v6845_v27 }
  0xe7   : > { %v2701_v39 = vrot.slane %v2580_v23, 5  ;;  %v2247_v15 = vrot.slane %v2245_v1, 5  ;;  %v2253_v61 = vrot.slane %v2251_v6, 5  ;;  %v5838_v21 = vrot.slane %v2582_v7, 9  ;;  %v1657_v23 = vld [vmem:[#allocation2 + $0xac] sm:$0xf] }
  0xe8   : > { %v1807_v63 = vsel %vm7279_vm14, %v5780_v49, %v1806_v51  ;;  %v1808_v0 = vrot.slane %v1806_v51, 4  ;;  %v2240_v3 = vsel %vm7022_vm11, %v2235_v58, %v2239_v38  ;;  %v2257_v8 = vrot.slane %v2255_v17, 4  ;;  %v2071_v43 = vld [vmem:[#allocation2 + $0x64] sm:$0xf]  ;;  %v832_v57 = vld [vmem:[#allocation2 + $0xc0] sm:$0xf] }
  0xe9   : > { %v2702_v50 = vsel %vm7279_vm14, %v5837_v37, %v2701_v39  ;;  %v2703_v33 = vrot.slane %v2701_v39, 4  ;;  %v5820_v11 = vcombine.low %v2230_v26, %v2240_v3  ;;  %v2248_v35 = vor.u32 %v2247_v15, %v2244_v5  ;;  %v2585_v1 = vld [vmem:[#allocation2 + $0x6c] sm:$0xe]  ;;  %v2587_v6 = vld [vmem:[#allocation2 + $0x74] sm:$0x1]  ;;  %v6848_v7 = vld [vmem:[%s8590_s1 + $0x238] sm:$0xff]  }
  0xea   : > { %v1810_v12 = vsel %vm7279_vm14, %v1808_v0, %v1809_v54  ;;  %v2708_v24 = vrot.slane %v2583_v9, 5  ;;  %v7664_v4 = vpack.c.bf16 %v301_v52, %v301_v52  ;;  %v660_v28 = vshll.u32 %v7613_v60, 16  ;;  %v1659_v17 = vld [vmem:[#allocation2 + $0xb4] sm:$0xe]  ;;  %6680 = vmatprep.subr.bf16.mxu0 %v6848_v7 }
  0xeb   : > { %v2705_v62 = vsel %vm7279_vm14, %v2703_v33, %v2704_v40  ;;  %v5796_v19 = vcombine.low %v1807_v63, %v1810_v12  ;;  %v2249_v22 = vrot.slane %v2248_v35, 4  ;;  %v2258_v31 = vor.u32 %v2257_v8, %v2253_v61  ;;  %v2070_v40 = vld [vmem:[#allocation2 + $0x60] sm:$0xf]  ;;  %v1661_v35 = vld [vmem:[#allocation2 + $0xbc] sm:$0x1]  ;;  %6681 = vmatpush3.bf16.msra.mxu0 %v6848_v7 }
  0xec   : > { %v5853_v46 = vcombine.low %v2702_v50, %v2705_v62  ;;  %v2709_v34 = vsel %vm7279_vm14, %v5838_v21, %v2708_v24  ;;  %v2710_v16 = vrot.slane %v2708_v24, 4  ;;  %v5781_v37 = vrot.slane %v1656_v30, 9  ;;  %v1660_v21 = vld [vmem:[#allocation2 + $0xb8] sm:$0xf] }
  0xed   : > { %4901 = vmatmul.mubr.bf16.gmra.mrb[64].mxu0 %v5819_v29  ;;  %4812 = vmatmul.mubr.bf16.gmra.mrb[68].mxu1 %v5796_v19  ;;  %v2263_v29 = vrot.slane %v2261_v20, 5  ;;  %v1813_v38 = vrot.slane %v1657_v23, 5  ;;  %v1816_v39 = vrot.slane %v1658_v36, 5  ;;  %v662_v41 = vor.u32 %v660_v28, %v7646_v32  ;;  %v2073_v28 = vld [vmem:[#allocation2 + $0x6c] sm:$0xf] }
  0xee   : > { %4908 = vmatprep.mubr.bf16.mxu0 %v5852_v53  ;;  %v2584_v53 = vld [vmem:[#allocation2 + $0x68] sm:$0x1]  ;;  %4819 = vmatprep.mubr.bf16.mxu1 %v6834_v2  ;;  %v2254_v60 = vsel %vm7022_vm11, %v2249_v22, %v2253_v61  ;;  %v2259_v42 = vrot.slane %v2258_v31, 4  ;;  %v2266_v49 = vshrl.u32 %v2070_v40, 16  ;;  %v2269_v54 = vshll.u32 %v2070_v40, 16 }
  0xef   : > { %v2711_v25 = vrot.slane %v2584_v53, 5  ;;  %v1814_v33 = vsel %vm7279_vm14, %v5781_v37, %v1813_v38  ;;  %v1815_v51 = vrot.slane %v1813_v38, 4  ;;  %v2275_v58 = vshll.u32 %v2071_v43, 16  ;;  %v2586_v2 = vld [vmem:[#allocation2 + $0x70] sm:$0xf] }
  0xf0   : > { %v2264_v55 = vsel %vm7022_vm11, %v2259_v42, %v2263_v29  ;;  %v2268_v26 = vrot.slane %v2266_v49, 4  ;;  %v2279_v56 = vshrl.u32 %v2071_v43, 16  ;;  %v2271_v63 = vrot.slane %v2269_v54, 5  ;;  %v2074_v23 = vld [vmem:[#allocation2 + $0x70] sm:$0xf] }
  0xf1   : > { %v2712_v44 = vsel %vm7279_vm14, %v2710_v16, %v2711_v25  ;;  %v5821_v59 = vcombine.low %v2254_v60, %v2264_v55  ;;  %v1817_v62 = vsel %vm7279_vm14, %v1815_v51, %v1816_v39  ;;  %v2285_v0 = vshll.u32 %v2072_v47, 16  ;;  %v2075_v36 = vld [vmem:[#allocation2 + $0x74] sm:$0x1]  ;;  %v2589_v60 = vld [vmem:[#allocation2 + $0x7c] sm:$0xf] }
  0xf2   : > { %v5854_v50 = vcombine.low %v2709_v34, %v2712_v44  ;;  %v5797_v52 = vcombine.low %v1814_v33, %v1817_v62  ;;  %v2277_v3 = vrot.slane %v2275_v58, 5  ;;  %v663_v5 = vrot.slane %v7646_v32, 4  ;;  %v2994_v33 = vld [vmem:[#allocation2 + $0x18] sm:$0xf] }
  0xf3   : > { %v2272_v9 = vor.u32 %v2271_v63, %v2268_v26  ;;  %v665_v12 = vshrl.u32 %v7664_v4, 16  ;;  %v668_v15 = vshll.u32 %v7664_v4, 16  ;;  %v833_v61 = vsel %vm6995_vm9, %v662_v41, %v832_v57  ;;  %v2588_v41 = vld [vmem:[#allocation2 + $0x78] sm:$0xe] }
  0xf4   : > { %v5839_v32 = vrot.slane %v2585_v1, 9  ;;  %v2715_v20 = vrot.slane %v2586_v2, 5  ;;  %834 = vst [vmem:[#allocation2 + $0xc0] sm:$0xf] %v833_v61  ;;  %v2718_v25 = vrot.slane %v2587_v6, 5  ;;  %v5782_v27 = vrot.slane %v1659_v17, 9 }
  0xf5   : > { %4909 = vmatmul.mubr.bf16.gmra.mrb[68].mxu0 %v5820_v11  ;;  %v2287_v11 = vrot.slane %v2285_v0, 5  ;;  %4820 = vmatmul.mubr.bf16.gmra.mrb[72].mxu1 %v5797_v52  ;;  %v2273_v8 = vrot.slane %v2272_v9, 4  ;;  %v7690_v24 = vrot.slane %v665_v12, 7  ;;  %v1820_v45 = vrot.slane %v1660_v21, 5  ;;  %v2996_v0 = vld [vmem:[#allocation2 + $0x20] sm:$0x1] }
  0xf6   : > { %4916 = vmatprep.mubr.bf16.mxu0 %v5853_v46  ;;  %v2281_v46 = vrot.slane %v2279_v56, 4  ;;  %v2716_v30 = vsel %vm7279_vm14, %v5839_v32, %v2715_v20  ;;  %v2717_v4 = vrot.slane %v2715_v20, 4  ;;  %v1823_v16 = vrot.slane %v1661_v35, 5  ;;  %v2995_v56 = vld [vmem:[#allocation2 + $0x1c] sm:$0xf] }
  0xf7   : > { %v2278_v22 = vsel %vm7022_vm11, %v2273_v8, %v2277_v3  ;;  %v670_v31 = vor.u32 %v668_v15, %v7690_v24  ;;  %v672_v34 = vrot.slane %v7690_v24, 4  ;;  %v7704_v39 = vsel %vm7279_vm14, %v5782_v27, %v1820_v45  ;;  %v2077_v35 = vld [vmem:[#allocation2 + $0x7c] sm:$0xf]  ;;  %v2078_v8 = vld [vmem:[#allocation2 + $0x80] sm:$0x1] }
  0xf8   : > { %v2282_v19 = vor.u32 %v2281_v46, %v2277_v3  ;;  %v2719_v38 = vsel %vm7279_vm14, %v2717_v4, %v2718_v25  ;;  %v1822_v40 = vrot.slane %v1820_v45, 4  ;;  %v2290_v49 = vshrl.u32 %v2073_v28, 16 }
  0xf9   : > { %v671_v43 = vsel %vm7004_vm10, %v663_v5, %v670_v31  ;;  %v5855_v47 = vcombine.low %v2716_v30, %v2719_v38  ;;  %v2293_v55 = vshll.u32 %v2073_v28, 16  ;;  %v2299_v26 = vshll.u32 %v2074_v23, 16  ;;  %v2591_v38 = vld [vmem:[#allocation2 + $0x84] sm:$0xe] }
  0xfa   : > { %v2283_v29 = vrot.slane %v2282_v19, 4  ;;  %835 = vst [vmem:[#allocation2 + $0xc4] sm:$0xf] %v671_v43  ;;  %v7714_v54 = vsel %vm7279_vm14, %v1822_v40, %v1823_v16  ;;  %v2303_v58 = vshrl.u32 %v2074_v23, 16  ;;  %v2309_v62 = vshll.u32 %v2075_v36, 16 }
  0xfb   : > { %v5798_v48 = vcombine.low %v7704_v39, %v7714_v54  ;;  %v5840_v63 = vrot.slane %v2588_v41, 9  ;;  %v894_v1 = vld [vmem:[#allocation2 + $0xc0] sm:$0x1]  ;;  %v2295_v2 = vrot.slane %v2293_v55, 5  ;;  %v2301_v52 = vrot.slane %v2299_v26, 5 }
  0xfc   : > { %v2288_v37 = vsel %vm7022_vm11, %v2283_v29, %v2287_v11  ;;  %v2305_v3 = vrot.slane %v2303_v58, 4  ;;  %v2722_v46 = vrot.slane %v2589_v60, 5  ;;  %v895_v5 = vsel %vm6958_vm3, 0, %v894_v1  ;;  %v2076_v19 = vld [vmem:[#allocation2 + $0x78] sm:$0xf] }
  0xfd   : > { %4917 = vmatmul.mubr.bf16.gmra.mrb[72].mxu0 %v5821_v59  ;;  %v5822_v44 = vcombine.low %v2278_v22, %v2288_v37  ;;  %v2292_v59 = vrot.slane %v2290_v49, 4  ;;  %v2311_v6 = vrot.slane %v2309_v62, 5  ;;  %v3043_v9 = vshrl.u32 %v2994_v33, 16  ;;  %896 = vst [vmem:[#allocation2 + $0xc0] sm:$0x1] %v895_v5 }
  0xfe   : > { %4924 = vmatprep.mubr.bf16.mxu0 %v5854_v50  ;;  %v2590_v50 = vld [vmem:[#allocation2 + $0x80] sm:$0x1]  ;;  %v2306_v12 = vor.u32 %v2305_v3, %v2301_v52  ;;  %v2723_v15 = vsel %vm7279_vm14, %v5840_v63, %v2722_v46  ;;  %v2724_v17 = vrot.slane %v2722_v46, 4  ;;  %v3046_v32 = vshll.u32 %v2994_v33, 16  ;;  %v2592_v43 = vld [vmem:[#allocation2 + $0x88] sm:$0xf] }
  0xff   : > { %v2725_v7 = vrot.slane %v2590_v50, 5  ;;  %v2296_v11 = vor.u32 %v2295_v2, %v2292_v59  ;;  %v3045_v61 = vrot.slane %v3043_v9, 4  ;;  %v3052_v20 = vshll.u32 %v2995_v56, 16  ;;  %v2997_v58 = vld [vmem:[#allocation2 + $0x24] sm:$0xf] }
 0x100   : > { %v3056_v21 = vshrl.u32 %v2995_v56, 16  ;;  %v2307_v27 = vrot.slane %v2306_v12, 4  ;;  %v3062_v30 = vshll.u32 %v2996_v0, 16  ;;  %v3048_v45 = vrot.slane %v3046_v32, 5  ;;  %v2998_v9 = vld [vmem:[#allocation2 + $0x28] sm:$0xf] }
 0x101   : > { %v7686_v53 = vpop.f32.mrb[0].mxu0  ;;  %v2297_v25 = vrot.slane %v2296_v11, 4  ;;  %v2726_v29 = vsel %vm7279_vm14, %v2724_v17, %v2725_v7  ;;  %v3054_v28 = vrot.slane %v3052_v20, 5  ;;  %v2314_v37 = vshrl.u32 %v2076_v19, 16 }
 0x102   : > { %v7706_v42 = vpop.f32.mrb[1].mxu0  ;;  %v5856_v4 = vcombine.low %v2723_v15, %v2726_v29  ;;  %v3058_v22 = vrot.slane %v3056_v21, 4  ;;  %v2312_v23 = vsel %vm7022_vm11, %v2307_v27, %v2311_v6  ;;  %v3064_v36 = vrot.slane %v3062_v30, 5  ;;  %v2999_v15 = vld [vmem:[#allocation2 + $0x2c] sm:$0x1] }
 0x103   : > { %v7710_v51 = vpop.f32.mrb[2].mxu0  ;;  %v2302_v16 = vsel %vm7022_vm11, %v2297_v25, %v2301_v52  ;;  %v3049_v41 = vor.u32 %v3048_v45, %v3045_v61  ;;  %v2316_v50 = vrot.slane %v2314_v37, 4  ;;  %v2323_v33 = vshll.u32 %v2077_v35, 16  ;;  %v6840_v25 = vld [vmem:[#allocation2 + $0x18] sm:$0xff]   ;;  %v2080_v45 = vld [vmem:[#allocation2 + $0x88] sm:$0xf] }
 0x104   : > { %v7716_v57 = vpop.f32.mrb[3].mxu0  ;;  %v5823_v40 = vcombine.low %v2302_v16, %v2312_v23  ;;  %v3059_v60 = vor.u32 %v3058_v22, %v3054_v28  ;;  %v2327_v55 = vshrl.u32 %v2077_v35, 16  ;;  %v2333_v26 = vshll.u32 %v2078_v8, 16  ;;  %v6838_v56 = vld [vmem:[#allocation2 + $0xc0] sm:$0xff]   ;;  %v2594_v37 = vld [vmem:[#allocation2 + $0x90] sm:$0xe] }
 0x105   : > { %4925 = vmatmul.mubr.bf16.gmra.mrb[76].mxu0 %v5822_v44  ;;  %v2317_v44 = vshll.u32 %v2076_v19, 16  ;;  %v3050_v59 = vrot.slane %v3049_v41, 4  ;;  %v7736_v0 = vadd.f32 %v7706_v42, %v7686_v53  ;;  %v2325_v1 = vrot.slane %v2323_v33, 5  ;;  %4827 = vmatprep.mubr.bf16.mxu1 %v6838_v56  ;;  %v2079_v19 = vld [vmem:[#allocation2 + $0x84] sm:$0xf] }
 0x106   : > { %4932 = vmatprep.mubr.bf16.mxu0 %v5855_v47  ;;  %v2593_v47 = vld [vmem:[#allocation2 + $0x8c] sm:$0x1]  ;;  %v3060_v62 = vrot.slane %v3059_v60, 4  ;;  %v2329_v2 = vrot.slane %v2327_v55, 4  ;;  %v2335_v52 = vrot.slane %v2333_v26, 5  ;;  %v5841_v3 = vrot.slane %v2591_v38, 9  ;;  %4828 = vmatmul.mubr.bf16.gmra.mrb[76].mxu1 %v5798_v48 }
 0x107   : > { %v2319_v63 = vrot.slane %v2317_v44, 5  ;;  %v3055_v46 = vsel %vm7022_vm11, %v3050_v59, %v3054_v28  ;;  %v2729_v7 = vrot.slane %v2592_v43, 5  ;;  %v2732_v12 = vrot.slane %v2593_v47, 5  ;;  %v2081_v28 = vld [vmem:[#allocation2 + $0x8c] sm:$0x1] }
 0x108   : > { %v3065_v5 = vsel %vm7022_vm11, %v3060_v62, %v3064_v36  ;;  %v2330_v42 = vor.u32 %v2329_v2, %v2325_v1  ;;  %v3067_v17 = vshrl.u32 %v2997_v58, 16  ;;  %v3070_v21 = vshll.u32 %v2997_v58, 16  ;;  %v2595_v38 = vld [vmem:[#allocation2 + $0x94] sm:$0xf]  ;;  %v2596_v43 = vld [vmem:[#allocation2 + $0x98] sm:$0x1] }
 0x109   : > { %v2320_v6 = vor.u32 %v2319_v63, %v2316_v50  ;;  %v5879_v53 = vcombine.low %v3055_v46, %v3065_v5  ;;  %v2730_v32 = vsel %vm7279_vm14, %v5841_v3, %v2729_v7  ;;  %v2731_v20 = vrot.slane %v2729_v7, 4  ;;  %v3000_v47 = vld [vmem:[#allocation2 + $0x30] sm:$0xf] }
 0x10a   : > { %v2331_v8 = vrot.slane %v2330_v42, 4  ;;  %v3069_v27 = vrot.slane %v3067_v17, 4  ;;  %v3076_v39 = vshll.u32 %v2998_v9, 16  ;;  %v3080_v54 = vshrl.u32 %v2998_v9, 16  ;;  %v3001_v9 = vld [vmem:[#allocation2 + $0x34] sm:$0xf] }
 0x10b   : > { %v2321_v61 = vrot.slane %v2320_v6, 4  ;;  %5029 = vmatprep.mubr.bf16.mxu1 %v5879_v53  ;;  %v2733_v29 = vsel %vm7279_vm14, %v2731_v20, %v2732_v12  ;;  %v3072_v30 = vrot.slane %v3070_v21, 5  ;;  %v2338_v44 = vshrl.u32 %v2079_v19, 16  ;;  %v3002_v17 = vld [vmem:[#allocation2 + $0x38] sm:$0x1]  ;;  %v6841_v20 = vld [vmem:[#allocation2 + $0x24] sm:$0xff]  }
 0x10c   : > { %v2336_v22 = vsel %vm7022_vm11, %v2331_v8, %v2335_v52  ;;  %v5857_v16 = vcombine.low %v2730_v32, %v2733_v29  ;;  %v3078_v23 = vrot.slane %v3076_v39, 5  ;;  %v3082_v36 = vrot.slane %v3080_v54, 4  ;;  %v2082_v29 = vld [vmem:[#allocation2 + $0x90] sm:$0xf] }
 0x10d   : > { %4933 = vmatmul.mubr.bf16.gmra.mrb[80].mxu0 %v5823_v40  ;;  %v2326_v48 = vsel %vm7022_vm11, %v2321_v61, %v2325_v1  ;;  %v3073_v41 = vor.u32 %v3072_v30, %v3069_v27  ;;  %v2341_v33 = vshll.u32 %v2079_v19, 16  ;;  %v2347_v55 = vshll.u32 %v2080_v45, 16 }
 0x10e   : > { %4940 = vmatprep.mubr.bf16.mxu0 %v5856_v4  ;;  %v3086_v4 = vshll.u32 %v2999_v15, 16  ;;  %v5824_v40 = vcombine.low %v2326_v48, %v2336_v22  ;;  %v3083_v50 = vor.u32 %v3082_v36, %v3078_v23  ;;  %v2351_v26 = vshrl.u32 %v2080_v45, 16  ;;  %5030 = vmatmul.mubr.bf16.vlgmr.msra.gmra.mrb[80].mxu1 %v6840_v25  ;;  %v2083_v22 = vld [vmem:[#allocation2 + $0x94] sm:$0xf] }
 0x10f   : > { %v7726_v31 = vpop.f32.mrb[4].mxu0  ;;  %v3074_v56 = vrot.slane %v3073_v41, 4  ;;  %v2340_v59 = vrot.slane %v2338_v44, 4  ;;  %v2357_v62 = vshll.u32 %v2081_v28, 16  ;;  %v5842_v63 = vrot.slane %v2594_v37, 9 }
 0x110   : > { %v7732_v49 = vpop.f32.mrb[5].mxu0  ;;  %v3088_v60 = vrot.slane %v3086_v4, 5  ;;  %v3084_v1 = vrot.slane %v3083_v50, 4  ;;  %v2343_v2 = vrot.slane %v2341_v33, 5  ;;  %v2349_v52 = vrot.slane %v2347_v55, 5 }
 0x111   : > { %v2353_v3 = vrot.slane %v2351_v26, 4  ;;  %v3079_v46 = vsel %vm7022_vm11, %v3074_v56, %v3078_v23  ;;  %v2359_v5 = vrot.slane %v2357_v62, 5  ;;  %v2736_v6 = vrot.slane %v2595_v38, 5  ;;  %v7765_v61 = vpop.f32.mrb[6].mxu0  ;;  %v2597_v41 = vld [vmem:[#allocation2 + $0x9c] sm:$0xe] }
 0x112   : > { %v2739_v7 = vrot.slane %v2596_v43, 5  ;;  %v3089_v42 = vsel %vm7022_vm11, %v3084_v1, %v3088_v60  ;;  %v2344_v12 = vor.u32 %v2343_v2, %v2340_v59  ;;  %v3091_v19 = vshrl.u32 %v3000_v47, 16  ;;  %v2598_v33 = vld [vmem:[#allocation2 + $0xa0] sm:$0xf]  ;;  %v2599_v62 = vld [vmem:[#allocation2 + $0xa4] sm:$0x1] }
 0x113   : > { %v2354_v15 = vor.u32 %v2353_v3, %v2349_v52  ;;  %v5880_v32 = vcombine.low %v3079_v46, %v3089_v42  ;;  %v2737_v21 = vsel %vm7279_vm14, %v5842_v63, %v2736_v6  ;;  %v2738_v8 = vrot.slane %v2736_v6, 4  ;;  %v3003_v3 = vld [vmem:[#allocation2 + $0x3c] sm:$0xf] }
 0x114   : > { %v7742_v11 = vpop.f32.mrb[0].mxu1  ;;  %v3094_v25 = vshll.u32 %v3000_v47, 16  ;;  %v2345_v27 = vrot.slane %v2344_v12, 4  ;;  %v3093_v54 = vrot.slane %v3091_v19, 4  ;;  %v3100_v48 = vshll.u32 %v3001_v9, 16 }
 0x115   : > { %v7749_v35 = vpop.f32.mrb[1].mxu1  ;;  %4941 = vmatmul.mubr.bf16.gmra.mrb[84].mxu0 %v5824_v40  ;;  %v2355_v39 = vrot.slane %v2354_v15, 4  ;;  %5037 = vmatprep.mubr.bf16.mxu1 %v5880_v32  ;;  %v2740_v30 = vsel %vm7279_vm14, %v2738_v8, %v2739_v7  ;;  %v3104_v45 = vshrl.u32 %v3001_v9, 16  ;;  %v3110_v28 = vshll.u32 %v3002_v17, 16  ;;  %v2084_v40 = vld [vmem:[#allocation2 + $0x98] sm:$0x1] }
 0x116   : > { %v7757_v58 = vpop.f32.mrb[2].mxu1  ;;  %4948 = vmatprep.mubr.bf16.mxu0 %v5857_v16  ;;  %v3096_v4 = vrot.slane %v3094_v25, 5  ;;  %v7771_v16 = vpop.f32.mrb[7].mxu0  ;;  %v2350_v23 = vsel %vm7022_vm11, %v2345_v27, %v2349_v52  ;;  %v5858_v37 = vcombine.low %v2737_v21, %v2740_v30  ;;  %v3102_v38 = vrot.slane %v3100_v48, 5  ;;  %5038 = vmatmul.mubr.bf16.gmra.mrb[84].mxu1 %v6841_v20  ;;  %v6843_v17 = vld [vmem:[#allocation2 + $0x30] sm:$0xff]  }
 0x117   : > { %v7761_v53 = vpop.f32.mrb[3].mxu1  ;;  %v2360_v36 = vsel %vm7022_vm11, %v2355_v39, %v2359_v5  ;;  %v3106_v47 = vrot.slane %v3104_v45, 4  ;;  %v3112_v50 = vrot.slane %v3110_v28, 5  ;;  %v2362_v55 = vshrl.u32 %v2082_v29, 16  ;;  %v3004_v25 = vld [vmem:[#allocation2 + $0x40] sm:$0xf] }
 0x118   : > { %v5825_v44 = vcombine.low %v2350_v23, %v2360_v36  ;;  %v3097_v43 = vor.u32 %v3096_v4, %v3093_v54  ;;  %v2365_v26 = vshll.u32 %v2082_v29, 16  ;;  %v2371_v56 = vshll.u32 %v2083_v22, 16  ;;  %v3005_v27 = vld [vmem:[#allocation2 + $0x44] sm:$0x1]  ;;  %v2085_v4 = vld [vmem:[#allocation2 + $0x9c] sm:$0xf] }
 0x119   : > { %v2375_v59 = vshrl.u32 %v2083_v22, 16  ;;  %v3107_v1 = vor.u32 %v3106_v47, %v3102_v38  ;;  %v2381_v2 = vshll.u32 %v2084_v40, 16  ;;  %v5843_v52 = vrot.slane %v2597_v41, 9  ;;  %v2086_v45 = vld [vmem:[#allocation2 + $0xa0] sm:$0xf] }
 0x11a   : > { %v3098_v63 = vrot.slane %v3097_v43, 4  ;;  %v2364_v5 = vrot.slane %v2362_v55, 4  ;;  %v2367_v6 = vrot.slane %v2365_v26, 5  ;;  %v2373_v7 = vrot.slane %v2371_v56, 5  ;;  %v2600_v47 = vld [vmem:[#allocation2 + $0xa8] sm:$0xe] }
 0x11b   : > { %v2377_v9 = vrot.slane %v2375_v59, 4  ;;  %v3108_v12 = vrot.slane %v3107_v1, 4  ;;  %v2383_v15 = vrot.slane %v2381_v2, 5  ;;  %v2743_v19 = vrot.slane %v2598_v33, 5 }
 0x11c   : > { %v3103_v42 = vsel %vm7022_vm11, %v3098_v63, %v3102_v38  ;;  %v2368_v20 = vor.u32 %v2367_v6, %v2364_v5  ;;  %v2746_v8 = vrot.slane %v2599_v62, 5  ;;  %v3115_v39 = vshrl.u32 %v3003_v3, 16  ;;  %v3006_v5 = vld [vmem:[#allocation2 + $0x48] sm:$0xf] }
 0x11d   : > { %4949 = vmatmul.mubr.bf16.gmra.mrb[88].mxu0 %v5825_v44  ;;  %v2378_v21 = vor.u32 %v2377_v9, %v2373_v7  ;;  %v3113_v54 = vsel %vm7022_vm11, %v3108_v12, %v3112_v50  ;;  %v2744_v48 = vsel %vm7279_vm14, %v5843_v52, %v2743_v19  ;;  %v2745_v29 = vrot.slane %v2743_v19, 4  ;;  %v2601_v52 = vld [vmem:[#allocation2 + $0xac] sm:$0xf] }
 0x11e   : > { %4956 = vmatprep.mubr.bf16.mxu0 %v5858_v37  ;;  %v3118_v30 = vshll.u32 %v3003_v3, 16  ;;  %v5881_v28 = vcombine.low %v3103_v42, %v3113_v54  ;;  %v2369_v22 = vrot.slane %v2368_v20, 4  ;;  %v3117_v36 = vrot.slane %v3115_v39, 4  ;;  %v2087_v37 = vld [vmem:[#allocation2 + $0xa4] sm:$0x1]  ;;  %v7793_v50 = vpop.f32.mrb[8].mxu0 }
 0x11f   : > { %v2379_v23 = vrot.slane %v2378_v21, 4  ;;  %v2747_v40 = vsel %vm7279_vm14, %v2745_v29, %v2746_v8  ;;  %v3124_v44 = vshll.u32 %v3004_v25, 16  ;;  %v3128_v43 = vshrl.u32 %v3004_v25, 16  ;;  %v7799_v59 = vpop.f32.mrb[9].mxu0  ;;  %v2602_v3 = vld [vmem:[#allocation2 + $0xb0] sm:$0x1] }
 0x120   : > { %v7777_v60 = vpop.f32.mrb[4].mxu1  ;;  %v3120_v41 = vrot.slane %v3118_v30, 5  ;;  %5045 = vmatprep.mubr.bf16.mxu1 %v5881_v28  ;;  %v2374_v33 = vsel %vm7022_vm11, %v2369_v22, %v2373_v7  ;;  %v5859_v26 = vcombine.low %v2744_v48, %v2747_v40  ;;  %v3134_v56 = vshll.u32 %v3005_v27, 16  ;;  %v3007_v7 = vld [vmem:[#allocation2 + $0x4c] sm:$0xf]  ;;  %v7801_v8 = vpop.f32.mrb[10].mxu0 }
 0x121   : > { %v7779_v46 = vpop.f32.mrb[5].mxu1  ;;  %v2384_v55 = vsel %vm7022_vm11, %v2379_v23, %v2383_v15  ;;  %5046 = vmatmul.mubr.bf16.gmra.mrb[88].mxu1 %v6843_v17  ;;  %v3126_v1 = vrot.slane %v3124_v44, 5  ;;  %v3130_v2 = vrot.slane %v3128_v43, 4  ;;  %v2386_v9 = vshrl.u32 %v2085_v4, 16  ;;  %v6844_v40 = vld [vmem:[#allocation2 + $0x3c] sm:$0xff]  }
 0x122   : > { %v7783_v32 = vpop.f32.mrb[6].mxu1  ;;  %v5826_v62 = vcombine.low %v2374_v33, %v2384_v55  ;;  %v3121_v63 = vor.u32 %v3120_v41, %v3117_v36  ;;  %v3136_v6 = vrot.slane %v3134_v56, 5  ;;  %v2389_v42 = vshll.u32 %v2085_v4, 16  ;;  %v7805_v4 = vpop.f32.mrb[11].mxu0  ;;  %v3008_v41 = vld [vmem:[#allocation2 + $0x50] sm:$0x1] }
 0x123   : > { %v7789_v38 = vpop.f32.mrb[7].mxu1  ;;  %v2395_v12 = vshll.u32 %v2086_v45, 16  ;;  %v3131_v15 = vor.u32 %v3130_v2, %v3126_v1  ;;  %v2399_v20 = vshrl.u32 %v2086_v45, 16  ;;  %v2405_v21 = vshll.u32 %v2087_v37, 16  ;;  %v2088_v56 = vld [vmem:[#allocation2 + $0xa8] sm:$0xf] }
 0x124   : > { %v3122_v19 = vrot.slane %v3121_v63, 4  ;;  %v2388_v17 = vrot.slane %v2386_v9, 4  ;;  %v2391_v25 = vrot.slane %v2389_v42, 5  ;;  %v5844_v39 = vrot.slane %v2600_v47, 9  ;;  %v2090_v42 = vld [vmem:[#allocation2 + $0xb0] sm:$0x1] }
 0x125   : > { %4957 = vmatmul.mubr.bf16.gmra.mrb[92].mxu0 %v5826_v62  ;;  %v2397_v27 = vrot.slane %v2395_v12, 5  ;;  %v3132_v48 = vrot.slane %v3131_v15, 4  ;;  %v2401_v29 = vrot.slane %v2399_v20, 4  ;;  %v2407_v30 = vrot.slane %v2405_v21, 5  ;;  %v2603_v12 = vld [vmem:[#allocation2 + $0xb4] sm:$0xe] }
 0x126   : > { %4964 = vmatprep.mubr.bf16.mxu0 %v5859_v26  ;;  %v3127_v54 = vsel %vm7022_vm11, %v3122_v19, %v3126_v1  ;;  %v2392_v28 = vor.u32 %v2391_v25, %v2388_v17  ;;  %v2750_v22 = vrot.slane %v2601_v52, 5  ;;  %v2753_v23 = vrot.slane %v2602_v3, 5  ;;  %v2089_v52 = vld [vmem:[#allocation2 + $0xac] sm:$0xf] }
 0x127   : > { %v3139_v45 = vshrl.u32 %v3006_v5, 16  ;;  %v3137_v36 = vsel %vm7022_vm11, %v3132_v48, %v3136_v6  ;;  %v2402_v37 = vor.u32 %v2401_v29, %v2397_v27  ;;  %v3142_v44 = vshll.u32 %v3006_v5, 16  ;;  %v2604_v48 = vld [vmem:[#allocation2 + $0xb8] sm:$0xf] }
 0x128   : > { %v3148_v43 = vshll.u32 %v3007_v7, 16  ;;  %v5882_v47 = vcombine.low %v3127_v54, %v3137_v36  ;;  %v2393_v33 = vrot.slane %v2392_v28, 4  ;;  %v2751_v55 = vsel %vm7279_vm14, %v5844_v39, %v2750_v22 }
 0x129   : > { %v2752_v26 = vrot.slane %v2750_v22, 4  ;;  %v2403_v62 = vrot.slane %v2402_v37, 4  ;;  %v3141_v63 = vrot.slane %v3139_v45, 4  ;;  %v3144_v1 = vrot.slane %v3142_v44, 5  ;;  %v2605_v45 = vld [vmem:[#allocation2 + $0xbc] sm:$0x1] }
 0x12a   : > { %v3150_v2 = vrot.slane %v3148_v43, 5  ;;  %5053 = vmatprep.mubr.bf16.mxu1 %v5882_v47  ;;  %v2398_v3 = vsel %vm7022_vm11, %v2393_v33, %v2397_v27  ;;  %v3152_v6 = vshrl.u32 %v3007_v7, 16  ;;  %v3158_v9 = vshll.u32 %v3008_v41, 16  ;;  %v3009_v41 = vld [vmem:[#allocation2 + $0x54] sm:$0xf] }
 0x12b   : > { %v2754_v5 = vsel %vm7279_vm14, %v2752_v26, %v2753_v23  ;;  %v2408_v19 = vsel %vm7022_vm11, %v2403_v62, %v2407_v30  ;;  %5054 = vmatmul.mubr.bf16.gmra.mrb[92].mxu1 %v6844_v40  ;;  %v3145_v20 = vor.u32 %v3144_v1, %v3141_v63  ;;  %v2410_v21 = vshrl.u32 %v2088_v56, 16  ;;  %v3010_v26 = vld [vmem:[#allocation2 + $0x58] sm:$0xf] }
 0x12c   : > { %v5860_v15 = vcombine.low %v2751_v55, %v2754_v5  ;;  %v5827_v25 = vcombine.low %v2398_v3, %v2408_v19  ;;  %v3154_v39 = vrot.slane %v3152_v6, 4  ;;  %v3160_v54 = vrot.slane %v3158_v9, 5  ;;  %v3011_v5 = vld [vmem:[#allocation2 + $0x5c] sm:$0x1]  ;;  %v2091_v19 = vld [vmem:[#allocation2 + $0xb4] sm:$0xf] }
 0x12d   : > { %v2413_v27 = vshll.u32 %v2088_v56, 16  ;;  %v3146_v7 = vrot.slane %v3145_v20, 4  ;;  %v2412_v28 = vrot.slane %v2410_v21, 4  ;;  %v2419_v22 = vshll.u32 %v2089_v52, 16 }
 0x12e   : > { %v2423_v23 = vshrl.u32 %v2089_v52, 16  ;;  %4965 = vmatmul.mubr.bf16.gmra.mrb[96].mxu0 %v5827_v25  ;;  %v3155_v30 = vor.u32 %v3154_v39, %v3150_v2  ;;  %v2429_v37 = vshll.u32 %v2090_v42, 16  ;;  %v5845_v40 = vrot.slane %v2603_v12, 9  ;;  %v6846_v52 = vld [vmem:[#allocation2 + $0x48] sm:$0xff]  }
 0x12f   : > { %v2415_v36 = vrot.slane %v2413_v27, 5  ;;  %4972 = vmatprep.mubr.bf16.mxu0 %v5860_v15  ;;  %v3151_v43 = vsel %vm7022_vm11, %v3146_v7, %v3150_v2  ;;  %v2421_v47 = vrot.slane %v2419_v22, 5  ;;  %v2757_v55 = vrot.slane %v2604_v48, 5  ;;  %v2092_v22 = vld [vmem:[#allocation2 + $0xb8] sm:$0xf] }
 0x130   : > { %v2425_v33 = vrot.slane %v2423_v23, 4  ;;  %v3156_v62 = vrot.slane %v3155_v30, 4  ;;  %v2431_v1 = vrot.slane %v2429_v37, 5  ;;  %v2760_v3 = vrot.slane %v2605_v45, 5 }
 0x131   : > { %v2416_v63 = vor.u32 %v2415_v36, %v2412_v28  ;;  %v2758_v42 = vsel %vm7279_vm14, %v5845_v40, %v2757_v55  ;;  %v2759_v12 = vrot.slane %v2757_v55, 4  ;;  %v3163_v2 = vshrl.u32 %v3009_v41, 16 }
 0x132   : > { %v2426_v9 = vor.u32 %v2425_v33, %v2421_v47  ;;  %v3161_v15 = vsel %vm7022_vm11, %v3156_v62, %v3160_v54  ;;  %v3166_v21 = vshll.u32 %v3009_v41, 16  ;;  %v3172_v25 = vshll.u32 %v3010_v26, 16  ;;  %v2093_v41 = vld [vmem:[#allocation2 + $0xbc] sm:$0x1] }
 0x133   : > { %v2417_v20 = vrot.slane %v2416_v63, 4  ;;  %v5883_v27 = vcombine.low %v3151_v43, %v3161_v15  ;;  %v2761_v7 = vsel %vm7279_vm14, %v2759_v12, %v2760_v3  ;;  %v3165_v28 = vrot.slane %v3163_v2, 4 }
 0x134   : > { %v7817_v17 = vpop.f32.mrb[12].mxu0  ;;  %v2427_v48 = vrot.slane %v2426_v9, 4  ;;  %v5861_v45 = vcombine.low %v2758_v42, %v2761_v7  ;;  %v3168_v30 = vrot.slane %v3166_v21, 5  ;;  %v3174_v36 = vrot.slane %v3172_v25, 5  ;;  %v836_v9 = vld [vmem:[#allocation2 + $0xc8] sm:$0x1] }
 0x135   : > { %v7819_v29 = vpop.f32.mrb[13].mxu0  ;;  %v2422_v23 = vsel %vm7022_vm11, %v2417_v20, %v2421_v47  ;;  %5061 = vmatprep.mubr.bf16.mxu1 %v5883_v27  ;;  %v3176_v37 = vshrl.u32 %v3010_v26, 16  ;;  %v3182_v40 = vshll.u32 %v3011_v5, 16  ;;  %v2434_v43 = vshrl.u32 %v2091_v19, 16  ;;  %v2606_v47 = vld [vmem:[#allocation2 + $0xc0] sm:$0xe] }
 0x136   : > { %v7821_v44 = vpop.f32.mrb[14].mxu0  ;;  %v2432_v54 = vsel %vm7022_vm11, %v2427_v48, %v2431_v1  ;;  %5062 = vmatmul.mubr.bf16.gmra.mrb[96].mxu1 %v6846_v52  ;;  %v3169_v62 = vor.u32 %v3168_v30, %v3165_v28  ;;  %v2437_v63 = vshll.u32 %v2091_v19, 16  ;;  %v2443_v3 = vshll.u32 %v2092_v22, 16  ;;  %v2607_v20 = vld [vmem:[#allocation2 + $0xc4] sm:$0xf] }
 0x137   : > { %v5828_v55 = vcombine.low %v2422_v23, %v2432_v54  ;;  %v3178_v42 = vrot.slane %v3176_v37, 4  ;;  %v3184_v12 = vrot.slane %v3182_v40, 5  ;;  %v2436_v2 = vrot.slane %v2434_v43, 4  ;;  %v3012_v25 = vld [vmem:[#allocation2 + $0x60] sm:$0xf]  ;;  %v6847_v40 = vld [vmem:[#allocation2 + $0x54] sm:$0xff]  }
 0x138   : > { %v2447_v15 = vshrl.u32 %v2092_v22, 16  ;;  %v3170_v1 = vrot.slane %v3169_v62, 4  ;;  %v2439_v26 = vrot.slane %v2437_v63, 5  ;;  %v2445_v5 = vrot.slane %v2443_v3, 5  ;;  %v3013_v7 = vld [vmem:[#allocation2 + $0x64] sm:$0xf] }
 0x139   : > { %4973 = vmatmul.mubr.bf16.gmra.mrb[100].mxu0 %v5828_v55  ;;  %v2453_v21 = vshll.u32 %v2093_v41, 16  ;;  %v3179_v27 = vor.u32 %v3178_v42, %v3174_v36  ;;  %v837_v52 = vsel %vm6958_vm3, %v672_v34, %v836_v9  ;;  %v5846_v19 = vrot.slane %v2606_v47, 9  ;;  %v7849_v55 = vpop.f32.mrb[15].mxu0  ;;  %v2094_v63 = vld [vmem:[#allocation2 + $0xc0] sm:$0xf] }
 0x13a   : > { %4980 = vmatprep.mubr.bf16.mxu0 %v5861_v45  ;;  %v2449_v48 = vrot.slane %v2447_v15, 4  ;;  %v3175_v28 = vsel %vm7022_vm11, %v3170_v1, %v3174_v36  ;;  %v2440_v22 = vor.u32 %v2439_v26, %v2436_v2  ;;  %838 = vst [vmem:[#allocation2 + $0xc8] sm:$0x1] %v837_v52  ;;  %v2764_v30 = vrot.slane %v2607_v20, 5  ;;  %v3014_v45 = vld [vmem:[#allocation2 + $0x68] sm:$0x1] }
 0x13b   : > { %v7825_v56 = vpop.f32.mrb[8].mxu1  ;;  %v2455_v23 = vrot.slane %v2453_v21, 5  ;;  %v3180_v54 = vrot.slane %v3179_v27, 4  ;;  %v3187_v41 = vshrl.u32 %v3012_v25, 16  ;;  %v3190_v43 = vshll.u32 %v3012_v25, 16 }
 0x13c   : > { %v7827_v6 = vpop.f32.mrb[9].mxu1  ;;  %v2450_v37 = vor.u32 %v2449_v48, %v2445_v5  ;;  %v2441_v24 = vrot.slane %v2440_v22, 4  ;;  %v7853_v34 = vsel %vm7279_vm14, %v5846_v19, %v2764_v30  ;;  %v7855_v62 = vrot.slane %v2764_v30, 4  ;;  %v2095_v15 = vld [vmem:[#allocation2 + $0xc4] sm:$0xf] }
 0x13d   : > { %v7833_v39 = vpop.f32.mrb[10].mxu1  ;;  %v3196_v36 = vshll.u32 %v3013_v7, 16  ;;  %v3185_v9 = vsel %vm7022_vm11, %v3180_v54, %v3184_v12  ;;  %v3189_v42 = vrot.slane %v3187_v41, 4  ;;  %v3192_v2 = vrot.slane %v3190_v43, 5  ;;  %v3015_v22 = vld [vmem:[#allocation2 + $0x6c] sm:$0xf] }
 0x13e   : > { %v7841_v33 = vpop.f32.mrb[11].mxu1  ;;  %v2451_v47 = vrot.slane %v2450_v37, 4  ;;  %v5884_v1 = vcombine.low %v3175_v28, %v3185_v9  ;;  %v2446_v26 = vsel %vm7022_vm11, %v2441_v24, %v2445_v5  ;;  %v3200_v25 = vshrl.u32 %v3013_v7, 16  ;;  %v3016_v41 = vld [vmem:[#allocation2 + $0x70] sm:$0xf] }
 0x13f   : > { %v3198_v21 = vrot.slane %v3196_v36, 5  ;;  %v3193_v48 = vor.u32 %v3192_v2, %v3189_v42  ;;  %v3206_v52 = vshll.u32 %v3014_v45, 16  ;;  %v2458_v19 = vshrl.u32 %v2094_v63, 16  ;;  %v3017_v9 = vld [vmem:[#allocation2 + $0x74] sm:$0x1] }
 0x140   : > { %v2456_v27 = vsel %vm7022_vm11, %v2451_v47, %v2455_v23  ;;  %5069 = vmatprep.mubr.bf16.mxu1 %v5884_v1  ;;  %v3202_v30 = vrot.slane %v3200_v25, 4  ;;  %v2461_v54 = vshll.u32 %v2094_v63, 16  ;;  %v2467_v37 = vshll.u32 %v2095_v15, 16 }
 0x141   : > { %v5829_v12 = vcombine.low %v2446_v26, %v2456_v27  ;;  %5070 = vmatmul.mubr.bf16.gmra.mrb[100].mxu1 %v6847_v40  ;;  %v949_v28 = vld [vmem:[#allocation2 + $0xc8] sm:$0x1]  ;;  %v3194_v5 = vrot.slane %v3193_v48, 4  ;;  %v3208_v24 = vrot.slane %v3206_v52, 5  ;;  %v2460_v7 = vrot.slane %v2458_v19, 4  ;;  %v7885_v25 = vpop.f32.mrb[16].mxu0 }
 0x142   : > { %v2471_v36 = vshrl.u32 %v2095_v15, 16  ;;  %v950_v23 = vsel %vm6969_vm4, 0, %v949_v28  ;;  %v3203_v45 = vor.u32 %v3202_v30, %v3198_v21  ;;  %v2463_v47 = vrot.slane %v2461_v54, 5  ;;  %v3506_v26 = vld [vmem:[#allocation2 + $0x18] sm:$0xe]  ;;  %v6849_v52 = vld [vmem:[#allocation2 + $0x60] sm:$0xff]  }
 0x143   : > { %4981 = vmatmul.mubr.bf16.gmra.mrb[104].mxu0 %v5829_v12  ;;  %v7871_v42 = vrot.slane %v2467_v37, 5  ;;  %951 = vst [vmem:[#allocation2 + $0xc8] sm:$0x1] %v950_v23  ;;  %v3199_v40 = vsel %vm7022_vm11, %v3194_v5, %v3198_v21  ;;  %v7879_v1 = vadd.f32 %v7716_v57, %v7710_v51  ;;  %v7883_v15 = vadd.f32 %v7749_v35, %v7742_v11  ;;  %v3507_v12 = vld [vmem:[#allocation2 + $0x1c] sm:$0xf]  ;;  %v7892_v35 = vpop.f32.mrb[17].mxu0 }
 0x144   : > { %v2473_v2 = vrot.slane %v2471_v36, 4  ;;  %v3204_v27 = vrot.slane %v3203_v45, 4  ;;  %v2464_v48 = vor.u32 %v2463_v47, %v2460_v7  ;;  %v7889_v19 = vadd.f32 %v7761_v53, %v7757_v58  ;;  %v3508_v30 = vld [vmem:[#allocation2 + $0x20] sm:$0x1]  ;;  %v3509_v11 = vld [vmem:[#allocation2 + $0x24] sm:$0xe] }
 0x145   : > { %v7857_v3 = vpop.f32.mrb[12].mxu1  ;;  %8612 = vst [vmem:[#allocation6_spill] sm:$0xff] %v7879_v1  ;;  %8613 = vst [vmem:[#allocation7_spill] sm:$0xff] %v7883_v15  ;;  %v3211_v21 = vshrl.u32 %v3015_v22, 16  ;;  %v3214_v57 = vshll.u32 %v3015_v22, 16  ;;  %v3220_v54 = vshll.u32 %v3016_v41, 16 }
 0x146   : > { %v7861_v20 = vpop.f32.mrb[13].mxu1  ;;  %8614 = vst [vmem:[#allocation8_spill] sm:$0xff] %v7889_v19  ;;  %v2474_v51 = vor.u32 %v2473_v2, %v7871_v42  ;;  %v3224_v37 = vshrl.u32 %v3016_v41, 16  ;;  %v3209_v28 = vsel %vm7022_vm11, %v3204_v27, %v3208_v24  ;;  %v2465_v5 = vrot.slane %v2464_v48, 4  ;;  %v3510_v23 = vld [vmem:[#allocation2 + $0x28] sm:$0xf] }
 0x147   : > { %v7867_v43 = vpop.f32.mrb[14].mxu1  ;;  %v3213_v7 = vrot.slane %v3211_v21, 4  ;;  %v3230_v36 = vshll.u32 %v3017_v9, 16  ;;  %v7896_v58 = vpop.f32.mrb[18].mxu0  ;;  %v5885_v53 = vcombine.low %v3199_v40, %v3209_v28  ;;  %v3216_v47 = vrot.slane %v3214_v57, 5 }
 0x148   : > { %v7873_v63 = vpop.f32.mrb[15].mxu1  ;;  %v2475_v45 = vrot.slane %v2474_v51, 4  ;;  %v3222_v19 = vrot.slane %v3220_v54, 5  ;;  %v3511_v2 = vld [vmem:[#allocation2 + $0x2c] sm:$0x1]  ;;  %v7898_v22 = vpop.f32.mrb[19].mxu0  ;;  %v2470_v41 = vsel %vm7022_vm11, %v2465_v5, %v7871_v42  ;;  %v7909_v42 = vadd.f32 %v7732_v49, %v7726_v31 }
 0x149   : > { %v3226_v15 = vrot.slane %v3224_v37, 4  ;;  %v3232_v13 = vrot.slane %v3230_v36, 5  ;;  %v5895_v24 = vrot.slane %v3506_v26, 9  ;;  %5077 = vmatprep.mubr.bf16.mxu1 %v5885_v53  ;;  %v3217_v9 = vor.u32 %v3216_v47, %v3213_v7  ;;  %v6850_v53 = vld [vmem:[#allocation2 + $0x6c] sm:$0xff]  }
 0x14a   : > { %v3604_v48 = vrot.slane %v3507_v12, 5  ;;  %v3607_v21 = vrot.slane %v3508_v30, 5  ;;  %v5896_v40 = vrot.slane %v3509_v11, 9  ;;  %v2608_v57 = vld [vmem:[#allocation2 + $0xc8] sm:$0x1]  ;;  %5078 = vmatmul.mubr.bf16.gmra.mrb[104].mxu1 %v6849_v52  ;;  %v3611_v18 = vrot.slane %v3510_v23, 5 }
 0x14b   : > { %v2096_v54 = vld [vmem:[#allocation2 + $0xc8] sm:$0x1]  ;;  %v3227_v28 = vor.u32 %v3226_v15, %v3222_v19  ;;  %v3614_v1 = vrot.slane %v3511_v2, 5  ;;  %v2767_v26 = vrot.slane %v2608_v57, 5  ;;  %v3218_v5 = vrot.slane %v3217_v9, 4 }
 0x14c   : > { %v2477_v37 = vshll.u32 %v2096_v54, 16  ;;  %v3605_v12 = vsel %vm7279_vm14, %v5895_v24, %v3604_v48  ;;  %v3606_v7 = vrot.slane %v3604_v48, 4  ;;  %v7917_v52 = vsel %vm7279_vm14, %v5896_v40, %v3611_v18  ;;  %v3018_v2 = vld [vmem:[#allocation2 + $0x78] sm:$0xf]  ;;  %v3019_v48 = vld [vmem:[#allocation2 + $0x7c] sm:$0xf] }
 0x14d   : > { %v7903_v27 = vpop.f32.mrb[16].mxu1  ;;  %v3228_v11 = vrot.slane %v3227_v28, 4  ;;  %v3613_v15 = vrot.slane %v3611_v18, 4  ;;  %v2768_v31 = vsel %vm7279_vm14, %v7855_v62, %v2767_v26  ;;  %v3223_v23 = vsel %vm7022_vm11, %v3218_v5, %v3222_v19  ;;  %v3020_v19 = vld [vmem:[#allocation2 + $0x80] sm:$0x1] }
 0x14e   : > { %v7905_v51 = vpop.f32.mrb[17].mxu1  ;;  %v2479_v49 = vrot.slane %v2477_v37, 5  ;;  %v7928_v47 = vadd.f32 %v7771_v16, %v7765_v61  ;;  %v5862_v24 = vcombine.low %v7853_v34, %v2768_v31  ;;  %v3608_v9 = vsel %vm7279_vm14, %v3606_v7, %v3607_v21  ;;  %v3512_v40 = vld [vmem:[#allocation2 + $0x30] sm:$0xe]  ;;  %v3513_v54 = vld [vmem:[#allocation2 + $0x34] sm:$0xf] }
 0x14f   : > { %v7913_v30 = vpop.f32.mrb[18].mxu1  ;;  %v3233_v18 = vsel %vm7022_vm11, %v3228_v11, %v3232_v13  ;;  %v7937_v62 = vsel %vm7279_vm14, %v3613_v15, %v3614_v1  ;;  %v5911_v57 = vcombine.low %v3605_v12, %v3608_v9  ;;  %v3514_v13 = vld [vmem:[#allocation2 + $0x38] sm:$0x1]  ;;  %v3515_v28 = vld [vmem:[#allocation2 + $0x3c] sm:$0xe]  ;;  %v7945_v1 = vadd.f32 %v7779_v46, %v7777_v60 }
 0x150   : > { %v7919_v36 = vpop.f32.mrb[19].mxu1  ;;  %v2480_v61 = vsel %vm7022_vm11, %v2475_v45, %v2479_v49  ;;  %v5886_v16 = vcombine.low %v3223_v23, %v3233_v18  ;;  %v5912_v34 = vcombine.low %v7917_v52, %v7937_v62  ;;  %4988 = vmatprep.mubr.bf16.mxu0 %v5862_v24  ;;  %v7949_v26 = vadd.f32 %v7789_v38, %v7783_v32  ;;  %v3516_v45 = vld [vmem:[#allocation2 + $0x40] sm:$0xf]  ;;  %v3517_v5 = vld [vmem:[#allocation2 + $0x44] sm:$0x1] }
 0x151   : > { %v5830_v21 = vcombine.low %v2470_v41, %v2480_v61  ;;  %8615 = vst [vmem:[#allocation9_spill] sm:$0xff] %v7945_v1  ;;  %v3235_v37 = vshrl.u32 %v3018_v2, 16  ;;  %v3238_v11 = vshll.u32 %v3018_v2, 16  ;;  %v3244_v7 = vshll.u32 %v3019_v48, 16 }
 0x152   : > { %8616 = vst [vmem:[#allocation10_spill] sm:$0xff] %v7949_v26  ;;  %5085 = vmatprep.mubr.bf16.mxu1 %v5886_v16  ;;  %v3248_v15 = vshrl.u32 %v3019_v48, 16  ;;  %v3254_v31 = vshll.u32 %v3020_v19, 16  ;;  %v5897_v49 = vrot.slane %v3512_v40, 9  ;;  %v3618_v60 = vrot.slane %v3513_v54, 5 }
 0x153   : > { %4989 = vmatmul.mubr.bf16.gmra.mrb[108].mxu0 %v5830_v21  ;;  %5086 = vmatmul.mubr.bf16.gmra.mrb[108].mxu1 %v6850_v53  ;;  %v3237_v41 = vrot.slane %v3235_v37, 4  ;;  %v3621_v46 = vrot.slane %v3514_v13, 5  ;;  %v3240_v23 = vrot.slane %v3238_v11, 5  ;;  %v3246_v32 = vrot.slane %v3244_v7, 5 }
 0x154   : > { %6682 = vmatprep.mubr.bf16.mxu0 %v5911_v57  ;;  %v3250_v38 = vrot.slane %v3248_v15, 4  ;;  %v3256_v24 = vrot.slane %v3254_v31, 5  ;;  %v3619_v18 = vsel %vm7279_vm14, %v5897_v49, %v3618_v60  ;;  %v3620_v9 = vrot.slane %v3618_v60, 4  ;;  %v3021_v57 = vld [vmem:[#allocation2 + $0x84] sm:$0xf]  ;;  %v6851_v15 = vld [vmem:[#allocation2 + $0x78] sm:$0xff]  }
 0x155   : > { %v5898_v61 = vrot.slane %v3515_v28, 9  ;;  %v3625_v2 = vrot.slane %v3516_v45, 5  ;;  %v3241_v48 = vor.u32 %v3240_v23, %v3237_v41  ;;  %v3628_v53 = vrot.slane %v3517_v5, 5  ;;  %v3022_v45 = vld [vmem:[#allocation2 + $0x88] sm:$0xf] }
 0x156   : > { %v3251_v19 = vor.u32 %v3250_v38, %v3246_v32  ;;  %v7959_v40 = vadd.f32 %v7799_v59, %v7793_v50  ;;  %v3622_v13 = vsel %vm7279_vm14, %v3620_v9, %v3621_v46  ;;  %v7971_v37 = vadd.f32 %v7805_v4, %v7801_v8  ;;  %v3023_v5 = vld [vmem:[#allocation2 + $0x8c] sm:$0x1]  ;;  %v3518_v41 = vld [vmem:[#allocation2 + $0x48] sm:$0xe]  ;;  %v3520_v23 = vld [vmem:[#allocation2 + $0x50] sm:$0x1] }
 0x157   : > { %v7967_v21 = vsel %vm7279_vm14, %v5898_v61, %v3625_v2  ;;  %v3627_v28 = vrot.slane %v3625_v2, 4  ;;  %v3242_v50 = vrot.slane %v3241_v48, 4  ;;  %v5913_v7 = vcombine.low %v3619_v18, %v3622_v13  ;;  %v3519_v49 = vld [vmem:[#allocation2 + $0x4c] sm:$0xf]  ;;  %v3521_v9 = vld [vmem:[#allocation2 + $0x54] sm:$0xe] }
 0x158   : > { %v3252_v59 = vrot.slane %v3251_v19, 4  ;;  %v7977_v31 = vadd.f32 %v7827_v6, %v7825_v56  ;;  %v7983_v8 = vadd.f32 %v7841_v33, %v7833_v39  ;;  %v3259_v4 = vshrl.u32 %v3021_v57, 16  ;;  %v7990_v61 = vpop.f32.mrb[20].mxu1  ;;  %v3522_v19 = vld [vmem:[#allocation2 + $0x58] sm:$0xf] }
 0x159   : > { %v7951_v12 = vpop.f32.mrb[20].mxu0  ;;  %v3629_v60 = vsel %vm7279_vm14, %v3627_v28, %v3628_v53  ;;  %v3262_v46 = vshll.u32 %v3021_v57, 16  ;;  %v3247_v38 = vsel %vm7022_vm11, %v3242_v50, %v3246_v32  ;;  %v3268_v6 = vshll.u32 %v3022_v45, 16  ;;  %v7995_v53 = vpop.f32.mrb[21].mxu1 }
 0x15a   : > { %v7955_v16 = vpop.f32.mrb[21].mxu0  ;;  %8617 = vst [vmem:[#allocation11_spill] sm:$0xff] %v7977_v31  ;;  %8618 = vst [vmem:[#allocation12_spill] sm:$0xff] %v7983_v8  ;;  %v3257_v18 = vsel %vm7022_vm11, %v3252_v59, %v3256_v24  ;;  %v5914_v56 = vcombine.low %v7967_v21, %v3629_v60  ;;  %v3261_v33 = vrot.slane %v3259_v4, 4  ;;  %v3272_v48 = vshrl.u32 %v3022_v45, 16  ;;  %v7997_v52 = vpop.f32.mrb[22].mxu1 }
 0x15b   : > { %v7961_v54 = vpop.f32.mrb[22].mxu0  ;;  %6683 = vmatmul.mubr.bf16.vlgmr.msra.gmra.mrb[112].mxu0 %v5912_v34  ;;  %v5887_v39 = vcombine.low %v3247_v38, %v3257_v18  ;;  %v3264_v2 = vrot.slane %v3262_v46, 5  ;;  %v3270_v32 = vrot.slane %v3268_v6, 5  ;;  %v3278_v24 = vshll.u32 %v3023_v5, 16  ;;  %v3523_v21 = vld [vmem:[#allocation2 + $0x5c] sm:$0x1] }
 0x15c   : > { %v7973_v11 = vpop.f32.mrb[23].mxu0  ;;  %6686 = vmatprep.mubr.bf16.mxu0 %v5913_v7  ;;  %v5899_v57 = vrot.slane %v3518_v41, 9  ;;  %v3632_v13 = vrot.slane %v3519_v49, 5  ;;  %v3274_v50 = vrot.slane %v3272_v48, 4  ;;  %v3635_v59 = vrot.slane %v3520_v23, 5  ;;  %v8001_v46 = vpop.f32.mrb[23].mxu1 }
 0x15d   : > { %5093 = vmatprep.mubr.bf16.mxu1 %v5887_v39  ;;  %v3265_v28 = vor.u32 %v3264_v2, %v3261_v33  ;;  %v5900_v60 = vrot.slane %v3521_v9, 9  ;;  %v3280_v62 = vrot.slane %v3278_v24, 5  ;;  %v3639_v4 = vrot.slane %v3522_v19, 5  ;;  %v3024_v7 = vld [vmem:[#allocation2 + $0x90] sm:$0xf]  ;;  %v6852_v24 = vld [vmem:[#allocation2 + $0x84] sm:$0xff]  }
 0x15e   : > { %5094 = vmatmul.mubr.bf16.gmra.mrb[112].mxu1 %v6851_v15  ;;  %v3633_v34 = vsel %vm7279_vm14, %v5899_v57, %v3632_v13  ;;  %v3634_v45 = vrot.slane %v3632_v13, 4  ;;  %v3275_v41 = vor.u32 %v3274_v50, %v3270_v32  ;;  %v3642_v49 = vrot.slane %v3523_v21, 5  ;;  %v3025_v23 = vld [vmem:[#allocation2 + $0x94] sm:$0xf]  ;;  %v3026_v18 = vld [vmem:[#allocation2 + $0x98] sm:$0x1] }
 0x15f   : > { %v3266_v5 = vrot.slane %v3265_v28, 4  ;;  %v8005_v38 = vadd.f32 %v7819_v29, %v7817_v17  ;;  %v8011_v6 = vsel %vm7279_vm14, %v5900_v60, %v3639_v4  ;;  %v3641_v9 = vrot.slane %v3639_v4, 4  ;;  %v3524_v33 = vld [vmem:[#allocation2 + $0x60] sm:$0xe]  ;;  %v3525_v2 = vld [vmem:[#allocation2 + $0x64] sm:$0xf] }
 0x160   : > { %v3636_v15 = vsel %vm7279_vm14, %v3634_v45, %v3635_v59  ;;  %v8015_v39 = vadd.f32 %v7849_v55, %v7821_v44  ;;  %v3276_v29 = vrot.slane %v3275_v41, 4  ;;  %v8023_v57 = vadd.f32 %v7861_v20, %v7857_v3  ;;  %v3526_v13 = vld [vmem:[#allocation2 + $0x68] sm:$0x1]  ;;  %v3527_v50 = vld [vmem:[#allocation2 + $0x6c] sm:$0xe]  ;;  %v8036_v4 = vpop.f32.mrb[24].mxu1 }
 0x161   : > { %v3271_v17 = vsel %vm7022_vm11, %v3266_v5, %v3270_v32  ;;  %v5915_v19 = vcombine.low %v3633_v34, %v3636_v15  ;;  %v3643_v21 = vsel %vm7279_vm14, %v3641_v9, %v3642_v49  ;;  %v8029_v44 = vadd.f32 %v7873_v63, %v7867_v43  ;;  %v3528_v59 = vld [vmem:[#allocation2 + $0x70] sm:$0xf]  ;;  %v3529_v34 = vld [vmem:[#allocation2 + $0x74] sm:$0x1] }
 0x162   : > { %v8017_v48 = vpop.f32.mrb[24].mxu0  ;;  %8619 = vst [vmem:[#allocation13_spill] sm:$0xff] %v8023_v57  ;;  %v3283_v55 = vshrl.u32 %v3024_v7, 16  ;;  %v3286_v28 = vshll.u32 %v3024_v7, 16  ;;  %v3281_v32 = vsel %vm7022_vm11, %v3276_v29, %v3280_v62  ;;  %v5916_v60 = vcombine.low %v8011_v6, %v3643_v21  ;;  %v3030_v57 = vld [vmem:[#allocation2 + $0xa8] sm:$0xf] }
 0x163   : > { %8620 = vst [vmem:[#allocation14_spill] sm:$0xff] %v8029_v44  ;;  %6687 = vmatmul.mubr.bf16.gmra.mrb[116].mxu0 %v5914_v56  ;;  %v3292_v3 = vshll.u32 %v3025_v23, 16  ;;  %v3296_v20 = vshrl.u32 %v3025_v23, 16  ;;  %v8034_v45 = vpop.f32.mrb[25].mxu0  ;;  %v5888_v5 = vcombine.low %v3271_v17, %v3281_v32  ;;  %v3302_v7 = vshll.u32 %v3026_v18, 16  ;;  %v8040_v56 = vpop.f32.mrb[25].mxu1 }
 0x164   : > { %6690 = vmatprep.mubr.bf16.mxu0 %v5915_v19  ;;  %v3285_v43 = vrot.slane %v3283_v55, 4  ;;  %v3288_v63 = vrot.slane %v3286_v28, 5  ;;  %v8038_v41 = vpop.f32.mrb[26].mxu0  ;;  %v5901_v15 = vrot.slane %v3524_v33, 9  ;;  %v3646_v6 = vrot.slane %v3525_v2, 5  ;;  %v8044_v23 = vpop.f32.mrb[26].mxu1 }
 0x165   : > { %v3294_v49 = vrot.slane %v3292_v3, 5  ;;  %v3298_v62 = vrot.slane %v3296_v20, 4  ;;  %v8042_v9 = vpop.f32.mrb[27].mxu0  ;;  %5101 = vmatprep.mubr.bf16.mxu1 %v5888_v5  ;;  %v3304_v21 = vrot.slane %v3302_v7, 5  ;;  %v3649_v17 = vrot.slane %v3526_v13, 5  ;;  %v8046_v55 = vpop.f32.mrb[27].mxu1 }
 0x166   : > { %v3289_v29 = vor.u32 %v3288_v63, %v3285_v43  ;;  %v5902_v19 = vrot.slane %v3527_v50, 9  ;;  %5102 = vmatmul.mubr.bf16.gmra.mrb[116].mxu1 %v6852_v24  ;;  %v3647_v28 = vsel %vm7279_vm14, %v5901_v15, %v3646_v6  ;;  %v3648_v32 = vrot.slane %v3646_v6, 4  ;;  %v3027_v13 = vld [vmem:[#allocation2 + $0x9c] sm:$0xf]  ;;  %v3028_v50 = vld [vmem:[#allocation2 + $0xa0] sm:$0xf] }
 0x167   : > { %v3299_v18 = vor.u32 %v3298_v62, %v3294_v49  ;;  %v3653_v3 = vrot.slane %v3528_v59, 5  ;;  %v3656_v2 = vrot.slane %v3529_v34, 5  ;;  %v8052_v20 = vadd.f32 %v7892_v35, %v7885_v25  ;;  %v6853_v63 = vld [vmem:[#allocation2 + $0x90] sm:$0xff]   ;;  %v3029_v7 = vld [vmem:[#allocation2 + $0xa4] sm:$0x1]  ;;  %v8066_v35 = vpop.f32.mrb[28].mxu1 }
 0x168   : > { %v3290_v33 = vrot.slane %v3289_v29, 4  ;;  %v8056_v5 = vadd.f32 %v7898_v22, %v7896_v58  ;;  %v3650_v24 = vsel %vm7279_vm14, %v3648_v32, %v3649_v17  ;;  %v3530_v62 = vld [vmem:[#allocation2 + $0x78] sm:$0xe]  ;;  %v6324_v15 = vadd.f32 %v7905_v51, %v7903_v27  ;;  %v3531_v29 = vld [vmem:[#allocation2 + $0x7c] sm:$0xf]  ;;  %v8622_v51 = vld [vmem:[#allocation6_spill] sm:$0xff] }
 0x169   : > { %v3300_v43 = vrot.slane %v3299_v18, 4  ;;  %v8062_v59 = vsel %vm7279_vm14, %v5902_v19, %v3653_v3  ;;  %v3655_v34 = vrot.slane %v3653_v3, 4  ;;  %v5917_v22 = vcombine.low %v3647_v28, %v3650_v24  ;;  %v3532_v3 = vld [vmem:[#allocation2 + $0x80] sm:$0x1]  ;;  %v3533_v44 = vld [vmem:[#allocation2 + $0x84] sm:$0xe] }
 0x16a   : > { %v8064_v25 = vpop.f32.mrb[28].mxu0  ;;  %v3295_v58 = vsel %vm7022_vm11, %v3290_v33, %v3294_v49  ;;  %v6327_v6 = vadd.f32 %v7919_v36, %v7913_v30  ;;  %v3307_v18 = vshrl.u32 %v3027_v13, 16  ;;  %v3310_v32 = vshll.u32 %v3027_v13, 16  ;;  %v3534_v36 = vld [vmem:[#allocation2 + $0x88] sm:$0xf]  ;;  %v8087_v33 = vpop.f32.mrb[29].mxu1 }
 0x16b   : > { %6691 = vmatmul.mubr.bf16.gmra.mrb[120].mxu0 %v5916_v60  ;;  %v3305_v17 = vsel %vm7022_vm11, %v3300_v43, %v3304_v21  ;;  %v3657_v19 = vsel %vm7279_vm14, %v3655_v34, %v3656_v2  ;;  %v8080_v27 = vadd.f32 %v6324_v15, %v7736_v0  ;;  %v3535_v60 = vld [vmem:[#allocation2 + $0x8c] sm:$0x1]  ;;  %v8085_v21 = vpop.f32.mrb[29].mxu0  ;;  %v3316_v43 = vshll.u32 %v3028_v50, 16 }
 0x16c   : > { %v5889_v49 = vcombine.low %v3295_v58, %v3305_v17  ;;  %6694 = vmatprep.mubr.bf16.mxu0 %v5917_v22  ;;  %v5918_v28 = vcombine.low %v8062_v59, %v3657_v19  ;;  %v8083_v30 = vadd.f32 %v6327_v6, %v8622_v51  ;;  %v3309_v2 = vrot.slane %v3307_v18, 4  ;;  %v8089_v34 = vpop.f32.mrb[30].mxu0  ;;  %v8091_v58 = vpop.f32.mrb[30].mxu1 }
 0x16d   : > { %8621 = vst [vmem:[#allocation15_spill] sm:$0xff] %v8080_v27  ;;  %v3312_v13 = vrot.slane %v3310_v32, 5  ;;  %v3320_v24 = vshrl.u32 %v3028_v50, 16  ;;  %v3326_v0 = vshll.u32 %v3029_v7, 16  ;;  %v5903_v59 = vrot.slane %v3530_v62, 9  ;;  %v8093_v6 = vpop.f32.mrb[31].mxu0 }
 0x16e   : > { %8623 = vst [vmem:[#allocation6_spill] sm:$0xff] %v8083_v30  ;;  %5109 = vmatprep.mubr.bf16.mxu1 %v5889_v49  ;;  %v3660_v22 = vrot.slane %v3531_v29, 5  ;;  %v3663_v15 = vrot.slane %v3532_v3, 5  ;;  %v8095_v17 = vpop.f32.mrb[31].mxu1  ;;  %v3318_v51 = vrot.slane %v3316_v43, 5  ;;  %v5904_v32 = vrot.slane %v3533_v44, 9 }
 0x16f   : > { %5110 = vmatmul.mubr.bf16.gmra.mrb[120].mxu1 %v6853_v63  ;;  %v3313_v19 = vor.u32 %v3312_v13, %v3309_v2  ;;  %v3322_v18 = vrot.slane %v3320_v24, 4  ;;  %v3328_v50 = vrot.slane %v3326_v0, 5  ;;  %v3667_v49 = vrot.slane %v3534_v36, 5  ;;  %v8107_v2 = vpop.f32.mrb[32].mxu1  ;;  %v3032_v24 = vld [vmem:[#allocation2 + $0xb0] sm:$0x1] }
 0x170   : > { %v3661_v8 = vsel %vm7279_vm14, %v5903_v59, %v3660_v22  ;;  %v3662_v31 = vrot.slane %v3660_v22, 4  ;;  %v3670_v3 = vrot.slane %v3535_v60, 5  ;;  %v8103_v26 = vadd.f32 %v7955_v16, %v7951_v12  ;;  %v3031_v60 = vld [vmem:[#allocation2 + $0xac] sm:$0xf]  ;;  %v6854_v22 = vld [vmem:[#allocation2 + $0x9c] sm:$0xff]  }
 0x171   : > { %v3314_v62 = vrot.slane %v3313_v19, 4  ;;  %v3323_v29 = vor.u32 %v3322_v18, %v3318_v51  ;;  %v3668_v13 = vsel %vm7279_vm14, %v5904_v32, %v3667_v49  ;;  %v3669_v36 = vrot.slane %v3667_v49, 4  ;;  %v8125_v18 = vpop.f32.mrb[33].mxu1  ;;  %v3538_v49 = vld [vmem:[#allocation2 + $0x98] sm:$0x1] }
 0x172   : > { %v3664_v44 = vsel %vm7279_vm14, %v3662_v31, %v3663_v15  ;;  %v8115_v43 = vadd.f32 %v7973_v11, %v7961_v54  ;;  %v6330_v31 = vadd.f32 %v7995_v53, %v7990_v61  ;;  %v3536_v15 = vld [vmem:[#allocation2 + $0x90] sm:$0xe]  ;;  %v6333_v11 = vadd.f32 %v8001_v46, %v7997_v52  ;;  %v8136_v1 = vpop.f32.mrb[34].mxu1 }
 0x173   : > { %6695 = vmatmul.mubr.bf16.gmra.mrb[124].mxu0 %v5918_v28  ;;  %v3319_v12 = vsel %vm7022_vm11, %v3314_v62, %v3318_v51  ;;  %v3324_v16 = vrot.slane %v3323_v29, 4  ;;  %v5919_v59 = vcombine.low %v3661_v8, %v3664_v44  ;;  %v3671_v54 = vsel %vm7279_vm14, %v3669_v36, %v3670_v3  ;;  %v3537_v51 = vld [vmem:[#allocation2 + $0x94] sm:$0xf]  ;;  %v3539_v29 = vld [vmem:[#allocation2 + $0x9c] sm:$0xe]  ;;  %v8141_v30 = vpop.f32.mrb[35].mxu1 }
 0x174   : > { %v3331_v28 = vshrl.u32 %v3030_v57, 16  ;;  %v3334_v32 = vshll.u32 %v3030_v57, 16  ;;  %v5920_v61 = vcombine.low %v3668_v13, %v3671_v54  ;;  %v8134_v53 = vadd.f32 %v6330_v31, %v7909_v42  ;;  %v3540_v44 = vld [vmem:[#allocation2 + $0xa0] sm:$0xf]  ;;  %v3541_v36 = vld [vmem:[#allocation2 + $0xa4] sm:$0x1] }
 0x175   : > { %v3329_v8 = vsel %vm7022_vm11, %v3324_v16, %v3328_v50  ;;  %6698 = vmatprep.mubr.bf16.mxu0 %v5919_v59  ;;  %v3340_v62 = vshll.u32 %v3031_v60, 16  ;;  %v8139_v52 = vadd.f32 %v6333_v11, %v7928_v47  ;;  %v3344_v16 = vshrl.u32 %v3031_v60, 16 }
 0x176   : > { %v8099_v7 = vpop.f32.mrb[32].mxu0  ;;  %8624 = vst [vmem:[#allocation16_spill] sm:$0xff] %v8134_v53  ;;  %v5890_v3 = vcombine.low %v3319_v12, %v3329_v8  ;;  %v3333_v46 = vrot.slane %v3331_v28, 4  ;;  %v3336_v57 = vrot.slane %v3334_v32, 5  ;;  %v3350_v13 = vshll.u32 %v3032_v24, 16  ;;  %v8143_v27 = vpop.f32.mrb[36].mxu1 }
 0x177   : > { %v8105_v63 = vpop.f32.mrb[33].mxu0  ;;  %8625 = vst [vmem:[#allocation17_spill] sm:$0xff] %v8139_v52  ;;  %v3342_v50 = vrot.slane %v3340_v62, 5  ;;  %v5905_v59 = vrot.slane %v3536_v15, 9  ;;  %v3674_v31 = vrot.slane %v3537_v51, 5  ;;  %v3677_v54 = vrot.slane %v3538_v49, 5 }
 0x178   : > { %v8117_v0 = vpop.f32.mrb[34].mxu0  ;;  %5117 = vmatprep.mubr.bf16.mxu1 %v5890_v3  ;;  %v3337_v42 = vor.u32 %v3336_v57, %v3333_v46  ;;  %v5906_v53 = vrot.slane %v3539_v29, 9  ;;  %v3346_v12 = vrot.slane %v3344_v16, 4  ;;  %v3352_v47 = vrot.slane %v3350_v13, 5  ;;  %v8145_v32 = vpop.f32.mrb[37].mxu1 }
 0x179   : > { %v8123_v19 = vpop.f32.mrb[35].mxu0  ;;  %5118 = vmatmul.mubr.bf16.gmra.mrb[124].mxu1 %v6854_v22  ;;  %v3681_v11 = vrot.slane %v3540_v44, 5  ;;  %v3684_v28 = vrot.slane %v3541_v36, 5  ;;  %v3675_v60 = vsel %vm7279_vm14, %v5905_v59, %v3674_v31  ;;  %v3676_v24 = vrot.slane %v3674_v31, 4  ;;  %v3033_v51 = vld [vmem:[#allocation2 + $0xb4] sm:$0xf] }
 0x17a   : > { %v3338_v8 = vrot.slane %v3337_v42, 4  ;;  %v8151_v15 = vadd.f32 %v8034_v45, %v8017_v48  ;;  %v8153_v49 = vpop.f32.mrb[38].mxu1  ;;  %v3347_v22 = vor.u32 %v3346_v12, %v3342_v50  ;;  %v8159_v44 = vadd.f32 %v8042_v9, %v8038_v41  ;;  %v3034_v3 = vld [vmem:[#allocation2 + $0xb8] sm:$0xf]  ;;  %v3035_v46 = vld [vmem:[#allocation2 + $0xbc] sm:$0x1] }
 0x17b   : > { %6699 = vmatmul.mubr.bf16.gmra.mrb[128].mxu0 %v5920_v61  ;;  %v3682_v62 = vsel %vm7279_vm14, %v5906_v53, %v3681_v11  ;;  %v3683_v29 = vrot.slane %v3681_v11, 4  ;;  %v8161_v57 = vpop.f32.mrb[39].mxu1  ;;  %v3678_v45 = vsel %vm7279_vm14, %v3676_v24, %v3677_v54  ;;  %v6336_v61 = vadd.f32 %v8040_v56, %v8036_v4  ;;  %v3542_v36 = vld [vmem:[#allocation2 + $0xa8] sm:$0xe]  ;;  %v3543_v16 = vld [vmem:[#allocation2 + $0xac] sm:$0xf] }
 0x17c   : > { %8626 = vst [vmem:[#allocation18_spill] sm:$0xff] %v8159_v44  ;;  %v3343_v48 = vsel %vm7022_vm11, %v3338_v8, %v3342_v50  ;;  %v6339_v53 = vadd.f32 %v8046_v55, %v8044_v23  ;;  %v3544_v41 = vld [vmem:[#allocation2 + $0xb0] sm:$0x1]  ;;  %v3348_v9 = vrot.slane %v3347_v22, 4  ;;  %v5921_v13 = vcombine.low %v3675_v60, %v3678_v45  ;;  %v3545_v31 = vld [vmem:[#allocation2 + $0xb4] sm:$0xe] }
 0x17d   : > { %v3685_v59 = vsel %vm7279_vm14, %v3683_v29, %v3684_v28  ;;  %v3355_v42 = vshrl.u32 %v3033_v51, 16  ;;  %v3546_v50 = vld [vmem:[#allocation2 + $0xb8] sm:$0xf]  ;;  %v8176_v11 = vadd.f32 %v6336_v61, %v7959_v40  ;;  %v3358_v56 = vshll.u32 %v3033_v51, 16  ;;  %v3547_v23 = vld [vmem:[#allocation2 + $0xbc] sm:$0x1] }
 0x17e   : > { %v8173_v12 = vpop.f32.mrb[40].mxu1  ;;  %v5922_v54 = vcombine.low %v3682_v62, %v3685_v59  ;;  %v8179_v4 = vadd.f32 %v6339_v53, %v7971_v37  ;;  %v3353_v28 = vsel %vm7022_vm11, %v3348_v9, %v3352_v47  ;;  %6702 = vmatprep.mubr.bf16.mxu0 %v5921_v13  ;;  %v6855_v60 = vld [vmem:[#allocation2 + $0xa8] sm:$0xff]   ;;  %v3364_v22 = vshll.u32 %v3034_v3, 16 }
 0x17f   : > { %8627 = vst [vmem:[#allocation19_spill] sm:$0xff] %v8176_v11  ;;  %v8183_v8 = vpop.f32.mrb[41].mxu1  ;;  %v3357_v24 = vrot.slane %v3355_v42, 4  ;;  %v3368_v62 = vshrl.u32 %v3034_v3, 16  ;;  %v5891_v37 = vcombine.low %v3343_v48, %v3353_v28  ;;  %v3360_v45 = vrot.slane %v3358_v56, 5 }
 0x180   : > { %8628 = vst [vmem:[#allocation20_spill] sm:$0xff] %v8179_v4  ;;  %v8189_v40 = vpop.f32.mrb[42].mxu1  ;;  %v3374_v51 = vshll.u32 %v3035_v46, 16  ;;  %v5907_v61 = vrot.slane %v3542_v36, 9  ;;  %v3366_v4 = vrot.slane %v3364_v22, 5  ;;  %v3688_v47 = vrot.slane %v3543_v16, 5 }
 0x181   : > { %v8193_v59 = vpop.f32.mrb[43].mxu1  ;;  %v3370_v11 = vrot.slane %v3368_v62, 4  ;;  %v3691_v9 = vrot.slane %v3544_v41, 5  ;;  %5125 = vmatprep.mubr.bf16.mxu1 %v5891_v37  ;;  %v3361_v3 = vor.u32 %v3360_v45, %v3357_v24  ;;  %v5908_v52 = vrot.slane %v3545_v31, 9  ;;  %v3036_v24 = vld [vmem:[#allocation2 + $0xc0] sm:$0xf] }
 0x182   : > { %v3376_v42 = vrot.slane %v3374_v51, 5  ;;  %v3695_v44 = vrot.slane %v3546_v50, 5  ;;  %5126 = vmatmul.mubr.bf16.gmra.mrb[128].mxu1 %v6855_v60  ;;  %v3689_v46 = vsel %vm7279_vm14, %v5907_v61, %v3688_v47  ;;  %v3690_v36 = vrot.slane %v3688_v47, 4  ;;  %v3038_v60 = vld [vmem:[#allocation2 + $0xc8] sm:$0x1] }
 0x183   : > { %6703 = vmatmul.mubr.bf16.gmra.mrb[132].mxu0 %v5922_v54  ;;  %v3371_v48 = vor.u32 %v3370_v11, %v3366_v4  ;;  %v3698_v56 = vrot.slane %v3547_v23, 5  ;;  %v3362_v28 = vrot.slane %v3361_v3, 4  ;;  %v8203_v22 = vadd.f32 %v8085_v21, %v8064_v25  ;;  %v3037_v23 = vld [vmem:[#allocation2 + $0xc4] sm:$0xf]  ;;  %v6856_v25 = vld [vmem:[#allocation2 + $0xb4] sm:$0xff]  }
 0x184   : > { %v3696_v16 = vsel %vm7279_vm14, %v5908_v52, %v3695_v44  ;;  %v3697_v41 = vrot.slane %v3695_v44, 4  ;;  %v3692_v50 = vsel %vm7279_vm14, %v3690_v36, %v3691_v9  ;;  %v8209_v54 = vadd.f32 %v8093_v6, %v8089_v34  ;;  %v3548_v37 = vld [vmem:[#allocation2 + $0xc0] sm:$0xe]  ;;  %v3549_v45 = vld [vmem:[#allocation2 + $0xc4] sm:$0xf] }
 0x185   : > { %v8181_v55 = vpop.f32.mrb[36].mxu0  ;;  %v3372_v31 = vrot.slane %v3371_v48, 4  ;;  %v6342_v11 = vadd.f32 %v8087_v33, %v8066_v35  ;;  %v3367_v52 = vsel %vm7022_vm11, %v3362_v28, %v3366_v4  ;;  %v5923_v44 = vcombine.low %v3689_v46, %v3692_v50  ;;  %v3550_v51 = vld [vmem:[#allocation2 + $0xc8] sm:$0x1]  ;;  %v952_v61 = vld [vmem:[#allocation2 + $0xd4] sm:$0x1] }
 0x186   : > { %v8187_v29 = vpop.f32.mrb[37].mxu0  ;;  %v3699_v21 = vsel %vm7279_vm14, %v3697_v41, %v3698_v56  ;;  %v6345_v62 = vadd.f32 %v8095_v17, %v8091_v58  ;;  %v3379_v4 = vshrl.u32 %v3036_v24, 16  ;;  %v3382_v17 = vshll.u32 %v3036_v24, 16  ;;  %v3551_v48 = vld [vmem:[#allocation2 + $0xcc] sm:$0xe] }
 0x187   : > { %v8191_v53 = vpop.f32.mrb[38].mxu0  ;;  %v3377_v35 = vsel %vm7022_vm11, %v3372_v31, %v3376_v42  ;;  %v5924_v33 = vcombine.low %v3696_v16, %v3699_v21  ;;  %v8224_v6 = vadd.f32 %v6342_v11, %v8005_v38  ;;  %6706 = vmatprep.mubr.bf16.mxu0 %v5923_v44  ;;  %v3388_v3 = vshll.u32 %v3037_v23, 16  ;;  %v3552_v28 = vld [vmem:[#allocation2 + $0xd0] sm:$0xf]  ;;  %v897_v50 = vld [vmem:[#allocation2 + $0xcc] sm:$0x1] }
 0x188   : > { %v8195_v13 = vpop.f32.mrb[39].mxu0  ;;  %v5892_v9 = vcombine.low %v3367_v52, %v3377_v35  ;;  %v8229_v58 = vadd.f32 %v6345_v62, %v8015_v39  ;;  %v3381_v36 = vrot.slane %v3379_v4, 4  ;;  %v3392_v42 = vshrl.u32 %v3037_v23, 16 }
 0x189   : > { %v3398_v56 = vshll.u32 %v3038_v60, 16  ;;  %v8233_v38 = vadd.f32 %v8105_v63, %v8099_v7  ;;  %v3384_v41 = vrot.slane %v3382_v17, 5  ;;  %v3390_v31 = vrot.slane %v3388_v3, 5 }
 0x18a   : > { %5133 = vmatprep.mubr.bf16.mxu1 %v5892_v9  ;;  %v8237_v39 = vadd.f32 %v8123_v19, %v8117_v0  ;;  %v5909_v24 = vrot.slane %v3548_v37, 9  ;;  %v3394_v23 = vrot.slane %v3392_v42, 4  ;;  %v3702_v52 = vrot.slane %v3549_v45, 5  ;;  %v3040_v9 = vld [vmem:[#allocation2 + $0xd0] sm:$0xf] }
 0x18b   : > { %v8239_v11 = vpop.f32.mrb[44].mxu1  ;;  %5134 = vmatmul.mubr.bf16.gmra.mrb[132].mxu1 %v6856_v25  ;;  %6707 = vmatmul.mubr.bf16.gmra.mrb[136].mxu0 %v5924_v33  ;;  %v3400_v60 = vrot.slane %v3398_v56, 5  ;;  %v3705_v7 = vrot.slane %v3550_v51, 5  ;;  %v3385_v44 = vor.u32 %v3384_v41, %v3381_v36  ;;  %v6348_v21 = vadd.f32 %v8125_v18, %v8107_v2  ;;  %v6857_v41 = vld [vmem:[#allocation2 + $0xc0] sm:$0xff]  }
 0x18c   : > { %v6365_v63 = vpop.f32.mrb[45].mxu1  ;;  %v953_v35 = vsel %vm6969_vm4, 0, %v952_v61  ;;  %v5910_v0 = vrot.slane %v3551_v48, 9  ;;  %v3395_v37 = vor.u32 %v3394_v23, %v3390_v31  ;;  %v3703_v4 = vsel %vm7279_vm14, %v5909_v24, %v3702_v52 }
 0x18d   : > { %v8219_v34 = vpop.f32.mrb[40].mxu0  ;;  %v6367_v19 = vpop.f32.mrb[46].mxu1  ;;  %v3704_v25 = vrot.slane %v3702_v52, 4  ;;  %954 = vst [vmem:[#allocation2 + $0xd4] sm:$0x1] %v953_v35  ;;  %v3709_v33 = vrot.slane %v3552_v28, 5  ;;  %v8248_v17 = vadd.f32 %v6348_v21, %v8052_v20  ;;  %v6351_v2 = vadd.f32 %v8141_v30, %v8136_v1 }
 0x18e   : > { %v8226_v47 = vpop.f32.mrb[41].mxu0  ;;  %v6368_v45 = vpop.f32.mrb[47].mxu1  ;;  %v3386_v51 = vrot.slane %v3385_v44, 4  ;;  %v898_v61 = vsel %vm6958_vm3, 0, %v897_v50  ;;  %v3396_v3 = vrot.slane %v3395_v37, 4  ;;  %v3412_v1 = vshll.u32 %v3040_v9, 16 }
 0x18f   : > { %v6273_v46 = vpop.f32.mrb[42].mxu0  ;;  %v3706_v48 = vsel %vm7279_vm14, %v3704_v25, %v3705_v7  ;;  %v3710_v36 = vsel %vm7279_vm14, %v5910_v0, %v3709_v33  ;;  %v3711_v42 = vrot.slane %v3709_v33, 4  ;;  %899 = vst [vmem:[#allocation2 + $0xcc] sm:$0x1] %v898_v61  ;;  %v8261_v28 = vadd.f32 %v6351_v2, %v8056_v5  ;;  %v8631_v37 = vld [vmem:[#allocation18_spill] sm:$0xff] }
 0x190   : > { %v6274_v16 = vpop.f32.mrb[43].mxu0  ;;  %v3391_v56 = vsel %vm7022_vm11, %v3386_v51, %v3390_v31  ;;  %v5925_v20 = vcombine.low %v3703_v4, %v3706_v48  ;;  %v3401_v30 = vsel %vm7022_vm11, %v3396_v3, %v3400_v60  ;;  %v3416_v24 = vshrl.u32 %v3040_v9, 16 }
 0x191   : > { %v8267_v50 = vadd.f32 %v8187_v29, %v8181_v55  ;;  %v8271_v23 = vadd.f32 %v8195_v13, %v8191_v53  ;;  %v5893_v31 = vcombine.low %v3391_v56, %v3401_v30  ;;  %v8273_v7 = vrot.slane %v3412_v1, 5 }
 0x192   : > { %6710 = vmatprep.mubr.bf16.mxu0 %v5925_v20  ;;  %v6354_v5 = vadd.f32 %v8145_v32, %v8143_v27  ;;  %v6357_v60 = vadd.f32 %v8161_v57, %v8153_v49  ;;  %v3418_v21 = vrot.slane %v3416_v24, 4  ;;  %v8281_v55 = vadd.f32 %v8226_v47, %v8219_v34  ;;  %v8632_v24 = vld [vmem:[#allocation15_spill] sm:$0xff] }
 0x193   : > { %v8283_v29 = vadd.f32 %v6274_v16, %v6273_v46  ;;  %v6360_v53 = vadd.f32 %v8183_v8, %v8173_v12  ;;  %5141 = vmatprep.mubr.bf16.mxu1 %v5893_v31  ;;  %v6363_v49 = vadd.f32 %v8193_v59, %v8189_v40  ;;  %v6366_v40 = vadd.f32 %v6365_v63, %v8239_v11 }
 0x194   : > { %v3553_v62 = vld [vmem:[#allocation2 + $0xd4] sm:$0x1]  ;;  %v8288_v27 = vadd.f32 %v6354_v5, %v8103_v26  ;;  %v8291_v32 = vadd.f32 %v6357_v60, %v8115_v43  ;;  %5142 = vmatmul.mubr.bf16.gmra.mrb[136].mxu1 %v6857_v41  ;;  %v3419_v12 = vor.u32 %v3418_v21, %v8273_v7  ;;  %v6369_v59 = vadd.f32 %v6368_v45, %v6367_v19  ;;  %v8633_v21 = vld [vmem:[#allocation6_spill] sm:$0xff] }
 0x195   : > { %v3041_v35 = vld [vmem:[#allocation2 + $0xd4] sm:$0x1]  ;;  %v3712_v46 = vrot.slane %v3553_v62, 5  ;;  %v8299_v16 = vadd.f32 %v6360_v53, %v8151_v15  ;;  %v8302_v43 = vadd.f32 %v6363_v49, %v8631_v37  ;;  %v8310_v3 = vadd.f32 %v6366_v40, %v8203_v22 }
 0x196   : > { %v3422_v8 = vshll.u32 %v3041_v35, 16  ;;  %v3039_v0 = vld [vmem:[#allocation2 + $0xcc] sm:$0xf]  ;;  %v3420_v2 = vrot.slane %v3419_v12, 4  ;;  %v8313_v48 = vadd.f32 %v6369_v59, %v8209_v54  ;;  %v8635_v59 = vld [vmem:[#allocation17_spill] sm:$0xff] }
 0x197   : > { %v6370_v47 = vpop.f32.mrb[48].mxu1  ;;  %v3713_v33 = vsel %vm7279_vm14, %v3711_v42, %v3712_v46  ;;  %v3403_v9 = vshrl.u32 %v3039_v0, 16  ;;  %v3406_v51 = vshll.u32 %v3039_v0, 16 }
 0x198   : > { %v6276_v52 = vpop.f32.mrb[44].mxu0  ;;  %v6371_v26 = vpop.f32.mrb[49].mxu1  ;;  %v5926_v15 = vcombine.low %v3710_v36, %v3713_v33  ;;  %v3424_v61 = vrot.slane %v3422_v8, 5 }
 0x199   : > { %v6277_v44 = vpop.f32.mrb[45].mxu0  ;;  %v6373_v25 = vpop.f32.mrb[50].mxu1  ;;  %v3405_v56 = vrot.slane %v3403_v9, 4  ;;  %v3408_v20 = vrot.slane %v3406_v51, 5  ;;  %v6372_v63 = vadd.f32 %v6371_v26, %v6370_v47  ;;  %v8634_v26 = vld [vmem:[#allocation16_spill] sm:$0xff] }
 0x19a   : > { %v6279_v13 = vpop.f32.mrb[46].mxu0  ;;  %v8295_v57 = vadd.f32 %v6277_v44, %v6276_v52  ;;  %v6374_v18 = vpop.f32.mrb[51].mxu1  ;;  %6711 = vmatmul.mubr.bf16.gmra.mrb[140].mxu0 %v5926_v15  ;;  %v3425_v54 = vsel %vm7022_vm11, %v3420_v2, %v3424_v61 }
 0x19b   : > { %v6280_v34 = vpop.f32.mrb[47].mxu0  ;;  %v6375_v19 = vadd.f32 %v6374_v18, %v6373_v25  ;;  %v3409_v45 = vor.u32 %v3408_v20, %v3405_v56  ;;  %v8316_v30 = vadd.f32 %v6372_v63, %v8233_v38  ;;  %v6858_v38 = vld [vmem:[#allocation2 + $0xcc] sm:$0xff]  }
 0x19c   : > { %v8304_v4 = vadd.f32 %v6280_v34, %v6279_v13  ;;  %v8636_v63 = vld [vmem:[#allocation19_spill] sm:$0xff] }
 0x19d   : > { %v8319_v36 = vadd.f32 %v6375_v19, %v8237_v39  ;;  %v3410_v41 = vrot.slane %v3409_v45, 4 }
 0x19f   : > { %v6376_v5 = vpop.f32.mrb[52].mxu1  ;;  %v3415_v44 = vsel %vm7022_vm11, %v3410_v41, %v8273_v7 }
 0x1a0   : > { %v6434_v11 = vpop.f32.mrb[48].mxu0  ;;  %v6377_v60 = vpop.f32.mrb[53].mxu1  ;;  %v5894_v62 = vcombine.low %v3415_v44, %v3425_v54 }
 0x1a1   : > { %v6435_v14 = vpop.f32.mrb[49].mxu0  ;;  %v6378_v39 = vadd.f32 %v6377_v60, %v6376_v5  ;;  %v6379_v13 = vpop.f32.mrb[54].mxu1 }
 0x1a2   : > { %v6436_v42 = vadd.f32 %v6435_v14, %v6434_v11  ;;  %v6437_v1 = vpop.f32.mrb[50].mxu0  ;;  %v6380_v35 = vpop.f32.mrb[55].mxu1  ;;  %5149 = vmatprep.mubr.bf16.mxu1 %v5894_v62 }
 0x1a3   : > { %v6438_v22 = vpop.f32.mrb[51].mxu0  ;;  %v8333_v34 = vadd.f32 %v6378_v39, %v8267_v50  ;;  %v6381_v47 = vadd.f32 %v6380_v35, %v6379_v13  ;;  %5150 = vmatmul.mubr.bf16.gmra.mrb[140].mxu1 %v6858_v38 }
 0x1a4   : > { %v8324_v52 = vadd.f32 %v6436_v42, %v8632_v24  ;;  %v6439_v31 = vadd.f32 %v6438_v22, %v6437_v1  ;;  %v8637_v42 = vld [vmem:[#allocation20_spill] sm:$0xff] }
 0x1a5   : > { %v8336_v10 = vadd.f32 %v6381_v47, %v8271_v23 }
 0x1a6   : > { %v8330_v53 = vadd.f32 %v6439_v31, %v8633_v21 }
 0x1a7   : > { %v6382_v40 = vpop.f32.mrb[56].mxu1 }
 0x1a8   : > { %v6440_v49 = vpop.f32.mrb[52].mxu0  ;;  %v6383_v50 = vpop.f32.mrb[57].mxu1 }
 0x1a9   : > { %v6441_v46 = vpop.f32.mrb[53].mxu0  ;;  %v6384_v33 = vadd.f32 %v6383_v50, %v6382_v40  ;;  %v6385_v9 = vpop.f32.mrb[58].mxu1 }
 0x1aa   : > { %v6442_v12 = vadd.f32 %v6441_v46, %v6440_v49  ;;  %v6443_v8 = vpop.f32.mrb[54].mxu0  ;;  %v6386_v2 = vpop.f32.mrb[59].mxu1 }
 0x1ab   : > { %v6444_v7 = vpop.f32.mrb[55].mxu0  ;;  %v8345_v15 = vadd.f32 %v6384_v33, %v8281_v55  ;;  %v6387_v23 = vadd.f32 %v6386_v2, %v6385_v9 }
 0x1ac   : > { %v8339_v0 = vadd.f32 %v6442_v12, %v8634_v26  ;;  %v6445_v37 = vadd.f32 %v6444_v7, %v6443_v8 }
 0x1ad   : > { %v8348_v11 = vadd.f32 %v6387_v23, %v8283_v29 }
 0x1ae   : > { %v8342_v25 = vadd.f32 %v6445_v37, %v8635_v59  ;;  %v8638_v37 = vld [vmem:[#allocation7_spill] sm:$0xff] }
 0x1af   : > { %v6388_v45 = vpop.f32.mrb[60].mxu1 }
 0x1b0   : > { %v6446_v51 = vpop.f32.mrb[56].mxu0  ;;  %v6389_v22 = vpop.f32.mrb[61].mxu1 }
 0x1b1   : > { %v6447_v18 = vpop.f32.mrb[57].mxu0  ;;  %v6390_v41 = vadd.f32 %v6389_v22, %v6388_v45  ;;  %v6391_v54 = vpop.f32.mrb[62].mxu1  ;;  %v8640_v45 = vld [vmem:[#allocation9_spill] sm:$0xff] }
 0x1b2   : > { %v6448_v61 = vadd.f32 %v6447_v18, %v6446_v51  ;;  %v6449_v56 = vpop.f32.mrb[58].mxu0  ;;  %v6392_v24 = vpop.f32.mrb[63].mxu1 }
 0x1b3   : > { %v6450_v20 = vpop.f32.mrb[59].mxu0  ;;  %v8357_v5 = vadd.f32 %v6390_v41, %v8295_v57  ;;  %v6393_v60 = vadd.f32 %v6392_v24, %v6391_v54 }
 0x1b4   : > { %v8351_v19 = vadd.f32 %v6448_v61, %v8636_v63  ;;  %v6451_v14 = vadd.f32 %v6450_v20, %v6449_v56 }
 0x1b5   : > { %v8360_v21 = vadd.f32 %v6393_v60, %v8304_v4 }
 0x1b6   : > { %v8354_v1 = vadd.f32 %v6451_v14, %v8637_v42 }
 0x1b7   : > { %v6394_v35 = vpop.f32.mrb[64].mxu1 }
 0x1b8   : > { %v6452_v55 = vpop.f32.mrb[60].mxu0  ;;  %v6395_v49 = vpop.f32.mrb[65].mxu1 }
 0x1b9   : > { %v6453_v31 = vpop.f32.mrb[61].mxu0  ;;  %v6396_v46 = vadd.f32 %v6395_v49, %v6394_v35  ;;  %v6397_v57 = vpop.f32.mrb[66].mxu1 }
 0x1ba   : > { %v6454_v29 = vadd.f32 %v6453_v31, %v6452_v55  ;;  %v6455_v44 = vpop.f32.mrb[62].mxu0  ;;  %v6398_v8 = vpop.f32.mrb[67].mxu1 }
 0x1bb   : > { %v6456_v38 = vpop.f32.mrb[63].mxu0  ;;  %v8369_v40 = vadd.f32 %v6396_v46, %v8638_v37  ;;  %v6399_v4 = vadd.f32 %v6398_v8, %v6397_v57  ;;  %v8642_v57 = vld [vmem:[#allocation11_spill] sm:$0xff] }
 0x1bc   : > { %v8363_v39 = vadd.f32 %v6454_v29, %v8224_v6  ;;  %v6457_v13 = vadd.f32 %v6456_v38, %v6455_v44 }
 0x1be   : > { %v8366_v62 = vadd.f32 %v6457_v13, %v8229_v58  ;;  %v8639_v58 = vld [vmem:[#allocation8_spill] sm:$0xff] }
 0x1bf   : > { %v8375_v33 = vadd.f32 %v6399_v4, %v8639_v58 }
 0x1c0   : > { %v6458_v47 = vpop.f32.mrb[64].mxu0  ;;  %v6400_v51 = vpop.f32.mrb[68].mxu1 }
 0x1c1   : > { %v6459_v12 = vpop.f32.mrb[65].mxu0  ;;  %v6401_v2 = vpop.f32.mrb[69].mxu1 }
 0x1c2   : > { %v6460_v7 = vadd.f32 %v6459_v12, %v6458_v47  ;;  %v6461_v26 = vpop.f32.mrb[66].mxu0  ;;  %v6402_v23 = vadd.f32 %v6401_v2, %v6400_v51  ;;  %v6403_v61 = vpop.f32.mrb[70].mxu1 }
 0x1c3   : > { %v6462_v59 = vpop.f32.mrb[67].mxu0  ;;  %v6404_v20 = vpop.f32.mrb[71].mxu1 }
 0x1c4   : > { %v8372_v6 = vadd.f32 %v6460_v7, %v8248_v17  ;;  %v6463_v50 = vadd.f32 %v6462_v59, %v6461_v26  ;;  %v8381_v42 = vadd.f32 %v6402_v23, %v8640_v45  ;;  %v6405_v17 = vadd.f32 %v6404_v20, %v6403_v61 }
 0x1c6   : > { %v8378_v9 = vadd.f32 %v6463_v50, %v8261_v28  ;;  %v8641_v28 = vld [vmem:[#allocation10_spill] sm:$0xff] }
 0x1c7   : > { %v8387_v55 = vadd.f32 %v6405_v17, %v8641_v28 }
 0x1c8   : > { %v6464_v18 = vpop.f32.mrb[68].mxu0  ;;  %v6406_v31 = vpop.f32.mrb[72].mxu1 }
 0x1c9   : > { %v6465_v56 = vpop.f32.mrb[69].mxu0  ;;  %v6407_v29 = vpop.f32.mrb[73].mxu1 }
 0x1ca   : > { %v6466_v63 = vadd.f32 %v6465_v56, %v6464_v18  ;;  %v6467_v14 = vpop.f32.mrb[70].mxu0  ;;  %v6408_v38 = vadd.f32 %v6407_v29, %v6406_v31  ;;  %v6409_v13 = vpop.f32.mrb[74].mxu1  ;;  %v8644_v31 = vld [vmem:[#allocation13_spill] sm:$0xff]  ;;  %v8645_v29 = vld [vmem:[#allocation14_spill] sm:$0xff] }
 0x1cb   : > { %v6468_v22 = vpop.f32.mrb[71].mxu0  ;;  %v6410_v47 = vpop.f32.mrb[75].mxu1 }
 0x1cc   : > { %v8384_v41 = vadd.f32 %v6466_v63, %v8288_v27  ;;  %v6469_v54 = vadd.f32 %v6468_v22, %v6467_v14  ;;  %v8393_v27 = vadd.f32 %v6408_v38, %v8642_v57  ;;  %v6411_v12 = vadd.f32 %v6410_v47, %v6409_v13 }
 0x1ce   : > { %v8390_v24 = vadd.f32 %v6469_v54, %v8291_v32  ;;  %v8643_v32 = vld [vmem:[#allocation12_spill] sm:$0xff] }
 0x1cf   : > { %v8399_v26 = vadd.f32 %v6411_v12, %v8643_v32 }
 0x1d0   : > { %v6470_v60 = vpop.f32.mrb[72].mxu0 }
 0x1d1   : > { %v6471_v44 = vpop.f32.mrb[73].mxu0 }
 0x1d2   : > { %v6472_v35 = vadd.f32 %v6471_v44, %v6470_v60  ;;  %v6473_v49 = vpop.f32.mrb[74].mxu0 }
 0x1d3   : > { %v6474_v46 = vpop.f32.mrb[75].mxu0 }
 0x1d4   : > { %v8396_v8 = vadd.f32 %v6472_v35, %v8299_v16  ;;  %v6475_v7 = vadd.f32 %v6474_v46, %v6473_v49 }
 0x1d6   : > { %v8402_v37 = vadd.f32 %v6475_v7, %v8302_v43 }
 0x1d8   : > { %v6476_v4 = vpop.f32.mrb[76].mxu0 }
 0x1d9   : > { %v6477_v59 = vpop.f32.mrb[77].mxu0  ;;  %v6412_v63 = vpop.f32.mrb[76].mxu1 }
 0x1da   : > { %v6478_v50 = vadd.f32 %v6477_v59, %v6476_v4  ;;  %v6479_v58 = vpop.f32.mrb[78].mxu0  ;;  %v6413_v43 = vpop.f32.mrb[77].mxu1 }
 0x1db   : > { %v6480_v51 = vpop.f32.mrb[79].mxu0  ;;  %v6414_v22 = vadd.f32 %v6413_v43, %v6412_v63  ;;  %v6415_v54 = vpop.f32.mrb[78].mxu1 }
 0x1dc   : > { %v8405_v2 = vadd.f32 %v6478_v50, %v8310_v3  ;;  %v6481_v18 = vadd.f32 %v6480_v51, %v6479_v58  ;;  %v6416_v28 = vpop.f32.mrb[79].mxu1 }
 0x1dd   : > { %v6417_v60 = vadd.f32 %v6416_v28, %v6415_v54 }
 0x1de   : > { %v8408_v23 = vadd.f32 %v6481_v18, %v8313_v48  ;;  %v8417_v48 = vadd.f32 %v6414_v22, %v8644_v31 }
 0x1df   : > { %v8420_v44 = vadd.f32 %v6417_v60, %v8645_v29 }
 0x1e0   : > { %v6482_v16 = vpop.f32.mrb[80].mxu0 }
 0x1e1   : > { %v6483_v61 = vpop.f32.mrb[81].mxu0  ;;  %v6546_v13 = vpop.f32.mrb[80].mxu1 }
 0x1e2   : > { %v6484_v56 = vadd.f32 %v6483_v61, %v6482_v16  ;;  %v6485_v20 = vpop.f32.mrb[82].mxu0 }
 0x1e3   : > { %v6486_v14 = vpop.f32.mrb[83].mxu0 }
 0x1e4   : > { %v8411_v45 = vadd.f32 %v6484_v56, %v8316_v30  ;;  %v6487_v17 = vadd.f32 %v6486_v14, %v6485_v20  ;;  %v6547_v30 = vpop.f32.mrb[81].mxu1 }
 0x1e5   : > { %v6548_v46 = vadd.f32 %v6547_v30, %v6546_v13  ;;  %v6549_v57 = vpop.f32.mrb[82].mxu1 }
 0x1e6   : > { %v8414_v3 = vadd.f32 %v6487_v17, %v8319_v36  ;;  %v6550_v32 = vpop.f32.mrb[83].mxu1 }
 0x1e7   : > { %v6551_v4 = vadd.f32 %v6550_v32, %v6549_v57  ;;  %v8426_v59 = vadd.f32 %v6548_v46, %v8324_v52 }
 0x1e8   : > { %v6488_v38 = vpop.f32.mrb[84].mxu0 }
 0x1e9   : > { %v6489_v35 = vpop.f32.mrb[85].mxu0  ;;  %v8432_v58 = vadd.f32 %v6551_v4, %v8330_v53  ;;  %v6552_v51 = vpop.f32.mrb[84].mxu1 }
 0x1ea   : > { %v6490_v49 = vadd.f32 %v6489_v35, %v6488_v38  ;;  %v6491_v47 = vpop.f32.mrb[86].mxu0  ;;  %v6553_v16 = vpop.f32.mrb[85].mxu1 }
 0x1eb   : > { %v6492_v12 = vpop.f32.mrb[87].mxu0  ;;  %v6554_v56 = vadd.f32 %v6553_v16, %v6552_v51  ;;  %v6555_v20 = vpop.f32.mrb[86].mxu1 }
 0x1ec   : > { %v8423_v7 = vadd.f32 %v6490_v49, %v8333_v34  ;;  %v6493_v36 = vadd.f32 %v6492_v12, %v6491_v47  ;;  %v6556_v14 = vpop.f32.mrb[87].mxu1 }
 0x1ed   : > { %v6557_v17 = vadd.f32 %v6556_v14, %v6555_v20  ;;  %v8435_v52 = vadd.f32 %v6554_v56, %v8339_v0 }
 0x1ee   : > { %v8429_v50 = vadd.f32 %v6493_v36, %v8336_v10 }
 0x1ef   : > { %v8441_v53 = vadd.f32 %v6557_v17, %v8342_v25 }
 0x1f0   : > { %v6494_v18 = vpop.f32.mrb[88].mxu0 }
 0x1f1   : > { %v6495_v61 = vpop.f32.mrb[89].mxu0 }
 0x1f2   : > { %v6496_v34 = vadd.f32 %v6495_v61, %v6494_v18  ;;  %v6497_v63 = vpop.f32.mrb[90].mxu0 }
 0x1f3   : > { %v6498_v43 = vpop.f32.mrb[91].mxu0 }
 0x1f4   : > { %v8438_v10 = vadd.f32 %v6496_v34, %v8345_v15  ;;  %v6499_v22 = vadd.f32 %v6498_v43, %v6497_v63  ;;  %v6558_v28 = vpop.f32.mrb[88].mxu1 }
 0x1f5   : > { %v6559_v31 = vpop.f32.mrb[89].mxu1 }
 0x1f6   : > { %v8444_v54 = vadd.f32 %v6499_v22, %v8348_v11  ;;  %v6560_v29 = vadd.f32 %v6559_v31, %v6558_v28  ;;  %v6561_v38 = vpop.f32.mrb[90].mxu1 }
 0x1f7   : > { %v6562_v35 = vpop.f32.mrb[91].mxu1 }
 0x1f8   : > { %v6500_v60 = vpop.f32.mrb[92].mxu0  ;;  %v6563_v30 = vadd.f32 %v6562_v35, %v6561_v38  ;;  %v8447_v15 = vadd.f32 %v6560_v29, %v8351_v19 }
 0x1f9   : > { %v6501_v13 = vpop.f32.mrb[93].mxu0 }
 0x1fa   : > { %v6502_v49 = vadd.f32 %v6501_v13, %v6500_v60  ;;  %v6503_v0 = vpop.f32.mrb[94].mxu0  ;;  %v8453_v11 = vadd.f32 %v6563_v30, %v8354_v1 }
 0x1fb   : > { %v6504_v47 = vpop.f32.mrb[95].mxu0 }
 0x1fc   : > { %v8450_v25 = vadd.f32 %v6502_v49, %v8357_v5  ;;  %v6505_v46 = vadd.f32 %v6504_v47, %v6503_v0 }
 0x1fe   : > { %v8456_v57 = vadd.f32 %v6505_v46, %v8360_v21  ;;  %v6564_v12 = vpop.f32.mrb[92].mxu1 }
 0x1ff   : > { %v6565_v36 = vpop.f32.mrb[93].mxu1 }
 0x200   : > { %v6566_v32 = vadd.f32 %v6565_v36, %v6564_v12  ;;  %v6567_v4 = vpop.f32.mrb[94].mxu1 }
 0x201   : > { %v6506_v51 = vpop.f32.mrb[96].mxu0  ;;  %v6568_v18 = vpop.f32.mrb[95].mxu1 }
 0x202   : > { %v6507_v16 = vpop.f32.mrb[97].mxu0  ;;  %v6569_v19 = vadd.f32 %v6568_v18, %v6567_v4  ;;  %v8459_v61 = vadd.f32 %v6566_v32, %v8363_v39 }
 0x203   : > { %v6508_v5 = vadd.f32 %v6507_v16, %v6506_v51  ;;  %v6509_v56 = vpop.f32.mrb[98].mxu0 }
 0x204   : > { %v6510_v20 = vpop.f32.mrb[99].mxu0  ;;  %v8462_v1 = vadd.f32 %v6569_v19, %v8366_v62 }
 0x205   : > { %v8465_v21 = vadd.f32 %v6508_v5, %v8369_v40  ;;  %v6511_v34 = vadd.f32 %v6510_v20, %v6509_v56 }
 0x207   : > { %v8468_v63 = vadd.f32 %v6511_v34, %v8375_v33 }
 0x209   : > { %v6570_v14 = vpop.f32.mrb[96].mxu1 }
 0x20a   : > { %v6571_v43 = vpop.f32.mrb[97].mxu1 }
 0x20b   : > { %v6572_v22 = vadd.f32 %v6571_v43, %v6570_v14  ;;  %v6573_v28 = vpop.f32.mrb[98].mxu1 }
 0x20c   : > { %v6512_v17 = vpop.f32.mrb[100].mxu0  ;;  %v6574_v31 = vpop.f32.mrb[99].mxu1 }
 0x20d   : > { %v6513_v39 = vpop.f32.mrb[101].mxu0  ;;  %v6575_v38 = vadd.f32 %v6574_v31, %v6573_v28  ;;  %v8471_v62 = vadd.f32 %v6572_v22, %v8372_v6 }
 0x20e   : > { %v6514_v60 = vadd.f32 %v6513_v39, %v6512_v17  ;;  %v6515_v29 = vpop.f32.mrb[102].mxu0 }
 0x20f   : > { %v6516_v13 = vpop.f32.mrb[103].mxu0  ;;  %v8477_v33 = vadd.f32 %v6575_v38, %v8378_v9 }
 0x210   : > { %v8474_v40 = vadd.f32 %v6514_v60, %v8381_v42  ;;  %v6517_v35 = vadd.f32 %v6516_v13, %v6515_v29 }
 0x212   : > { %v8480_v49 = vadd.f32 %v6517_v35, %v8387_v55 }
 0x214   : > { %v6576_v0 = vpop.f32.mrb[100].mxu1 }
 0x215   : > { %v6577_v47 = vpop.f32.mrb[101].mxu1 }
 0x216   : > { %v6518_v30 = vpop.f32.mrb[104].mxu0  ;;  %v6578_v12 = vadd.f32 %v6577_v47, %v6576_v0  ;;  %v6579_v36 = vpop.f32.mrb[102].mxu1 }
 0x217   : > { %v6519_v46 = vpop.f32.mrb[105].mxu0  ;;  %v6580_v4 = vpop.f32.mrb[103].mxu1 }
 0x218   : > { %v6520_v32 = vadd.f32 %v6519_v46, %v6518_v30  ;;  %v6521_v6 = vpop.f32.mrb[106].mxu0  ;;  %v6581_v18 = vadd.f32 %v6580_v4, %v6579_v36  ;;  %v8483_v42 = vadd.f32 %v6578_v12, %v8384_v41 }
 0x219   : > { %v6522_v51 = vpop.f32.mrb[107].mxu0 }
 0x21a   : > { %v8486_v9 = vadd.f32 %v6520_v32, %v8393_v27  ;;  %v6523_v16 = vadd.f32 %v6522_v51, %v6521_v6  ;;  %v8489_v55 = vadd.f32 %v6581_v18, %v8390_v24 }
 0x21c   : > { %v8492_v19 = vadd.f32 %v6523_v16, %v8399_v26 }
 0x21d   : > { %v6582_v5 = vpop.f32.mrb[104].mxu1 }
 0x21e   : > { %v6583_v56 = vpop.f32.mrb[105].mxu1 }
 0x21f   : > { %v6584_v20 = vadd.f32 %v6583_v56, %v6582_v5  ;;  %v6585_v34 = vpop.f32.mrb[106].mxu1 }
 0x220   : > { %v6586_v14 = vpop.f32.mrb[107].mxu1 }
 0x221   : > { %v6587_v43 = vadd.f32 %v6586_v14, %v6585_v34  ;;  %v8495_v17 = vadd.f32 %v6584_v20, %v8396_v8 }
 0x223   : > { %v8498_v41 = vadd.f32 %v6587_v43, %v8402_v37 }
 0x226   : > { %v6524_v27 = vpop.f32.mrb[108].mxu0  ;;  %v6588_v22 = vpop.f32.mrb[108].mxu1 }
 0x227   : > { %v6525_v28 = vpop.f32.mrb[109].mxu0  ;;  %v6589_v24 = vpop.f32.mrb[109].mxu1 }
 0x228   : > { %v6526_v39 = vadd.f32 %v6525_v28, %v6524_v27  ;;  %v6527_v26 = vpop.f32.mrb[110].mxu0  ;;  %v6590_v31 = vadd.f32 %v6589_v24, %v6588_v22  ;;  %v6591_v60 = vpop.f32.mrb[110].mxu1 }
 0x229   : > { %v6528_v29 = vpop.f32.mrb[111].mxu0  ;;  %v6592_v38 = vpop.f32.mrb[111].mxu1 }
 0x22a   : > { %v8501_v13 = vadd.f32 %v6526_v39, %v8417_v48  ;;  %v6529_v35 = vadd.f32 %v6528_v29, %v6527_v26  ;;  %v6593_v8 = vadd.f32 %v6592_v38, %v6591_v60  ;;  %v8504_v0 = vadd.f32 %v6590_v31, %v8405_v2 }
 0x22c   : > { %v8507_v37 = vadd.f32 %v6529_v35, %v8420_v44  ;;  %v8510_v30 = vadd.f32 %v6593_v8, %v8408_v23 }
 0x22e   : > { %v6684_v47 = vpop.f32.mrb[112].mxu0 }
 0x22f   : > { %v5201_v46 = vadd.f32 %v6684_v47, %v8435_v52  ;;  %v5192_v12 = vpop.f32.mrb[113].mxu0 }
 0x230   : > { %v5193_v36 = vadd.f32 %v5192_v12, %v8426_v59  ;;  %v6685_v48 = vpop.f32.mrb[114].mxu0 }
 0x231   : > { %v5204_v32 = vadd.f32 %v6685_v48, %v8441_v53  ;;  %v5195_v6 = vpop.f32.mrb[115].mxu0  ;;  %v6594_v4 = vpop.f32.mrb[112].mxu1  ;;  %v5519_v34 = vmul.f32 %v5201_v46, %v5201_v46 }
 0x232   : > { %v5196_v2 = vadd.f32 %v5195_v6, %v8432_v58  ;;  %v6595_v23 = vpop.f32.mrb[113].mxu1  ;;  %v5517_v18 = vmul.f32 %v5193_v36, %v5193_v36 }
 0x233   : > { %v6107_v44 = vpack.c.bf16 %v5204_v32, %v5201_v46  ;;  %v6596_v52 = vadd.f32 %v6595_v23, %v6594_v4  ;;  %v6597_v51 = vpop.f32.mrb[114].mxu1  ;;  %v5520_v24 = vmul.f32 %v5204_v32, %v5204_v32 }
 0x234   : > { %v6102_v59 = vpack.c.bf16 %v5196_v2, %v5193_v36  ;;  %v5479_v16 = vadd.f32 %v5196_v2, %v5193_v36  ;;  %v5518_v5 = vmul.f32 %v5196_v2, %v5196_v2  ;;  %v6598_v53 = vpop.f32.mrb[115].mxu1 }
 0x235   : > { %6179 = vst [vmem:[%s8519_s8 + $0x8] sm:$0xff] %v6107_v44   ;;  %v6599_v56 = vadd.f32 %v6598_v53, %v6597_v51  ;;  %v8524_v20 = vadd.f32 %v6596_v52, %v8411_v45 }
 0x236   : > { %6103 = vst [vmem:[%s8519_s8] sm:$0xff] %v6102_v59   ;;  %v5480_v14 = vadd.f32 %v5479_v16, %v5201_v46  ;;  %v5549_v43 = vadd.f32 %v5518_v5, %v5517_v18  ;;  %v6688_v27 = vpop.f32.mrb[116].mxu0 }
 0x237   : > { %v5217_v58 = vadd.f32 %v6688_v27, %v8459_v61  ;;  %v5208_v22 = vpop.f32.mrb[117].mxu0  ;;  %v8529_v28 = vadd.f32 %v6599_v56, %v8414_v3 }
 0x238   : > { %v5550_v39 = vadd.f32 %v5549_v43, %v5519_v34  ;;  %v5209_v26 = vadd.f32 %v5208_v22, %v8447_v15  ;;  %v5481_v31 = vadd.f32 %v5480_v14, %v5204_v32  ;;  %v6689_v60 = vpop.f32.mrb[118].mxu0 }
 0x239   : > { %v5220_v45 = vadd.f32 %v6689_v60, %v8462_v1  ;;  %v5211_v29 = vpop.f32.mrb[119].mxu0  ;;  %v6600_v47 = vpop.f32.mrb[116].mxu1  ;;  %v5523_v2 = vmul.f32 %v5217_v58, %v5217_v58 }
 0x23a   : > { %v5482_v38 = vadd.f32 %v5481_v31, %v5209_v26  ;;  %v5521_v35 = vmul.f32 %v5209_v26, %v5209_v26  ;;  %v5551_v8 = vadd.f32 %v5550_v39, %v5520_v24  ;;  %v5212_v61 = vadd.f32 %v5211_v29, %v8453_v11  ;;  %v6601_v3 = vpop.f32.mrb[117].mxu1 }
 0x23b   : > { %v6117_v46 = vpack.c.bf16 %v5220_v45, %v5217_v58  ;;  %v6603_v15 = vpop.f32.mrb[118].mxu1  ;;  %v6602_v32 = vadd.f32 %v6601_v3, %v6600_v47  ;;  %v5524_v51 = vmul.f32 %v5220_v45, %v5220_v45 }
 0x23c   : > { %v5552_v12 = vadd.f32 %v5551_v8, %v5521_v35  ;;  %v6112_v36 = vpack.c.bf16 %v5212_v61, %v5209_v26  ;;  %v5483_v48 = vadd.f32 %v5482_v38, %v5212_v61  ;;  %v5522_v6 = vmul.f32 %v5212_v61, %v5212_v61  ;;  %v6604_v4 = vpop.f32.mrb[119].mxu1 }
 0x23d   : > { %6181 = vst [vmem:[%s8519_s8 + $0x18] sm:$0xff] %v6117_v46   ;;  %v6605_v52 = vadd.f32 %v6604_v4, %v6603_v15  ;;  %v5104_v59 = vadd.f32 %v6602_v32, %v8423_v7 }
 0x23e   : > { %6180 = vst [vmem:[%s8519_s8 + $0x10] sm:$0xff] %v6112_v36   ;;  %v5484_v1 = vadd.f32 %v5483_v48, %v5217_v58  ;;  %v5553_v23 = vadd.f32 %v5552_v12, %v5522_v6  ;;  %v6692_v44 = vpop.f32.mrb[120].mxu0 }
 0x23f   : > { %v5233_v11 = vadd.f32 %v6692_v44, %v8483_v42  ;;  %v5224_v18 = vpop.f32.mrb[121].mxu0  ;;  %v8540_v34 = vadd.f32 %v6605_v52, %v8429_v50 }
 0x240   : > { %v5554_v16 = vadd.f32 %v5553_v23, %v5523_v2  ;;  %v5225_v5 = vadd.f32 %v5224_v18, %v8471_v62  ;;  %v5485_v53 = vadd.f32 %v5484_v1, %v5220_v45  ;;  %v6693_v56 = vpop.f32.mrb[122].mxu0 }
 0x241   : > { %v5236_v14 = vadd.f32 %v6693_v56, %v8489_v55  ;;  %v5227_v43 = vpop.f32.mrb[123].mxu0  ;;  %v5527_v38 = vmul.f32 %v5233_v11, %v5233_v11 }
 0x242   : > { %v5486_v27 = vadd.f32 %v5485_v53, %v5225_v5  ;;  %v5525_v58 = vmul.f32 %v5225_v5, %v5225_v5  ;;  %v5555_v22 = vadd.f32 %v5554_v16, %v5524_v51  ;;  %v5228_v42 = vadd.f32 %v5227_v43, %v8477_v33  ;;  %v6606_v24 = vpop.f32.mrb[120].mxu1 }
 0x243   : > { %v6127_v7 = vpack.c.bf16 %v5236_v14, %v5233_v11  ;;  %v6607_v39 = vpop.f32.mrb[121].mxu1  ;;  %v5528_v47 = vmul.f32 %v5236_v14, %v5236_v14 }
 0x244   : > { %v5556_v26 = vadd.f32 %v5555_v22, %v5525_v58  ;;  %v6122_v62 = vpack.c.bf16 %v5228_v42, %v5225_v5  ;;  %v5487_v31 = vadd.f32 %v5486_v27, %v5228_v42  ;;  %v5526_v60 = vmul.f32 %v5228_v42, %v5228_v42  ;;  %v6609_v45 = vpop.f32.mrb[122].mxu1 }
 0x245   : > { %6183 = vst [vmem:[%s8519_s8 + $0x28] sm:$0xff] %v6127_v7   ;;  %v6608_v50 = vadd.f32 %v6607_v39, %v6606_v24  ;;  %v6610_v29 = vpop.f32.mrb[123].mxu1 }
 0x246   : > { %6182 = vst [vmem:[%s8519_s8 + $0x20] sm:$0xff] %v6122_v62   ;;  %v5488_v55 = vadd.f32 %v5487_v31, %v5233_v11  ;;  %v5557_v35 = vadd.f32 %v5556_v26, %v5526_v60  ;;  %v6696_v8 = vpop.f32.mrb[124].mxu0  ;;  %v6611_v61 = vadd.f32 %v6610_v29, %v6609_v45 }
 0x247   : > { %v5249_v33 = vadd.f32 %v6696_v8, %v8504_v0  ;;  %v5240_v46 = vpop.f32.mrb[125].mxu0  ;;  %v5112_v3 = vadd.f32 %v6608_v50, %v8438_v10 }
 0x248   : > { %v5558_v12 = vadd.f32 %v5557_v35, %v5527_v38  ;;  %v5241_v36 = vadd.f32 %v5240_v46, %v8495_v17  ;;  %v5489_v48 = vadd.f32 %v5488_v55, %v5236_v14  ;;  %v6697_v6 = vpop.f32.mrb[126].mxu0  ;;  %v8550_v15 = vadd.f32 %v6611_v61, %v8444_v54 }
 0x249   : > { %v5252_v32 = vadd.f32 %v6697_v6, %v8510_v30  ;;  %v5243_v4 = vpop.f32.mrb[127].mxu0  ;;  %v5531_v16 = vmul.f32 %v5249_v33, %v5249_v33 }
 0x24a   : > { %v5490_v2 = vadd.f32 %v5489_v48, %v5241_v36  ;;  %v5529_v1 = vmul.f32 %v5241_v36, %v5241_v36  ;;  %v5559_v23 = vadd.f32 %v5558_v12, %v5528_v47  ;;  %v5244_v0 = vadd.f32 %v5243_v4, %v8498_v41 }
 0x24b   : > { %v6137_v44 = vpack.c.bf16 %v5252_v32, %v5249_v33  ;;  %v5532_v14 = vmul.f32 %v5252_v32, %v5252_v32 }
 0x24c   : > { %v5560_v10 = vadd.f32 %v5559_v23, %v5529_v1  ;;  %v6132_v52 = vpack.c.bf16 %v5244_v0, %v5241_v36  ;;  %v5491_v51 = vadd.f32 %v5490_v2, %v5244_v0  ;;  %v5530_v17 = vmul.f32 %v5244_v0, %v5244_v0  ;;  %v6612_v11 = vpop.f32.mrb[124].mxu1 }
 0x24d   : > { %6185 = vst [vmem:[%s8519_s8 + $0x38] sm:$0xff] %v6137_v44   ;;  %v6613_v18 = vpop.f32.mrb[125].mxu1 }
 0x24e   : > { %6184 = vst [vmem:[%s8519_s8 + $0x30] sm:$0xff] %v6132_v52   ;;  %v5492_v54 = vadd.f32 %v5491_v51, %v5249_v33  ;;  %v5561_v5 = vadd.f32 %v5560_v10, %v5530_v17  ;;  %v6700_v53 = vpop.f32.mrb[128].mxu0  ;;  %v6614_v30 = vadd.f32 %v6613_v18, %v6612_v11  ;;  %v6615_v56 = vpop.f32.mrb[126].mxu1 }
 0x24f   : > { %v5265_v43 = vadd.f32 %v6700_v53, %v5104_v59  ;;  %v5256_v27 = vpop.f32.mrb[129].mxu0  ;;  %v6616_v58 = vpop.f32.mrb[127].mxu1 }
 0x250   : > { %v5562_v41 = vadd.f32 %v5561_v5, %v5531_v16  ;;  %v5257_v22 = vadd.f32 %v5256_v27, %v8524_v20  ;;  %v5493_v42 = vadd.f32 %v5492_v54, %v5252_v32  ;;  %v6701_v24 = vpop.f32.mrb[130].mxu0  ;;  %v6617_v7 = vadd.f32 %v6616_v58, %v6615_v56 }
 0x251   : > { %v5268_v39 = vadd.f32 %v6701_v24, %v8540_v34  ;;  %v5259_v26 = vpop.f32.mrb[131].mxu0  ;;  %v5120_v62 = vadd.f32 %v6614_v30, %v8450_v25  ;;  %v5535_v8 = vmul.f32 %v5265_v43, %v5265_v43 }
 0x252   : > { %v5494_v31 = vadd.f32 %v5493_v42, %v5257_v22  ;;  %v5533_v60 = vmul.f32 %v5257_v22, %v5257_v22  ;;  %v5563_v45 = vadd.f32 %v5562_v41, %v5532_v14  ;;  %v5260_v59 = vadd.f32 %v5259_v26, %v8529_v28 }
 0x253   : > { %v6147_v50 = vpack.c.bf16 %v5268_v39, %v5265_v43  ;;  %v5123_v29 = vadd.f32 %v6617_v7, %v8456_v57  ;;  %v5536_v25 = vmul.f32 %v5268_v39, %v5268_v39 }
 0x254   : > { %v5564_v38 = vadd.f32 %v5563_v45, %v5533_v60  ;;  %v6142_v20 = vpack.c.bf16 %v5260_v59, %v5257_v22  ;;  %v5495_v55 = vadd.f32 %v5494_v31, %v5260_v59  ;;  %v5534_v35 = vmul.f32 %v5260_v59, %v5260_v59 }
 0x255   : > { %6187 = vst [vmem:[%s8519_s8 + $0x48] sm:$0xff] %v6147_v50   ;;  %v6618_v47 = vpop.f32.mrb[128].mxu1 }
 0x256   : > { %6186 = vst [vmem:[%s8519_s8 + $0x40] sm:$0xff] %v6142_v20   ;;  %v5496_v61 = vadd.f32 %v5495_v55, %v5265_v43  ;;  %v5565_v34 = vadd.f32 %v5564_v38, %v5534_v35  ;;  %v6704_v33 = vpop.f32.mrb[132].mxu0  ;;  %v6619_v12 = vpop.f32.mrb[129].mxu1 }
 0x257   : > { %v5281_v46 = vadd.f32 %v6704_v33, %v5120_v62  ;;  %v5272_v36 = vpop.f32.mrb[133].mxu0  ;;  %v6620_v28 = vadd.f32 %v6619_v12, %v6618_v47  ;;  %v6621_v32 = vpop.f32.mrb[130].mxu1 }
 0x258   : > { %v5566_v48 = vadd.f32 %v5565_v34, %v5535_v8  ;;  %v5273_v6 = vadd.f32 %v5272_v36, %v5112_v3  ;;  %v5497_v57 = vadd.f32 %v5496_v61, %v5268_v39  ;;  %v6705_v4 = vpop.f32.mrb[134].mxu0  ;;  %v6622_v1 = vpop.f32.mrb[131].mxu1 }
 0x259   : > { %v5284_v2 = vadd.f32 %v6705_v4, %v5123_v29  ;;  %v5275_v23 = vpop.f32.mrb[135].mxu0  ;;  %v6623_v52 = vadd.f32 %v6622_v1, %v6621_v32  ;;  %v5128_v11 = vadd.f32 %v6620_v28, %v8465_v21  ;;  %v5539_v56 = vmul.f32 %v5281_v46, %v5281_v46 }
 0x25a   : > { %v5498_v0 = vadd.f32 %v5497_v57, %v5273_v6  ;;  %v5537_v44 = vmul.f32 %v5273_v6, %v5273_v6  ;;  %v5567_v10 = vadd.f32 %v5566_v48, %v5536_v25  ;;  %v5276_v17 = vadd.f32 %v5275_v23, %v8550_v15 }
 0x25b   : > { %v6157_v51 = vpack.c.bf16 %v5284_v2, %v5281_v46  ;;  %v5131_v3 = vadd.f32 %v6623_v52, %v8468_v63  ;;  %v5540_v21 = vmul.f32 %v5284_v2, %v5284_v2 }
 0x25c   : > { %v5568_v18 = vadd.f32 %v5567_v10, %v5537_v44  ;;  %v6152_v16 = vpack.c.bf16 %v5276_v17, %v5273_v6  ;;  %v5499_v54 = vadd.f32 %v5498_v0, %v5276_v17  ;;  %v5538_v5 = vmul.f32 %v5276_v17, %v5276_v17 }
 0x25d   : > { %6189 = vst [vmem:[%s8519_s8 + $0x58] sm:$0xff] %v6157_v51  }
 0x25e   : > { %v6624_v53 = vpop.f32.mrb[132].mxu1  ;;  %v6708_v30 = vpop.f32.mrb[136].mxu0  ;;  %6188 = vst [vmem:[%s8519_s8 + $0x50] sm:$0xff] %v6152_v16   ;;  %v5500_v14 = vadd.f32 %v5499_v54, %v5281_v46  ;;  %v5569_v43 = vadd.f32 %v5568_v18, %v5538_v5 }
 0x25f   : > { %v6625_v27 = vpop.f32.mrb[133].mxu1  ;;  %v5288_v58 = vpop.f32.mrb[137].mxu0 }
 0x260   : > { %v6626_v41 = vadd.f32 %v6625_v27, %v6624_v53  ;;  %v5289_v22 = vadd.f32 %v5288_v58, %v5128_v11  ;;  %v6627_v15 = vpop.f32.mrb[134].mxu1  ;;  %v6709_v42 = vpop.f32.mrb[138].mxu0  ;;  %v5570_v24 = vadd.f32 %v5569_v43, %v5539_v56  ;;  %v5501_v7 = vadd.f32 %v5500_v14, %v5284_v2 }
 0x261   : > { %v6628_v63 = vpop.f32.mrb[135].mxu1  ;;  %v5291_v39 = vpop.f32.mrb[139].mxu0 }
 0x262   : > { %v5136_v26 = vadd.f32 %v6626_v41, %v8474_v40  ;;  %v5541_v62 = vmul.f32 %v5289_v22, %v5289_v22  ;;  %v6629_v31 = vadd.f32 %v6628_v63, %v6627_v15  ;;  %v5292_v60 = vadd.f32 %v5291_v39, %v5131_v3 }
 0x263   : > { %v5502_v45 = vadd.f32 %v5501_v7, %v5289_v22  ;;  %v5571_v59 = vadd.f32 %v5570_v24, %v5540_v21 }
 0x264   : > { %v5297_v50 = vadd.f32 %v6708_v30, %v5136_v26  ;;  %v5139_v29 = vadd.f32 %v6629_v31, %v8480_v49  ;;  %v6162_v38 = vpack.c.bf16 %v5292_v60, %v5289_v22  ;;  %v5542_v20 = vmul.f32 %v5292_v60, %v5292_v60 }
 0x265   : > { %v5572_v55 = vadd.f32 %v5571_v59, %v5541_v62  ;;  %v5503_v35 = vadd.f32 %v5502_v45, %v5292_v60 }
 0x266   : > { %v5543_v8 = vmul.f32 %v5297_v50, %v5297_v50  ;;  %v5300_v61 = vadd.f32 %v6709_v42, %v5139_v29  ;;  %6190 = vst [vmem:[%s8519_s8 + $0x60] sm:$0xff] %v6162_v38  }
 0x267   : > { %v5504_v34 = vadd.f32 %v5503_v35, %v5297_v50  ;;  %v5573_v47 = vadd.f32 %v5572_v55, %v5542_v20  ;;  %v6630_v25 = vpop.f32.mrb[136].mxu1 }
 0x268   : > { %v6167_v33 = vpack.c.bf16 %v5300_v61, %v5297_v50  ;;  %v5544_v40 = vmul.f32 %v5300_v61, %v5300_v61  ;;  %v6631_v12 = vpop.f32.mrb[137].mxu1 }
 0x269   : > { %v5574_v46 = vadd.f32 %v5573_v47, %v5543_v8  ;;  %v5505_v36 = vadd.f32 %v5504_v34, %v5300_v61  ;;  %v6632_v48 = vadd.f32 %v6631_v12, %v6630_v25  ;;  %v6633_v28 = vpop.f32.mrb[138].mxu1 }
 0x26a   : > { %6191 = vst [vmem:[%s8519_s8 + $0x68] sm:$0xff] %v6167_v33   ;;  %v6634_v49 = vpop.f32.mrb[139].mxu1 }
 0x26b   : > { %v5575_v6 = vadd.f32 %v5574_v46, %v5544_v40  ;;  %v6635_v57 = vadd.f32 %v6634_v49, %v6633_v28  ;;  %v5144_v32 = vadd.f32 %v6632_v48, %v8486_v9 }
 0x26d   : > { %v6712_v4 = vpop.f32.mrb[140].mxu0  ;;  %v5147_v1 = vadd.f32 %v6635_v57, %v8492_v19 }
 0x26e   : > { %v5304_v2 = vpop.f32.mrb[141].mxu0 }
 0x26f   : > { %v5305_v23 = vadd.f32 %v5304_v2, %v5144_v32  ;;  %v6713_v0 = vpop.f32.mrb[142].mxu0 }
 0x270   : > { %v5307_v44 = vpop.f32.mrb[143].mxu0 }
 0x271   : > { %v5506_v10 = vadd.f32 %v5505_v36, %v5305_v23  ;;  %v5545_v52 = vmul.f32 %v5305_v23, %v5305_v23  ;;  %v5308_v51 = vadd.f32 %v5307_v44, %v5147_v1 }
 0x273   : > { %v5576_v17 = vadd.f32 %v5575_v6, %v5545_v52  ;;  %v6172_v11 = vpack.c.bf16 %v5308_v51, %v5305_v23  ;;  %v5507_v18 = vadd.f32 %v5506_v10, %v5308_v51  ;;  %v5546_v3 = vmul.f32 %v5308_v51, %v5308_v51 }
 0x275   : > { %6192 = vst [vmem:[%s8519_s8 + $0x70] sm:$0xff] %v6172_v11   ;;  %v5577_v16 = vadd.f32 %v5576_v17, %v5546_v3 }
 0x276   : > { %v6636_v54 = vpop.f32.mrb[140].mxu1 }
 0x277   : > { %v6637_v5 = vpop.f32.mrb[141].mxu1 }
 0x278   : > { %v6638_v9 = vadd.f32 %v6637_v5, %v6636_v54  ;;  %v6639_v53 = vpop.f32.mrb[142].mxu1 }
 0x279   : > { %v6640_v30 = vpop.f32.mrb[143].mxu1 }
 0x27a   : > { %v5152_v19 = vadd.f32 %v6638_v9, %v8501_v13  ;;  %v6641_v56 = vadd.f32 %v6640_v30, %v6639_v53 }
 0x27c   : > { %v5313_v14 = vadd.f32 %v6712_v4, %v5152_v19  ;;  %v5155_v43 = vadd.f32 %v6641_v56, %v8507_v37 }
 0x27e   : > { %v5508_v27 = vadd.f32 %v5507_v18, %v5313_v14  ;;  %v5547_v58 = vmul.f32 %v5313_v14, %v5313_v14  ;;  %v5316_v41 = vadd.f32 %v6713_v0, %v5155_v43 }
 0x280   : > { %v5578_v22 = vadd.f32 %v5577_v16, %v5547_v58  ;;  %v6177_v15 = vpack.c.bf16 %v5316_v41, %v5313_v14  ;;  %v5509_v42 = vadd.f32 %v5508_v27, %v5316_v41  ;;  %v5548_v21 = vmul.f32 %v5316_v41, %v5316_v41 }
 0x282   : > { %6193 = vst [vmem:[%s8519_s8 + $0x78] sm:$0xff] %v6177_v15   ;;  %v5510_v24 = vrot.slane %v5509_v42, 4  ;;  %v5579_v7 = vadd.f32 %v5578_v22, %v5548_v21 }
 0x284   : > { %v5511_v63 = vadd.f32 %v5510_v24, %v5509_v42  ;;  %v5580_v39 = vrot.slane %v5579_v7, 4 }
 0x286   : > { %v5512_v26 = vrot.slane %v5511_v63, 2  ;;  %v5581_v13 = vadd.f32 %v5580_v39, %v5579_v7 }
 0x288   : > { %v5513_v62 = vadd.f32 %v5512_v26, %v5511_v63  ;;  %v5582_v31 = vrot.slane %v5581_v13, 2 }
 0x28a   : > { %v5514_v60 = vrot.slane %v5513_v62, 1  ;;  %v5583_v37 = vadd.f32 %v5582_v31, %v5581_v13 }
 0x28c   : > { %v5515_v45 = vadd.f32 %v5514_v60, %v5513_v62  ;;  %v5584_v59 = vrot.slane %v5583_v37, 1 }
 0x28e   : > { %v5585_v50 = vadd.f32 %v5584_v59, %v5583_v37  ;;  %5587 = vst [vmem:[%s265_s11] sm:$0x1] %v5515_v45 }
 0x290   : > { %5588 = vst [vmem:[%s268_s14] sm:$0x1] %v5585_v50 }
 0x291 PF: > { %s17_s21 = sadd.s32 1, %s6865_s21  }
 0x292   : > { %p14_p4 = scmp.ge.s32.totalorder %s17_s21, 4  }
 0x294   :  { %16 = sbr.rel (!%p14_p4) target bundleno = 1 (0x1), region = 93 }

// kernel: basic_block_forward.4
= control target key start
LH: loop header
LB: loop body
LE: loop exit
PB: predicated region body
PF: predicated region fallthrough
CT: control target
= control target key end

     0   :  { %s7131_s21 = smov 0   ;;  %s9075_s0 = inlined_call_operand.vmem [shape: bf16[2,16,16,128], index: 0, kind: input, shape index: {}]   ;;  %s9076_s1 = inlined_call_operand.vmem [shape: bf16[1152,128], index: 1, kind: input, shape index: {}]   ;;  %s9077_s2 = inlined_call_operand.vmem [shape: f32[1,128], index: 2, kind: input, shape index: {}]   ;;  %s9078_s3 = inlined_call_operand.vmem [shape: f32[1,128], index: 3, kind: input, shape index: {}]   ;;  %s9079_s4 = inlined_call_operand.vmem [shape: bf16[2,256,128], index: 4, kind: output, shape index: {0}]   ;;  %s9080_s5 = inlined_call_operand.vmem [shape: f32[2,1,128], index: 5, kind: output, shape index: {1}]   ;;  %s9081_s6 = inlined_call_operand.vmem [shape: f32[2,1,128], index: 6, kind: output, shape index: {2}]  }
   0x1 LB: > { %s5836_s22 = sadd.s32 4294967295, %s7093_s21   ;;  %p5840_p0 = scmp.ge.s32.totalorder %s7093_s21, 1  ;;  %s7093_s21 = sphi %s7131_s21, %s17_s21  }
   0x2   : > { %p217_p1 = scmp.lt.s32.totalorder %s7093_s21, 3 }
   0x4   : > { %p218_p2 = pnand %p5840_p0, %p217_p1 }
   0x6   : > { %221 = sbr.rel (%p218_p2) target bundleno = 677 (0x2a5), region = 36 }
   0xd   : > { %v6962_v0 = vld [vmem:[%s9076_s1 + $0x40] sm:$0xff]   ;;  %v6964_v2 = vld [vmem:[%s9076_s1 + $0x48] sm:$0xff]   ;;  %v7095_v3 = vmov 0   ;;  %v6966_v5 = vld [vmem:[%s9076_s1 + $0x50] sm:$0xff]   ;;  %p253_p3 = scmp.lt.s32.totalorder %s5836_s22, 1  ;;  %vm871_vm0 = vcmask 1040384  }
   0xe   : > { %v6963_v1 = vld [vmem:[%s9076_s1] sm:$0xff]   ;;  %6417 = vmatprep.subr.bf16.mxu0 %v6962_v0  ;;  %6937 = vmatprep.subr.bf16.mxu1 %v6962_v0  ;;  %981 = vst [vmem:[#allocation2] sm:$0xf] %v7095_v3  ;;  %982 = vst [vmem:[#allocation2 + $0x4] sm:$0xf] %v7095_v3  ;;  %v6965_v4 = vld [vmem:[%s9076_s1 + $0x8] sm:$0xff]  }
   0xf   : > { %983 = vst [vmem:[#allocation2 + $0x8] sm:$0x1] %v7095_v3  ;;  %985 = vst [vmem:[#allocation2 + $0xcc] sm:$0xf] %v7095_v3  ;;  %6418 = vmatpush3.bf16.msra.mxu0 %v6963_v1  ;;  %6945 = vmatpush3.bf16.msra.mxu1 %v6963_v1  ;;  %v6967_v6 = vld [vmem:[%s9076_s1 + $0x10] sm:$0xff]   ;;  %v6968_v7 = vld [vmem:[%s9076_s1 + $0x58] sm:$0xff]  }
  0x10   : > { %986 = vst [vmem:[#allocation2 + $0xd0] sm:$0xf] %v7095_v3  ;;  %987 = vst [vmem:[#allocation2 + $0xd4] sm:$0x1] %v7095_v3  ;;  %6419 = vmatprep.subr.bf16.mxu0 %v6964_v2  ;;  %6938 = vmatprep.subr.bf16.mxu1 %v6964_v2  ;;  %s9125_s22 = smov (!%p253_p3, %s5836_s22), 1  ;;  %v6969_v8 = vld [vmem:[%s9076_s1 + $0x18] sm:$0xff]  }
  0x11   : > { %v6970_v9 = vld [vmem:[%s9076_s1 + $0x60] sm:$0xff]   ;;  %s6177_s17 = sshll.u32 %s9125_s22, 7  ;;  %v6972_v11 = vld [vmem:[%s9076_s1 + $0x68] sm:$0xff]   ;;  %vm540_vm1 = vsmask.f32 256  ;;  %v9084_v13 = vmov 0  ;;  %s265_s25 = scalar_lea.vmem %s9080_s5, %s9125_s22 }
  0x12   : > { %v6971_v10 = vld [vmem:[%s9076_s1 + $0x20] sm:$0xff]   ;;  %s7181_s24 = scalar_lea.vmem %s9075_s0, %s6177_s17  ;;  %vm865_vm2 = vsmask.f32 7938  ;;  %vm7188_vm3 = vmand %vm871_vm0, %vm540_vm1  ;;  %v9087_v17 = vmov 0  ;;  %v6973_v21 = vld [vmem:[%s9076_s1 + $0x28] sm:$0xff]   ;;  %vm864_vm8 = vcmask 1043456   ;;  %s9005_s23 = scalar_lea.vmem %s9079_s4, %s6177_s17 }
  0x13   : > { %6420 = vmatpush3.bf16.msra.mxu0 %v6965_v4  ;;  %6946 = vmatpush3.bf16.msra.mxu1 %v6965_v4  ;;  %v9085_v13 = vsel %vm7188_vm3, 4294967295, %v9084_v13  ;;  %vm7196_vm4 = vmand %vm871_vm0, %vm865_vm2  ;;  %v6244_v20 = vld [vmem:[%s7181_s24] sm:$0xff]   ;;  %v6974_v26 = vld [vmem:[%s9076_s1 + $0x70] sm:$0xff]   ;;  %vm1289_vm5 = vsmask.f32 3328  ;;  %vm1852_vm12 = vcmask 1042432   ;;  %s268_s28 = scalar_lea.vmem %s9081_s6, %s9125_s22 }
  0x14   : > { %6421 = vmatprep.subr.bf16.mxu0 %v6966_v5  ;;  %6939 = vmatprep.subr.bf16.mxu1 %v6966_v5  ;;  %9086 = vst [vmem:[#allocation4_spill] sm:$0xff] %v9085_v13  ;;  %v9088_v17 = vsel %vm7196_vm4, 4294967295, %v9087_v17  ;;  %v6245_v23 = vunpack.c.l.bf16 %v6244_v20  ;;  %v6246_v24 = vunpack.c.h.bf16 %v6244_v20  ;;  %v7209_v25 = vld [vmem:[%s9077_s2] ss:$0 sm:$0xff]  ;;  %v6975_v32 = vld [vmem:[%s9076_s1 + $0x30] sm:$0xff]   ;;  %v6397_v34 = vld [vmem:[%s7181_s24 + $0x58] sm:$0xff]  }
  0x15   : > { %v988_v12 = vld [vmem:[#allocation2] sm:$0x1]  ;;  %v1242_v15 = vld [vmem:[#allocation2 + $0x4] sm:$0xf]  ;;  %9089 = vst [vmem:[#allocation5_spill] sm:$0xff] %v9088_v17  ;;  %v6976_v35 = vld [vmem:[%s9076_s1 + $0x78] sm:$0xff]   ;;  %v6289_v38 = vunpack.c.l.bf16 %v6397_v34  ;;  %v6290_v39 = vunpack.c.h.bf16 %v6397_v34 }
  0x16   : > { %v1043_v14 = vld [vmem:[#allocation2 + $0x8] sm:$0x1]  ;;  %v989_v16 = vsel %vm7188_vm3, 0, %v988_v12  ;;  %v1302_v18 = vshll.u32 %v1242_v15, 16  ;;  %v1306_v19 = vshrl.u32 %v1242_v15, 16  ;;  %v341_v30 = vmul.f32 %v6245_v23, %v7209_v25  ;;  %v6977_v46 = vld [vmem:[%s9076_s1 + $0x38] sm:$0xff]   ;;  %vm7256_vm10 = vmand %vm864_vm8, %vm865_vm2 }
  0x17   : > { %6422 = vmatpush3.bf16.msra.mxu0 %v6967_v6  ;;  %6947 = vmatpush3.bf16.msra.mxu1 %v6967_v6  ;;  %990 = vst [vmem:[#allocation2] sm:$0x1] %v989_v16  ;;  %v1044_v22 = vsel %vm7196_vm4, 0, %v1043_v14  ;;  %v7219_v29 = vld [vmem:[%s9078_s3] ss:$0 sm:$0xff]  ;;  %v342_v31 = vmul.f32 %v6246_v24, %v7209_v25  ;;  %v363_v42 = vmul.f32 %v6289_v38, %v7209_v25  ;;  %vm1853_vm13 = vcmask 1046532  }
  0x18   : > { %6423 = vmatprep.subr.bf16.mxu0 %v6968_v7  ;;  %6940 = vmatprep.subr.bf16.mxu1 %v6968_v7  ;;  %1045 = vst [vmem:[#allocation2 + $0x8] sm:$0x1] %v1044_v22  ;;  %v7214_v27 = vrot.slane %v1302_v18, 5  ;;  %v1308_v28 = vrot.slane %v1306_v19, 4  ;;  %vm1290_vm6 = vsmask.f32 7440  ;;  %v380_v36 = vadd.f32 %v7219_v29, %v341_v30  ;;  %vm7568_vm14 = vmor %vm1852_vm12, %vm1853_vm13 }
  0x19   : > { %v381_v37 = vadd.f32 %v7219_v29, %v342_v31  ;;  %vm541_vm7 = vsmask.f32 4368  ;;  %v364_v43 = vmul.f32 %v6290_v39, %v7209_v25  ;;  %v6979_v52 = vld [vmem:[%s9076_s1 + $0xc0] sm:$0xff]   ;;  %v402_v54 = vadd.f32 %v7219_v29, %v363_v42  ;;  %vm7248_vm9 = vmor %vm1289_vm5, %vm1290_vm6  ;;  %v873_v15 = vld [vmem:[#allocation2 + $0x14] sm:$0x1] }
  0x1a   : > { %v1309_v33 = vor.u32 %v1308_v28, %v7214_v27  ;;  %v412_v40 = vmax.f32 %v380_v36, 0.0  ;;  %v6980_v56 = vld [vmem:[%s9076_s1 + $0x140] sm:$0xff]   ;;  %vm7262_vm11 = vmor %vm540_vm1, %vm541_vm7  ;;  %v6387_v22 = vld [vmem:[%s7181_s24 + $0x8] sm:$0xff]  }
  0x1b   : > { %6424 = vmatpush3.bf16.msra.mxu0 %v6969_v8  ;;  %6948 = vmatpush3.bf16.msra.mxu1 %v6969_v8  ;;  %v413_v41 = vmax.f32 %v381_v37, 0.0  ;;  %v403_v55 = vadd.f32 %v7219_v29, %v364_v43  ;;  %v434_v1 = vmax.f32 %v402_v54, 0.0  ;;  %v867_v8 = vld [vmem:[#allocation2 + $0xc] sm:$0xf]  ;;  %v6398_v23 = vld [vmem:[%s7181_s24 + $0x60] sm:$0xff]   ;;  %v6249_v39 = vunpack.c.l.bf16 %v6387_v22 }
  0x1c   : > { %6425 = vmatprep.subr.bf16.mxu0 %v6970_v9  ;;  %6941 = vmatprep.subr.bf16.mxu1 %v6970_v9  ;;  %v1310_v45 = vrot.slane %v1309_v33, 4  ;;  %v6179_v50 = vpack.c.bf16 %v412_v40, %v412_v40  ;;  %v950_v37 = vld [vmem:[#allocation2 + $0x98] sm:$0x1]  ;;  %v6250_v40 = vunpack.c.h.bf16 %v6387_v22  ;;  %v6992_v42 = vld [vmem:[%s9076_s1 + $0x148] sm:$0xff]  }
  0x1d   : > { %v6180_v51 = vpack.c.bf16 %v413_v41, %v413_v41  ;;  %v435_v4 = vmax.f32 %v403_v55, 0.0  ;;  %v6201_v9 = vpack.c.bf16 %v434_v1, %v434_v1  ;;  %v6293_v41 = vunpack.c.l.bf16 %v6398_v23 }
  0x1e   : > { %v1241_v44 = vld [vmem:[#allocation2] sm:$0xf]  ;;  %v544_v60 = vshrl.u32 %v6179_v50, 16  ;;  %v547_v61 = vshll.u32 %v6179_v50, 16  ;;  %v6994_v50 = vld [vmem:[%s9076_s1 + $0x108] sm:$0xff]  }
  0x1f   : > { %6426 = vmatpush3.bf16.msra.mxu0 %v6971_v10  ;;  %6949 = vmatpush3.bf16.msra.mxu1 %v6971_v10  ;;  %v1243_v47 = vld [vmem:[#allocation2 + $0x8] sm:$0x1]  ;;  %v1293_v48 = vshrl.u32 %v1241_v44, 16  ;;  %v1296_v49 = vshll.u32 %v1241_v44, 16  ;;  %v552_v63 = vshrl.u32 %v6180_v51, 16  ;;  %v555_v0 = vshll.u32 %v6180_v51, 16 }
  0x20   : > { %6427 = vmatprep.subr.bf16.mxu0 %v6972_v11  ;;  %6942 = vmatprep.subr.bf16.mxu1 %v6972_v11  ;;  %v1312_v53 = vshll.u32 %v1243_v47, 16  ;;  %v546_v3 = vrot.slane %v544_v60, 7  ;;  %v6202_v16 = vpack.c.bf16 %v435_v4, %v435_v4  ;;  %v731_v20 = vshrl.u32 %v6201_v9, 16 }
  0x21   : > { %v1295_v58 = vrot.slane %v1293_v48, 4  ;;  %v1298_v59 = vrot.slane %v1296_v49, 5  ;;  %v554_v6 = vrot.slane %v552_v63, 7  ;;  %v343_v48 = vmul.f32 %v6249_v39, %v7209_v25 }
  0x22   : > { %v1314_v62 = vrot.slane %v1312_v53, 5  ;;  %v549_v12 = vor.u32 %v547_v61, %v546_v3  ;;  %v550_v14 = vrot.slane %v546_v3, 4  ;;  %v739_v30 = vshrl.u32 %v6202_v16, 16 }
  0x23   : > { %6428 = vmatpush3.bf16.msra.mxu0 %v6973_v21  ;;  %6950 = vmatpush3.bf16.msra.mxu1 %v6973_v21  ;;  %v1299_v2 = vor.u32 %v1298_v59, %v1295_v58  ;;  %v557_v18 = vor.u32 %v555_v0, %v554_v6  ;;  %v559_v19 = vrot.slane %v554_v6, 4  ;;  %v734_v21 = vshll.u32 %v6201_v9, 16  ;;  %v6388_v59 = vld [vmem:[%s7181_s24 + $0x10] sm:$0xff]   ;;  %v7302_v0 = vld [vmem:[%s7181_s24 + $0x68] sm:$0xff]  }
  0x24   : > { %6429 = vmatprep.subr.bf16.mxu0 %v6974_v26  ;;  %6943 = vmatprep.subr.bf16.mxu1 %v6974_v26  ;;  %v1315_v5 = vsel %vm7248_vm9, %v1310_v45, %v1314_v62  ;;  %v6978_v26 = vld [vmem:[#allocation2] sm:$0xff]   ;;  %v868_v28 = vsel %vm7256_vm10, %v549_v12, %v867_v8  ;;  %v742_v31 = vshll.u32 %v6202_v16, 16  ;;  %v733_v36 = vrot.slane %v731_v20, 7 }
  0x25   : > { %v1300_v10 = vrot.slane %v1299_v2, 4  ;;  %v558_v34 = vsel %vm7262_vm11, %v550_v14, %v557_v18  ;;  %869 = vst [vmem:[#allocation2 + $0xc] sm:$0xf] %v868_v28  ;;  %v741_v38 = vrot.slane %v739_v30, 7  ;;  %v6294_v45 = vunpack.c.h.bf16 %v6398_v23 }
  0x26   : > { %870 = vst [vmem:[#allocation2 + $0x10] sm:$0xf] %v558_v34  ;;  %v736_v43 = vor.u32 %v734_v21, %v733_v36  ;;  %v737_v44 = vrot.slane %v733_v36, 4  ;;  %v344_v49 = vmul.f32 %v6250_v40, %v7209_v25  ;;  %v6253_v62 = vunpack.c.l.bf16 %v6388_v59  ;;  %v876_v34 = vld [vmem:[#allocation2 + $0x18] sm:$0xf] }
  0x27   : > { %6430 = vmatpush3.bf16.msra.mxu0 %v6975_v32  ;;  %6951 = vmatpush3.bf16.msra.mxu1 %v6975_v32  ;;  %v1305_v24 = vsel %vm7248_vm9, %v1300_v10, %v7214_v27  ;;  %v946_v32 = vld [vmem:[#allocation2 + $0x90] sm:$0xf]  ;;  %v6984_v27 = vld [vmem:[%s9076_s1 + $0x100] sm:$0xff]   ;;  %v746_v47 = vrot.slane %v741_v38, 4  ;;  %v366_v53 = vmul.f32 %v6294_v45, %v7209_v25  ;;  %v6254_v63 = vunpack.c.h.bf16 %v6388_v59 }
  0x28   : > { %6431 = vmatprep.subr.bf16.mxu0 %v6976_v35  ;;  %6944 = vmatprep.subr.bf16.mxu1 %v6976_v35  ;;  %v5895_v33 = vcombine.low %v1305_v24, %v1315_v5  ;;  %v874_v35 = vsel %vm7188_vm3, %v559_v19, %v873_v15  ;;  %v947_v51 = vsel %vm7256_vm10, %v736_v43, %v946_v32  ;;  %v6297_v4 = vunpack.c.l.bf16 %v7302_v0 }
  0x29   : > { %875 = vst [vmem:[#allocation2 + $0x14] sm:$0x1] %v874_v35  ;;  %948 = vst [vmem:[#allocation2 + $0x90] sm:$0xf] %v947_v51  ;;  %v951_v55 = vsel %vm7188_vm3, %v746_v47, %v950_v37  ;;  %v383_v58 = vadd.f32 %v7219_v29, %v344_v49  ;;  %v405_v61 = vadd.f32 %v7219_v29, %v366_v53  ;;  %v6298_v5 = vunpack.c.h.bf16 %v7302_v0  ;;  %v7002_v0 = vld [vmem:[%s9076_s1 + $0x150] sm:$0xff]  }
  0x2a   : > { %4688 = vmatprep.mubr.bf16.mxu0 %v5895_v33  ;;  %952 = vst [vmem:[#allocation2 + $0x98] sm:$0x1] %v951_v55  ;;  %v345_v12 = vmul.f32 %v6253_v62, %v7209_v25  ;;  %v346_v14 = vmul.f32 %v6254_v63, %v7209_v25  ;;  %v367_v55 = vmul.f32 %v6297_v4, %v7209_v25 }
  0x2b   : > { %6432 = vmatpush3.bf16.msra.mxu0 %v6977_v46  ;;  %6952 = vmatpush3.bf16.msra.mxu1 %v6977_v46  ;;  %v744_v46 = vor.u32 %v742_v31, %v741_v38  ;;  %v415_v3 = vmax.f32 %v383_v58, 0.0  ;;  %v437_v21 = vmax.f32 %v405_v61, 0.0 }
  0x2c   : > { %6529 = vmatprep.subr.bf16.mxu1 %v6979_v52  ;;  %6641 = vmatprep.subr.bf16.mxu0 %v6980_v56  ;;  %v365_v52 = vmul.f32 %v6293_v41, %v7209_v25  ;;  %v382_v56 = vadd.f32 %v7219_v29, %v343_v48  ;;  %v991_v1 = vld [vmem:[#allocation2 + $0xc] sm:$0x1]  ;;  %v7313_v23 = vadd.f32 %v7219_v29, %v345_v12 }
  0x2d   : > { %v745_v54 = vsel %vm7262_vm11, %v737_v44, %v744_v46  ;;  %v992_v6 = vsel %vm7188_vm3, 0, %v991_v1  ;;  %v1245_v9 = vld [vmem:[#allocation2 + $0x10] sm:$0xf]  ;;  %v6182_v20 = vpack.c.bf16 %v415_v3, %v415_v3  ;;  %v7317_v35 = vpack.c.bf16 %v437_v21, %v437_v21  ;;  %v880_v46 = vld [vmem:[#allocation2 + $0x20] sm:$0x1] }
  0x2e   : > { %4689 = vmatmul.mubr.bf16.vlgmr.msra.gmra.mrb[0].mxu0 %v6978_v26  ;;  %949 = vst [vmem:[#allocation2 + $0x94] sm:$0xf] %v745_v54  ;;  %v404_v60 = vadd.f32 %v7219_v29, %v365_v52  ;;  %v414_v2 = vmax.f32 %v382_v56, 0.0  ;;  %993 = vst [vmem:[#allocation2 + $0xc] sm:$0x1] %v992_v6  ;;  %v1326_v16 = vshll.u32 %v1245_v9, 16  ;;  %v7323_v41 = vadd.f32 %v7219_v29, %v346_v14 }
  0x2f   : > { %6642 = vmatpush3.bf16.msra.mxu0 %v6984_v27  ;;  %v1330_v18 = vshrl.u32 %v1245_v9, 16  ;;  %v569_v32 = vshrl.u32 %v6182_v20, 16  ;;  %v572_v33 = vshll.u32 %v6182_v20, 16  ;;  %v756_v14 = vshrl.u32 %v7317_v35, 16 }
  0x30   : > { %6643 = vmatprep.subr.bf16.mxu0 %v6992_v42  ;;  %v1046_v8 = vld [vmem:[#allocation2 + $0x14] sm:$0x1]  ;;  %v436_v10 = vmax.f32 %v404_v60, 0.0  ;;  %v6181_v19 = vpack.c.bf16 %v414_v2, %v414_v2  ;;  %v7315_v24 = vrot.slane %v1326_v16, 5  ;;  %v1024_v31 = vld [vmem:[#allocation2 + $0x90] sm:$0x1]  ;;  %v368_v20 = vmul.f32 %v6298_v5, %v7209_v25 }
  0x31   : > { %v1047_v15 = vsel %vm7196_vm4, 0, %v1046_v8  ;;  %v1332_v26 = vrot.slane %v1330_v18, 4  ;;  %v1025_v27 = vsel %vm7188_vm3, 0, %v1024_v31  ;;  %v1079_v38 = vld [vmem:[#allocation2 + $0x98] sm:$0x1]  ;;  %v571_v45 = vrot.slane %v569_v32, 7 }
  0x32   : > { %1048 = vst [vmem:[#allocation2 + $0x14] sm:$0x1] %v1047_v15  ;;  %v6203_v22 = vpack.c.bf16 %v436_v10, %v436_v10  ;;  %v561_v28 = vshrl.u32 %v6181_v19, 16  ;;  %v564_v30 = vshll.u32 %v6181_v19, 16  ;;  %1026 = vst [vmem:[#allocation2 + $0x90] sm:$0x1] %v1025_v27  ;;  %v7345_v21 = vadd.f32 %v7219_v29, %v367_v55 }
  0x33   : > { %6644 = vmatpush3.bf16.msra.mxu0 %v6994_v50  ;;  %v1333_v37 = vor.u32 %v1332_v26, %v7315_v24  ;;  %v1080_v42 = vsel %vm7196_vm4, 0, %v1079_v38  ;;  %v574_v54 = vor.u32 %v572_v33, %v571_v45  ;;  %v576_v60 = vrot.slane %v571_v45, 4  ;;  %v953_v15 = vld [vmem:[#allocation2 + $0x9c] sm:$0xf]  ;;  %v957_v38 = vld [vmem:[#allocation2 + $0xa4] sm:$0x1] }
  0x34   : > { %v748_v36 = vshrl.u32 %v6203_v22, 16  ;;  %v563_v40 = vrot.slane %v561_v28, 7  ;;  %1081 = vst [vmem:[#allocation2 + $0x98] sm:$0x1] %v1080_v42  ;;  %v751_v2 = vshll.u32 %v6203_v22, 16  ;;  %v759_v19 = vshll.u32 %v7317_v35, 16  ;;  %6645 = vmatprep.subr.bf16.mxu0 %v7002_v0 }
  0x35   : > { %v1278_v39 = vld [vmem:[#allocation2 + $0x94] sm:$0xf]  ;;  %v1334_v47 = vrot.slane %v1333_v37, 4  ;;  %v1244_v51 = vld [vmem:[#allocation2 + $0xc] sm:$0xf]  ;;  %v881_v4 = vsel %vm7188_vm3, %v576_v60, %v880_v46  ;;  %v758_v31 = vrot.slane %v756_v14, 7 }
  0x36   : > { %v1590_v43 = vshll.u32 %v1278_v39, 16  ;;  %v1594_v44 = vshrl.u32 %v1278_v39, 16  ;;  %v566_v48 = vor.u32 %v564_v30, %v563_v40  ;;  %v567_v49 = vrot.slane %v563_v40, 4  ;;  %882 = vst [vmem:[#allocation2 + $0x20] sm:$0x1] %v881_v4  ;;  %v6981_v42 = vld [vmem:[#allocation2 + $0xc] sm:$0xff]  }
  0x37   : > { %v750_v50 = vrot.slane %v748_v36, 7  ;;  %v1317_v58 = vshrl.u32 %v1244_v51, 16  ;;  %v1320_v59 = vshll.u32 %v1244_v51, 16  ;;  %v416_v35 = vmax.f32 %v7313_v23, 0.0  ;;  %v6389_v60 = vld [vmem:[%s7181_s24 + $0x18] sm:$0xff]  }
  0x38   : > { %v7327_v52 = vrot.slane %v1590_v43, 5  ;;  %v1596_v53 = vrot.slane %v1594_v44, 4  ;;  %v877_v61 = vsel %vm7256_vm10, %v566_v48, %v876_v34  ;;  %v575_v1 = vsel %vm7262_vm11, %v567_v49, %v574_v54 }
  0x39   : > { %v1246_v56 = vld [vmem:[#allocation2 + $0x14] sm:$0x1]  ;;  %878 = vst [vmem:[#allocation2 + $0x18] sm:$0xf] %v877_v61  ;;  %v1319_v3 = vrot.slane %v1317_v58, 4  ;;  %v1322_v6 = vrot.slane %v1320_v59, 5  ;;  %v753_v12 = vor.u32 %v751_v2, %v750_v50  ;;  %v761_v37 = vor.u32 %v759_v19, %v758_v31 }
  0x3a   : > { %v1336_v62 = vshll.u32 %v1246_v56, 16  ;;  %v1597_v63 = vor.u32 %v1596_v53, %v7327_v52  ;;  %879 = vst [vmem:[#allocation2 + $0x1c] sm:$0xf] %v575_v1  ;;  %v754_v8 = vrot.slane %v750_v50, 4  ;;  %v1277_v18 = vld [vmem:[#allocation2 + $0x90] sm:$0xf]  ;;  %v6183_v23 = vpack.c.bf16 %v416_v35, %v416_v35 }
  0x3b   : > { %v1323_v16 = vor.u32 %v1322_v6, %v1319_v3  ;;  %v1279_v26 = vld [vmem:[#allocation2 + $0x98] sm:$0x1]  ;;  %v1581_v28 = vshrl.u32 %v1277_v18, 16  ;;  %v1584_v30 = vshll.u32 %v1277_v18, 16  ;;  %v954_v34 = vsel %vm7256_vm10, %v753_v12, %v953_v15  ;;  %v6983_v61 = vld [vmem:[%s9076_s1 + $0x80] sm:$0xff]   ;;  %v7381_v6 = vld [vmem:[%s7181_s24 + $0x70] sm:$0xff]  }
  0x3c   : > { %v1338_v9 = vrot.slane %v1336_v62, 5  ;;  %v7337_v10 = vrot.slane %v1597_v63, 4  ;;  %v1600_v33 = vshll.u32 %v1279_v26, 16  ;;  %v763_v27 = vrot.slane %v758_v31, 4  ;;  %955 = vst [vmem:[#allocation2 + $0x9c] sm:$0xf] %v954_v34 }
  0x3d   : > { %v1324_v32 = vrot.slane %v1323_v16, 4  ;;  %v1583_v5 = vrot.slane %v1581_v28, 4  ;;  %v1586_v36 = vrot.slane %v1584_v30, 5  ;;  %v417_v44 = vmax.f32 %v7323_v41, 0.0  ;;  %v1049_v50 = vld [vmem:[#allocation2 + $0x20] sm:$0x1] }
  0x3e   : > { %v1339_v22 = vsel %vm7248_vm9, %v1334_v47, %v1338_v9  ;;  %v1602_v40 = vrot.slane %v1600_v33, 5  ;;  %v762_v49 = vsel %vm7262_vm11, %v754_v8, %v761_v37  ;;  %v958_v54 = vsel %vm7188_vm3, %v763_v27, %v957_v38  ;;  %v883_v2 = vld [vmem:[#allocation2 + $0x24] sm:$0xf]  ;;  %v6982_v8 = vld [vmem:[#allocation2 + $0x90] sm:$0xff]   ;;  %v6986_v30 = vld [vmem:[%s9076_s1 + $0x88] sm:$0xff]  }
  0x3f   : > { %v1329_v39 = vsel %vm7248_vm9, %v1324_v32, %v7315_v24  ;;  %v1587_v46 = vor.u32 %v1586_v36, %v1583_v5  ;;  %v7006_v24 = vld [vmem:[%s9076_s1 + $0x110] sm:$0xff]   ;;  %956 = vst [vmem:[#allocation2 + $0xa0] sm:$0xf] %v762_v49  ;;  %v1050_v56 = vsel %vm7196_vm4, 0, %v1049_v50  ;;  %959 = vst [vmem:[#allocation2 + $0xa4] sm:$0x1] %v958_v54  ;;  %v6184_v58 = vpack.c.bf16 %v417_v44, %v417_v44 }
  0x40   : > { %v994_v43 = vld [vmem:[#allocation2 + $0x18] sm:$0x1]  ;;  %v5896_v45 = vcombine.low %v1329_v39, %v1339_v22  ;;  %v1603_v41 = vsel %vm7248_vm9, %v7337_v10, %v1602_v40  ;;  %v578_v59 = vshrl.u32 %v6183_v23, 16  ;;  %6646 = vmatpush3.bf16.msra.mxu0 %v7006_v24  ;;  %1051 = vst [vmem:[#allocation2 + $0x20] sm:$0x1] %v1050_v56  ;;  %v581_v1 = vshll.u32 %v6183_v23, 16 }
  0x41   : > { %v995_v47 = vsel %vm7188_vm3, 0, %v994_v43  ;;  %v1248_v48 = vld [vmem:[#allocation2 + $0x1c] sm:$0xf]  ;;  %v1588_v55 = vrot.slane %v1587_v46, 4  ;;  %v407_v3 = vadd.f32 %v7219_v29, %v368_v20  ;;  %v586_v10 = vshrl.u32 %v6184_v58, 16  ;;  %v6985_v20 = vld [vmem:[%s9076_s1 + $0xc8] sm:$0xff]  }
  0x42   : > { %996 = vst [vmem:[#allocation2 + $0x18] sm:$0x1] %v995_v47  ;;  %v1350_v51 = vshll.u32 %v1248_v48, 16  ;;  %v1354_v53 = vshrl.u32 %v1248_v48, 16  ;;  %4696 = vmatprep.mubr.bf16.mxu0 %v5896_v45  ;;  %v580_v9 = vrot.slane %v578_v59, 7  ;;  %v589_v12 = vshll.u32 %v6184_v58, 16 }
  0x43   : > { %4697 = vmatmul.mubr.bf16.gmra.mrb[4].mxu0 %v6981_v42  ;;  %v1593_v4 = vsel %vm7248_vm9, %v1588_v55, %v7327_v52  ;;  %v1027_v16 = vld [vmem:[#allocation2 + $0x9c] sm:$0x1]  ;;  %v438_v18 = vmax.f32 %v7345_v21, 0.0  ;;  %v439_v19 = vmax.f32 %v407_v3, 0.0  ;;  %v588_v28 = vrot.slane %v586_v10, 7  ;;  %v6987_v45 = vld [vmem:[%s9076_s1 + $0xd0] sm:$0xff]  }
  0x44   : > { %v7377_v62 = vrot.slane %v1350_v51, 5  ;;  %v1356_v63 = vrot.slane %v1354_v53, 4  ;;  %v5907_v14 = vcombine.low %v1593_v4, %v1603_v41  ;;  %v1028_v22 = vsel %vm7188_vm3, 0, %v1027_v16  ;;  %v887_v43 = vld [vmem:[#allocation2 + $0x2c] sm:$0x1]  ;;  %v6990_v59 = vld [vmem:[%s9076_s1 + $0x90] sm:$0xff]  }
  0x45   : > { %v583_v26 = vor.u32 %v581_v1, %v580_v9  ;;  %v584_v52 = vrot.slane %v580_v9, 4  ;;  %1029 = vst [vmem:[#allocation2 + $0x9c] sm:$0x1] %v1028_v22  ;;  %v6205_v21 = vpack.c.bf16 %v438_v18, %v438_v18  ;;  %v7398_v32 = vpack.c.bf16 %v439_v19, %v439_v19  ;;  %v6991_v3 = vld [vmem:[%s9076_s1 + $0xd8] sm:$0xff]  }
  0x46   : > { %v1357_v15 = vor.u32 %v1356_v63, %v7377_v62  ;;  %4784 = vmatprep.mubr.bf16.mxu1 %v5907_v14  ;;  %v6257_v33 = vunpack.c.l.bf16 %v6389_v60  ;;  %v1281_v35 = vld [vmem:[#allocation2 + $0xa0] sm:$0xf]  ;;  %v591_v0 = vor.u32 %v589_v12, %v588_v28  ;;  %v6258_v36 = vunpack.c.h.bf16 %v6389_v60  ;;  %v1082_v39 = vld [vmem:[#allocation2 + $0xa4] sm:$0x1]  ;;  %v960_v63 = vld [vmem:[#allocation2 + $0xa8] sm:$0xf] }
  0x47   : > { %4785 = vmatmul.mubr.bf16.vlgmr.msra.gmra.mrb[0].mxu1 %v6982_v8  ;;  %v884_v5 = vsel %vm7256_vm10, %v583_v26, %v883_v2  ;;  %v6301_v37 = vunpack.c.l.bf16 %v7381_v6  ;;  %v1614_v40 = vshll.u32 %v1281_v35, 16  ;;  %v1618_v42 = vshrl.u32 %v1281_v35, 16  ;;  %v1249_v44 = vld [vmem:[#allocation2 + $0x20] sm:$0x1]  ;;  %v6993_v16 = vld [vmem:[%s9076_s1 + $0x98] sm:$0xff]  }
  0x48   : > { %v7396_v31 = vrot.slane %v1357_v15, 4  ;;  %6530 = vmatpush3.bf16.msra.mxu1 %v6983_v61  ;;  %885 = vst [vmem:[#allocation2 + $0x24] sm:$0xf] %v884_v5  ;;  %v1083_v23 = vsel %vm7196_vm4, 0, %v1082_v39  ;;  %v592_v46 = vsel %vm7262_vm11, %v584_v52, %v591_v0  ;;  %v347_v47 = vmul.f32 %v6257_v33, %v7209_v25  ;;  %v7013_v18 = vld [vmem:[%s9076_s1 + $0x158] sm:$0xff]  }
  0x49   : > { %v1247_v34 = vld [vmem:[#allocation2 + $0x18] sm:$0xf]  ;;  %6531 = vmatprep.subr.bf16.mxu1 %v6985_v20  ;;  %v7412_v48 = vmul.f32 %v6258_v36, %v7209_v25  ;;  %v1360_v41 = vshll.u32 %v1249_v44, 16  ;;  %1084 = vst [vmem:[#allocation2 + $0xa4] sm:$0x1] %v1083_v23  ;;  %v7414_v50 = vrot.slane %v1614_v40, 5  ;;  %6647 = vmatprep.subr.bf16.mxu0 %v7013_v18 }
  0x4a   : > { %v1341_v27 = vshrl.u32 %v1247_v34, 16  ;;  %v1344_v38 = vshll.u32 %v1247_v34, 16  ;;  %886 = vst [vmem:[#allocation2 + $0x28] sm:$0xf] %v592_v46  ;;  %v1620_v51 = vrot.slane %v1618_v42, 4  ;;  %v593_v53 = vrot.slane %v588_v28, 4 }
  0x4b   : > { %v765_v54 = vshrl.u32 %v6205_v21, 16  ;;  %v768_v55 = vshll.u32 %v6205_v21, 16  ;;  %v1362_v58 = vrot.slane %v1360_v41, 5  ;;  %v773_v60 = vshrl.u32 %v7398_v32, 16  ;;  %v7014_v28 = vld [vmem:[%s9076_s1 + $0x118] sm:$0xff]   ;;  %v6998_v44 = vld [vmem:[%s9076_s1 + $0xa0] sm:$0xff]  }
  0x4c   : > { %v1343_v49 = vrot.slane %v1341_v27, 4  ;;  %v1346_v24 = vrot.slane %v1344_v38, 5  ;;  %6532 = vmatpush3.bf16.msra.mxu1 %v6986_v30  ;;  %v776_v61 = vshll.u32 %v7398_v32, 16  ;;  %v1280_v1 = vld [vmem:[#allocation2 + $0x9c] sm:$0xf]  ;;  %v1621_v2 = vor.u32 %v1620_v51, %v7414_v50  ;;  %6648 = vmatpush3.bf16.msra.mxu0 %v7014_v28  ;;  %v6999_v46 = vld [vmem:[%s9076_s1 + $0xe8] sm:$0xff]  }
  0x4d   : > { %6533 = vmatprep.subr.bf16.mxu1 %v6987_v45  ;;  %v888_v4 = vsel %vm7188_vm3, %v593_v53, %v887_v43  ;;  %v767_v8 = vrot.slane %v765_v54, 7  ;;  %v386_v9 = vadd.f32 %v7219_v29, %v347_v47  ;;  %v1363_v12 = vsel %vm7248_vm9, %v7396_v31, %v1362_v58  ;;  %v6988_v32 = vld [vmem:[#allocation2 + $0x18] sm:$0xff]   ;;  %v964_v34 = vld [vmem:[#allocation2 + $0xb0] sm:$0x1] }
  0x4e   : > { %v1347_v56 = vor.u32 %v1346_v24, %v1343_v49  ;;  %v1605_v14 = vshrl.u32 %v1280_v1, 16  ;;  %v1608_v15 = vshll.u32 %v1280_v1, 16  ;;  %889 = vst [vmem:[#allocation2 + $0x2c] sm:$0x1] %v888_v4  ;;  %v1622_v19 = vrot.slane %v1621_v2, 4  ;;  %v7018_v24 = vld [vmem:[%s9076_s1 + $0x160] sm:$0xff]  }
  0x4f   : > { %v997_v20 = vld [vmem:[#allocation2 + $0x24] sm:$0x1]  ;;  %v770_v22 = vor.u32 %v768_v55, %v767_v8  ;;  %v771_v26 = vrot.slane %v767_v8, 4  ;;  %v775_v52 = vrot.slane %v773_v60, 7  ;;  %v387_v47 = vadd.f32 %v7219_v29, %v7412_v48  ;;  %6649 = vmatprep.subr.bf16.mxu0 %v7018_v24  ;;  %v6989_v1 = vld [vmem:[#allocation2 + $0x9c] sm:$0xff]   ;;  %v7000_v4 = vld [vmem:[%s9076_s1 + $0xa8] sm:$0xff]  }
  0x50   : > { %v1348_v10 = vrot.slane %v1347_v56, 4  ;;  %v1607_v31 = vrot.slane %v1605_v14, 4  ;;  %v1610_v21 = vrot.slane %v1608_v15, 5  ;;  %6534 = vmatpush3.bf16.msra.mxu1 %v6990_v59  ;;  %v998_v33 = vsel %vm7188_vm3, 0, %v997_v20  ;;  %v1282_v0 = vld [vmem:[#allocation2 + $0xa4] sm:$0x1] }
  0x51   : > { %6535 = vmatprep.subr.bf16.mxu1 %v6991_v3  ;;  %999 = vst [vmem:[#allocation2 + $0x24] sm:$0x1] %v998_v33  ;;  %v1251_v5 = vld [vmem:[#allocation2 + $0x28] sm:$0xf]  ;;  %v778_v36 = vor.u32 %v776_v61, %v775_v52  ;;  %v780_v27 = vrot.slane %v775_v52, 4  ;;  %v961_v38 = vsel %vm7256_vm10, %v770_v22, %v960_v63  ;;  %v1624_v40 = vshll.u32 %v1282_v0, 16 }
  0x52   : > { %v1353_v30 = vsel %vm7248_vm9, %v1348_v10, %v7377_v62  ;;  %v6995_v62 = vld [vmem:[%s9076_s1 + $0xe0] sm:$0xff]   ;;  %v1611_v39 = vor.u32 %v1610_v21, %v1607_v31  ;;  %v1374_v42 = vshll.u32 %v1251_v5, 16  ;;  %v1378_v43 = vshrl.u32 %v1251_v5, 16  ;;  %962 = vst [vmem:[#allocation2 + $0xa8] sm:$0xf] %v961_v38  ;;  %v7001_v18 = vld [vmem:[%s9076_s1 + $0xf0] sm:$0xff]  }
  0x53   : > { %v5897_v35 = vcombine.low %v1353_v30, %v1363_v12  ;;  %v779_v23 = vsel %vm7262_vm11, %v771_v26, %v778_v36  ;;  %v965_v45 = vsel %vm7188_vm3, %v780_v27, %v964_v34  ;;  %v418_v49 = vmax.f32 %v386_v9, 0.0  ;;  %v7472_v60 = vld [vmem:[%s7181_s24 + $0x20] sm:$0xff]   ;;  %v890_v14 = vld [vmem:[#allocation2 + $0x30] sm:$0xf]  ;;  %v7007_v27 = vld [vmem:[%s9076_s1 + $0xf8] sm:$0xff]  }
  0x54   : > { %v1612_v41 = vrot.slane %v1611_v39, 4  ;;  %v1626_v51 = vrot.slane %v1624_v40, 5  ;;  %6536 = vmatpush3.bf16.msra.mxu1 %v6993_v16  ;;  %v7465_v53 = vrot.slane %v1374_v42, 5  ;;  %v1380_v54 = vrot.slane %v1378_v43, 4  ;;  %963 = vst [vmem:[#allocation2 + $0xac] sm:$0xf] %v779_v23 }
  0x55   : > { %4704 = vmatprep.mubr.bf16.mxu0 %v5897_v35  ;;  %966 = vst [vmem:[#allocation2 + $0xb0] sm:$0x1] %v965_v45  ;;  %v1052_v55 = vld [vmem:[#allocation2 + $0x2c] sm:$0x1]  ;;  %6537 = vmatprep.subr.bf16.mxu1 %v6995_v62  ;;  %v419_v56 = vmax.f32 %v387_v47, 0.0  ;;  %v6185_v58 = vpack.c.bf16 %v418_v49, %v418_v49  ;;  %v6302_v48 = vunpack.c.h.bf16 %v7381_v6  ;;  %v369_v59 = vmul.f32 %v6301_v37, %v7209_v25  ;;  %v7021_v6 = vld [vmem:[%s9076_s1 + $0x120] sm:$0xff]  }
  0x56   : > { %4705 = vmatmul.mubr.bf16.gmra.mrb[8].mxu0 %v6988_v32  ;;  %v1617_v61 = vsel %vm7248_vm9, %v1612_v41, %v7414_v50  ;;  %v1627_v63 = vsel %vm7248_vm9, %v1622_v19, %v1626_v51  ;;  %v1053_v2 = vsel %vm7196_vm4, 0, %v1052_v55  ;;  %v1381_v3 = vor.u32 %v1380_v54, %v7465_v53  ;;  %v7005_v33 = vld [vmem:[%s9076_s1 + $0xb0] sm:$0xff]   ;;  %v894_v42 = vld [vmem:[#allocation2 + $0x38] sm:$0x1] }
  0x57   : > { %v5908_v37 = vcombine.low %v1617_v61, %v1627_v63  ;;  %1054 = vst [vmem:[#allocation2 + $0x2c] sm:$0x1] %v1053_v2  ;;  %v6186_v50 = vpack.c.bf16 %v419_v56, %v419_v56  ;;  %v595_v8 = vshrl.u32 %v6185_v58, 16  ;;  %v598_v9 = vshll.u32 %v6185_v58, 16  ;;  %6650 = vmatpush3.bf16.msra.mxu0 %v7021_v6  ;;  %v7514_v58 = vld [vmem:[%s7181_s24 + $0x28] sm:$0xff]   ;;  %v7008_v63 = vld [vmem:[%s9076_s1 + $0xb8] sm:$0xff]  }
  0x58   : > { %v1250_v10 = vld [vmem:[#allocation2 + $0x24] sm:$0xf]  ;;  %v7488_v12 = vrot.slane %v1381_v3, 4  ;;  %6538 = vmatpush3.bf16.msra.mxu1 %v6998_v44  ;;  %v370_v15 = vmul.f32 %v6302_v48, %v7209_v25  ;;  %v408_v16 = vadd.f32 %v7219_v29, %v369_v59  ;;  %v6261_v19 = vunpack.c.l.bf16 %v7472_v60 }
  0x59   : > { %4792 = vmatprep.mubr.bf16.mxu1 %v5908_v37  ;;  %v1365_v20 = vshrl.u32 %v1250_v10, 16  ;;  %v1368_v22 = vshll.u32 %v1250_v10, 16  ;;  %v1030_v26 = vld [vmem:[#allocation2 + $0xa8] sm:$0x1]  ;;  %6539 = vmatprep.subr.bf16.mxu1 %v6999_v46  ;;  %v597_v52 = vrot.slane %v595_v8, 7  ;;  %v603_v28 = vshrl.u32 %v6186_v50, 16 }
  0x5a   : > { %4793 = vmatmul.mubr.bf16.gmra.mrb[4].mxu1 %v6989_v1  ;;  %v1031_v30 = vsel %vm7188_vm3, 0, %v1030_v26  ;;  %v606_v31 = vshll.u32 %v6186_v50, 16  ;;  %v409_v21 = vadd.f32 %v7219_v29, %v370_v15  ;;  %v440_v32 = vmax.f32 %v408_v16, 0.0  ;;  %v7010_v6 = vld [vmem:[%s9076_s1 + $0x1c0] sm:$0xff]   ;;  %v967_v8 = vld [vmem:[#allocation2 + $0xb4] sm:$0xf] }
  0x5b   : > { %v1367_v34 = vrot.slane %v1365_v20, 4  ;;  %v1370_v35 = vrot.slane %v1368_v22, 5  ;;  %1032 = vst [vmem:[#allocation2 + $0xa8] sm:$0x1] %v1031_v30  ;;  %v1284_v5 = vld [vmem:[#allocation2 + $0xac] sm:$0xf]  ;;  %v600_v36 = vor.u32 %v598_v9, %v597_v52  ;;  %v6262_v38 = vunpack.c.h.bf16 %v7472_v60 }
  0x5c   : > { %v1085_v0 = vld [vmem:[#allocation2 + $0xb0] sm:$0x1]  ;;  %v1638_v62 = vshll.u32 %v1284_v5, 16  ;;  %v1642_v39 = vshrl.u32 %v1284_v5, 16  ;;  %6540 = vmatpush3.bf16.msra.mxu1 %v7000_v4  ;;  %v601_v40 = vrot.slane %v597_v52, 4  ;;  %v605_v44 = vrot.slane %v603_v28, 7 }
  0x5d   : > { %v1086_v29 = vsel %vm7196_vm4, 0, %v1085_v0  ;;  %v1371_v43 = vor.u32 %v1370_v35, %v1367_v34  ;;  %v891_v23 = vsel %vm7256_vm10, %v600_v36, %v890_v14  ;;  %v441_v45 = vmax.f32 %v409_v21, 0.0  ;;  %6541 = vmatprep.subr.bf16.mxu1 %v7001_v18  ;;  %v6996_v50 = vld [vmem:[#allocation2 + $0x24] sm:$0xff]   ;;  %v7541_v10 = vld [vmem:[%s9078_s3] ss:$0 sm:$0xff] }
  0x5e   : > { %1087 = vst [vmem:[#allocation2 + $0xb0] sm:$0x1] %v1086_v29  ;;  %v1252_v46 = vld [vmem:[#allocation2 + $0x2c] sm:$0x1]  ;;  %v7510_v47 = vrot.slane %v1638_v62, 5  ;;  %v1644_v49 = vrot.slane %v1642_v39, 4  ;;  %v6207_v24 = vpack.c.bf16 %v440_v32, %v440_v32  ;;  %v349_v41 = vmul.f32 %v6261_v19, %v7209_v25 }
  0x5f   : > { %892 = vst [vmem:[#allocation2 + $0x30] sm:$0xf] %v891_v23  ;;  %v1372_v51 = vrot.slane %v1371_v43, 4  ;;  %v1384_v54 = vshll.u32 %v1252_v46, 16  ;;  %v608_v55 = vor.u32 %v606_v31, %v605_v44  ;;  %v610_v56 = vrot.slane %v605_v44, 4  ;;  %v7025_v22 = vld [vmem:[%s9076_s1 + $0x168] sm:$0xff]  }
  0x60   : > { %v1645_v48 = vor.u32 %v1644_v49, %v7510_v47  ;;  %v6208_v59 = vpack.c.bf16 %v441_v45, %v441_v45  ;;  %v782_v60 = vshrl.u32 %v6207_v24, 16  ;;  %v785_v61 = vshll.u32 %v6207_v24, 16  ;;  %6542 = vmatpush3.bf16.msra.mxu1 %v7005_v33  ;;  %v1756_v21 = vld [vmem:[#allocation2] sm:$0xe]  ;;  %6651 = vmatprep.subr.bf16.mxu0 %v7025_v22  ;;  %v7026_v0 = vld [vmem:[%s9076_s1 + $0x128] sm:$0xff]  }
  0x61   : > { %v1377_v25 = vsel %vm7248_vm9, %v1372_v51, %v7465_v53  ;;  %v1386_v1 = vrot.slane %v1384_v54, 5  ;;  %v609_v2 = vsel %vm7262_vm11, %v601_v40, %v608_v55  ;;  %v895_v3 = vsel %vm7188_vm3, %v610_v56, %v894_v42  ;;  %6543 = vmatprep.subr.bf16.mxu1 %v7007_v27  ;;  %v7535_v53 = vld [vmem:[%s9077_s2] ss:$0 sm:$0xff]  ;;  %v1757_v29 = vld [vmem:[#allocation2 + $0x4] sm:$0xf]  ;;  %6652 = vmatpush3.bf16.msra.mxu0 %v7026_v0 }
  0x62   : > { %v1283_v37 = vld [vmem:[#allocation2 + $0xa8] sm:$0xf]  ;;  %v7530_v4 = vrot.slane %v1645_v48, 4  ;;  %893 = vst [vmem:[#allocation2 + $0x34] sm:$0xf] %v609_v2  ;;  %v350_v9 = vmul.f32 %v7535_v53, %v6262_v38  ;;  %v388_v14 = vadd.f32 %v7541_v10, %v349_v41  ;;  %v6265_v15 = vunpack.c.l.bf16 %v7514_v58 }
  0x63   : > { %896 = vst [vmem:[#allocation2 + $0x38] sm:$0x1] %v895_v3  ;;  %v1387_v16 = vsel %vm7248_vm9, %v7488_v12, %v1386_v1  ;;  %v1629_v18 = vshrl.u32 %v1283_v37, 16  ;;  %v1632_v19 = vshll.u32 %v1283_v37, 16  ;;  %v784_v20 = vrot.slane %v782_v60, 7  ;;  %v6997_v56 = vld [vmem:[#allocation2 + $0xa8] sm:$0xff]  }
  0x64   : > { %v5898_v26 = vcombine.low %v1377_v25, %v1387_v16  ;;  %v790_v28 = vshrl.u32 %v6208_v59, 16  ;;  %v793_v30 = vshll.u32 %v6208_v59, 16  ;;  %6544 = vmatpush3.bf16.msra.mxu1 %v7008_v63  ;;  %v389_v31 = vadd.f32 %v7541_v10, %v350_v9  ;;  %v971_v23 = vld [vmem:[#allocation2 + $0xbc] sm:$0x1]  ;;  %v1758_v9 = vld [vmem:[#allocation2 + $0x8] sm:$0x1] }
  0x65   : > { %v1285_v52 = vld [vmem:[#allocation2 + $0xb0] sm:$0x1]  ;;  %v1631_v32 = vrot.slane %v1629_v18, 4  ;;  %v1634_v33 = vrot.slane %v1632_v19, 5  ;;  %v787_v12 = vor.u32 %v785_v61, %v784_v20  ;;  %6753 = vmatprep.subr.bf16.mxu1 %v7010_v6  ;;  %v788_v36 = vrot.slane %v784_v20, 4 }
  0x66   : > { %v1648_v34 = vshll.u32 %v1285_v52, 16  ;;  %v1000_v35 = vld [vmem:[#allocation2 + $0x30] sm:$0x1]  ;;  %4712 = vmatprep.mubr.bf16.mxu0 %v5898_v26  ;;  %v792_v27 = vrot.slane %v790_v28, 7  ;;  %v420_v38 = vmax.f32 %v388_v14, 0.0  ;;  %v421_v42 = vmax.f32 %v389_v31, 0.0 }
  0x67   : > { %v1001_v5 = vsel %vm7188_vm3, 0, %v1000_v35  ;;  %v1635_v62 = vor.u32 %v1634_v33, %v1631_v32  ;;  %4713 = vmatmul.mubr.bf16.gmra.mrb[12].mxu0 %v6996_v50  ;;  %v968_v40 = vsel %vm7256_vm10, %v787_v12, %v967_v8  ;;  %v5911_v46 = vrot.slane %v1756_v21, 9  ;;  %v897_v8 = vld [vmem:[#allocation2 + $0x3c] sm:$0xf]  ;;  %v901_v18 = vld [vmem:[#allocation2 + $0x44] sm:$0x1] }
  0x68   : > { %v1650_v39 = vrot.slane %v1648_v34, 5  ;;  %1002 = vst [vmem:[#allocation2 + $0x30] sm:$0x1] %v1001_v5  ;;  %v795_v43 = vor.u32 %v793_v30, %v792_v27  ;;  %v797_v44 = vrot.slane %v792_v27, 4  ;;  %969 = vst [vmem:[#allocation2 + $0xb4] sm:$0xf] %v968_v40  ;;  %v6187_v45 = vpack.c.bf16 %v420_v38, %v420_v38 }
  0x69   : > { %v1636_v49 = vrot.slane %v1635_v62, 4  ;;  %v1254_v51 = vld [vmem:[#allocation2 + $0x34] sm:$0xf]  ;;  %v6188_v54 = vpack.c.bf16 %v421_v42, %v421_v42  ;;  %v1857_v55 = vrot.slane %v1757_v29, 5  ;;  %v6266_v52 = vunpack.c.h.bf16 %v7514_v58 }
  0x6a   : > { %v1651_v24 = vsel %vm7248_vm9, %v7530_v4, %v1650_v39  ;;  %v1055_v41 = vld [vmem:[#allocation2 + $0x38] sm:$0x1]  ;;  %v1398_v59 = vshll.u32 %v1254_v51, 16  ;;  %v1402_v60 = vshrl.u32 %v1254_v51, 16  ;;  %v796_v61 = vsel %vm7262_vm11, %v788_v36, %v795_v43 }
  0x6b   : > { %v1056_v48 = vsel %vm7196_vm4, 0, %v1055_v41  ;;  %v1641_v25 = vsel %vm7248_vm9, %v1636_v49, %v7510_v47  ;;  %970 = vst [vmem:[#allocation2 + $0xb8] sm:$0xf] %v796_v61  ;;  %v972_v1 = vsel %vm7188_vm3, %v797_v44, %v971_v23  ;;  %v612_v2 = vshrl.u32 %v6187_v45, 16  ;;  %v7034_v49 = vld [vmem:[%s9076_s1 + $0x130] sm:$0xff]  }
  0x6c   : > { %1057 = vst [vmem:[#allocation2 + $0x38] sm:$0x1] %v1056_v48  ;;  %v615_v3 = vshll.u32 %v6187_v45, 16  ;;  %v5909_v6 = vcombine.low %v1641_v25, %v1651_v24  ;;  %v7577_v37 = vrot.slane %v1398_v59, 5  ;;  %v1404_v4 = vrot.slane %v1402_v60, 4 }
  0x6d   : > { %973 = vst [vmem:[#allocation2 + $0xbc] sm:$0x1] %v972_v1  ;;  %v620_v50 = vshrl.u32 %v6188_v54, 16  ;;  %v614_v14 = vrot.slane %v612_v2, 7  ;;  %v623_v16 = vshll.u32 %v6188_v54, 16  ;;  %v7581_v47 = vsel %vm7568_vm14, %v5911_v46, %v1857_v55 }
  0x6e   : > { %v1859_v19 = vrot.slane %v1857_v55, 4  ;;  %4800 = vmatprep.mubr.bf16.mxu1 %v5909_v6  ;;  %v1405_v22 = vor.u32 %v1404_v4, %v7577_v37  ;;  %v351_v28 = vmul.f32 %v7535_v53, %v6265_v15  ;;  %v1860_v27 = vrot.slane %v1758_v9, 5  ;;  %v7032_v15 = vld [vmem:[%s9076_s1 + $0x170] sm:$0xff]   ;;  %v7611_v55 = vld [vmem:[#allocation2 + $0xc] sm:$0xe] }
  0x6f   : > { %v1253_v20 = vld [vmem:[#allocation2 + $0x30] sm:$0xf]  ;;  %v622_v26 = vrot.slane %v620_v50, 7  ;;  %4801 = vmatmul.mubr.bf16.gmra.mrb[8].mxu1 %v6997_v56  ;;  %v1033_v21 = vld [vmem:[#allocation2 + $0xb4] sm:$0x1]  ;;  %v617_v32 = vor.u32 %v615_v3, %v614_v14  ;;  %v618_v33 = vrot.slane %v614_v14, 4  ;;  %v352_v40 = vmul.f32 %v7535_v53, %v6266_v52  ;;  %6653 = vmatprep.subr.bf16.mxu0 %v7032_v15 }
  0x70   : > { %v1389_v30 = vshrl.u32 %v1253_v20, 16  ;;  %v1392_v31 = vshll.u32 %v1253_v20, 16  ;;  %v1406_v34 = vrot.slane %v1405_v22, 4  ;;  %v1034_v35 = vsel %vm7188_vm3, 0, %v1033_v21  ;;  %v7613_v56 = vld [vmem:[#allocation2 + $0x10] sm:$0xf]  ;;  %6654 = vmatpush3.bf16.msra.mxu0 %v7034_v49 }
  0x71   : > { %v625_v12 = vor.u32 %v623_v16, %v622_v26  ;;  %v627_v0 = vrot.slane %v622_v26, 4  ;;  %1035 = vst [vmem:[#allocation2 + $0xb4] sm:$0x1] %v1034_v35  ;;  %v898_v58 = vsel %vm7256_vm10, %v617_v32, %v897_v8  ;;  %v390_v42 = vadd.f32 %v7541_v10, %v351_v28  ;;  %v7003_v50 = vld [vmem:[#allocation2 + $0x30] sm:$0xff]  }
  0x72   : > { %v1391_v5 = vrot.slane %v1389_v30, 4  ;;  %v1394_v36 = vrot.slane %v1392_v31, 5  ;;  %v1287_v29 = vld [vmem:[#allocation2 + $0xb8] sm:$0xf]  ;;  %899 = vst [vmem:[#allocation2 + $0x3c] sm:$0xf] %v898_v58  ;;  %v7608_v41 = vsel %vm7568_vm14, %v1859_v19, %v1860_v27  ;;  %v391_v51 = vadd.f32 %v7541_v10, %v352_v40 }
  0x73   : > { %v1255_v38 = vld [vmem:[#allocation2 + $0x38] sm:$0x1]  ;;  %v626_v62 = vsel %vm7262_vm11, %v618_v33, %v625_v12  ;;  %v902_v39 = vsel %vm7188_vm3, %v627_v0, %v901_v18  ;;  %v1662_v45 = vshll.u32 %v1287_v29, 16  ;;  %v1666_v46 = vshrl.u32 %v1287_v29, 16  ;;  %v6392_v9 = vld [vmem:[%s7181_s24 + $0x30] sm:$0xff]  }
  0x74   : > { %v1395_v43 = vor.u32 %v1394_v36, %v1391_v5  ;;  %v1408_v44 = vshll.u32 %v1255_v38, 16  ;;  %v1088_v23 = vld [vmem:[#allocation2 + $0xbc] sm:$0x1]  ;;  %900 = vst [vmem:[#allocation2 + $0x40] sm:$0xf] %v626_v62  ;;  %v422_v54 = vmax.f32 %v390_v42, 0.0  ;;  %v5927_v25 = vcombine.low %v7581_v47, %v7608_v41 }
  0x75   : > { %903 = vst [vmem:[#allocation2 + $0x44] sm:$0x1] %v902_v39  ;;  %v1089_v24 = vsel %vm7196_vm4, 0, %v1088_v23  ;;  %v7615_v60 = vrot.slane %v1662_v45, 5  ;;  %v1668_v61 = vrot.slane %v1666_v46, 4  ;;  %v423_v1 = vmax.f32 %v391_v51, 0.0 }
  0x76   : > { %v1396_v48 = vrot.slane %v1395_v43, 4  ;;  %v1410_v59 = vrot.slane %v1408_v44, 5  ;;  %1090 = vst [vmem:[#allocation2 + $0xbc] sm:$0x1] %v1089_v24  ;;  %v6189_v2 = vpack.c.bf16 %v422_v54, %v422_v54  ;;  %v5912_v8 = vrot.slane %v7611_v55, 9  ;;  %v7039_v24 = vld [vmem:[%s9076_s1 + $0x178] sm:$0xff]  }
  0x77   : > { %v1669_v4 = vor.u32 %v1668_v61, %v7615_v60  ;;  %v6190_v18 = vpack.c.bf16 %v423_v1, %v423_v1  ;;  %v1864_v20 = vrot.slane %v7613_v56, 5  ;;  %v904_v30 = vld [vmem:[#allocation2 + $0x48] sm:$0xf]  ;;  %v6269_v35 = vunpack.c.l.bf16 %v6392_v9  ;;  %v908_v44 = vld [vmem:[#allocation2 + $0x50] sm:$0x1]  ;;  %6655 = vmatprep.subr.bf16.mxu0 %v7039_v24 }
  0x78   : > { %v1401_v3 = vsel %vm7248_vm9, %v1396_v48, %v7577_v37  ;;  %v1411_v6 = vsel %vm7248_vm9, %v1406_v34, %v1410_v59  ;;  %v1286_v16 = vld [vmem:[#allocation2 + $0xb4] sm:$0xf]  ;;  %v629_v19 = vshrl.u32 %v6189_v2, 16  ;;  %v632_v37 = vshll.u32 %v6189_v2, 16  ;;  %v1762_v48 = vld [vmem:[#allocation2 + $0x18] sm:$0xe] }
  0x79   : > { %v5899_v14 = vcombine.low %v1401_v3, %v1411_v6  ;;  %v1653_v22 = vshrl.u32 %v1286_v16, 16  ;;  %v1656_v26 = vshll.u32 %v1286_v16, 16  ;;  %v1670_v52 = vrot.slane %v1669_v4, 4  ;;  %v1003_v28 = vld [vmem:[#allocation2 + $0x3c] sm:$0x1]  ;;  %v7009_v1 = vld [vmem:[#allocation2 + $0xc] sm:$0xff]  }
  0x7a   : > { %v1004_v31 = vsel %vm7188_vm3, 0, %v1003_v28  ;;  %v631_v33 = vrot.slane %v629_v19, 7  ;;  %v1761_v34 = vld [vmem:[#allocation2 + $0x14] sm:$0x1]  ;;  %v6270_v12 = vunpack.c.h.bf16 %v6392_v9  ;;  %v637_v62 = vshrl.u32 %v6190_v18, 16  ;;  %v7040_v59 = vld [vmem:[%s9076_s1 + $0x138] sm:$0xff]  }
  0x7b   : > { %4720 = vmatprep.mubr.bf16.mxu0 %v5899_v14  ;;  %v1257_v32 = vld [vmem:[#allocation2 + $0x40] sm:$0xf]  ;;  %v1655_v0 = vrot.slane %v1653_v22, 4  ;;  %v1658_v5 = vrot.slane %v1656_v26, 5  ;;  %1005 = vst [vmem:[#allocation2 + $0x3c] sm:$0x1] %v1004_v31  ;;  %v353_v56 = vmul.f32 %v7535_v53, %v6269_v35  ;;  %6656 = vmatpush3.bf16.msra.mxu0 %v7040_v59 }
  0x7c   : > { %v1058_v21 = vld [vmem:[#allocation2 + $0x44] sm:$0x1]  ;;  %4721 = vmatmul.mubr.bf16.gmra.mrb[16].mxu0 %v7003_v50  ;;  %v1422_v58 = vshll.u32 %v1257_v32, 16  ;;  %v1426_v15 = vshrl.u32 %v1257_v32, 16  ;;  %v634_v38 = vor.u32 %v632_v37, %v631_v33  ;;  %v635_v29 = vrot.slane %v631_v33, 4  ;;  %v7004_v16 = vld [vmem:[#allocation2 + $0xb4] sm:$0xff]  }
  0x7d   : > { %v1059_v36 = vsel %vm7196_vm4, 0, %v1058_v21  ;;  %v1288_v27 = vld [vmem:[#allocation2 + $0xbc] sm:$0x1]  ;;  %v1659_v39 = vor.u32 %v1658_v5, %v1655_v0  ;;  %v640_v43 = vshll.u32 %v6190_v18, 16  ;;  %v639_v45 = vrot.slane %v637_v62, 7  ;;  %v7044_v59 = vld [vmem:[%s9076_s1 + $0x200] sm:$0xff]  }
  0x7e   : > { %1060 = vst [vmem:[#allocation2 + $0x44] sm:$0x1] %v1059_v36  ;;  %v1672_v40 = vshll.u32 %v1288_v27, 16  ;;  %v7632_v42 = vrot.slane %v1422_v58, 5  ;;  %v1428_v23 = vrot.slane %v1426_v15, 4  ;;  %v905_v46 = vsel %vm7256_vm10, %v634_v38, %v904_v30  ;;  %v6393_v30 = vld [vmem:[%s7181_s24 + $0x38] sm:$0xff]   ;;  %6889 = vmatprep.subr.bf16.mxu0 %v7044_v59 }
  0x7f   : > { %v1866_v49 = vrot.slane %v1864_v20, 4  ;;  %v1660_v51 = vrot.slane %v1659_v39, 4  ;;  %906 = vst [vmem:[#allocation2 + $0x48] sm:$0xf] %v905_v46  ;;  %v1867_v55 = vrot.slane %v1761_v34, 5  ;;  %v642_v2 = vor.u32 %v640_v43, %v639_v45 }
  0x80   : > { %v1674_v54 = vrot.slane %v1672_v40, 5  ;;  %v1429_v61 = vor.u32 %v1428_v23, %v7632_v42  ;;  %v644_v3 = vrot.slane %v639_v45, 4  ;;  %v354_v6 = vmul.f32 %v7535_v53, %v6270_v12  ;;  %v1763_v4 = vld [vmem:[#allocation2 + $0x1c] sm:$0xf]  ;;  %v1764_v50 = vld [vmem:[#allocation2 + $0x20] sm:$0x1] }
  0x81   : > { %v1665_v9 = vsel %vm7248_vm9, %v1660_v51, %v7615_v60  ;;  %v7652_v18 = vsel %vm7568_vm14, %v5912_v8, %v1864_v20  ;;  %v392_v19 = vadd.f32 %v7541_v10, %v353_v56  ;;  %v643_v37 = vsel %vm7262_vm11, %v635_v29, %v642_v2  ;;  %v7012_v45 = vld [vmem:[%s9076_s1 + $0x180] sm:$0xff]   ;;  %v7019_v2 = vld [vmem:[%s9076_s1 + $0x1c8] sm:$0xff]  }
  0x82   : > { %v1675_v14 = vsel %vm7248_vm9, %v1670_v52, %v1674_v54  ;;  %v1256_v26 = vld [vmem:[#allocation2 + $0x3c] sm:$0xf]  ;;  %v1430_v28 = vrot.slane %v1429_v61, 4  ;;  %v909_v60 = vsel %vm7188_vm3, %v644_v3, %v908_v44  ;;  %907 = vst [vmem:[#allocation2 + $0x4c] sm:$0xf] %v643_v37  ;;  %v7662_v8 = vsel %vm7568_vm14, %v1866_v49, %v1867_v55  ;;  %v7672_v44 = vld [vmem:[%s7181_s24 + $0x40] sm:$0xff]  }
  0x83   : > { %v5910_v22 = vcombine.low %v1665_v9, %v1675_v14  ;;  %v1413_v52 = vshrl.u32 %v1256_v26, 16  ;;  %v1416_v21 = vshll.u32 %v1256_v26, 16  ;;  %910 = vst [vmem:[#allocation2 + $0x50] sm:$0x1] %v909_v60  ;;  %v393_v20 = vadd.f32 %v7541_v10, %v354_v6  ;;  %v7015_v54 = vld [vmem:[#allocation2 + $0x18] sm:$0xff]  }
  0x84   : > { %v424_v33 = vmax.f32 %v392_v19, 0.0  ;;  %v5913_v34 = vrot.slane %v1762_v48, 9  ;;  %v1871_v35 = vrot.slane %v1763_v4, 5  ;;  %v1874_v36 = vrot.slane %v1764_v50, 5  ;;  %v7011_v14 = vld [vmem:[#allocation2 + $0x3c] sm:$0xff]  }
  0x85   : > { %v1258_v31 = vld [vmem:[#allocation2 + $0x44] sm:$0x1]  ;;  %4808 = vmatprep.mubr.bf16.mxu1 %v5910_v22  ;;  %v1415_v12 = vrot.slane %v1413_v52, 4  ;;  %v1418_v0 = vrot.slane %v1416_v21, 5  ;;  %v425_v5 = vmax.f32 %v393_v20, 0.0  ;;  %v6273_v43 = vunpack.c.l.bf16 %v6393_v30  ;;  %v7022_v20 = vld [vmem:[%s9076_s1 + $0x188] sm:$0xff]  }
  0x86   : > { %v1432_v32 = vshll.u32 %v1258_v31, 16  ;;  %4809 = vmatmul.mubr.bf16.gmra.mrb[12].mxu1 %v7004_v16  ;;  %v1006_v27 = vld [vmem:[#allocation2 + $0x48] sm:$0x1]  ;;  %v6191_v15 = vpack.c.bf16 %v424_v33, %v424_v33  ;;  %v7667_v38 = vsel %vm7568_vm14, %v5913_v34, %v1871_v35  ;;  %v1873_v29 = vrot.slane %v1871_v35, 4  ;;  %v911_v26 = vld [vmem:[#allocation2 + $0x54] sm:$0xf] }
  0x87   : > { %4849 = vmatprep.mubr.bf16.mxu1 %v7009_v1  ;;  %v1419_v62 = vor.u32 %v1418_v0, %v1415_v12  ;;  %v1007_v39 = vsel %vm7188_vm3, 0, %v1006_v27  ;;  %v6192_v40 = vpack.c.bf16 %v425_v5, %v425_v5  ;;  %v5928_v46 = vcombine.low %v7652_v18, %v7662_v8  ;;  %v1765_v52 = vld [vmem:[#allocation2 + $0x24] sm:$0xe]  ;;  %v7028_v34 = vld [vmem:[%s9076_s1 + $0x1d0] sm:$0xff]   ;;  %v1766_v12 = vld [vmem:[#allocation2 + $0x28] sm:$0xf] }
  0x88   : > { %v1434_v58 = vrot.slane %v1432_v32, 5  ;;  %1008 = vst [vmem:[#allocation2 + $0x48] sm:$0x1] %v1007_v39  ;;  %v646_v49 = vshrl.u32 %v6191_v15, 16  ;;  %v7683_v24 = vsel %vm7568_vm14, %v1873_v29, %v1874_v36  ;;  %v649_v55 = vshll.u32 %v6191_v15, 16  ;;  %v7038_v8 = vld [vmem:[%s9076_s1 + $0x198] sm:$0xff]  }
  0x89   : > { %v1420_v51 = vrot.slane %v1419_v62, 4  ;;  %v654_v56 = vshrl.u32 %v6192_v40, 16  ;;  %v657_v48 = vshll.u32 %v6192_v40, 16  ;;  %v1260_v1 = vld [vmem:[#allocation2 + $0x4c] sm:$0xf]  ;;  %v5929_v3 = vcombine.low %v7667_v38, %v7683_v24 }
  0x8a   : > { %v1435_v23 = vsel %vm7248_vm9, %v1430_v28, %v1434_v58  ;;  %v1061_v61 = vld [vmem:[#allocation2 + $0x50] sm:$0x1]  ;;  %v6274_v6 = vunpack.c.h.bf16 %v6393_v30  ;;  %v355_v4 = vmul.f32 %v7535_v53, %v6273_v43  ;;  %v6277_v50 = vunpack.c.l.bf16 %v7672_v44  ;;  %v915_v30 = vld [vmem:[#allocation2 + $0x5c] sm:$0x1]  ;;  %v1767_v0 = vld [vmem:[#allocation2 + $0x2c] sm:$0x1] }
  0x8b   : > { %v1425_v9 = vsel %vm7248_vm9, %v1420_v51, %v7632_v42  ;;  %v1062_v16 = vsel %vm7196_vm4, 0, %v1061_v61  ;;  %v1446_v19 = vshll.u32 %v1260_v1, 16  ;;  %v1450_v22 = vshrl.u32 %v1260_v1, 16  ;;  %v7030_v51 = vld [vmem:[%s9076_s1 + $0x190] sm:$0xff]  }
  0x8c   : > { %v5900_v28 = vcombine.low %v1425_v9, %v1435_v23  ;;  %1063 = vst [vmem:[#allocation2 + $0x50] sm:$0x1] %v1062_v16  ;;  %v648_v37 = vrot.slane %v646_v49, 7  ;;  %v656_v60 = vrot.slane %v654_v56, 7  ;;  %v356_v31 = vmul.f32 %v7535_v53, %v6274_v6 }
  0x8d   : > { %v7704_v42 = vrot.slane %v1446_v19, 5  ;;  %v1452_v21 = vrot.slane %v1450_v22, 4  ;;  %v394_v32 = vadd.f32 %v7541_v10, %v355_v4  ;;  %v6278_v33 = vunpack.c.h.bf16 %v7672_v44  ;;  %v7017_v44 = vld [vmem:[#allocation2 + $0x24] sm:$0xff]   ;;  %v7036_v4 = vld [vmem:[%s9076_s1 + $0x1d8] sm:$0xff]  }
  0x8e   : > { %4850 = vmatmul.mubr.bf16.vlgmr.msra.gmra.mrb[16].mxu1 %v5927_v25  ;;  %4728 = vmatprep.mubr.bf16.mxu0 %v5900_v28  ;;  %v651_v35 = vor.u32 %v649_v55, %v648_v37  ;;  %v652_v47 = vrot.slane %v648_v37, 4  ;;  %v659_v41 = vor.u32 %v657_v48, %v656_v60  ;;  %v661_v25 = vrot.slane %v656_v60, 4  ;;  %v918_v28 = vld [vmem:[#allocation2 + $0x60] sm:$0xf]  ;;  %v7738_v60 = vld [vmem:[%s7181_s24 + $0x48] sm:$0xff]  }
  0x8f   : > { %6754 = vmatpush3.bf16.msra.mxu1 %v7012_v45  ;;  %4729 = vmatmul.mubr.bf16.gmra.mrb[20].mxu0 %v7011_v14  ;;  %v1259_v5 = vld [vmem:[#allocation2 + $0x48] sm:$0xf]  ;;  %v1453_v36 = vor.u32 %v1452_v21, %v7704_v42  ;;  %v395_v58 = vadd.f32 %v7541_v10, %v356_v31  ;;  %v426_v27 = vmax.f32 %v394_v32, 0.0  ;;  %v5914_v15 = vrot.slane %v1765_v52, 9 }
  0x90   : > { %4857 = vmatprep.mubr.bf16.mxu1 %v7015_v54  ;;  %v1437_v29 = vshrl.u32 %v1259_v5, 16  ;;  %v1440_v62 = vshll.u32 %v1259_v5, 16  ;;  %v660_v39 = vsel %vm7262_vm11, %v652_v47, %v659_v41  ;;  %v912_v40 = vsel %vm7256_vm10, %v651_v35, %v911_v26  ;;  %6755 = vmatprep.subr.bf16.mxu1 %v7019_v2  ;;  %v1768_v35 = vld [vmem:[#allocation2 + $0x30] sm:$0xe]  ;;  %v1769_v47 = vld [vmem:[#allocation2 + $0x34] sm:$0xf] }
  0x91   : > { %913 = vst [vmem:[#allocation2 + $0x54] sm:$0xf] %v912_v40  ;;  %914 = vst [vmem:[#allocation2 + $0x58] sm:$0xf] %v660_v39  ;;  %v916_v43 = vsel %vm7188_vm3, %v661_v25, %v915_v30  ;;  %v427_v23 = vmax.f32 %v395_v58, 0.0  ;;  %v6193_v45 = vpack.c.bf16 %v426_v27, %v426_v27  ;;  %v357_v49 = vmul.f32 %v7535_v53, %v6277_v50  ;;  %v7043_v41 = vld [vmem:[%s9076_s1 + $0x1e0] sm:$0xff]  }
  0x92   : > { %v1439_v54 = vrot.slane %v1437_v29, 4  ;;  %v1442_v55 = vrot.slane %v1440_v62, 5  ;;  %917 = vst [vmem:[#allocation2 + $0x5c] sm:$0x1] %v916_v43  ;;  %v1878_v56 = vrot.slane %v1766_v12, 5  ;;  %v1881_v48 = vrot.slane %v1767_v0, 5 }
  0x93   : > { %6756 = vmatpush3.bf16.msra.mxu1 %v7022_v20  ;;  %v1261_v59 = vld [vmem:[#allocation2 + $0x50] sm:$0x1]  ;;  %v6194_v61 = vpack.c.bf16 %v427_v23, %v427_v23  ;;  %v663_v1 = vshrl.u32 %v6193_v45, 16  ;;  %v666_v2 = vshll.u32 %v6193_v45, 16  ;;  %v358_v6 = vmul.f32 %v7535_v53, %v6278_v33  ;;  %v922_v33 = vld [vmem:[#allocation2 + $0x68] sm:$0x1] }
  0x94   : > { %6757 = vmatprep.subr.bf16.mxu1 %v7028_v34  ;;  %v1443_v50 = vor.u32 %v1442_v55, %v1439_v54  ;;  %v1454_v9 = vrot.slane %v1453_v36, 4  ;;  %v1456_v14 = vshll.u32 %v1261_v59, 16  ;;  %v1880_v16 = vrot.slane %v1878_v56, 4  ;;  %v7023_v36 = vld [vmem:[#allocation2 + $0x30] sm:$0xff]   ;;  %v1770_v58 = vld [vmem:[#allocation2 + $0x38] sm:$0x1] }
  0x95   : > { %v665_v19 = vrot.slane %v663_v1, 7  ;;  %v671_v22 = vshrl.u32 %v6194_v61, 16  ;;  %v674_v26 = vshll.u32 %v6194_v61, 16  ;;  %v7735_v37 = vsel %vm7568_vm14, %v5914_v15, %v1878_v56 }
  0x96   : > { %4858 = vmatmul.mubr.bf16.gmra.mrb[20].mxu1 %v5928_v46  ;;  %v1444_v30 = vrot.slane %v1443_v50, 4  ;;  %v1458_v31 = vrot.slane %v1456_v14, 5  ;;  %v7742_v52 = vsel %vm7568_vm14, %v1880_v16, %v1881_v48  ;;  %v396_v18 = vadd.f32 %v7541_v10, %v357_v49  ;;  %v7016_v46 = vld [vmem:[#allocation2 + $0x48] sm:$0xff]   ;;  %v6396_v14 = vld [vmem:[%s7181_s24 + $0x50] sm:$0xff]  }
  0x97   : > { %4865 = vmatprep.mubr.bf16.mxu1 %v7017_v44  ;;  %6758 = vmatpush3.bf16.msra.mxu1 %v7030_v51  ;;  %v668_v21 = vor.u32 %v666_v2, %v665_v19  ;;  %v669_v20 = vrot.slane %v665_v19, 4  ;;  %v673_v32 = vrot.slane %v671_v22, 7  ;;  %v397_v34 = vadd.f32 %v7541_v10, %v358_v6  ;;  %v7048_v48 = vld [vmem:[%s9076_s1 + $0x1e8] sm:$0xff]  }
  0x98   : > { %6759 = vmatprep.subr.bf16.mxu1 %v7036_v4  ;;  %v1449_v25 = vsel %vm7248_vm9, %v1444_v30, %v7704_v42  ;;  %v1459_v12 = vsel %vm7248_vm9, %v1454_v9, %v1458_v31  ;;  %v1009_v0 = vld [vmem:[#allocation2 + $0x54] sm:$0x1]  ;;  %v1263_v5 = vld [vmem:[#allocation2 + $0x58] sm:$0xf]  ;;  %v6281_v27 = vunpack.c.l.bf16 %v7738_v60  ;;  %v6282_v15 = vunpack.c.h.bf16 %v7738_v60  ;;  %v7045_v42 = vld [vmem:[%s9076_s1 + $0x1a0] sm:$0xff]  }
  0x99   : > { %v5901_v29 = vcombine.low %v1449_v25, %v1459_v12  ;;  %v1010_v62 = vsel %vm7188_vm3, 0, %v1009_v0  ;;  %v1064_v39 = vld [vmem:[#allocation2 + $0x5c] sm:$0x1]  ;;  %v1470_v40 = vshll.u32 %v1263_v5, 16  ;;  %v1474_v43 = vshrl.u32 %v1263_v5, 16  ;;  %v7053_v60 = vld [vmem:[%s9076_s1 + $0x1f0] sm:$0xff]  }
  0x9a   : > { %1011 = vst [vmem:[#allocation2 + $0x54] sm:$0x1] %v1010_v62  ;;  %v1065_v44 = vsel %vm7196_vm4, 0, %v1064_v39  ;;  %v676_v23 = vor.u32 %v674_v26, %v673_v32  ;;  %v678_v45 = vrot.slane %v673_v32, 4  ;;  %v919_v49 = vsel %vm7256_vm10, %v668_v21, %v918_v28  ;;  %v7050_v26 = vld [vmem:[%s9076_s1 + $0x1a8] sm:$0xff]   ;;  %v7027_v21 = vld [vmem:[#allocation2 + $0x3c] sm:$0xff]  }
  0x9b   : > { %6760 = vmatpush3.bf16.msra.mxu1 %v7038_v8  ;;  %4736 = vmatprep.mubr.bf16.mxu0 %v5901_v29  ;;  %1066 = vst [vmem:[#allocation2 + $0x5c] sm:$0x1] %v1065_v44  ;;  %v7768_v51 = vrot.slane %v1470_v40, 5  ;;  %v1476_v54 = vrot.slane %v1474_v43, 4  ;;  %920 = vst [vmem:[#allocation2 + $0x60] sm:$0xf] %v919_v49  ;;  %v359_v19 = vmul.f32 %v7535_v53, %v6281_v27  ;;  %v6285_v32 = vunpack.c.l.bf16 %v6396_v14 }
  0x9c   : > { %v428_v55 = vmax.f32 %v396_v18, 0.0  ;;  %v429_v56 = vmax.f32 %v397_v34, 0.0  ;;  %6761 = vmatprep.subr.bf16.mxu1 %v7043_v41  ;;  %4737 = vmatmul.mubr.bf16.gmra.mrb[24].mxu0 %v7016_v46  ;;  %v677_v59 = vsel %vm7262_vm11, %v669_v20, %v676_v23  ;;  %v923_v61 = vsel %vm7188_vm3, %v678_v45, %v922_v33  ;;  %v925_v46 = vld [vmem:[#allocation2 + $0x6c] sm:$0xf]  ;;  %v1771_v39 = vld [vmem:[#allocation2 + $0x3c] sm:$0xe] }
  0x9d   : > { %v5915_v1 = vrot.slane %v1768_v35, 9  ;;  %v1885_v2 = vrot.slane %v1769_v47, 5  ;;  %v1477_v6 = vor.u32 %v1476_v54, %v7768_v51  ;;  %921 = vst [vmem:[#allocation2 + $0x64] sm:$0xf] %v677_v59  ;;  %924 = vst [vmem:[#allocation2 + $0x68] sm:$0x1] %v923_v61  ;;  %v360_v22 = vmul.f32 %v7535_v53, %v6282_v15 }
  0x9e   : > { %4866 = vmatmul.mubr.bf16.gmra.mrb[24].mxu1 %v5929_v3  ;;  %v6195_v4 = vpack.c.bf16 %v428_v55, %v428_v55  ;;  %v7781_v50 = vpack.c.bf16 %v429_v56, %v429_v56  ;;  %v1888_v9 = vrot.slane %v1770_v58, 5  ;;  %v5930_v38 = vcombine.low %v7735_v37, %v7742_v52  ;;  %v1772_v56 = vld [vmem:[#allocation2 + $0x40] sm:$0xf]  ;;  %v929_v61 = vld [vmem:[#allocation2 + $0x74] sm:$0x1] }
  0x9f   : > { %4873 = vmatprep.mubr.bf16.mxu1 %v7023_v36  ;;  %v1887_v16 = vrot.slane %v1885_v2, 4  ;;  %6762 = vmatpush3.bf16.msra.mxu1 %v7045_v42  ;;  %v7793_v28 = vsel %vm7568_vm14, %v5915_v1, %v1885_v2  ;;  %v7798_v30 = vrot.slane %v1477_v6, 4  ;;  %v398_v20 = vadd.f32 %v7541_v10, %v359_v19  ;;  %v7055_v2 = vld [vmem:[%s9076_s1 + $0x1b0] sm:$0xff]  }
  0xa0   : > { %v680_v24 = vshrl.u32 %v6195_v4, 16  ;;  %v683_v3 = vshll.u32 %v6195_v4, 16  ;;  %6763 = vmatprep.subr.bf16.mxu1 %v7048_v48  ;;  %v688_v31 = vshrl.u32 %v7781_v50, 16  ;;  %v691_v18 = vshll.u32 %v7781_v50, 16 }
  0xa1   : > { %v7804_v37 = vsel %vm7568_vm14, %v1887_v16, %v1888_v9  ;;  %v1262_v52 = vld [vmem:[#allocation2 + $0x54] sm:$0xf]  ;;  %v6286_v33 = vunpack.c.h.bf16 %v6396_v14  ;;  %v399_v12 = vadd.f32 %v7541_v10, %v360_v22  ;;  %v361_v40 = vmul.f32 %v7535_v53, %v6285_v32 }
  0xa2   : > { %v682_v8 = vrot.slane %v680_v24, 7  ;;  %v1264_v34 = vld [vmem:[#allocation2 + $0x5c] sm:$0x1]  ;;  %v1461_v35 = vshrl.u32 %v1262_v52, 16  ;;  %v1464_v47 = vshll.u32 %v1262_v52, 16  ;;  %v5931_v25 = vcombine.low %v7793_v28, %v7804_v37 }
  0xa3   : > { %v1012_v41 = vld [vmem:[#allocation2 + $0x60] sm:$0x1]  ;;  %6764 = vmatpush3.bf16.msra.mxu1 %v7050_v26  ;;  %v1480_v0 = vshll.u32 %v1264_v34, 16  ;;  %v7814_v43 = vmul.f32 %v7535_v53, %v6286_v33  ;;  %v690_v49 = vrot.slane %v688_v31, 7  ;;  %v430_v55 = vmax.f32 %v398_v20, 0.0 }
  0xa4   : > { %v1013_v5 = vsel %vm7188_vm3, 0, %v1012_v41  ;;  %v685_v36 = vor.u32 %v683_v3, %v682_v8  ;;  %v686_v58 = vrot.slane %v682_v8, 4  ;;  %6765 = vmatprep.subr.bf16.mxu1 %v7053_v60  ;;  %v1463_v27 = vrot.slane %v1461_v35, 4  ;;  %v1067_v29 = vld [vmem:[#allocation2 + $0x68] sm:$0x1] }
  0xa5   : > { %v1466_v15 = vrot.slane %v1464_v47, 5  ;;  %1014 = vst [vmem:[#allocation2 + $0x60] sm:$0x1] %v1013_v5  ;;  %v1266_v62 = vld [vmem:[#allocation2 + $0x64] sm:$0xf]  ;;  %v1482_v10 = vrot.slane %v1480_v0, 5  ;;  %v693_v4 = vor.u32 %v691_v18, %v690_v49  ;;  %v6197_v9 = vpack.c.bf16 %v430_v55, %v430_v55 }
  0xa6   : > { %v1068_v42 = vsel %vm7196_vm4, 0, %v1067_v29  ;;  %v1494_v44 = vshll.u32 %v1266_v62, 16  ;;  %v1498_v23 = vshrl.u32 %v1266_v62, 16  ;;  %4874 = vmatmul.mubr.bf16.gmra.mrb[28].mxu1 %v5930_v38  ;;  %v926_v54 = vsel %vm7256_vm10, %v685_v36, %v925_v46  ;;  %v7020_v38 = vld [vmem:[#allocation2 + $0x54] sm:$0xff]   ;;  %v1773_v31 = vld [vmem:[#allocation2 + $0x44] sm:$0x1] }
  0xa7   : > { %v1467_v45 = vor.u32 %v1466_v15, %v1463_v27  ;;  %1069 = vst [vmem:[#allocation2 + $0x68] sm:$0x1] %v1068_v42  ;;  %4881 = vmatprep.mubr.bf16.mxu1 %v7027_v21  ;;  %v1483_v53 = vsel %vm7248_vm9, %v7798_v30, %v1482_v10  ;;  %927 = vst [vmem:[#allocation2 + $0x6c] sm:$0xf] %v926_v54  ;;  %v431_v1 = vmax.f32 %v399_v12, 0.0  ;;  %v695_v50 = vrot.slane %v690_v49, 4 }
  0xa8   : > { %v7823_v48 = vrot.slane %v1494_v44, 5  ;;  %v1500_v59 = vrot.slane %v1498_v23, 4  ;;  %v5916_v19 = vrot.slane %v1771_v39, 9  ;;  %v1892_v22 = vrot.slane %v1772_v56, 5  ;;  %6766 = vmatpush3.bf16.msra.mxu1 %v7055_v2  ;;  %v7031_v30 = vld [vmem:[#allocation2 + $0x48] sm:$0xff]   ;;  %v7058_v54 = vld [vmem:[%s9076_s1 + $0x1f8] sm:$0xff]  }
  0xa9   : > { %v1468_v6 = vrot.slane %v1467_v45, 4  ;;  %v6198_v16 = vpack.c.bf16 %v431_v1, %v431_v1  ;;  %v694_v24 = vsel %vm7262_vm11, %v686_v58, %v693_v4  ;;  %v930_v3 = vsel %vm7188_vm3, %v695_v50, %v929_v61  ;;  %v932_v46 = vld [vmem:[#allocation2 + $0x78] sm:$0xf]  ;;  %v7845_v21 = vld [vmem:[%s9078_s3] ss:$0 sm:$0xff]  ;;  %6767 = vmatprep.subr.bf16.mxu1 %v7058_v54 }
  0xaa   : > { %v1501_v14 = vor.u32 %v1500_v59, %v7823_v48  ;;  %v697_v60 = vshrl.u32 %v6197_v9, 16  ;;  %928 = vst [vmem:[#allocation2 + $0x70] sm:$0xf] %v694_v24  ;;  %931 = vst [vmem:[#allocation2 + $0x74] sm:$0x1] %v930_v3  ;;  %v400_v20 = vadd.f32 %v7845_v21, %v361_v40  ;;  %v700_v35 = vshll.u32 %v6197_v9, 16 }
  0xab   : > { %v1473_v26 = vsel %vm7248_vm9, %v1468_v6, %v7768_v51  ;;  %v7840_v51 = vsel %vm7568_vm14, %v5916_v19, %v1892_v22  ;;  %v705_v41 = vshrl.u32 %v6198_v16, 16  ;;  %v708_v12 = vshll.u32 %v6198_v16, 16  ;;  %v936_v10 = vld [vmem:[#allocation2 + $0x80] sm:$0x1]  ;;  %v1774_v37 = vld [vmem:[#allocation2 + $0x48] sm:$0xe] }
  0xac   : > { %v5902_v18 = vcombine.low %v1473_v26, %v1483_v53  ;;  %v1265_v52 = vld [vmem:[#allocation2 + $0x60] sm:$0xf]  ;;  %v7836_v8 = vrot.slane %v1501_v14, 4  ;;  %v699_v34 = vrot.slane %v697_v60, 7  ;;  %v1894_v0 = vrot.slane %v1892_v22, 4  ;;  %v7035_v45 = vld [vmem:[#allocation2 + $0x54] sm:$0xff]  }
  0xad   : > { %v1485_v32 = vshrl.u32 %v1265_v52, 16  ;;  %v1488_v33 = vshll.u32 %v1265_v52, 16  ;;  %v1895_v5 = vrot.slane %v1773_v31, 5  ;;  %v707_v40 = vrot.slane %v705_v41, 7  ;;  %v1775_v49 = vld [vmem:[#allocation2 + $0x4c] sm:$0xf] }
  0xae   : > { %4744 = vmatprep.mubr.bf16.mxu0 %v5902_v18  ;;  %v1267_v47 = vld [vmem:[#allocation2 + $0x68] sm:$0x1]  ;;  %4882 = vmatmul.mubr.bf16.gmra.mrb[32].mxu1 %v5931_v25  ;;  %v1015_v15 = vld [vmem:[#allocation2 + $0x6c] sm:$0x1]  ;;  %v702_v29 = vor.u32 %v700_v35, %v699_v34  ;;  %v703_v39 = vrot.slane %v699_v34, 4  ;;  %v401_v53 = vadd.f32 %v7845_v21, %v7814_v43  ;;  %v432_v59 = vmax.f32 %v400_v20, 0.0 }
  0xaf   : > { %4745 = vmatmul.mubr.bf16.gmra.mrb[28].mxu0 %v7020_v38  ;;  %v1487_v36 = vrot.slane %v1485_v32, 4  ;;  %v1490_v58 = vrot.slane %v1488_v33, 5  ;;  %v1504_v27 = vshll.u32 %v1267_v47, 16  ;;  %4889 = vmatprep.mubr.bf16.mxu1 %v7031_v30  ;;  %v1016_v62 = vsel %vm7188_vm3, 0, %v1015_v15  ;;  %v1776_v61 = vld [vmem:[#allocation2 + $0x50] sm:$0x1] }
  0xb0   : > { %v1896_v28 = vsel %vm7568_vm14, %v1894_v0, %v1895_v5  ;;  %1017 = vst [vmem:[#allocation2 + $0x6c] sm:$0x1] %v1016_v62  ;;  %v933_v44 = vsel %vm7256_vm10, %v702_v29, %v932_v46  ;;  %v710_v55 = vor.u32 %v708_v12, %v707_v40  ;;  %v712_v56 = vrot.slane %v707_v40, 4  ;;  %v7024_v9 = vld [vmem:[#allocation2 + $0x60] sm:$0xff]   ;;  %v7060_v3 = vld [vmem:[%s9076_s1 + $0x1b8] sm:$0xff]  }
  0xb1   : > { %v1491_v25 = vor.u32 %v1490_v58, %v1487_v36  ;;  %v1506_v42 = vrot.slane %v1504_v27, 5  ;;  %v5932_v23 = vcombine.low %v7840_v51, %v1896_v28  ;;  %934 = vst [vmem:[#allocation2 + $0x78] sm:$0xf] %v933_v44  ;;  %v1070_v6 = vld [vmem:[#allocation2 + $0x74] sm:$0x1]  ;;  %v5917_v50 = vrot.slane %v1774_v37, 9  ;;  %6768 = vmatpush3.bf16.msra.mxu1 %v7060_v3 }
  0xb2   : > { %v1269_v4 = vld [vmem:[#allocation2 + $0x70] sm:$0xf]  ;;  %v1071_v14 = vsel %vm7196_vm4, 0, %v1070_v6  ;;  %v711_v43 = vsel %vm7262_vm11, %v703_v39, %v710_v55  ;;  %v937_v26 = vsel %vm7188_vm3, %v712_v56, %v936_v10  ;;  %v433_v38 = vmax.f32 %v401_v53, 0.0  ;;  %v7884_v34 = vld [vmem:[%s7181_s24 + $0x78] sm:$0xff]   ;;  %v7041_v28 = vld [vmem:[#allocation2 + $0x60] sm:$0xff]  }
  0xb3   : > { %v1492_v1 = vrot.slane %v1491_v25, 4  ;;  %v1507_v2 = vsel %vm7248_vm9, %v7836_v8, %v1506_v42  ;;  %v1518_v16 = vshll.u32 %v1269_v4, 16  ;;  %v1522_v19 = vshrl.u32 %v1269_v4, 16  ;;  %1072 = vst [vmem:[#allocation2 + $0x74] sm:$0x1] %v1071_v14 }
  0xb4   : > { %935 = vst [vmem:[#allocation2 + $0x7c] sm:$0xf] %v711_v43  ;;  %v6199_v24 = vpack.c.bf16 %v432_v59, %v432_v59  ;;  %938 = vst [vmem:[#allocation2 + $0x80] sm:$0x1] %v937_v26  ;;  %v1899_v18 = vrot.slane %v1775_v49, 5  ;;  %v1902_v46 = vrot.slane %v1776_v61, 5  ;;  %v6306_v49 = vunpack.c.h.bf16 %v7884_v34 }
  0xb5   : > { %v1497_v22 = vsel %vm7248_vm9, %v1492_v1, %v7823_v48  ;;  %v7878_v30 = vrot.slane %v1518_v16, 5  ;;  %v1524_v31 = vrot.slane %v1522_v19, 4  ;;  %v6200_v48 = vpack.c.bf16 %v433_v38, %v433_v38  ;;  %v939_v5 = vld [vmem:[#allocation2 + $0x84] sm:$0xf]  ;;  %v2703_v36 = vld [vmem:[#allocation2 + $0xc] sm:$0xe] }
  0xb6   : > { %v5903_v60 = vcombine.low %v1497_v22, %v1507_v2  ;;  %4890 = vmatmul.mubr.bf16.gmra.mrb[36].mxu1 %v5932_v23  ;;  %v714_v52 = vshrl.u32 %v6199_v24, 16  ;;  %v717_v8 = vshll.u32 %v6199_v24, 16  ;;  %v1900_v32 = vsel %vm7568_vm14, %v5917_v50, %v1899_v18  ;;  %v2704_v37 = vld [vmem:[#allocation2 + $0x10] sm:$0xf]  ;;  %v2705_v23 = vld [vmem:[#allocation2 + $0x14] sm:$0x1] }
  0xb7   : > { %4897 = vmatprep.mubr.bf16.mxu1 %v7035_v45  ;;  %v1268_v51 = vld [vmem:[#allocation2 + $0x6c] sm:$0xf]  ;;  %v1525_v20 = vor.u32 %v1524_v31, %v7878_v30  ;;  %v1901_v33 = vrot.slane %v1899_v18, 4  ;;  %v722_v0 = vshrl.u32 %v6200_v48, 16  ;;  %v725_v15 = vshll.u32 %v6200_v48, 16 }
  0xb8   : > { %4752 = vmatprep.mubr.bf16.mxu0 %v5903_v60  ;;  %v1509_v35 = vshrl.u32 %v1268_v51, 16  ;;  %v1512_v47 = vshll.u32 %v1268_v51, 16  ;;  %v1018_v41 = vld [vmem:[#allocation2 + $0x78] sm:$0x1]  ;;  %v716_v12 = vrot.slane %v714_v52, 7  ;;  %v6305_v45 = vunpack.c.l.bf16 %v7884_v34  ;;  %v7029_v52 = vld [vmem:[#allocation2 + $0x6c] sm:$0xff]  }
  0xb9   : > { %4753 = vmatmul.mubr.bf16.gmra.mrb[32].mxu0 %v7024_v9  ;;  %v1526_v58 = vrot.slane %v1525_v20, 4  ;;  %v1019_v27 = vsel %vm7188_vm3, 0, %v1018_v41  ;;  %v1903_v29 = vsel %vm7568_vm14, %v1901_v33, %v1902_v46  ;;  %v943_v61 = vld [vmem:[#allocation2 + $0x8c] sm:$0x1]  ;;  %v724_v2 = vrot.slane %v722_v0, 7 }
  0xba   : > { %v1511_v62 = vrot.slane %v1509_v35, 4  ;;  %v1514_v39 = vrot.slane %v1512_v47, 5  ;;  %1020 = vst [vmem:[#allocation2 + $0x78] sm:$0x1] %v1019_v27  ;;  %v719_v40 = vor.u32 %v717_v8, %v716_v12  ;;  %v720_v10 = vrot.slane %v716_v12, 4 }
  0xbb   : > { %v1270_v25 = vld [vmem:[#allocation2 + $0x74] sm:$0x1]  ;;  %v1272_v42 = vld [vmem:[#allocation2 + $0x7c] sm:$0xf]  ;;  %v5933_v44 = vcombine.low %v1900_v32, %v1903_v29  ;;  %v1073_v56 = vld [vmem:[#allocation2 + $0x80] sm:$0x1]  ;;  %v727_v22 = vor.u32 %v725_v15, %v724_v2 }
  0xbc   : > { %v1515_v54 = vor.u32 %v1514_v39, %v1511_v62  ;;  %v1528_v55 = vshll.u32 %v1270_v25, 16  ;;  %v1542_v53 = vshll.u32 %v1272_v42, 16  ;;  %v1546_v59 = vshrl.u32 %v1272_v42, 16  ;;  %v1777_v50 = vld [vmem:[#allocation2 + $0x54] sm:$0xe] }
  0xbd   : > { %v1074_v1 = vsel %vm7196_vm4, 0, %v1073_v56  ;;  %v940_v6 = vsel %vm7256_vm10, %v719_v40, %v939_v5  ;;  %v5975_v4 = vrot.slane %v2703_v36, 9  ;;  %v1778_v43 = vld [vmem:[#allocation2 + $0x58] sm:$0xf]  ;;  %v729_v26 = vrot.slane %v724_v2, 4 }
  0xbe   : > { %4898 = vmatmul.mubr.bf16.gmra.mrb[40].mxu1 %v5933_v44  ;;  %v1516_v9 = vrot.slane %v1515_v54, 4  ;;  %v1530_v14 = vrot.slane %v1528_v55, 5  ;;  %1075 = vst [vmem:[#allocation2 + $0x80] sm:$0x1] %v1074_v1  ;;  %v7896_v16 = vrot.slane %v1542_v53, 5  ;;  %v1548_v19 = vrot.slane %v1546_v59, 4 }
  0xbf   : > { %941 = vst [vmem:[#allocation2 + $0x84] sm:$0xf] %v940_v6  ;;  %4905 = vmatprep.mubr.bf16.mxu1 %v7041_v28  ;;  %v2801_v38 = vrot.slane %v2704_v37, 5  ;;  %v1779_v24 = vld [vmem:[#allocation2 + $0x5c] sm:$0x1]  ;;  %v2804_v46 = vrot.slane %v2705_v23, 5  ;;  %v728_v33 = vsel %vm7262_vm11, %v720_v10, %v727_v22  ;;  %v944_v35 = vsel %vm7188_vm3, %v729_v26, %v943_v61 }
  0xc0   : > { %v2191_v3 = vld [vmem:[#allocation2 + $0xc] sm:$0xf]  ;;  %v7085_v60 = vld [vmem:[%s9077_s2] ss:$0 sm:$0xff]  ;;  %v1521_v18 = vsel %vm7248_vm9, %v1516_v9, %v7878_v30  ;;  %v1531_v48 = vsel %vm7248_vm9, %v1526_v58, %v1530_v14  ;;  %v1549_v8 = vor.u32 %v1548_v19, %v7896_v16  ;;  %v2192_v51 = vld [vmem:[#allocation2 + $0x10] sm:$0xf] }
  0xc1   : > { %v7901_v31 = vmul.f32 %v7085_v60, %v6305_v45  ;;  %v5904_v20 = vcombine.low %v1521_v18, %v1531_v48  ;;  %v1271_v32 = vld [vmem:[#allocation2 + $0x78] sm:$0xf]  ;;  %v5918_v47 = vrot.slane %v1777_v50, 9  ;;  %942 = vst [vmem:[#allocation2 + $0x88] sm:$0xf] %v728_v33  ;;  %v7915_v30 = vsel %vm7568_vm14, %v5975_v4, %v2801_v38  ;;  %v7042_v1 = vld [vmem:[#allocation2 + $0x6c] sm:$0xff]  }
  0xc2   : > { %v1533_v41 = vshrl.u32 %v1271_v32, 16  ;;  %v1536_v12 = vshll.u32 %v1271_v32, 16  ;;  %945 = vst [vmem:[#allocation2 + $0x8c] sm:$0x1] %v944_v35  ;;  %v2803_v0 = vrot.slane %v2801_v38, 4  ;;  %v1906_v36 = vrot.slane %v1778_v43, 5 }
  0xc3   : > { %v2193_v5 = vld [vmem:[#allocation2 + $0x14] sm:$0x1]  ;;  %4760 = vmatprep.mubr.bf16.mxu0 %v5904_v20  ;;  %v1909_v58 = vrot.slane %v1779_v24, 5  ;;  %v2240_v27 = vshrl.u32 %v2191_v3, 16  ;;  %v2243_v15 = vshll.u32 %v2191_v3, 16  ;;  %v1550_v39 = vrot.slane %v1549_v8, 4 }
  0xc4   : > { %4761 = vmatmul.mubr.bf16.gmra.mrb[36].mxu0 %v7029_v52  ;;  %v1535_v29 = vrot.slane %v1533_v41, 4  ;;  %v1538_v62 = vrot.slane %v1536_v12, 5  ;;  %v2249_v40 = vshll.u32 %v2192_v51, 16  ;;  %v7919_v37 = vsel %vm7568_vm14, %v2803_v0, %v2804_v46  ;;  %v2706_v9 = vld [vmem:[#allocation2 + $0x18] sm:$0xe] }
  0xc5   : > { %v1273_v10 = vld [vmem:[#allocation2 + $0x80] sm:$0x1]  ;;  %v1907_v25 = vsel %vm7568_vm14, %v5918_v47, %v1906_v36  ;;  %v1908_v42 = vrot.slane %v1906_v36, 4  ;;  %v2242_v44 = vrot.slane %v2240_v27, 4  ;;  %v2245_v55 = vrot.slane %v2243_v15, 5  ;;  %v7033_v3 = vld [vmem:[#allocation2 + $0x78] sm:$0xff]  }
  0xc6   : > { %v1021_v28 = vld [vmem:[#allocation2 + $0x84] sm:$0x1]  ;;  %v1539_v23 = vor.u32 %v1538_v62, %v1535_v29  ;;  %v1552_v45 = vshll.u32 %v1273_v10, 16  ;;  %v2251_v53 = vrot.slane %v2249_v40, 5  ;;  %v2253_v59 = vshrl.u32 %v2192_v51, 16 }
  0xc7   : > { %v1022_v54 = vsel %vm7188_vm3, 0, %v1021_v28  ;;  %v1910_v56 = vsel %vm7568_vm14, %v1908_v42, %v1909_v58  ;;  %v2259_v61 = vshll.u32 %v2193_v5, 16  ;;  %v2246_v50 = vor.u32 %v2245_v55, %v2242_v44  ;;  %v2707_v14 = vld [vmem:[#allocation2 + $0x1c] sm:$0xf]  ;;  %v2708_v52 = vld [vmem:[#allocation2 + $0x20] sm:$0x1] }
  0xc8   : > { %1023 = vst [vmem:[#allocation2 + $0x84] sm:$0x1] %v1022_v54  ;;  %v1540_v2 = vrot.slane %v1539_v23, 4  ;;  %v1554_v6 = vrot.slane %v1552_v45, 5  ;;  %v5934_v4 = vcombine.low %v1907_v25, %v1910_v56  ;;  %v1275_v43 = vld [vmem:[#allocation2 + $0x88] sm:$0xf]  ;;  %v5991_v22 = vcombine.low %v7915_v30, %v7919_v37 }
  0xc9   : > { %v1076_v19 = vld [vmem:[#allocation2 + $0x8c] sm:$0x1]  ;;  %v372_v26 = vmul.f32 %v7085_v60, %v6306_v49  ;;  %v1566_v48 = vshll.u32 %v1275_v43, 16  ;;  %v1570_v46 = vshrl.u32 %v1275_v43, 16  ;;  %v2247_v51 = vrot.slane %v2246_v50, 4 }
  0xca   : > { %v1545_v38 = vsel %vm7248_vm9, %v1540_v2, %v7896_v16  ;;  %v1555_v24 = vsel %vm7248_vm9, %v1550_v39, %v1554_v6  ;;  %v1077_v18 = vsel %vm7196_vm4, 0, %v1076_v19  ;;  %4906 = vmatmul.mubr.bf16.gmra.mrb[44].mxu1 %v5934_v4  ;;  %v2255_v34 = vrot.slane %v2253_v59, 4  ;;  %v1780_v49 = vld [vmem:[#allocation2 + $0x60] sm:$0xe]  ;;  %v1781_v60 = vld [vmem:[#allocation2 + $0x64] sm:$0xf] }
  0xcb   : > { %v5905_v8 = vcombine.low %v1545_v38, %v1555_v24  ;;  %1078 = vst [vmem:[#allocation2 + $0x8c] sm:$0x1] %v1077_v18  ;;  %4913 = vmatprep.mubr.bf16.mxu1 %v7042_v1  ;;  %v7938_v20 = vrot.slane %v1566_v48, 5  ;;  %v5976_v16 = vrot.slane %v2706_v9, 9  ;;  %v2808_v32 = vrot.slane %v2707_v14, 5 }
  0xcc   : > { %v1782_v33 = vld [vmem:[#allocation2 + $0x68] sm:$0x1]  ;;  %v7942_v35 = vadd.f32 %v7845_v21, %v7901_v31  ;;  %v1572_v47 = vrot.slane %v1570_v46, 4  ;;  %v2256_v41 = vor.u32 %v2255_v34, %v2251_v53  ;;  %v2261_v12 = vrot.slane %v2259_v61, 5  ;;  %v2194_v15 = vld [vmem:[#allocation2 + $0x18] sm:$0xf] }
  0xcd   : > { %4768 = vmatprep.mubr.bf16.mxu0 %v5905_v8  ;;  %v2811_v0 = vrot.slane %v2708_v52, 5  ;;  %v2252_v36 = vsel %vm7248_vm9, %v2247_v51, %v2251_v53  ;;  %v7948_v58 = vsel %vm7568_vm14, %v5976_v16, %v2808_v32  ;;  %v2810_v27 = vrot.slane %v2808_v32, 4  ;;  %v2195_v44 = vld [vmem:[#allocation2 + $0x1c] sm:$0xf]  ;;  %v2196_v55 = vld [vmem:[#allocation2 + $0x20] sm:$0x1] }
  0xce   : > { %4769 = vmatmul.mubr.bf16.gmra.mrb[40].mxu0 %v7033_v3  ;;  %v7951_v29 = vadd.f32 %v7845_v21, %v372_v26  ;;  %v1573_v39 = vor.u32 %v1572_v47, %v7938_v20  ;;  %v2257_v40 = vrot.slane %v2256_v41, 4  ;;  %v5919_v28 = vrot.slane %v1780_v49, 9  ;;  %v2709_v2 = vld [vmem:[#allocation2 + $0x24] sm:$0xe]  ;;  %v2710_v6 = vld [vmem:[#allocation2 + $0x28] sm:$0xf] }
  0xcf   : > { %v1274_v5 = vld [vmem:[#allocation2 + $0x84] sm:$0xf]  ;;  %v7956_v10 = vsel %vm7568_vm14, %v2810_v27, %v2811_v0  ;;  %v1913_v25 = vrot.slane %v1781_v60, 5  ;;  %v1916_v42 = vrot.slane %v1782_v33, 5  ;;  %v2264_v9 = vshrl.u32 %v2194_v15, 16  ;;  %v7046_v3 = vld [vmem:[#allocation2 + $0x78] sm:$0xff]  }
  0xd0   : > { %v1557_v31 = vshrl.u32 %v1274_v5, 16  ;;  %v1560_v62 = vshll.u32 %v1274_v5, 16  ;;  %v1574_v54 = vrot.slane %v1573_v39, 4  ;;  %v2262_v21 = vsel %vm7248_vm9, %v2257_v40, %v2261_v12  ;;  %v2711_v19 = vld [vmem:[#allocation2 + $0x2c] sm:$0x1]  ;;  %v7037_v41 = vld [vmem:[#allocation2 + $0x84] sm:$0xff]  }
  0xd1   : > { %v7960_v53 = vcombine.low %v2252_v36, %v2262_v21  ;;  %v5992_v59 = vcombine.low %v7948_v58, %v7956_v10  ;;  %v1914_v61 = vsel %vm7568_vm14, %v5919_v28, %v1913_v25  ;;  %v1915_v1 = vrot.slane %v1913_v25, 4  ;;  %v1783_v18 = vld [vmem:[#allocation2 + $0x6c] sm:$0xe]  ;;  %v1784_v48 = vld [vmem:[#allocation2 + $0x70] sm:$0xf] }
  0xd2   : > { %v1559_v23 = vrot.slane %v1557_v31, 4  ;;  %v1562_v45 = vrot.slane %v1560_v62, 5  ;;  %v1276_v56 = vld [vmem:[#allocation2 + $0x8c] sm:$0x1]  ;;  %v2267_v14 = vshll.u32 %v2194_v15, 16  ;;  %v2273_v26 = vshll.u32 %v2195_v44, 16 }
  0xd3   : > { %v1576_v50 = vshll.u32 %v1276_v56, 16  ;;  %v1917_v43 = vsel %vm7568_vm14, %v1915_v1, %v1916_v42  ;;  %v2277_v38 = vshrl.u32 %v2195_v44, 16  ;;  %v2283_v24 = vshll.u32 %v2196_v55, 16  ;;  %v1785_v34 = vld [vmem:[#allocation2 + $0x74] sm:$0x1] }
  0xd4   : > { %v1563_v4 = vor.u32 %v1562_v45, %v1559_v23  ;;  %v5935_v46 = vcombine.low %v1914_v61, %v1917_v43  ;;  %v2266_v51 = vrot.slane %v2264_v9, 4  ;;  %v2269_v49 = vrot.slane %v2267_v14, 5  ;;  %v2197_v5 = vld [vmem:[#allocation2 + $0x24] sm:$0xf]  ;;  %v2198_v62 = vld [vmem:[#allocation2 + $0x28] sm:$0xf] }
  0xd5   : > { %v1578_v8 = vrot.slane %v1576_v50, 5  ;;  %v2275_v60 = vrot.slane %v2273_v26, 5  ;;  %v2279_v16 = vrot.slane %v2277_v38, 4  ;;  %v2285_v32 = vrot.slane %v2283_v24, 5  ;;  %v2199_v25 = vld [vmem:[#allocation2 + $0x2c] sm:$0x1] }
  0xd6   : > { %v1564_v52 = vrot.slane %v1563_v4, 4  ;;  %4914 = vmatmul.mubr.bf16.gmra.mrb[48].mxu1 %v5935_v46  ;;  %v5977_v12 = vrot.slane %v2709_v2, 9  ;;  %v2815_v0 = vrot.slane %v2710_v6, 5  ;;  %v2270_v27 = vor.u32 %v2269_v49, %v2266_v51  ;;  %v2712_v42 = vld [vmem:[#allocation2 + $0x30] sm:$0xe]  ;;  %v7047_v14 = vld [vmem:[#allocation2 + $0x84] sm:$0xff]  }
  0xd7   : > { %v1579_v47 = vsel %vm7248_vm9, %v1574_v54, %v1578_v8  ;;  %v2280_v15 = vor.u32 %v2279_v16, %v2275_v60  ;;  %4921 = vmatprep.mubr.bf16.mxu1 %v7046_v3  ;;  %v2818_v31 = vrot.slane %v2711_v19, 5  ;;  %v1920_v28 = vrot.slane %v1784_v48, 5  ;;  %v2713_v21 = vld [vmem:[#allocation2 + $0x34] sm:$0xf]  ;;  %v2714_v55 = vld [vmem:[#allocation2 + $0x38] sm:$0x1] }
  0xd8   : > { %v1569_v33 = vsel %vm7248_vm9, %v1564_v52, %v7938_v20  ;;  %v7975_v39 = vsel %vm7568_vm14, %v5977_v12, %v2815_v0  ;;  %v2817_v40 = vrot.slane %v2815_v0, 4  ;;  %v5920_v20 = vrot.slane %v1783_v18, 9  ;;  %v1786_v30 = vld [vmem:[#allocation2 + $0x78] sm:$0xe]  ;;  %v1787_v37 = vld [vmem:[#allocation2 + $0x7c] sm:$0xf] }
  0xd9   : > { %v5906_v36 = vcombine.low %v1569_v33, %v1579_v47  ;;  %v2271_v44 = vrot.slane %v2270_v27, 4  ;;  %v2281_v23 = vrot.slane %v2280_v15, 4  ;;  %v1923_v45 = vrot.slane %v1785_v34, 5  ;;  %v1788_v48 = vld [vmem:[#allocation2 + $0x80] sm:$0x1]  ;;  %v7049_v0 = vld [vmem:[%s9076_s1 + $0x208] sm:$0xff]  }
  0xda   : > { %v2288_v54 = vshrl.u32 %v2197_v5, 16  ;;  %v7979_v56 = vsel %vm7568_vm14, %v2817_v40, %v2818_v31  ;;  %v1921_v61 = vsel %vm7568_vm14, %v5920_v20, %v1920_v28  ;;  %v1922_v1 = vrot.slane %v1920_v28, 4  ;;  %v2200_v34 = vld [vmem:[#allocation2 + $0x30] sm:$0xf]  ;;  %v2201_v33 = vld [vmem:[#allocation2 + $0x34] sm:$0xf] }
  0xdb   : > { %4776 = vmatprep.mubr.bf16.mxu0 %v5906_v36  ;;  %v2291_v2 = vshll.u32 %v2197_v5, 16  ;;  %v2276_v6 = vsel %vm7248_vm9, %v2271_v44, %v2275_v60  ;;  %v2286_v4 = vsel %vm7248_vm9, %v2281_v23, %v2285_v32  ;;  %v5993_v50 = vcombine.low %v7975_v39, %v7979_v56  ;;  %v2202_v36 = vld [vmem:[#allocation2 + $0x38] sm:$0x1]  ;;  %v2715_v27 = vld [vmem:[#allocation2 + $0x3c] sm:$0xe]  ;;  %v7062_v39 = vld [vmem:[%s9076_s1 + $0x220] sm:$0xff]  }
  0xdc   : > { %4777 = vmatmul.mubr.bf16.gmra.mrb[44].mxu0 %v7037_v41  ;;  %v2290_v9 = vrot.slane %v2288_v54, 4  ;;  %v7992_v19 = vcombine.low %v2276_v6, %v2286_v4  ;;  %v1924_v43 = vsel %vm7568_vm14, %v1922_v1, %v1923_v45  ;;  %v2297_v38 = vshll.u32 %v2198_v62, 16  ;;  %v2716_v20 = vld [vmem:[#allocation2 + $0x40] sm:$0xf]  ;;  %v2717_v28 = vld [vmem:[#allocation2 + $0x44] sm:$0x1] }
  0xdd   : > { %5010 = vmatprep.mubr.bf16.mxu0 %v5991_v22  ;;  %v2293_v26 = vrot.slane %v2291_v2, 5  ;;  %v5936_v22 = vcombine.low %v1921_v61, %v1924_v43  ;;  %v2301_v24 = vshrl.u32 %v2198_v62, 16  ;;  %v2307_v3 = vshll.u32 %v2199_v25, 16  ;;  %v7051_v45 = vld [vmem:[#allocation2 + $0x90] sm:$0xff]   ;;  %v1789_v54 = vld [vmem:[#allocation2 + $0x84] sm:$0xe] }
  0xde   : > { %v5978_v18 = vrot.slane %v2712_v42, 9  ;;  %v2299_v8 = vrot.slane %v2297_v38, 5  ;;  %v2822_v46 = vrot.slane %v2713_v21, 5  ;;  %v2825_v51 = vrot.slane %v2714_v55, 5  ;;  %v7086_v21 = vld [vmem:[%s9076_s1 + $0x200] sm:$0xff]  }
  0xdf   : > { %v2294_v52 = vor.u32 %v2293_v26, %v2290_v9  ;;  %4922 = vmatmul.mubr.bf16.gmra.mrb[52].mxu1 %v5936_v22  ;;  %v2303_v49 = vrot.slane %v2301_v24, 4  ;;  %v2309_v60 = vrot.slane %v2307_v3, 5  ;;  %v5921_v16 = vrot.slane %v1786_v30, 9  ;;  %v1790_v2 = vld [vmem:[#allocation2 + $0x88] sm:$0xf] }
  0xe0   : > { %v1927_v32 = vrot.slane %v1787_v37, 5  ;;  %4929 = vmatprep.mubr.bf16.mxu1 %v7047_v14  ;;  %v7998_v41 = vsel %vm7568_vm14, %v5978_v18, %v2822_v46  ;;  %v2824_v12 = vrot.slane %v2822_v46, 4  ;;  %v1930_v5 = vrot.slane %v1788_v48, 5  ;;  %v1791_v6 = vld [vmem:[#allocation2 + $0x8c] sm:$0x1]  ;;  %v7054_v14 = vld [vmem:[%s9076_s1 + $0x210] sm:$0xff]  }
  0xe1   : > { %v2295_v47 = vrot.slane %v2294_v52, 4  ;;  %v2304_v15 = vor.u32 %v2303_v49, %v2299_v8  ;;  %v2312_v40 = vshrl.u32 %v2200_v34, 16  ;;  %v2315_v44 = vshll.u32 %v2200_v34, 16  ;;  %v2204_v37 = vld [vmem:[#allocation2 + $0x40] sm:$0xf] }
  0xe2   : > { %v1928_v31 = vsel %vm7568_vm14, %v5921_v16, %v1927_v32  ;;  %v1929_v62 = vrot.slane %v1927_v32, 4  ;;  %v8010_v42 = vsel %vm7568_vm14, %v2824_v12, %v2825_v51  ;;  %v2321_v23 = vshll.u32 %v2201_v33, 16  ;;  %v2205_v51 = vld [vmem:[#allocation2 + $0x44] sm:$0x1]  ;;  %v2718_v34 = vld [vmem:[#allocation2 + $0x48] sm:$0xe] }
  0xe3   : > { %v2300_v25 = vsel %vm7248_vm9, %v2295_v47, %v2299_v8  ;;  %v5994_v55 = vcombine.low %v7998_v41, %v8010_v42  ;;  %v2314_v1 = vrot.slane %v2312_v40, 4  ;;  %v2317_v9 = vrot.slane %v2315_v44, 5  ;;  %v2720_v40 = vld [vmem:[#allocation2 + $0x50] sm:$0x1] }
  0xe4   : > { %5011 = vmatmul.mubr.bf16.vlgmr.msra.gmra.mrb[48].mxu0 %v7960_v53  ;;  %v2305_v53 = vrot.slane %v2304_v15, 4  ;;  %v1931_v61 = vsel %vm7568_vm14, %v1929_v62, %v1930_v5  ;;  %v2323_v58 = vrot.slane %v2321_v23, 5  ;;  %v2325_v10 = vshrl.u32 %v2201_v33, 16  ;;  %v7059_v33 = vld [vmem:[%s9076_s1 + $0x218] sm:$0xff]   ;;  %v1793_v23 = vld [vmem:[#allocation2 + $0x94] sm:$0xf] }
  0xe5   : > { %5018 = vmatprep.mubr.bf16.mxu0 %v5992_v59  ;;  %6890 = vmatpush3.bf16.msra.mxu0 %v7086_v21  ;;  %v5937_v4 = vcombine.low %v1928_v31, %v1931_v61  ;;  %v2203_v59 = vld [vmem:[#allocation2 + $0x3c] sm:$0xf]  ;;  %v2331_v26 = vshll.u32 %v2202_v36, 16  ;;  %v5979_v38 = vrot.slane %v2715_v27, 9  ;;  %v2829_v30 = vrot.slane %v2716_v20, 5 }
  0xe6   : > { %6891 = vmatprep.subr.bf16.mxu0 %v7049_v0  ;;  %v2310_v43 = vsel %vm7248_vm9, %v2305_v53, %v2309_v60  ;;  %v2318_v24 = vor.u32 %v2317_v9, %v2314_v1  ;;  %v2327_v3 = vrot.slane %v2325_v10, 4  ;;  %v2832_v18 = vrot.slane %v2717_v28, 5  ;;  %v2719_v36 = vld [vmem:[#allocation2 + $0x4c] sm:$0xf]  ;;  %v1792_v20 = vld [vmem:[#allocation2 + $0x90] sm:$0xe] }
  0xe7   : > { %v8027_v22 = vcombine.low %v2300_v25, %v2310_v43  ;;  %4930 = vmatmul.mubr.bf16.gmra.mrb[56].mxu1 %v5937_v4  ;;  %v2333_v48 = vrot.slane %v2331_v26, 5  ;;  %v8031_v52 = vsel %vm7568_vm14, %v5979_v38, %v2829_v30  ;;  %v2831_v8 = vrot.slane %v2829_v30, 4  ;;  %v2206_v1 = vld [vmem:[#allocation2 + $0x48] sm:$0xf]  ;;  %v2207_v9 = vld [vmem:[#allocation2 + $0x4c] sm:$0xf] }
  0xe8   : > { %v5922_v46 = vrot.slane %v1789_v54, 9  ;;  %v2319_v49 = vrot.slane %v2318_v24, 4  ;;  %v2328_v60 = vor.u32 %v2327_v3, %v2323_v58  ;;  %4937 = vmatprep.mubr.bf16.mxu1 %v7051_v45  ;;  %v1934_v16 = vrot.slane %v1790_v2, 5  ;;  %v1794_v45 = vld [vmem:[#allocation2 + $0x98] sm:$0x1] }
  0xe9   : > { %6892 = vmatpush3.bf16.msra.mxu0 %v7049_v0  ;;  %v1937_v32 = vrot.slane %v1791_v6, 5  ;;  %v8038_v47 = vsel %vm7568_vm14, %v2831_v8, %v2832_v18  ;;  %v2336_v12 = vshrl.u32 %v2203_v59, 16  ;;  %v2339_v0 = vshll.u32 %v2203_v59, 16  ;;  %v7052_v6 = vld [vmem:[#allocation2 + $0x9c] sm:$0xff]  }
  0xea   : > { %6893 = vmatprep.subr.bf16.mxu0 %v7054_v14  ;;  %v2345_v5 = vshll.u32 %v2204_v37, 16  ;;  %v2324_v27 = vsel %vm7248_vm9, %v2319_v49, %v2323_v58  ;;  %v2329_v15 = vrot.slane %v2328_v60, 4  ;;  %v5995_v31 = vcombine.low %v8031_v52, %v8038_v47  ;;  %v2721_v60 = vld [vmem:[#allocation2 + $0x54] sm:$0xe]  ;;  %v1798_v47 = vld [vmem:[#allocation2 + $0xa8] sm:$0xe] }
  0xeb   : > { %v1935_v62 = vsel %vm7568_vm14, %v5922_v46, %v1934_v16  ;;  %v1936_v28 = vrot.slane %v1934_v16, 4  ;;  %v2338_v25 = vrot.slane %v2336_v12, 4  ;;  %v2341_v44 = vrot.slane %v2339_v0, 5  ;;  %v2722_v0 = vld [vmem:[#allocation2 + $0x58] sm:$0xf] }
  0xec   : > { %5019 = vmatmul.mubr.bf16.gmra.mrb[52].mxu0 %v7992_v19  ;;  %v8050_v19 = vrot.slane %v2345_v5, 5  ;;  %v2334_v54 = vsel %vm7248_vm9, %v2329_v15, %v2333_v48  ;;  %v2349_v21 = vshrl.u32 %v2204_v37, 16  ;;  %v2355_v53 = vshll.u32 %v2205_v51, 16  ;;  %v7065_v48 = vld [vmem:[%s9076_s1 + $0x228] sm:$0xff]   ;;  %v2208_v51 = vld [vmem:[#allocation2 + $0x50] sm:$0x1] }
  0xed   : > { %5026 = vmatprep.mubr.bf16.mxu0 %v5993_v50  ;;  %6894 = vmatpush3.bf16.msra.mxu0 %v7054_v14  ;;  %v5980_v61 = vrot.slane %v2718_v34, 9  ;;  %v8057_v56 = vcombine.low %v2324_v27, %v2334_v54  ;;  %v1938_v50 = vsel %vm7568_vm14, %v1936_v28, %v1937_v32  ;;  %v2342_v2 = vor.u32 %v2341_v44, %v2338_v25  ;;  %v2723_v5 = vld [vmem:[#allocation2 + $0x5c] sm:$0x1]  ;;  %v7056_v54 = vld [vmem:[#allocation2 + $0xa8] sm:$0xff]  }
  0xee   : > { %6895 = vmatprep.subr.bf16.mxu0 %v7059_v33  ;;  %v2836_v4 = vrot.slane %v2719_v36, 5  ;;  %v5938_v58 = vcombine.low %v1935_v62, %v1938_v50  ;;  %v2351_v10 = vrot.slane %v2349_v21, 4  ;;  %v2357_v59 = vrot.slane %v2355_v53, 5  ;;  %v7068_v36 = vld [vmem:[%s9076_s1 + $0x230] sm:$0xff]   ;;  %v2210_v53 = vld [vmem:[#allocation2 + $0x58] sm:$0xf] }
  0xef   : > { %v2839_v14 = vrot.slane %v2720_v40, 5  ;;  %v2343_v43 = vrot.slane %v2342_v2, 4  ;;  %v5923_v30 = vrot.slane %v1792_v20, 9  ;;  %v1941_v24 = vrot.slane %v1793_v23, 5  ;;  %v1795_v40 = vld [vmem:[#allocation2 + $0x9c] sm:$0xe] }
  0xf0   : > { %v8063_v26 = vsel %vm7568_vm14, %v5980_v61, %v2836_v4  ;;  %v2838_v38 = vrot.slane %v2836_v4, 4  ;;  %4938 = vmatmul.mubr.bf16.gmra.mrb[60].mxu1 %v5938_v58  ;;  %v2352_v37 = vor.u32 %v2351_v10, %v8050_v19  ;;  %v1944_v3 = vrot.slane %v1794_v45, 5  ;;  %v1797_v23 = vld [vmem:[#allocation2 + $0xa4] sm:$0x1]  ;;  %v2209_v21 = vld [vmem:[#allocation2 + $0x54] sm:$0xf] }
  0xf1   : > { %6896 = vmatpush3.bf16.msra.mxu0 %v7059_v33  ;;  %v2360_v18 = vshrl.u32 %v2206_v1, 16  ;;  %v2348_v8 = vsel %vm7248_vm9, %v2343_v43, %v8050_v19  ;;  %4945 = vmatprep.mubr.bf16.mxu1 %v7052_v6  ;;  %v2363_v34 = vshll.u32 %v2206_v1, 16  ;;  %v2369_v49 = vshll.u32 %v2207_v9, 16  ;;  %v1796_v19 = vld [vmem:[#allocation2 + $0xa0] sm:$0xf] }
  0xf2   : > { %6897 = vmatprep.subr.bf16.mxu0 %v7062_v39  ;;  %v8074_v46 = vsel %vm7568_vm14, %v2838_v38, %v2839_v14  ;;  %v2353_v16 = vrot.slane %v2352_v37, 4  ;;  %v1942_v33 = vsel %vm7568_vm14, %v5923_v30, %v1941_v24  ;;  %v1943_v12 = vrot.slane %v1941_v24, 4  ;;  %v2724_v38 = vld [vmem:[#allocation2 + $0x60] sm:$0xe]  ;;  %v7071_v30 = vld [vmem:[%s9076_s1 + $0x238] sm:$0xff]  }
  0xf3   : > { %v5996_v32 = vcombine.low %v8063_v26, %v8074_v46  ;;  %v2362_v27 = vrot.slane %v2360_v18, 4  ;;  %v2371_v15 = vrot.slane %v2369_v49, 5  ;;  %v2373_v62 = vshrl.u32 %v2207_v9, 16 }
  0xf4   : > { %5027 = vmatmul.mubr.bf16.gmra.mrb[56].mxu0 %v8027_v22  ;;  %v2365_v22 = vrot.slane %v2363_v34, 5  ;;  %v2358_v20 = vsel %vm7248_vm9, %v2353_v16, %v2357_v59  ;;  %v1945_v28 = vsel %vm7568_vm14, %v1943_v12, %v1944_v3  ;;  %v2379_v25 = vshll.u32 %v2208_v51, 16  ;;  %v2211_v59 = vld [vmem:[#allocation2 + $0x5c] sm:$0x1] }
  0xf5   : > { %5034 = vmatprep.mubr.bf16.mxu0 %v5994_v55  ;;  %6898 = vmatpush3.bf16.msra.mxu0 %v7062_v39  ;;  %v5981_v44 = vrot.slane %v2721_v60, 9  ;;  %v8091_v45 = vcombine.low %v2348_v8, %v2358_v20  ;;  %v5939_v41 = vcombine.low %v1942_v33, %v1945_v28  ;;  %v2375_v55 = vrot.slane %v2373_v62, 4  ;;  %v2726_v8 = vld [vmem:[#allocation2 + $0x68] sm:$0x1] }
  0xf6   : > { %6899 = vmatprep.subr.bf16.mxu0 %v7065_v48  ;;  %v2366_v42 = vor.u32 %v2365_v22, %v2362_v27  ;;  %v2381_v61 = vrot.slane %v2379_v25, 5  ;;  %v2843_v1 = vrot.slane %v2722_v0, 5  ;;  %v2846_v39 = vrot.slane %v2723_v5, 5  ;;  %v7057_v5 = vld [vmem:[#allocation2 + $0xb4] sm:$0xff]  }
  0xf7   : > { %v5924_v50 = vrot.slane %v1795_v40, 9  ;;  %v2376_v6 = vor.u32 %v2375_v55, %v2371_v15  ;;  %v1948_v4 = vrot.slane %v1796_v19, 5  ;;  %v1951_v9 = vrot.slane %v1797_v23, 5 }
  0xf8   : > { %v2367_v2 = vrot.slane %v2366_v42, 4  ;;  %4946 = vmatmul.mubr.bf16.gmra.mrb[64].mxu1 %v5939_v41  ;;  %v8095_v58 = vsel %vm7568_vm14, %v5981_v44, %v2843_v1  ;;  %v2845_v10 = vrot.slane %v2843_v1, 4  ;;  %v2384_v14 = vshrl.u32 %v2209_v21, 16  ;;  %v1799_v44 = vld [vmem:[#allocation2 + $0xac] sm:$0xf] }
  0xf9   : > { %6900 = vmatpush3.bf16.msra.mxu0 %v7065_v48  ;;  %v2387_v43 = vshll.u32 %v2209_v21, 16  ;;  %v2377_v24 = vrot.slane %v2376_v6, 4  ;;  %4953 = vmatprep.mubr.bf16.mxu1 %v7056_v54  ;;  %v1949_v3 = vsel %vm7568_vm14, %v5924_v50, %v1948_v4  ;;  %v1950_v18 = vrot.slane %v1948_v4, 4  ;;  %v2725_v48 = vld [vmem:[#allocation2 + $0x64] sm:$0xf] }
  0xfa   : > { %6901 = vmatprep.subr.bf16.mxu0 %v7068_v36  ;;  %v2372_v37 = vsel %vm7248_vm9, %v2367_v2, %v2371_v15  ;;  %v8107_v51 = vsel %vm7568_vm14, %v2845_v10, %v2846_v39  ;;  %v2386_v34 = vrot.slane %v2384_v14, 4  ;;  %v2393_v60 = vshll.u32 %v2210_v53, 16  ;;  %v1800_v41 = vld [vmem:[#allocation2 + $0xb0] sm:$0x1]  ;;  %v2213_v1 = vld [vmem:[#allocation2 + $0x64] sm:$0xf] }
  0xfb   : > { %v2389_v49 = vrot.slane %v2387_v43, 5  ;;  %v2382_v33 = vsel %vm7248_vm9, %v2377_v24, %v2381_v61  ;;  %v5997_v12 = vcombine.low %v8095_v58, %v8107_v51  ;;  %v2397_v0 = vshrl.u32 %v2210_v53, 16  ;;  %v2212_v61 = vld [vmem:[#allocation2 + $0x60] sm:$0xf]  ;;  %v2214_v4 = vld [vmem:[#allocation2 + $0x68] sm:$0x1] }
  0xfc   : > { %5035 = vmatmul.mubr.bf16.gmra.mrb[60].mxu0 %v8057_v56  ;;  %v1952_v56 = vsel %vm7568_vm14, %v1950_v18, %v1951_v9  ;;  %v8122_v22 = vcombine.low %v2372_v37, %v2382_v33  ;;  %v2395_v52 = vrot.slane %v2393_v60, 5  ;;  %v2403_v20 = vshll.u32 %v2211_v59, 16 }
  0xfd   : > { %5042 = vmatprep.mubr.bf16.mxu0 %v5995_v31  ;;  %6902 = vmatpush3.bf16.msra.mxu0 %v7068_v36  ;;  %v5940_v15 = vcombine.low %v1949_v3, %v1952_v56  ;;  %v2390_v62 = vor.u32 %v2389_v49, %v2386_v34  ;;  %v2399_v40 = vrot.slane %v2397_v0, 4  ;;  %v5982_v28 = vrot.slane %v2724_v38, 9  ;;  %v2727_v3 = vld [vmem:[#allocation2 + $0x6c] sm:$0xe]  ;;  %v2729_v49 = vld [vmem:[#allocation2 + $0x74] sm:$0x1] }
  0xfe   : > { %6903 = vmatprep.subr.bf16.mxu0 %v7071_v30  ;;  %v2850_v25 = vrot.slane %v2725_v48, 5  ;;  %v2853_v23 = vrot.slane %v2726_v8, 5  ;;  %v5925_v36 = vrot.slane %v1798_v47, 9  ;;  %v1955_v42 = vrot.slane %v1799_v44, 5 }
  0xff   : > { %v2391_v19 = vrot.slane %v2390_v62, 4  ;;  %v2400_v55 = vor.u32 %v2399_v40, %v2395_v52  ;;  %v2405_v54 = vrot.slane %v2403_v20, 5  ;;  %v1958_v6 = vrot.slane %v1800_v41, 5 }
 0x100   : > { %v8128_v21 = vsel %vm7568_vm14, %v5982_v28, %v2850_v25  ;;  %v2852_v53 = vrot.slane %v2850_v25, 4  ;;  %4954 = vmatmul.mubr.bf16.gmra.mrb[68].mxu1 %v5940_v15  ;;  %v1956_v50 = vsel %vm7568_vm14, %v5925_v36, %v1955_v42  ;;  %v1957_v2 = vrot.slane %v1955_v42, 4 }
 0x101   : > { %v8109_v16 = vpop.f32.mrb[0].mxu0  ;;  %6904 = vmatpush3.bf16.msra.mxu0 %v7071_v30  ;;  %v2396_v39 = vsel %vm7248_vm9, %v2391_v19, %v2395_v52  ;;  %v2401_v9 = vrot.slane %v2400_v55, 4  ;;  %4961 = vmatprep.mubr.bf16.mxu1 %v7057_v5  ;;  %v2408_v59 = vshrl.u32 %v2212_v61, 16  ;;  %v2411_v14 = vshll.u32 %v2212_v61, 16  ;;  %v1801_v5 = vld [vmem:[#allocation2 + $0xb4] sm:$0xe] }
 0x102   : > { %v8120_v27 = vpop.f32.mrb[1].mxu0  ;;  %v8136_v10 = vsel %vm7568_vm14, %v2852_v53, %v2853_v23  ;;  %v1959_v30 = vsel %vm7568_vm14, %v1957_v2, %v1958_v6  ;;  %v2417_v37 = vshll.u32 %v2213_v1, 16  ;;  %v2421_v24 = vshrl.u32 %v2213_v1, 16  ;;  %v2215_v61 = vld [vmem:[#allocation2 + $0x6c] sm:$0xf] }
 0x103   : > { %v8124_v31 = vpop.f32.mrb[2].mxu0  ;;  %v5998_v38 = vcombine.low %v8128_v21, %v8136_v10  ;;  %v2406_v18 = vsel %vm7248_vm9, %v2401_v9, %v2405_v54  ;;  %v5941_v48 = vcombine.low %v1956_v50, %v1959_v30  ;;  %v2410_v8 = vrot.slane %v2408_v59, 4  ;;  %v974_v50 = vld [vmem:[#allocation2 + $0xc0] sm:$0xf]  ;;  %v2217_v30 = vld [vmem:[#allocation2 + $0x74] sm:$0x1] }
 0x104   : > { %v8138_v43 = vpop.f32.mrb[3].mxu0  ;;  %5043 = vmatmul.mubr.bf16.gmra.mrb[64].mxu0 %v8091_v45  ;;  %v2413_v34 = vrot.slane %v2411_v14, 5  ;;  %v2728_v45 = vld [vmem:[#allocation2 + $0x70] sm:$0xf]  ;;  %v8150_v60 = vcombine.low %v2396_v39, %v2406_v18  ;;  %v2419_v33 = vrot.slane %v2417_v37, 5  ;;  %v2423_v56 = vrot.slane %v2421_v24, 4 }
 0x105   : > { %5050 = vmatprep.mubr.bf16.mxu0 %v5996_v32  ;;  %v2427_v0 = vshll.u32 %v2214_v4, 16  ;;  %v442_v62 = vmax.f32 %v7942_v35, 0.0  ;;  %v443_v26 = vmax.f32 %v7951_v29, 0.0  ;;  %v5983_v46 = vrot.slane %v2727_v3, 9  ;;  %v1802_v32 = vld [vmem:[#allocation2 + $0xb8] sm:$0xf] }
 0x106   : > { %v2414_v15 = vor.u32 %v2413_v34, %v2410_v8  ;;  %v2424_v52 = vor.u32 %v2423_v56, %v2419_v33  ;;  %v2857_v40 = vrot.slane %v2728_v45, 5  ;;  %v2860_v20 = vrot.slane %v2729_v49, 5  ;;  %v1803_v35 = vld [vmem:[#allocation2 + $0xbc] sm:$0x1]  ;;  %v2216_v4 = vld [vmem:[#allocation2 + $0x70] sm:$0xf] }
 0x107   : > { %v2429_v47 = vrot.slane %v2427_v0, 5  ;;  %v6209_v25 = vpack.c.bf16 %v442_v62, %v442_v62  ;;  %v6210_v44 = vpack.c.bf16 %v443_v26, %v443_v26  ;;  %v5926_v19 = vrot.slane %v1801_v5, 9  ;;  %v2730_v37 = vld [vmem:[#allocation2 + $0x78] sm:$0xe]  ;;  %v2731_v8 = vld [vmem:[#allocation2 + $0x7c] sm:$0xf] }
 0x108   : > { %v2415_v28 = vrot.slane %v2414_v15, 4  ;;  %4962 = vmatmul.mubr.bf16.gmra.mrb[72].mxu1 %v5941_v48  ;;  %v2425_v23 = vrot.slane %v2424_v52, 4  ;;  %v8156_v41 = vsel %vm7568_vm14, %v5983_v46, %v2857_v40  ;;  %v2859_v36 = vrot.slane %v2857_v40, 4  ;;  %v2732_v34 = vld [vmem:[#allocation2 + $0x80] sm:$0x1] }
 0x109   : > { %v1962_v42 = vrot.slane %v1802_v32, 5  ;;  %v799_v55 = vshrl.u32 %v6209_v25, 16  ;;  %v802_v54 = vshll.u32 %v6209_v25, 16  ;;  %v807_v53 = vshrl.u32 %v6210_v44, 16  ;;  %v3136_v5 = vld [vmem:[#allocation2 + $0x18] sm:$0xf] }
 0x10a   : > { %v2420_v29 = vsel %vm7248_vm9, %v2415_v28, %v2419_v33  ;;  %v2430_v1 = vsel %vm7248_vm9, %v2425_v23, %v2429_v47  ;;  %v810_v39 = vshll.u32 %v6210_v44, 16  ;;  %v8165_v2 = vsel %vm7568_vm14, %v2859_v36, %v2860_v20  ;;  %v3137_v32 = vld [vmem:[#allocation2 + $0x1c] sm:$0xf]  ;;  %v3138_v28 = vld [vmem:[#allocation2 + $0x20] sm:$0x1] }
 0x10b   : > { %v8169_v6 = vsel %vm7568_vm14, %v5926_v19, %v1962_v42  ;;  %v8174_v9 = vcombine.low %v2420_v29, %v2430_v1  ;;  %v8176_v59 = vrot.slane %v807_v53, 7  ;;  %v5999_v14 = vcombine.low %v8156_v41, %v8165_v2  ;;  %v3141_v2 = vld [vmem:[#allocation2 + $0x2c] sm:$0x1] }
 0x10c   : > { %5051 = vmatmul.mubr.bf16.gmra.mrb[68].mxu0 %v8122_v22  ;;  %v801_v22 = vrot.slane %v799_v55, 7  ;;  %v1964_v24 = vrot.slane %v1962_v42, 4  ;;  %v1965_v3 = vrot.slane %v1803_v35, 5  ;;  %v2432_v18 = vshrl.u32 %v2215_v61, 16  ;;  %v2218_v42 = vld [vmem:[#allocation2 + $0x78] sm:$0xf] }
 0x10d   : > { %5058 = vmatprep.mubr.bf16.mxu0 %v5997_v12  ;;  %v2435_v48 = vshll.u32 %v2215_v61, 16  ;;  %v812_v58 = vor.u32 %v810_v39, %v8176_v59  ;;  %v814_v51 = vrot.slane %v8176_v59, 4  ;;  %v2441_v0 = vshll.u32 %v2216_v4, 16 }
 0x10e   : > { %v804_v45 = vor.u32 %v802_v54, %v801_v22  ;;  %v805_v49 = vrot.slane %v801_v22, 4  ;;  %v8184_v12 = vsel %vm7568_vm14, %v1964_v24, %v1965_v3  ;;  %v2434_v33 = vrot.slane %v2432_v18, 4 }
 0x10f   : > { %v2437_v56 = vrot.slane %v2435_v48, 5  ;;  %v5942_v26 = vcombine.low %v8169_v6, %v8184_v12  ;;  %v2445_v46 = vshrl.u32 %v2216_v4, 16  ;;  %v2443_v47 = vrot.slane %v2441_v0, 5  ;;  %v3143_v6 = vld [vmem:[#allocation2 + $0x34] sm:$0xf] }
 0x110   : > { %v813_v15 = vsel %vm7262_vm11, %v805_v49, %v812_v58  ;;  %v975_v62 = vsel %vm7256_vm10, %v804_v45, %v974_v50  ;;  %v2451_v40 = vshll.u32 %v2217_v30, 16  ;;  %v5984_v20 = vrot.slane %v2730_v37, 9  ;;  %v2219_v50 = vld [vmem:[#allocation2 + $0x7c] sm:$0xf] }
 0x111   : > { %976 = vst [vmem:[#allocation2 + $0xc0] sm:$0xf] %v975_v62  ;;  %977 = vst [vmem:[#allocation2 + $0xc4] sm:$0xf] %v813_v15  ;;  %v2438_v52 = vor.u32 %v2437_v56, %v2434_v33  ;;  %v2447_v25 = vrot.slane %v2445_v46, 4  ;;  %v2864_v44 = vrot.slane %v2731_v8, 5  ;;  %v8216_v56 = vadd.f32 %v8120_v27, %v8109_v16 }
 0x112   : > { %v2867_v19 = vrot.slane %v2732_v34, 5  ;;  %v3185_v11 = vshrl.u32 %v3136_v5, 16  ;;  %v2453_v23 = vrot.slane %v2451_v40, 5  ;;  %v3188_v36 = vshll.u32 %v3136_v5, 16  ;;  %v2733_v8 = vld [vmem:[#allocation2 + $0x84] sm:$0xe] }
 0x113   : > { %v2439_v7 = vrot.slane %v2438_v52, 4  ;;  %v3194_v35 = vshll.u32 %v3137_v32, 16  ;;  %v2448_v29 = vor.u32 %v2447_v25, %v2443_v47  ;;  %v8198_v55 = vsel %vm7568_vm14, %v5984_v20, %v2864_v44  ;;  %v2734_v34 = vld [vmem:[#allocation2 + $0x88] sm:$0xf]  ;;  %v2735_v46 = vld [vmem:[#allocation2 + $0x8c] sm:$0x1] }
 0x114   : > { %5059 = vmatmul.mubr.bf16.gmra.mrb[72].mxu0 %v8150_v60  ;;  %v2866_v54 = vrot.slane %v2864_v44, 4  ;;  %v3187_v53 = vrot.slane %v3185_v11, 4  ;;  %v3190_v60 = vrot.slane %v3188_v36, 5  ;;  %v3198_v39 = vshrl.u32 %v3137_v32, 16  ;;  %v3139_v32 = vld [vmem:[#allocation2 + $0x24] sm:$0xf] }
 0x115   : > { %5066 = vmatprep.mubr.bf16.mxu0 %v5998_v38  ;;  %v2444_v61 = vsel %vm7248_vm9, %v2439_v7, %v2443_v47  ;;  %v3196_v1 = vrot.slane %v3194_v35, 5  ;;  %v2449_v22 = vrot.slane %v2448_v29, 4  ;;  %v3204_v10 = vshll.u32 %v3138_v28, 16  ;;  %v2220_v38 = vld [vmem:[#allocation2 + $0x80] sm:$0x1] }
 0x116   : > { %v8202_v4 = vpop.f32.mrb[4].mxu0  ;;  %v8206_v21 = vsel %vm7568_vm14, %v2866_v54, %v2867_v19  ;;  %v2456_v30 = vshrl.u32 %v2218_v42, 16  ;;  %v3191_v3 = vor.u32 %v3190_v60, %v3187_v53  ;;  %v3200_v18 = vrot.slane %v3198_v39, 4  ;;  %v3140_v36 = vld [vmem:[#allocation2 + $0x28] sm:$0xf] }
 0x117   : > { %v8208_v37 = vpop.f32.mrb[5].mxu0  ;;  %v6000_v24 = vcombine.low %v8198_v55, %v8206_v21  ;;  %v2459_v48 = vshll.u32 %v2218_v42, 16  ;;  %v2454_v49 = vsel %vm7248_vm9, %v2449_v22, %v2453_v23  ;;  %v3206_v58 = vrot.slane %v3204_v10, 5  ;;  %v2221_v60 = vld [vmem:[#allocation2 + $0x84] sm:$0xf] }
 0x118   : > { %v1036_v45 = vld [vmem:[#allocation2 + $0xc0] sm:$0x1]  ;;  %v2458_v33 = vrot.slane %v2456_v30, 4  ;;  %v5967_v5 = vcombine.low %v2444_v61, %v2454_v49  ;;  %v3192_v15 = vrot.slane %v3191_v3, 4  ;;  %v3201_v62 = vor.u32 %v3200_v18, %v3196_v1  ;;  %v2222_v10 = vld [vmem:[#allocation2 + $0x88] sm:$0xf] }
 0x119   : > { %v1037_v0 = vsel %vm7188_vm3, 0, %v1036_v45  ;;  %v2461_v52 = vrot.slane %v2459_v48, 5  ;;  %v2465_v47 = vshll.u32 %v2219_v50, 16  ;;  %v2469_v40 = vshrl.u32 %v2219_v50, 16 }
 0x11a   : > { %1038 = vst [vmem:[#allocation2 + $0xc0] sm:$0x1] %v1037_v0  ;;  %v2475_v20 = vshll.u32 %v2220_v38, 16  ;;  %v3197_v28 = vsel %vm7248_vm9, %v3192_v15, %v3196_v1  ;;  %v3202_v16 = vrot.slane %v3201_v62, 4  ;;  %v5985_v27 = vrot.slane %v2733_v8, 9  ;;  %v8223_v44 = vpop.f32.mrb[0].mxu1 }
 0x11b   : > { %v2871_v25 = vrot.slane %v2734_v34, 5  ;;  %v2462_v19 = vor.u32 %v2461_v52, %v2458_v33  ;;  %v2467_v11 = vrot.slane %v2465_v47, 5  ;;  %v2471_v7 = vrot.slane %v2469_v40, 4  ;;  %v8228_v35 = vpop.f32.mrb[1].mxu1  ;;  %v2223_v8 = vld [vmem:[#allocation2 + $0x8c] sm:$0x1] }
 0x11c   : > { %5067 = vmatmul.mubr.bf16.gmra.mrb[76].mxu0 %v8174_v9  ;;  %v2477_v23 = vrot.slane %v2475_v20, 5  ;;  %v3207_v9 = vsel %vm7248_vm9, %v3202_v16, %v3206_v58  ;;  %v2874_v54 = vrot.slane %v2735_v46, 5  ;;  %v3212_v39 = vshll.u32 %v3139_v32, 16  ;;  %v8240_v38 = vpop.f32.mrb[2].mxu1  ;;  %v2737_v16 = vld [vmem:[#allocation2 + $0x94] sm:$0xf] }
 0x11d   : > { %5074 = vmatprep.mubr.bf16.mxu0 %v5999_v14  ;;  %v8234_v42 = vsel %vm7568_vm14, %v5985_v27, %v2871_v25  ;;  %v2873_v29 = vrot.slane %v2871_v25, 4  ;;  %v6023_v53 = vcombine.low %v3197_v28, %v3207_v9  ;;  %v2463_v61 = vrot.slane %v2462_v19, 4  ;;  %v8252_v52 = vpop.f32.mrb[3].mxu1  ;;  %v2738_v27 = vld [vmem:[#allocation2 + $0x98] sm:$0x1]  ;;  %v8254_v25 = vpop.f32.mrb[6].mxu0 }
 0x11e   : > { %v2472_v41 = vor.u32 %v2471_v7, %v2467_v11  ;;  %v3209_v14 = vshrl.u32 %v3139_v32, 16  ;;  %v3218_v50 = vshll.u32 %v3140_v36, 16  ;;  %v3222_v22 = vshrl.u32 %v3140_v36, 16  ;;  %v2736_v32 = vld [vmem:[#allocation2 + $0x90] sm:$0xe]  ;;  %v8262_v12 = vpop.f32.mrb[7].mxu0 }
 0x11f   : > { %v8238_v1 = vsel %vm7568_vm14, %v2873_v29, %v2874_v54  ;;  %v2468_v30 = vsel %vm7248_vm9, %v2463_v61, %v2467_v11  ;;  %v3214_v45 = vrot.slane %v3212_v39, 5  ;;  %v8248_v33 = vadd.f32 %v8138_v43, %v8124_v31  ;;  %v3142_v11 = vld [vmem:[#allocation2 + $0x30] sm:$0xf] }
 0x120   : > { %v2473_v3 = vrot.slane %v2472_v41, 4  ;;  %v6001_v18 = vcombine.low %v8234_v42, %v8238_v1  ;;  %v3211_v48 = vrot.slane %v3209_v14, 4  ;;  %v3220_v49 = vrot.slane %v3218_v50, 5  ;;  %v2741_v42 = vld [vmem:[#allocation2 + $0xa4] sm:$0x1] }
 0x121   : > { %v7061_v34 = vld [vmem:[#allocation2 + $0xc0] sm:$0xff]   ;;  %v3224_v58 = vrot.slane %v3222_v22, 4  ;;  %v3228_v15 = vshll.u32 %v3141_v2, 16  ;;  %v2480_v62 = vshrl.u32 %v2221_v60, 16  ;;  %v2483_v46 = vshll.u32 %v2221_v60, 16  ;;  %v7063_v2 = vld [vmem:[#allocation2 + $0x18] sm:$0xff]  }
 0x122   : > { %v2478_v0 = vsel %vm7248_vm9, %v2473_v3, %v2477_v23  ;;  %4969 = vmatprep.mubr.bf16.mxu1 %v7061_v34  ;;  %v3215_v40 = vor.u32 %v3214_v45, %v3211_v48  ;;  %v2489_v28 = vshll.u32 %v2222_v10, 16  ;;  %v2499_v9 = vshll.u32 %v2223_v8, 16  ;;  %v2224_v8 = vld [vmem:[#allocation2 + $0x90] sm:$0xf] }
 0x123   : > { %v5968_v47 = vcombine.low %v2468_v30, %v2478_v0  ;;  %v3225_v20 = vor.u32 %v3224_v58, %v3220_v49  ;;  %4970 = vmatmul.mubr.bf16.gmra.mrb[76].mxu1 %v5942_v26  ;;  %v3230_v31 = vrot.slane %v3228_v15, 5  ;;  %v2482_v43 = vrot.slane %v2480_v62, 4  ;;  %v2225_v0 = vld [vmem:[#allocation2 + $0x94] sm:$0xf] }
 0x124   : > { %5075 = vmatmul.mubr.bf16.gmra.mrb[80].mxu0 %v5967_v5  ;;  %v2485_v19 = vrot.slane %v2483_v46, 5  ;;  %v2493_v5 = vshrl.u32 %v2222_v10, 16  ;;  %5171 = vmatprep.mubr.bf16.mxu1 %v6023_v53  ;;  %v3216_v7 = vrot.slane %v3215_v40, 4  ;;  %v2491_v36 = vrot.slane %v2489_v28, 5  ;;  %v3144_v53 = vld [vmem:[#allocation2 + $0x38] sm:$0x1] }
 0x125   : > { %5082 = vmatprep.mubr.bf16.mxu0 %v6000_v24  ;;  %v3226_v23 = vrot.slane %v3225_v20, 4  ;;  %v5986_v61 = vrot.slane %v2736_v32, 9  ;;  %v2878_v41 = vrot.slane %v2737_v16, 5  ;;  %v2501_v21 = vrot.slane %v2499_v9, 5  ;;  %v2226_v20 = vld [vmem:[#allocation2 + $0x98] sm:$0x1] }
 0x126   : > { %v2486_v29 = vor.u32 %v2485_v19, %v2482_v43  ;;  %v2495_v54 = vrot.slane %v2493_v5, 4  ;;  %v3221_v26 = vsel %vm7248_vm9, %v3216_v7, %v3220_v49  ;;  %v2881_v24 = vrot.slane %v2738_v27, 5  ;;  %v2739_v43 = vld [vmem:[#allocation2 + $0x9c] sm:$0xe] }
 0x127   : > { %v3231_v55 = vsel %vm7248_vm9, %v3226_v23, %v3230_v31  ;;  %v8270_v50 = vsel %vm7568_vm14, %v5986_v61, %v2878_v41  ;;  %v2880_v10 = vrot.slane %v2878_v41, 4  ;;  %v3233_v30 = vshrl.u32 %v3142_v11, 16  ;;  %v2740_v23 = vld [vmem:[#allocation2 + $0xa0] sm:$0xf] }
 0x128   : > { %v6024_v14 = vcombine.low %v3221_v26, %v3231_v55  ;;  %v2487_v60 = vrot.slane %v2486_v29, 4  ;;  %v2496_v39 = vor.u32 %v2495_v54, %v2491_v36  ;;  %v3236_v3 = vshll.u32 %v3142_v11, 16  ;;  %v3145_v26 = vld [vmem:[#allocation2 + $0x3c] sm:$0xf]  ;;  %v7064_v55 = vld [vmem:[#allocation2 + $0x24] sm:$0xff]  }
 0x129   : > { %v8272_v22 = vpop.f32.mrb[8].mxu0  ;;  %v3242_v48 = vshll.u32 %v3143_v6, 16  ;;  %v3246_v49 = vshrl.u32 %v3143_v6, 16  ;;  %v3252_v58 = vshll.u32 %v3144_v53, 16  ;;  %v2882_v62 = vsel %vm7568_vm14, %v2880_v10, %v2881_v24  ;;  %v3146_v10 = vld [vmem:[#allocation2 + $0x40] sm:$0xf] }
 0x12a   : > { %v2492_v34 = vsel %vm7248_vm9, %v2487_v60, %v2491_v36  ;;  %v2497_v45 = vrot.slane %v2496_v39, 4  ;;  %v8276_v15 = vpop.f32.mrb[9].mxu0  ;;  %v3235_v46 = vrot.slane %v3233_v30, 4  ;;  %v3238_v32 = vrot.slane %v3236_v3, 5  ;;  %v3147_v30 = vld [vmem:[#allocation2 + $0x44] sm:$0x1] }
 0x12b   : > { %v3244_v40 = vrot.slane %v3242_v48, 5  ;;  %v8280_v28 = vpop.f32.mrb[10].mxu0  ;;  %5172 = vmatmul.mubr.bf16.vlgmr.msra.gmra.mrb[80].mxu1 %v7063_v2  ;;  %v6002_v27 = vcombine.low %v8270_v50, %v2882_v62  ;;  %v3254_v31 = vrot.slane %v3252_v58, 5  ;;  %v2504_v11 = vshrl.u32 %v2224_v8, 16  ;;  %v2227_v62 = vld [vmem:[#allocation2 + $0x9c] sm:$0xf] }
 0x12c   : > { %5083 = vmatmul.mubr.bf16.gmra.mrb[84].mxu0 %v5968_v47  ;;  %v2502_v16 = vsel %vm7248_vm9, %v2497_v45, %v2501_v21  ;;  %v3248_v47 = vrot.slane %v3246_v49, 4  ;;  %5179 = vmatprep.mubr.bf16.mxu1 %v6024_v14  ;;  %v3239_v5 = vor.u32 %v3238_v32, %v3235_v46  ;;  %v2507_v7 = vshll.u32 %v2224_v8, 16 }
 0x12d   : > { %5090 = vmatprep.mubr.bf16.mxu0 %v6001_v18  ;;  %v5969_v19 = vcombine.low %v2492_v34, %v2502_v16  ;;  %v2513_v9 = vshll.u32 %v2225_v0, 16  ;;  %v2517_v29 = vshrl.u32 %v2225_v0, 16  ;;  %v2523_v54 = vshll.u32 %v2226_v20, 16  ;;  %v8288_v1 = vpop.f32.mrb[4].mxu1  ;;  %v2228_v16 = vld [vmem:[#allocation2 + $0xa0] sm:$0xf] }
 0x12e   : > { %v3249_v36 = vor.u32 %v3248_v47, %v3244_v40  ;;  %v3240_v18 = vrot.slane %v3239_v5, 4  ;;  %v2506_v61 = vrot.slane %v2504_v11, 4  ;;  %v2509_v41 = vrot.slane %v2507_v7, 5  ;;  %v7066_v11 = vld [vmem:[#allocation2 + $0x30] sm:$0xff]  }
 0x12f   : > { %v5987_v6 = vrot.slane %v2739_v43, 9  ;;  %v2515_v24 = vrot.slane %v2513_v9, 5  ;;  %v2519_v53 = vrot.slane %v2517_v29, 4  ;;  %v2525_v2 = vrot.slane %v2523_v54, 5  ;;  %v2742_v9 = vld [vmem:[#allocation2 + $0xa8] sm:$0xe] }
 0x130   : > { %v3250_v21 = vrot.slane %v3249_v36, 4  ;;  %v3245_v14 = vsel %vm7248_vm9, %v3240_v18, %v3244_v40  ;;  %v2510_v60 = vor.u32 %v2509_v41, %v2506_v61  ;;  %v2885_v39 = vrot.slane %v2740_v23, 5  ;;  %v2229_v36 = vld [vmem:[#allocation2 + $0xa4] sm:$0x1]  ;;  %v8302_v29 = vpop.f32.mrb[5].mxu1 }
 0x131   : > { %v2888_v50 = vrot.slane %v2741_v42, 5  ;;  %v2520_v48 = vor.u32 %v2519_v53, %v2515_v24  ;;  %v3257_v8 = vshrl.u32 %v3145_v26, 16  ;;  %v3260_v34 = vshll.u32 %v3145_v26, 16  ;;  %v2743_v41 = vld [vmem:[#allocation2 + $0xac] sm:$0xf] }
 0x132   : > { %v3255_v3 = vsel %vm7248_vm9, %v3250_v21, %v3254_v31  ;;  %v2511_v49 = vrot.slane %v2510_v60, 4  ;;  %v2886_v58 = vsel %vm7568_vm14, %v5987_v6, %v2885_v39  ;;  %v2887_v0 = vrot.slane %v2885_v39, 4  ;;  %v8304_v6 = vpop.f32.mrb[6].mxu1  ;;  %v2744_v53 = vld [vmem:[#allocation2 + $0xb0] sm:$0x1] }
 0x133   : > { %v6025_v45 = vcombine.low %v3245_v14, %v3255_v3  ;;  %5180 = vmatmul.mubr.bf16.gmra.mrb[84].mxu1 %v7064_v55  ;;  %v2521_v46 = vrot.slane %v2520_v48, 4  ;;  %v3259_v32 = vrot.slane %v3257_v8, 4  ;;  %v3262_v40 = vrot.slane %v3260_v34, 5  ;;  %v3149_v34 = vld [vmem:[#allocation2 + $0x4c] sm:$0xf] }
 0x134   : > { %5091 = vmatmul.mubr.bf16.gmra.mrb[88].mxu0 %v5969_v19  ;;  %v3266_v20 = vshll.u32 %v3146_v10, 16  ;;  %v2516_v47 = vsel %vm7248_vm9, %v2511_v49, %v2515_v24  ;;  %v2889_v31 = vsel %vm7568_vm14, %v2887_v0, %v2888_v50  ;;  %v3270_v43 = vshrl.u32 %v3146_v10, 16  ;;  %v3148_v50 = vld [vmem:[#allocation2 + $0x48] sm:$0xf]  ;;  %v8306_v10 = vpop.f32.mrb[7].mxu1 }
 0x135   : > { %5098 = vmatprep.mubr.bf16.mxu0 %v6002_v27  ;;  %5187 = vmatprep.mubr.bf16.mxu1 %v6025_v45  ;;  %v3276_v19 = vshll.u32 %v3147_v30, 16  ;;  %v2526_v5 = vsel %vm7248_vm9, %v2521_v46, %v2525_v2  ;;  %v6003_v7 = vcombine.low %v2886_v58, %v2889_v31  ;;  %v3263_v27 = vor.u32 %v3262_v40, %v3259_v32  ;;  %v8310_v45 = vpop.f32.mrb[11].mxu0  ;;  %v3150_v40 = vld [vmem:[#allocation2 + $0x50] sm:$0x1] }
 0x136   : > { %v3268_v23 = vrot.slane %v3266_v20, 5  ;;  %v5970_v54 = vcombine.low %v2516_v47, %v2526_v5  ;;  %v3272_v42 = vrot.slane %v3270_v43, 4  ;;  %v2528_v61 = vshrl.u32 %v2227_v62, 16  ;;  %v2230_v47 = vld [vmem:[#allocation2 + $0xa8] sm:$0xf] }
 0x137   : > { %v3278_v18 = vrot.slane %v3276_v19, 5  ;;  %v3264_v26 = vrot.slane %v3263_v27, 4  ;;  %v2531_v55 = vshll.u32 %v2227_v62, 16  ;;  %v2537_v21 = vshll.u32 %v2228_v16, 16 }
 0x138   : > { %v2541_v24 = vshrl.u32 %v2228_v16, 16  ;;  %v3273_v2 = vor.u32 %v3272_v42, %v3268_v23  ;;  %v2530_v14 = vrot.slane %v2528_v61, 4  ;;  %v2547_v60 = vshll.u32 %v2229_v36, 16 }
 0x139   : > { %v5988_v39 = vrot.slane %v2742_v9, 9  ;;  %v3269_v30 = vsel %vm7248_vm9, %v3264_v26, %v3268_v23  ;;  %v2533_v3 = vrot.slane %v2531_v55, 5  ;;  %v2539_v48 = vrot.slane %v2537_v21, 5  ;;  %v7067_v9 = vld [vmem:[#allocation2 + $0x3c] sm:$0xff]  }
 0x13a   : > { %v2543_v8 = vrot.slane %v2541_v24, 4  ;;  %v3274_v49 = vrot.slane %v3273_v2, 4  ;;  %v2549_v58 = vrot.slane %v2547_v60, 5  ;;  %v2892_v0 = vrot.slane %v2743_v41, 5  ;;  %v2746_v60 = vld [vmem:[#allocation2 + $0xb8] sm:$0xf] }
 0x13b   : > { %v2895_v62 = vrot.slane %v2744_v53, 5  ;;  %5188 = vmatmul.mubr.bf16.gmra.mrb[88].mxu1 %v7066_v11  ;;  %v2534_v46 = vor.u32 %v2533_v3, %v2530_v14  ;;  %v3281_v20 = vshrl.u32 %v3148_v50, 16  ;;  %v3284_v16 = vshll.u32 %v3148_v50, 16  ;;  %v2745_v14 = vld [vmem:[#allocation2 + $0xb4] sm:$0xe] }
 0x13c   : > { %5099 = vmatmul.mubr.bf16.gmra.mrb[92].mxu0 %v5970_v54  ;;  %v2544_v32 = vor.u32 %v2543_v8, %v2539_v48  ;;  %v3279_v31 = vsel %vm7248_vm9, %v3274_v49, %v3278_v18  ;;  %v2893_v43 = vsel %vm7568_vm14, %v5988_v39, %v2892_v0  ;;  %v2894_v19 = vrot.slane %v2892_v0, 4  ;;  %v8316_v54 = vpop.f32.mrb[12].mxu0  ;;  %v2232_v18 = vld [vmem:[#allocation2 + $0xb0] sm:$0x1]  ;;  %v3151_v49 = vld [vmem:[#allocation2 + $0x54] sm:$0xf] }
 0x13d   : > { %5106 = vmatprep.mubr.bf16.mxu0 %v6003_v7  ;;  %v3290_v5 = vshll.u32 %v3149_v34, 16  ;;  %v6026_v27 = vcombine.low %v3269_v30, %v3279_v31  ;;  %v2535_v23 = vrot.slane %v2534_v46, 4  ;;  %v3283_v11 = vrot.slane %v3281_v20, 4  ;;  %v2231_v7 = vld [vmem:[#allocation2 + $0xac] sm:$0xf]  ;;  %v8320_v55 = vpop.f32.mrb[13].mxu0 }
 0x13e   : > { %v2545_v36 = vrot.slane %v2544_v32, 4  ;;  %v2896_v42 = vsel %vm7568_vm14, %v2894_v19, %v2895_v62  ;;  %v3286_v61 = vrot.slane %v3284_v16, 5  ;;  %v3294_v26 = vshrl.u32 %v3149_v34, 16  ;;  %v8326_v39 = vpop.f32.mrb[14].mxu0  ;;  %v2747_v34 = vld [vmem:[#allocation2 + $0xbc] sm:$0x1] }
 0x13f   : > { %v3292_v41 = vrot.slane %v3290_v5, 5  ;;  %5195 = vmatprep.mubr.bf16.mxu1 %v6026_v27  ;;  %v2540_v21 = vsel %vm7248_vm9, %v2535_v23, %v2539_v48  ;;  %v6004_v53 = vcombine.low %v2893_v43, %v2896_v42  ;;  %v3300_v2 = vshll.u32 %v3150_v40, 16 }
 0x140   : > { %v2550_v24 = vsel %vm7248_vm9, %v2545_v36, %v2549_v58  ;;  %v3287_v30 = vor.u32 %v3286_v61, %v3283_v11  ;;  %v3296_v3 = vrot.slane %v3294_v26, 4  ;;  %v2552_v8 = vshrl.u32 %v2230_v47, 16  ;;  %v3152_v11 = vld [vmem:[#allocation2 + $0x58] sm:$0xf] }
 0x141   : > { %v5971_v50 = vcombine.low %v2540_v21, %v2550_v24  ;;  %v3302_v0 = vrot.slane %v3300_v2, 5  ;;  %v2555_v62 = vshll.u32 %v2230_v47, 16  ;;  %v2561_v46 = vshll.u32 %v2231_v7, 16  ;;  %v7069_v21 = vld [vmem:[#allocation2 + $0x48] sm:$0xff]   ;;  %v3153_v2 = vld [vmem:[#allocation2 + $0x5c] sm:$0x1] }
 0x142   : > { %v2565_v32 = vshrl.u32 %v2231_v7, 16  ;;  %v3288_v48 = vrot.slane %v3287_v30, 4  ;;  %v3297_v20 = vor.u32 %v3296_v3, %v3292_v41  ;;  %v2554_v58 = vrot.slane %v2552_v8, 4  ;;  %v8328_v40 = vpop.f32.mrb[8].mxu1  ;;  %v2233_v3 = vld [vmem:[#allocation2 + $0xb4] sm:$0xf] }
 0x143   : > { %v2571_v16 = vshll.u32 %v2232_v18, 16  ;;  %5196 = vmatmul.mubr.bf16.gmra.mrb[92].mxu1 %v7067_v9  ;;  %v2557_v31 = vrot.slane %v2555_v62, 5  ;;  %v2563_v43 = vrot.slane %v2561_v46, 5  ;;  %v5989_v5 = vrot.slane %v2745_v14, 9  ;;  %v8332_v7 = vpop.f32.mrb[9].mxu1 }
 0x144   : > { %5107 = vmatmul.mubr.bf16.gmra.mrb[96].mxu0 %v5971_v50  ;;  %v2567_v19 = vrot.slane %v2565_v32, 4  ;;  %v3293_v27 = vsel %vm7248_vm9, %v3288_v48, %v3292_v41  ;;  %v3298_v23 = vrot.slane %v3297_v20, 4  ;;  %v2899_v36 = vrot.slane %v2746_v60, 5  ;;  %v8338_v8 = vpop.f32.mrb[10].mxu1  ;;  %v2234_v32 = vld [vmem:[#allocation2 + $0xb8] sm:$0xf] }
 0x145   : > { %5114 = vmatprep.mubr.bf16.mxu0 %v6004_v53  ;;  %v2573_v47 = vrot.slane %v2571_v16, 5  ;;  %v2558_v42 = vor.u32 %v2557_v31, %v2554_v58  ;;  %v2902_v26 = vrot.slane %v2747_v34, 5  ;;  %v3305_v18 = vshrl.u32 %v3151_v49, 16  ;;  %v8342_v48 = vpop.f32.mrb[11].mxu1  ;;  %v2235_v31 = vld [vmem:[#allocation2 + $0xbc] sm:$0x1] }
 0x146   : > { %v2568_v61 = vor.u32 %v2567_v19, %v2563_v43  ;;  %v3303_v9 = vsel %vm7248_vm9, %v3298_v23, %v3302_v0  ;;  %v2900_v24 = vsel %vm7568_vm14, %v5989_v5, %v2899_v36  ;;  %v2901_v53 = vrot.slane %v2899_v36, 4  ;;  %v978_v19 = vld [vmem:[#allocation2 + $0xc8] sm:$0x1]  ;;  %v8348_v5 = vpop.f32.mrb[15].mxu0 }
 0x147   : > { %v3308_v41 = vshll.u32 %v3151_v49, 16  ;;  %v6027_v14 = vcombine.low %v3293_v27, %v3303_v9  ;;  %v2559_v50 = vrot.slane %v2558_v42, 4  ;;  %v3307_v30 = vrot.slane %v3305_v18, 4  ;;  %v2748_v42 = vld [vmem:[#allocation2 + $0xc0] sm:$0xe] }
 0x148   : > { %v2569_v60 = vrot.slane %v2568_v61, 4  ;;  %v2903_v34 = vsel %vm7568_vm14, %v2901_v53, %v2902_v26  ;;  %v3314_v46 = vshll.u32 %v3152_v11, 16  ;;  %v3318_v0 = vshrl.u32 %v3152_v11, 16 }
 0x149   : > { %v3310_v62 = vrot.slane %v3308_v41, 5  ;;  %5203 = vmatprep.mubr.bf16.mxu1 %v6027_v14  ;;  %v2564_v49 = vsel %vm7248_vm9, %v2559_v50, %v2563_v43  ;;  %v6005_v58 = vcombine.low %v2900_v24, %v2903_v34  ;;  %v3324_v16 = vshll.u32 %v3153_v2, 16  ;;  %v2749_v43 = vld [vmem:[#allocation2 + $0xc4] sm:$0xf]  ;;  %v3154_v41 = vld [vmem:[#allocation2 + $0x60] sm:$0xf] }
 0x14a   : > { %v2574_v20 = vsel %vm7248_vm9, %v2569_v60, %v2573_v47  ;;  %v3316_v36 = vrot.slane %v3314_v46, 5  ;;  %v3320_v11 = vrot.slane %v3318_v0, 4  ;;  %v2576_v26 = vshrl.u32 %v2233_v3, 16 }
 0x14b   : > { %v5972_v27 = vcombine.low %v2564_v49, %v2574_v20  ;;  %v3311_v23 = vor.u32 %v3310_v62, %v3307_v30  ;;  %5204 = vmatmul.mubr.bf16.gmra.mrb[96].mxu1 %v7069_v21  ;;  %v3326_v61 = vrot.slane %v3324_v16, 5  ;;  %v2579_v18 = vshll.u32 %v2233_v3, 16  ;;  %v3155_v30 = vld [vmem:[#allocation2 + $0x64] sm:$0xf]  ;;  %v7070_v20 = vld [vmem:[#allocation2 + $0x54] sm:$0xff]  }
 0x14c   : > { %v2585_v9 = vshll.u32 %v2234_v32, 16  ;;  %v3321_v47 = vor.u32 %v3320_v11, %v3316_v36  ;;  %v2589_v24 = vshrl.u32 %v2234_v32, 16  ;;  %v2595_v2 = vshll.u32 %v2235_v31, 16  ;;  %v2236_v11 = vld [vmem:[#allocation2 + $0xc0] sm:$0xf] }
 0x14d   : > { %5115 = vmatmul.mubr.bf16.gmra.mrb[100].mxu0 %v5972_v27  ;;  %v3312_v53 = vrot.slane %v3311_v23, 4  ;;  %v2578_v14 = vrot.slane %v2576_v26, 4  ;;  %v2581_v50 = vrot.slane %v2579_v18, 5  ;;  %v979_v21 = vsel %vm7188_vm3, %v814_v51, %v978_v19  ;;  %v3156_v27 = vld [vmem:[#allocation2 + $0x68] sm:$0x1] }
 0x14e   : > { %5122 = vmatprep.mubr.bf16.mxu0 %v6005_v58  ;;  %v2587_v60 = vrot.slane %v2585_v9, 5  ;;  %v3322_v62 = vrot.slane %v3321_v47, 4  ;;  %v2591_v46 = vrot.slane %v2589_v24, 4  ;;  %v2597_v0 = vrot.slane %v2595_v2, 5  ;;  %980 = vst [vmem:[#allocation2 + $0xc8] sm:$0x1] %v979_v21 }
 0x14f   : > { %v8354_v34 = vpop.f32.mrb[16].mxu0  ;;  %v3317_v3 = vsel %vm7248_vm9, %v3312_v53, %v3316_v36  ;;  %v2582_v49 = vor.u32 %v2581_v50, %v2578_v14  ;;  %v5990_v58 = vrot.slane %v2748_v42, 9  ;;  %v2906_v16 = vrot.slane %v2749_v43, 5  ;;  %v2237_v42 = vld [vmem:[#allocation2 + $0xc4] sm:$0xf] }
 0x150   : > { %v8358_v32 = vpop.f32.mrb[17].mxu0  ;;  %v3329_v59 = vshrl.u32 %v3154_v41, 16  ;;  %v3327_v51 = vsel %vm7248_vm9, %v3322_v62, %v3326_v61  ;;  %v2592_v19 = vor.u32 %v2591_v46, %v2587_v60  ;;  %v3332_v23 = vshll.u32 %v3154_v41, 16 }
 0x151   : > { %v8360_v31 = vpop.f32.mrb[18].mxu0  ;;  %v3338_v36 = vshll.u32 %v3155_v30, 16  ;;  %v6028_v26 = vcombine.low %v3317_v3, %v3327_v51  ;;  %v2583_v18 = vrot.slane %v2582_v49, 4  ;;  %v8366_v9 = vsel %vm7568_vm14, %v5990_v58, %v2906_v16  ;;  %v3157_v58 = vld [vmem:[#allocation2 + $0x6c] sm:$0xf] }
 0x152   : > { %v8368_v53 = vrot.slane %v2906_v16, 4  ;;  %v2593_v43 = vrot.slane %v2592_v19, 4  ;;  %v3331_v47 = vrot.slane %v3329_v59, 4  ;;  %v3334_v24 = vrot.slane %v3332_v23, 5  ;;  %v8372_v21 = vpop.f32.mrb[19].mxu0 }
 0x153   : > { %v3340_v2 = vrot.slane %v3338_v36, 5  ;;  %5211 = vmatprep.mubr.bf16.mxu1 %v6028_v26  ;;  %v2588_v61 = vsel %vm7248_vm9, %v2583_v18, %v2587_v60  ;;  %v3342_v41 = vshrl.u32 %v3155_v30, 16  ;;  %v3348_v14 = vshll.u32 %v3156_v27, 16  ;;  %v3158_v26 = vld [vmem:[#allocation2 + $0x70] sm:$0xf] }
 0x154   : > { %v2600_v50 = vshrl.u32 %v2236_v11, 16  ;;  %v2598_v3 = vsel %vm7248_vm9, %v2593_v43, %v2597_v0  ;;  %5212 = vmatmul.mubr.bf16.gmra.mrb[100].mxu1 %v7070_v20  ;;  %v3335_v62 = vor.u32 %v3334_v24, %v3331_v47  ;;  %v2603_v46 = vshll.u32 %v2236_v11, 16  ;;  %v3159_v43 = vld [vmem:[#allocation2 + $0x74] sm:$0x1] }
 0x155   : > { %v2609_v49 = vshll.u32 %v2237_v42, 16  ;;  %v5973_v16 = vcombine.low %v2588_v61, %v2598_v3  ;;  %v1091_v59 = vld [vmem:[#allocation2 + $0xc8] sm:$0x1]  ;;  %v3344_v51 = vrot.slane %v3342_v41, 4  ;;  %v3350_v19 = vrot.slane %v3348_v14, 5 }
 0x156   : > { %v2602_v23 = vrot.slane %v2600_v50, 4  ;;  %v1092_v60 = vsel %vm7196_vm4, 0, %v1091_v59  ;;  %v3336_v30 = vrot.slane %v3335_v62, 4  ;;  %v2605_v27 = vrot.slane %v2603_v46, 5  ;;  %v3648_v50 = vld [vmem:[#allocation2 + $0x18] sm:$0xe] }
 0x157   : > { %v8378_v36 = vrot.slane %v2609_v49, 5  ;;  %5123 = vmatmul.mubr.bf16.gmra.mrb[104].mxu0 %v5973_v16  ;;  %1093 = vst [vmem:[#allocation2 + $0xc8] sm:$0x1] %v1092_v60  ;;  %v3345_v0 = vor.u32 %v3344_v51, %v3340_v2  ;;  %v2613_v20 = vshrl.u32 %v2237_v42, 16  ;;  %v8382_v11 = vadd.f32 %v8228_v35, %v8223_v44  ;;  %v7072_v62 = vld [vmem:[#allocation2 + $0x60] sm:$0xff]  }
 0x158   : > { %v8386_v18 = vadd.f32 %v8252_v52, %v8240_v38  ;;  %v3341_v24 = vsel %vm7248_vm9, %v3336_v30, %v3340_v2  ;;  %v2606_v61 = vor.u32 %v2605_v27, %v2602_v23  ;;  %v3353_v41 = vshrl.u32 %v3157_v58, 16  ;;  %v3649_v35 = vld [vmem:[#allocation2 + $0x1c] sm:$0xf]  ;;  %v3650_v59 = vld [vmem:[#allocation2 + $0x20] sm:$0x1] }
 0x159   : > { %9098 = vst [vmem:[#allocation6_spill] sm:$0xff] %v8382_v11  ;;  %v8388_v47 = vpop.f32.mrb[12].mxu1  ;;  %v3356_v14 = vshll.u32 %v3157_v58, 16  ;;  %v3346_v3 = vrot.slane %v3345_v0, 4  ;;  %v2615_v42 = vrot.slane %v2613_v20, 4  ;;  %v3362_v46 = vshll.u32 %v3158_v26, 16 }
 0x15a   : > { %9099 = vst [vmem:[#allocation7_spill] sm:$0xff] %v8386_v18  ;;  %v3366_v44 = vshrl.u32 %v3158_v26, 16  ;;  %v2607_v49 = vrot.slane %v2606_v61, 4  ;;  %v3355_v16 = vrot.slane %v3353_v41, 4  ;;  %v3372_v52 = vshll.u32 %v3159_v43, 16  ;;  %v8398_v61 = vpop.f32.mrb[13].mxu1 }
 0x15b   : > { %v3358_v38 = vrot.slane %v3356_v14, 5  ;;  %v3351_v51 = vsel %vm7248_vm9, %v3346_v3, %v3350_v19  ;;  %v2616_v2 = vor.u32 %v2615_v42, %v8378_v36  ;;  %v3364_v23 = vrot.slane %v3362_v46, 5  ;;  %v3651_v0 = vld [vmem:[#allocation2 + $0x24] sm:$0xe]  ;;  %v3652_v20 = vld [vmem:[#allocation2 + $0x28] sm:$0xf] }
 0x15c   : > { %v3368_v60 = vrot.slane %v3366_v44, 4  ;;  %v6029_v58 = vcombine.low %v3341_v24, %v3351_v51  ;;  %v2612_v30 = vsel %vm7248_vm9, %v2607_v49, %v8378_v36  ;;  %v3374_v26 = vrot.slane %v3372_v52, 5  ;;  %v3653_v19 = vld [vmem:[#allocation2 + $0x2c] sm:$0x1]  ;;  %v8400_v3 = vpop.f32.mrb[14].mxu1 }
 0x15d   : > { %v3359_v27 = vor.u32 %v3358_v38, %v3355_v16  ;;  %v2617_v43 = vrot.slane %v2616_v2, 4  ;;  %v6039_v14 = vrot.slane %v3648_v50, 9  ;;  %v3746_v18 = vrot.slane %v3649_v35, 5  ;;  %v8412_v52 = vpop.f32.mrb[15].mxu1 }
 0x15e   : > { %v3369_v41 = vor.u32 %v3368_v60, %v3364_v23  ;;  %v2750_v42 = vld [vmem:[#allocation2 + $0xc8] sm:$0x1]  ;;  %5219 = vmatprep.mubr.bf16.mxu1 %v6029_v58  ;;  %v3749_v44 = vrot.slane %v3650_v59, 5  ;;  %v8404_v36 = vadd.f32 %v8208_v37, %v8202_v4  ;;  %v8408_v49 = vadd.f32 %v8262_v12, %v8254_v25  ;;  %v7073_v60 = vld [vmem:[#allocation2 + $0x6c] sm:$0xff]  }
 0x15f   : > { %v2238_v24 = vld [vmem:[#allocation2 + $0xc8] sm:$0x1]  ;;  %v3360_v46 = vrot.slane %v3359_v27, 4  ;;  %v2909_v16 = vrot.slane %v2750_v42, 5  ;;  %5220 = vmatmul.mubr.bf16.gmra.mrb[104].mxu1 %v7072_v62  ;;  %v3747_v35 = vsel %vm7568_vm14, %v6039_v14, %v3746_v18  ;;  %v3748_v51 = vrot.slane %v3746_v18, 4 }
 0x160   : > { %v2619_v38 = vshll.u32 %v2238_v24, 16  ;;  %v3370_v50 = vrot.slane %v3369_v41, 4  ;;  %v6040_v2 = vrot.slane %v3651_v0, 9  ;;  %v3753_v4 = vrot.slane %v3652_v20, 5  ;;  %v3160_v27 = vld [vmem:[#allocation2 + $0x78] sm:$0xf] }
 0x161   : > { %v3365_v59 = vsel %vm7248_vm9, %v3360_v46, %v3364_v23  ;;  %v8416_v37 = vpop.f32.mrb[16].mxu1  ;;  %v2910_v25 = vsel %vm7568_vm14, %v8368_v53, %v2909_v16  ;;  %v3756_v58 = vrot.slane %v3653_v19, 5  ;;  %v3161_v41 = vld [vmem:[#allocation2 + $0x7c] sm:$0xf]  ;;  %v3750_v18 = vsel %vm7568_vm14, %v3748_v51, %v3749_v44  ;;  %v3162_v20 = vld [vmem:[#allocation2 + $0x80] sm:$0x1] }
 0x162   : > { %v2621_v12 = vrot.slane %v2619_v38, 5  ;;  %v3375_v62 = vsel %vm7248_vm9, %v3370_v50, %v3374_v26  ;;  %v6006_v14 = vcombine.low %v8366_v9, %v2910_v25  ;;  %v8428_v0 = vsel %vm7568_vm14, %v6040_v2, %v3753_v4  ;;  %v3654_v53 = vld [vmem:[#allocation2 + $0x30] sm:$0xe]  ;;  %v3655_v9 = vld [vmem:[#allocation2 + $0x34] sm:$0xf]  ;;  %v8436_v46 = vpop.f32.mrb[17].mxu1 }
 0x163   : > { %v6030_v23 = vcombine.low %v3365_v59, %v3375_v62  ;;  %v6055_v26 = vcombine.low %v3747_v35, %v3750_v18  ;;  %v3755_v24 = vrot.slane %v3753_v4, 4  ;;  %v8434_v19 = vadd.f32 %v8302_v29, %v8288_v1  ;;  %v3656_v59 = vld [vmem:[#allocation2 + $0x38] sm:$0x1]  ;;  %v3658_v2 = vld [vmem:[#allocation2 + $0x40] sm:$0xf]  ;;  %v8444_v4 = vpop.f32.mrb[18].mxu1 }
 0x164   : > { %v2622_v42 = vsel %vm7248_vm9, %v2617_v43, %v2621_v12  ;;  %5130 = vmatprep.mubr.bf16.mxu0 %v6006_v14  ;;  %v8440_v16 = vadd.f32 %v8306_v10, %v8304_v6  ;;  %v3377_v38 = vshrl.u32 %v3160_v27, 16  ;;  %v3380_v50 = vshll.u32 %v3160_v27, 16  ;;  %v3657_v43 = vld [vmem:[#allocation2 + $0x3c] sm:$0xe]  ;;  %v3659_v10 = vld [vmem:[#allocation2 + $0x44] sm:$0x1] }
 0x165   : > { %9100 = vst [vmem:[#allocation8_spill] sm:$0xff] %v8434_v19  ;;  %v5974_v44 = vcombine.low %v2612_v30, %v2622_v42  ;;  %5227 = vmatprep.mubr.bf16.mxu1 %v6030_v23  ;;  %v3757_v35 = vsel %vm7568_vm14, %v3755_v24, %v3756_v58  ;;  %v3386_v51 = vshll.u32 %v3161_v41, 16  ;;  %v3390_v1 = vshrl.u32 %v3161_v41, 16  ;;  %v8447_v62 = vpop.f32.mrb[19].mxu1  ;;  %v3163_v24 = vld [vmem:[#allocation2 + $0x84] sm:$0xf] }
 0x166   : > { %9101 = vst [vmem:[#allocation9_spill] sm:$0xff] %v8440_v16  ;;  %v3396_v29 = vshll.u32 %v3162_v20, 16  ;;  %v6056_v30 = vcombine.low %v8428_v0, %v3757_v35  ;;  %v3379_v25 = vrot.slane %v3377_v38, 4  ;;  %v3382_v12 = vrot.slane %v3380_v50, 5  ;;  %v3164_v35 = vld [vmem:[#allocation2 + $0x88] sm:$0xf] }
 0x167   : > { %5131 = vmatmul.mubr.bf16.gmra.mrb[108].mxu0 %v5974_v44  ;;  %v6041_v6 = vrot.slane %v3654_v53, 9  ;;  %5228 = vmatmul.mubr.bf16.gmra.mrb[108].mxu1 %v7073_v60  ;;  %v3388_v27 = vrot.slane %v3386_v51, 5  ;;  %v3392_v14 = vrot.slane %v3390_v1, 4  ;;  %v3760_v23 = vrot.slane %v3655_v9, 5  ;;  %v8449_v44 = vpop.f32.mrb[20].mxu0 }
 0x168   : > { %6905 = vmatprep.mubr.bf16.mxu0 %v6055_v26  ;;  %v3398_v58 = vrot.slane %v3396_v29, 5  ;;  %v3383_v41 = vor.u32 %v3382_v12, %v3379_v25  ;;  %v3763_v18 = vrot.slane %v3656_v59, 5  ;;  %v6042_v20 = vrot.slane %v3657_v43, 9  ;;  %v3165_v26 = vld [vmem:[#allocation2 + $0x8c] sm:$0x1]  ;;  %v7074_v29 = vld [vmem:[#allocation2 + $0x78] sm:$0xff]  }
 0x169   : > { %v3767_v42 = vrot.slane %v3658_v2, 5  ;;  %v3393_v0 = vor.u32 %v3392_v14, %v3388_v27  ;;  %v3761_v53 = vsel %vm7568_vm14, %v6041_v6, %v3760_v23  ;;  %v3762_v38 = vrot.slane %v3760_v23, 4  ;;  %v3660_v12 = vld [vmem:[#allocation2 + $0x48] sm:$0xe]  ;;  %v3661_v6 = vld [vmem:[#allocation2 + $0x4c] sm:$0xf] }
 0x16a   : > { %v3770_v50 = vrot.slane %v3659_v10, 5  ;;  %v3384_v60 = vrot.slane %v3383_v41, 4  ;;  %v8459_v59 = vadd.f32 %v8276_v15, %v8272_v22  ;;  %v8465_v2 = vadd.f32 %v8310_v45, %v8280_v28  ;;  %v8471_v10 = vpop.f32.mrb[21].mxu0  ;;  %v3662_v45 = vld [vmem:[#allocation2 + $0x50] sm:$0x1] }
 0x16b   : > { %v8455_v51 = vsel %vm7568_vm14, %v6042_v20, %v3767_v42  ;;  %v3769_v9 = vrot.slane %v3767_v42, 4  ;;  %v3394_v43 = vrot.slane %v3393_v0, 4  ;;  %v3764_v1 = vsel %vm7568_vm14, %v3762_v38, %v3763_v18  ;;  %v3663_v23 = vld [vmem:[#allocation2 + $0x54] sm:$0xe]  ;;  %v3664_v42 = vld [vmem:[#allocation2 + $0x58] sm:$0xf] }
 0x16c   : > { %v8469_v25 = vadd.f32 %v8332_v7, %v8328_v40  ;;  %v3389_v22 = vsel %vm7248_vm9, %v3384_v60, %v3388_v27  ;;  %v6057_v15 = vcombine.low %v3761_v53, %v3764_v1  ;;  %v8481_v28 = vadd.f32 %v8342_v48, %v8338_v8  ;;  %v8483_v40 = vpop.f32.mrb[22].mxu0  ;;  %v8485_v7 = vpop.f32.mrb[20].mxu1  ;;  %v3665_v60 = vld [vmem:[#allocation2 + $0x5c] sm:$0x1] }
 0x16d   : > { %v8477_v14 = vsel %vm7568_vm14, %v3769_v9, %v3770_v50  ;;  %v3399_v41 = vsel %vm7248_vm9, %v3394_v43, %v3398_v58  ;;  %v3401_v18 = vshrl.u32 %v3163_v24, 16  ;;  %v3404_v20 = vshll.u32 %v3163_v24, 16  ;;  %v8491_v0 = vpop.f32.mrb[23].mxu0  ;;  %v8493_v53 = vpop.f32.mrb[21].mxu1 }
 0x16e   : > { %9102 = vst [vmem:[#allocation10_spill] sm:$0xff] %v8469_v25  ;;  %9103 = vst [vmem:[#allocation11_spill] sm:$0xff] %v8481_v28  ;;  %v6058_v27 = vcombine.low %v8455_v51, %v8477_v14  ;;  %v6031_v8 = vcombine.low %v3389_v22, %v3399_v41  ;;  %v3410_v48 = vshll.u32 %v3164_v35, 16  ;;  %v3414_v38 = vshrl.u32 %v3164_v35, 16  ;;  %v8495_v9 = vpop.f32.mrb[22].mxu1 }
 0x16f   : > { %6906 = vmatmul.mubr.bf16.vlgmr.msra.gmra.mrb[112].mxu0 %v6056_v30  ;;  %v3420_v50 = vshll.u32 %v3165_v26, 16  ;;  %v3403_v58 = vrot.slane %v3401_v18, 4  ;;  %v3406_v43 = vrot.slane %v3404_v20, 5  ;;  %v6043_v1 = vrot.slane %v3660_v12, 9  ;;  %v8497_v14 = vpop.f32.mrb[23].mxu1  ;;  %v8499_v24 = vpop.f32.mrb[24].mxu0 }
 0x170   : > { %6909 = vmatprep.mubr.bf16.mxu0 %v6057_v15  ;;  %v3774_v51 = vrot.slane %v3661_v6, 5  ;;  %5235 = vmatprep.mubr.bf16.mxu1 %v6031_v8  ;;  %v3412_v28 = vrot.slane %v3410_v48, 5  ;;  %v3416_v25 = vrot.slane %v3414_v38, 4  ;;  %v3777_v22 = vrot.slane %v3662_v45, 5  ;;  %v3166_v18 = vld [vmem:[#allocation2 + $0x90] sm:$0xf] }
 0x171   : > { %v3422_v30 = vrot.slane %v3420_v50, 5  ;;  %5236 = vmatmul.mubr.bf16.gmra.mrb[112].mxu1 %v7074_v29  ;;  %v3407_v35 = vor.u32 %v3406_v43, %v3403_v58  ;;  %v6044_v15 = vrot.slane %v3663_v23, 9  ;;  %v3167_v20 = vld [vmem:[#allocation2 + $0x94] sm:$0xf]  ;;  %v3781_v6 = vrot.slane %v3664_v42, 5  ;;  %v8517_v42 = vpop.f32.mrb[25].mxu0 }
 0x172   : > { %v3775_v26 = vsel %vm7568_vm14, %v6043_v1, %v3774_v51  ;;  %v3776_v41 = vrot.slane %v3774_v51, 4  ;;  %v3417_v12 = vor.u32 %v3416_v25, %v3412_v28  ;;  %v3784_v16 = vrot.slane %v3665_v60, 5  ;;  %v3168_v48 = vld [vmem:[#allocation2 + $0x98] sm:$0x1]  ;;  %v3666_v25 = vld [vmem:[#allocation2 + $0x60] sm:$0xe] }
 0x173   : > { %v8505_v19 = vadd.f32 %v8320_v55, %v8316_v54  ;;  %v3408_v8 = vrot.slane %v3407_v35, 4  ;;  %v8511_v29 = vadd.f32 %v8348_v5, %v8326_v39  ;;  %v8515_v23 = vadd.f32 %v8398_v61, %v8388_v47  ;;  %v3667_v60 = vld [vmem:[#allocation2 + $0x64] sm:$0xf]  ;;  %v3668_v58 = vld [vmem:[#allocation2 + $0x68] sm:$0x1]  ;;  %v8523_v43 = vpop.f32.mrb[26].mxu0 }
 0x174   : > { %v3778_v45 = vsel %vm7568_vm14, %v3776_v41, %v3777_v22  ;;  %v3418_v38 = vrot.slane %v3417_v12, 4  ;;  %v8521_v54 = vsel %vm7568_vm14, %v6044_v15, %v3781_v6  ;;  %v3783_v55 = vrot.slane %v3781_v6, 4  ;;  %v8525_v39 = vpop.f32.mrb[24].mxu1  ;;  %v3669_v51 = vld [vmem:[#allocation2 + $0x6c] sm:$0xe]  ;;  %v8533_v22 = vpop.f32.mrb[27].mxu0 }
 0x175   : > { %9104 = vst [vmem:[#allocation12_spill] sm:$0xff] %v8515_v23  ;;  %v6059_v50 = vcombine.low %v3775_v26, %v3778_v45  ;;  %v3413_v5 = vsel %vm7248_vm9, %v3408_v8, %v3412_v28  ;;  %v8531_v47 = vadd.f32 %v8412_v52, %v8400_v3  ;;  %v3425_v61 = vshrl.u32 %v3166_v18, 16  ;;  %v8535_v35 = vpop.f32.mrb[25].mxu1  ;;  %v7075_v41 = vld [vmem:[#allocation2 + $0x84] sm:$0xff]   ;;  %v3670_v6 = vld [vmem:[#allocation2 + $0x70] sm:$0xf] }
 0x176   : > { %v3428_v1 = vshll.u32 %v3166_v18, 16  ;;  %v3423_v26 = vsel %vm7248_vm9, %v3418_v38, %v3422_v30  ;;  %v3785_v15 = vsel %vm7568_vm14, %v3783_v55, %v3784_v16  ;;  %v3434_v28 = vshll.u32 %v3167_v20, 16  ;;  %v8541_v3 = vpop.f32.mrb[26].mxu1 }
 0x177   : > { %9105 = vst [vmem:[#allocation13_spill] sm:$0xff] %v8531_v47  ;;  %6910 = vmatmul.mubr.bf16.gmra.mrb[116].mxu0 %v6058_v27  ;;  %v3438_v12 = vshrl.u32 %v3167_v20, 16  ;;  %v6032_v52 = vcombine.low %v3413_v5, %v3423_v26  ;;  %v6060_v18 = vcombine.low %v8521_v54, %v3785_v15  ;;  %v3427_v8 = vrot.slane %v3425_v61, 4  ;;  %v3671_v47 = vld [vmem:[#allocation2 + $0x74] sm:$0x1]  ;;  %v8544_v27 = vpop.f32.mrb[27].mxu1 }
 0x178   : > { %6913 = vmatprep.mubr.bf16.mxu0 %v6059_v50  ;;  %v3430_v45 = vrot.slane %v3428_v1, 5  ;;  %v3436_v23 = vrot.slane %v3434_v28, 5  ;;  %v3444_v38 = vshll.u32 %v3168_v48, 16  ;;  %v6045_v11 = vrot.slane %v3666_v25, 9  ;;  %v3169_v1 = vld [vmem:[#allocation2 + $0x9c] sm:$0xf] }
 0x179   : > { %v3440_v30 = vrot.slane %v3438_v12, 4  ;;  %5243 = vmatprep.mubr.bf16.mxu1 %v6032_v52  ;;  %v3788_v55 = vrot.slane %v3667_v60, 5  ;;  %v3791_v20 = vrot.slane %v3668_v58, 5  ;;  %v6046_v13 = vrot.slane %v3669_v51, 9  ;;  %v8546_v17 = vpop.f32.mrb[28].mxu1 }
 0x17a   : > { %v3431_v16 = vor.u32 %v3430_v45, %v3427_v8  ;;  %5244 = vmatmul.mubr.bf16.gmra.mrb[116].mxu1 %v7075_v41  ;;  %v3446_v5 = vrot.slane %v3444_v38, 5  ;;  %v3795_v54 = vrot.slane %v3670_v6, 5  ;;  %v3798_v61 = vrot.slane %v3671_v47, 5  ;;  %v8548_v26 = vpop.f32.mrb[29].mxu1  ;;  %v3170_v58 = vld [vmem:[#allocation2 + $0xa0] sm:$0xf] }
 0x17b   : > { %v3441_v50 = vor.u32 %v3440_v30, %v3436_v23  ;;  %v3789_v48 = vsel %vm7568_vm14, %v6045_v11, %v3788_v55  ;;  %v3790_v25 = vrot.slane %v3788_v55, 4  ;;  %v8554_v60 = vadd.f32 %v8358_v32, %v8354_v34  ;;  %v3171_v12 = vld [vmem:[#allocation2 + $0xa4] sm:$0x1]  ;;  %v3672_v6 = vld [vmem:[#allocation2 + $0x78] sm:$0xe]  ;;  %v7076_v32 = vld [vmem:[#allocation2 + $0x90] sm:$0xff]  }
 0x17c   : > { %v3432_v15 = vrot.slane %v3431_v16, 4  ;;  %v8558_v41 = vsel %vm7568_vm14, %v6046_v13, %v3795_v54  ;;  %v3797_v28 = vrot.slane %v3795_v54, 4  ;;  %v8562_v47 = vadd.f32 %v8372_v21, %v8360_v31  ;;  %v3673_v8 = vld [vmem:[#allocation2 + $0x7c] sm:$0xf]  ;;  %v3674_v45 = vld [vmem:[#allocation2 + $0x80] sm:$0x1] }
 0x17d   : > { %v3442_v51 = vrot.slane %v3441_v50, 4  ;;  %v3792_v34 = vsel %vm7568_vm14, %v3790_v25, %v3791_v20  ;;  %v6547_v52 = vadd.f32 %v8436_v46, %v8416_v37  ;;  %v6550_v13 = vadd.f32 %v8447_v62, %v8444_v4  ;;  %v8572_v30 = vpop.f32.mrb[30].mxu1  ;;  %v3675_v16 = vld [vmem:[#allocation2 + $0x84] sm:$0xe]  ;;  %v3676_v55 = vld [vmem:[#allocation2 + $0x88] sm:$0xf] }
 0x17e   : > { %v3437_v11 = vsel %vm7248_vm9, %v3432_v15, %v3436_v23  ;;  %v6061_v21 = vcombine.low %v3789_v48, %v3792_v34  ;;  %v3799_v23 = vsel %vm7568_vm14, %v3797_v28, %v3798_v61  ;;  %v3449_v38 = vshrl.u32 %v3169_v1, 16  ;;  %v8578_v20 = vpop.f32.mrb[31].mxu1 }
 0x17f   : > { %6914 = vmatmul.mubr.bf16.gmra.mrb[120].mxu0 %v6060_v18  ;;  %v3447_v31 = vsel %vm7248_vm9, %v3442_v51, %v3446_v5  ;;  %v6062_v46 = vcombine.low %v8558_v41, %v3799_v23  ;;  %v8582_v4 = vadd.f32 %v6547_v52, %v8216_v56  ;;  %v8585_v62 = vadd.f32 %v6550_v13, %v8248_v33  ;;  %v3677_v18 = vld [vmem:[#allocation2 + $0x8c] sm:$0x1] }
 0x180   : > { %v6033_v37 = vcombine.low %v3437_v11, %v3447_v31  ;;  %6917 = vmatprep.mubr.bf16.mxu0 %v6061_v21  ;;  %v3451_v5 = vrot.slane %v3449_v38, 4  ;;  %v3452_v54 = vshll.u32 %v3169_v1, 16  ;;  %v3458_v61 = vshll.u32 %v3170_v58, 16 }
 0x181   : > { %9106 = vst [vmem:[#allocation14_spill] sm:$0xff] %v8585_v62  ;;  %v8587_v50 = vpop.f32.mrb[32].mxu1  ;;  %v3462_v15 = vshrl.u32 %v3170_v58, 16  ;;  %v3468_v51 = vshll.u32 %v3171_v12, 16  ;;  %v6047_v41 = vrot.slane %v3672_v6, 9  ;;  %v3802_v56 = vrot.slane %v3673_v8, 5 }
 0x182   : > { %v8589_v48 = vpop.f32.mrb[28].mxu0  ;;  %v8591_v25 = vpop.f32.mrb[33].mxu1  ;;  %5251 = vmatprep.mubr.bf16.mxu1 %v6033_v37  ;;  %v3805_v28 = vrot.slane %v3674_v45, 5  ;;  %v3454_v34 = vrot.slane %v3452_v54, 5  ;;  %v3460_v52 = vrot.slane %v3458_v61, 5  ;;  %v6048_v1 = vrot.slane %v3675_v16, 9 }
 0x183   : > { %v8593_v11 = vpop.f32.mrb[29].mxu0  ;;  %v8595_v33 = vpop.f32.mrb[34].mxu1  ;;  %5252 = vmatmul.mubr.bf16.gmra.mrb[120].mxu1 %v7076_v32  ;;  %v3464_v13 = vrot.slane %v3462_v15, 4  ;;  %v3470_v21 = vrot.slane %v3468_v51, 5  ;;  %v3803_v12 = vsel %vm7568_vm14, %v6047_v41, %v3802_v56  ;;  %v3804_v6 = vrot.slane %v3802_v56, 4 }
 0x184   : > { %v8597_v31 = vpop.f32.mrb[30].mxu0  ;;  %v8599_v58 = vpop.f32.mrb[35].mxu1  ;;  %v3809_v8 = vrot.slane %v3676_v55, 5  ;;  %v3455_v23 = vor.u32 %v3454_v34, %v3451_v5  ;;  %v3812_v37 = vrot.slane %v3677_v18, 5  ;;  %v8607_v32 = vadd.f32 %v8471_v10, %v8449_v44  ;;  %v3172_v16 = vld [vmem:[#allocation2 + $0xa8] sm:$0xf] }
 0x185   : > { %v8603_v45 = vpop.f32.mrb[31].mxu0  ;;  %v3465_v38 = vor.u32 %v3464_v13, %v3460_v52  ;;  %v3806_v54 = vsel %vm7568_vm14, %v3804_v6, %v3805_v28  ;;  %v8615_v55 = vadd.f32 %v8491_v0, %v8483_v40  ;;  %v3173_v51 = vld [vmem:[#allocation2 + $0xac] sm:$0xf]  ;;  %v3174_v5 = vld [vmem:[#allocation2 + $0xb0] sm:$0x1]  ;;  %v6553_v44 = vadd.f32 %v8493_v53, %v8485_v7  ;;  %v7077_v6 = vld [vmem:[#allocation2 + $0x9c] sm:$0xff]  }
 0x186   : > { %v3810_v61 = vsel %vm7568_vm14, %v6048_v1, %v3809_v8  ;;  %v3811_v15 = vrot.slane %v3809_v8, 4  ;;  %v3456_v18 = vrot.slane %v3455_v23, 4  ;;  %v6063_v56 = vcombine.low %v3803_v12, %v3806_v54  ;;  %v3678_v10 = vld [vmem:[#allocation2 + $0x90] sm:$0xe]  ;;  %v3679_v34 = vld [vmem:[#allocation2 + $0x94] sm:$0xf] }
 0x187   : > { %6918 = vmatmul.mubr.bf16.gmra.mrb[124].mxu0 %v6062_v46  ;;  %v3466_v41 = vrot.slane %v3465_v38, 4  ;;  %v6556_v13 = vadd.f32 %v8497_v14, %v8495_v9  ;;  %v3473_v1 = vshrl.u32 %v3172_v16, 16  ;;  %v3476_v40 = vshll.u32 %v3172_v16, 16  ;;  %v3680_v0 = vld [vmem:[#allocation2 + $0x98] sm:$0x1] }
 0x188   : > { %v3813_v28 = vsel %vm7568_vm14, %v3811_v15, %v3812_v37  ;;  %v3461_v46 = vsel %vm7248_vm9, %v3456_v18, %v3460_v52  ;;  %6921 = vmatprep.mubr.bf16.mxu0 %v6063_v56  ;;  %v8628_v53 = vadd.f32 %v6553_v44, %v8404_v36  ;;  %v3681_v8 = vld [vmem:[#allocation2 + $0x9c] sm:$0xe]  ;;  %v3682_v23 = vld [vmem:[#allocation2 + $0xa0] sm:$0xf]  ;;  %v3683_v52 = vld [vmem:[#allocation2 + $0xa4] sm:$0x1] }
 0x189   : > { %v3471_v12 = vsel %vm7248_vm9, %v3466_v41, %v3470_v21  ;;  %v6064_v7 = vcombine.low %v3810_v61, %v3813_v28  ;;  %v8630_v38 = vpop.f32.mrb[36].mxu1  ;;  %v8633_v14 = vadd.f32 %v6556_v13, %v8408_v49  ;;  %v3475_v37 = vrot.slane %v3473_v1, 4 }
 0x18a   : > { %9107 = vst [vmem:[#allocation15_spill] sm:$0xff] %v8628_v53  ;;  %v6034_v9 = vcombine.low %v3461_v46, %v3471_v12  ;;  %v3478_v16 = vrot.slane %v3476_v40, 5  ;;  %v8635_v54 = vpop.f32.mrb[37].mxu1  ;;  %v3482_v21 = vshll.u32 %v3173_v51, 16  ;;  %v3486_v15 = vshrl.u32 %v3173_v51, 16 }
 0x18b   : > { %9108 = vst [vmem:[#allocation16_spill] sm:$0xff] %v8633_v14  ;;  %v3492_v18 = vshll.u32 %v3174_v5, 16  ;;  %v6049_v61 = vrot.slane %v3678_v10, 9  ;;  %v8639_v36 = vpop.f32.mrb[38].mxu1  ;;  %v3816_v44 = vrot.slane %v3679_v34, 5  ;;  %v3819_v28 = vrot.slane %v3680_v0, 5 }
 0x18c   : > { %v8637_v41 = vpop.f32.mrb[32].mxu0  ;;  %5259 = vmatprep.mubr.bf16.mxu1 %v6034_v9  ;;  %v3479_v56 = vor.u32 %v3478_v16, %v3475_v37  ;;  %v6050_v46 = vrot.slane %v3681_v8, 9  ;;  %v8643_v13 = vpop.f32.mrb[39].mxu1  ;;  %v3484_v1 = vrot.slane %v3482_v21, 5  ;;  %v3488_v40 = vrot.slane %v3486_v15, 4 }
 0x18d   : > { %v8641_v49 = vpop.f32.mrb[33].mxu0  ;;  %5260 = vmatmul.mubr.bf16.gmra.mrb[124].mxu1 %v7077_v6  ;;  %v3494_v12 = vrot.slane %v3492_v18, 5  ;;  %v3823_v51 = vrot.slane %v3682_v23, 5  ;;  %v3817_v14 = vsel %vm7568_vm14, %v6049_v61, %v3816_v44  ;;  %v3818_v9 = vrot.slane %v3816_v44, 4  ;;  %v3175_v23 = vld [vmem:[#allocation2 + $0xb4] sm:$0xf] }
 0x18e   : > { %v8645_v5 = vpop.f32.mrb[34].mxu0  ;;  %v3480_v10 = vrot.slane %v3479_v56, 4  ;;  %v3826_v37 = vrot.slane %v3683_v52, 5  ;;  %v3489_v0 = vor.u32 %v3488_v40, %v3484_v1  ;;  %v8655_v16 = vadd.f32 %v8517_v42, %v8499_v24  ;;  %v3176_v18 = vld [vmem:[#allocation2 + $0xb8] sm:$0xf] }
 0x18f   : > { %v8649_v34 = vpop.f32.mrb[35].mxu0  ;;  %6922 = vmatmul.mubr.bf16.gmra.mrb[128].mxu0 %v6064_v7  ;;  %v3824_v8 = vsel %vm7568_vm14, %v6050_v46, %v3823_v51  ;;  %v3825_v6 = vrot.slane %v3823_v51, 4  ;;  %v3820_v15 = vsel %vm7568_vm14, %v3818_v9, %v3819_v28  ;;  %v8663_v52 = vadd.f32 %v8533_v22, %v8523_v43  ;;  %v3177_v61 = vld [vmem:[#allocation2 + $0xbc] sm:$0x1]  ;;  %v3684_v28 = vld [vmem:[#allocation2 + $0xa8] sm:$0xe] }
 0x190   : > { %v3485_v21 = vsel %vm7248_vm9, %v3480_v10, %v3484_v1  ;;  %v6559_v7 = vadd.f32 %v8535_v35, %v8525_v39  ;;  %v3490_v24 = vrot.slane %v3489_v0, 4  ;;  %v6065_v42 = vcombine.low %v3817_v14, %v3820_v15  ;;  %v3685_v1 = vld [vmem:[#allocation2 + $0xac] sm:$0xf]  ;;  %v3686_v51 = vld [vmem:[#allocation2 + $0xb0] sm:$0x1] }
 0x191   : > { %v8667_v56 = vpop.f32.mrb[40].mxu1  ;;  %v3827_v44 = vsel %vm7568_vm14, %v3825_v6, %v3826_v37  ;;  %v6562_v46 = vadd.f32 %v8544_v27, %v8541_v3  ;;  %v3497_v39 = vshrl.u32 %v3175_v23, 16  ;;  %v3500_v35 = vshll.u32 %v3175_v23, 16  ;;  %v7078_v9 = vld [vmem:[#allocation2 + $0xa8] sm:$0xff]   ;;  %v3687_v0 = vld [vmem:[#allocation2 + $0xb4] sm:$0xe] }
 0x192   : > { %v8673_v40 = vpop.f32.mrb[41].mxu1  ;;  %v6066_v43 = vcombine.low %v3824_v8, %v3827_v44  ;;  %v8676_v22 = vadd.f32 %v6559_v7, %v8459_v59  ;;  %v3495_v14 = vsel %vm7248_vm9, %v3490_v24, %v3494_v12  ;;  %6925 = vmatprep.mubr.bf16.mxu0 %v6065_v42  ;;  %v3506_v27 = vshll.u32 %v3176_v18, 16  ;;  %v3688_v7 = vld [vmem:[#allocation2 + $0xb8] sm:$0xf]  ;;  %v3689_v12 = vld [vmem:[#allocation2 + $0xbc] sm:$0x1] }
 0x193   : > { %v8678_v10 = vpop.f32.mrb[42].mxu1  ;;  %v8683_v3 = vadd.f32 %v6562_v46, %v8465_v2  ;;  %v3510_v37 = vshrl.u32 %v3176_v18, 16  ;;  %v6035_v59 = vcombine.low %v3485_v21, %v3495_v14  ;;  %v3499_v6 = vrot.slane %v3497_v39, 4 }
 0x194   : > { %9109 = vst [vmem:[#allocation17_spill] sm:$0xff] %v8676_v22  ;;  %v8685_v8 = vpop.f32.mrb[43].mxu1  ;;  %v3502_v15 = vrot.slane %v3500_v35, 5  ;;  %v3516_v23 = vshll.u32 %v3177_v61, 16  ;;  %v3508_v44 = vrot.slane %v3506_v27, 5  ;;  %v6051_v53 = vrot.slane %v3684_v28, 9 }
 0x195   : > { %v3512_v22 = vrot.slane %v3510_v37, 4  ;;  %v3830_v62 = vrot.slane %v3685_v1, 5  ;;  %5267 = vmatprep.mubr.bf16.mxu1 %v6035_v59  ;;  %v3833_v2 = vrot.slane %v3686_v51, 5  ;;  %v6052_v46 = vrot.slane %v3687_v0, 9  ;;  %v3178_v51 = vld [vmem:[#allocation2 + $0xc0] sm:$0xf] }
 0x196   : > { %v3503_v24 = vor.u32 %v3502_v15, %v3499_v6  ;;  %v3518_v42 = vrot.slane %v3516_v23, 5  ;;  %5268 = vmatmul.mubr.bf16.gmra.mrb[128].mxu1 %v7078_v9  ;;  %v3837_v35 = vrot.slane %v3688_v7, 5  ;;  %v3840_v27 = vrot.slane %v3689_v12, 5  ;;  %v7079_v0 = vld [vmem:[#allocation2 + $0xb4] sm:$0xff]   ;;  %v3179_v59 = vld [vmem:[#allocation2 + $0xc4] sm:$0xf] }
 0x197   : > { %6926 = vmatmul.mubr.bf16.gmra.mrb[132].mxu0 %v6066_v43  ;;  %v3513_v18 = vor.u32 %v3512_v22, %v3508_v44  ;;  %v3831_v21 = vsel %vm7568_vm14, %v6051_v53, %v3830_v62  ;;  %v3832_v39 = vrot.slane %v3830_v62, 4  ;;  %v8689_v61 = vpop.f32.mrb[36].mxu0  ;;  %v8693_v28 = vadd.f32 %v8593_v11, %v8589_v48  ;;  %v3180_v7 = vld [vmem:[#allocation2 + $0xc8] sm:$0x1] }
 0x198   : > { %v3504_v14 = vrot.slane %v3503_v24, 4  ;;  %v8697_v1 = vadd.f32 %v8603_v45, %v8597_v31  ;;  %v8699_v43 = vpop.f32.mrb[37].mxu0  ;;  %v3838_v53 = vsel %vm7568_vm14, %v6052_v46, %v3837_v35  ;;  %v3839_v9 = vrot.slane %v3837_v35, 4  ;;  %v3690_v24 = vld [vmem:[#allocation2 + $0xc0] sm:$0xe] }
 0x199   : > { %v3514_v22 = vrot.slane %v3513_v18, 4  ;;  %v3834_v62 = vsel %vm7568_vm14, %v3832_v39, %v3833_v2  ;;  %v8705_v37 = vpop.f32.mrb[38].mxu0  ;;  %v6565_v31 = vadd.f32 %v8548_v26, %v8546_v17  ;;  %v6568_v45 = vadd.f32 %v8578_v20, %v8572_v30  ;;  %v3691_v30 = vld [vmem:[#allocation2 + $0xc4] sm:$0xf]  ;;  %v3692_v20 = vld [vmem:[#allocation2 + $0xc8] sm:$0x1] }
 0x19a   : > { %v3509_v48 = vsel %vm7248_vm9, %v3504_v14, %v3508_v44  ;;  %v6067_v11 = vcombine.low %v3831_v21, %v3834_v62  ;;  %v8713_v6 = vpop.f32.mrb[39].mxu0  ;;  %v3841_v23 = vsel %vm7568_vm14, %v3839_v9, %v3840_v27  ;;  %v3521_v12 = vshrl.u32 %v3178_v51, 16  ;;  %v1094_v18 = vld [vmem:[#allocation2 + $0xd4] sm:$0x1] }
 0x19b   : > { %v3519_v15 = vsel %vm7248_vm9, %v3514_v22, %v3518_v42  ;;  %v3524_v44 = vshll.u32 %v3178_v51, 16  ;;  %v6068_v46 = vcombine.low %v3838_v53, %v3841_v23  ;;  %v8720_v17 = vadd.f32 %v6565_v31, %v8505_v19 }
 0x19c   : > { %v6036_v2 = vcombine.low %v3509_v48, %v3519_v15  ;;  %6929 = vmatprep.mubr.bf16.mxu0 %v6067_v11  ;;  %v8723_v26 = vadd.f32 %v6568_v45, %v8511_v29  ;;  %v3523_v42 = vrot.slane %v3521_v12, 4  ;;  %v3530_v39 = vshll.u32 %v3179_v59, 16  ;;  %v3694_v11 = vld [vmem:[#allocation2 + $0xd0] sm:$0xf] }
 0x19d   : > { %v3526_v21 = vrot.slane %v3524_v44, 5  ;;  %v3534_v35 = vshrl.u32 %v3179_v59, 16  ;;  %v8725_v14 = vpop.f32.mrb[44].mxu1  ;;  %v3540_v27 = vshll.u32 %v3180_v7, 16  ;;  %v8729_v51 = vadd.f32 %v8641_v49, %v8637_v41  ;;  %v3693_v44 = vld [vmem:[#allocation2 + $0xcc] sm:$0xe] }
 0x19e   : > { %5275 = vmatprep.mubr.bf16.mxu1 %v6036_v2  ;;  %v8733_v19 = vadd.f32 %v8649_v34, %v8645_v5  ;;  %v6053_v29 = vrot.slane %v3690_v24, 9  ;;  %v8735_v22 = vpop.f32.mrb[45].mxu1  ;;  %v3532_v53 = vrot.slane %v3530_v39, 5  ;;  %v3844_v48 = vrot.slane %v3691_v30, 5  ;;  %v1039_v34 = vld [vmem:[#allocation2 + $0xcc] sm:$0x1] }
 0x19f   : > { %5276 = vmatmul.mubr.bf16.gmra.mrb[132].mxu1 %v7079_v0  ;;  %6930 = vmatmul.mubr.bf16.gmra.mrb[136].mxu0 %v6068_v46  ;;  %v3527_v62 = vor.u32 %v3526_v21, %v3523_v42  ;;  %v3536_v9 = vrot.slane %v3534_v35, 4  ;;  %v6590_v31 = vpop.f32.mrb[46].mxu1  ;;  %v3542_v45 = vrot.slane %v3540_v27, 5  ;;  %v3847_v59 = vrot.slane %v3692_v20, 5 }
 0x1a0   : > { %v6571_v41 = vadd.f32 %v8591_v25, %v8587_v50  ;;  %v1095_v5 = vsel %vm7196_vm4, 0, %v1094_v18  ;;  %v6591_v15 = vpop.f32.mrb[47].mxu1  ;;  %v3845_v0 = vsel %vm7568_vm14, %v6053_v29, %v3844_v48  ;;  %v3846_v12 = vrot.slane %v3844_v48, 4  ;;  %v3182_v25 = vld [vmem:[#allocation2 + $0xd0] sm:$0xf] }
 0x1a1   : > { %v3528_v23 = vrot.slane %v3527_v62, 4  ;;  %v3537_v7 = vor.u32 %v3536_v9, %v3532_v53  ;;  %1096 = vst [vmem:[#allocation2 + $0xd4] sm:$0x1] %v1095_v5  ;;  %v6493_v24 = vpop.f32.mrb[40].mxu0  ;;  %v3851_v46 = vrot.slane %v3694_v11, 5  ;;  %v6574_v50 = vadd.f32 %v8599_v58, %v8595_v33 }
 0x1a2   : > { %v8744_v2 = vadd.f32 %v6571_v41, %v8554_v60  ;;  %v6494_v30 = vpop.f32.mrb[41].mxu0  ;;  %v3848_v42 = vsel %vm7568_vm14, %v3846_v12, %v3847_v59  ;;  %v1040_v39 = vsel %vm7188_vm3, 0, %v1039_v34  ;;  %v6054_v60 = vrot.slane %v3693_v44, 9 }
 0x1a3   : > { %v3533_v20 = vsel %vm7248_vm9, %v3528_v23, %v3532_v53  ;;  %v3538_v18 = vrot.slane %v3537_v7, 4  ;;  %v6496_v35 = vpop.f32.mrb[42].mxu0  ;;  %v6069_v27 = vcombine.low %v3845_v0, %v3848_v42  ;;  %v3853_v29 = vrot.slane %v3851_v46, 4  ;;  %1041 = vst [vmem:[#allocation2 + $0xcc] sm:$0x1] %v1040_v39  ;;  %v7080_v53 = vld [vmem:[#allocation2 + $0xc0] sm:$0xff]  }
 0x1a4   : > { %v8755_v62 = vadd.f32 %v6574_v50, %v8562_v47  ;;  %v6497_v33 = vpop.f32.mrb[43].mxu0  ;;  %v3554_v9 = vshll.u32 %v3182_v25, 16  ;;  %v3558_v48 = vshrl.u32 %v3182_v25, 16  ;;  %v8761_v11 = vadd.f32 %v8699_v43, %v8689_v61 }
 0x1a5   : > { %v3543_v58 = vsel %vm7248_vm9, %v3538_v18, %v3542_v45  ;;  %6933 = vmatprep.mubr.bf16.mxu0 %v6069_v27  ;;  %v8765_v41 = vadd.f32 %v8713_v6, %v8705_v37  ;;  %v6577_v47 = vadd.f32 %v8635_v54, %v8630_v38  ;;  %v6580_v49 = vadd.f32 %v8643_v13, %v8639_v36 }
 0x1a6   : > { %v6037_v59 = vcombine.low %v3533_v20, %v3543_v58  ;;  %v3556_v45 = vrot.slane %v3554_v9, 5  ;;  %v3560_v5 = vrot.slane %v3558_v48, 4  ;;  %v8771_v34 = vadd.f32 %v6494_v30, %v6493_v24 }
 0x1a7   : > { %v8773_v23 = vadd.f32 %v6497_v33, %v6496_v35  ;;  %v8776_v7 = vadd.f32 %v6577_v47, %v8607_v32  ;;  %v8779_v37 = vadd.f32 %v6580_v49, %v8615_v55  ;;  %v6583_v38 = vadd.f32 %v8673_v40, %v8667_v56 }
 0x1a8   : > { %5283 = vmatprep.mubr.bf16.mxu1 %v6037_v59  ;;  %v3695_v61 = vld [vmem:[#allocation2 + $0xd4] sm:$0x1]  ;;  %v6586_v54 = vadd.f32 %v8685_v8, %v8678_v10  ;;  %v3852_v36 = vsel %vm7568_vm14, %v6054_v60, %v3851_v46  ;;  %v3561_v6 = vor.u32 %v3560_v5, %v3556_v45  ;;  %v6589_v0 = vadd.f32 %v8735_v22, %v8725_v14 }
 0x1a9   : > { %v3183_v43 = vld [vmem:[#allocation2 + $0xd4] sm:$0x1]  ;;  %5284 = vmatmul.mubr.bf16.gmra.mrb[136].mxu1 %v7080_v53  ;;  %v3854_v13 = vrot.slane %v3695_v61, 5  ;;  %v8790_v12 = vadd.f32 %v6583_v38, %v8655_v16  ;;  %v6592_v56 = vadd.f32 %v6591_v15, %v6590_v31  ;;  %v6593_v40 = vpop.f32.mrb[48].mxu1 }
 0x1aa   : > { %v3564_v32 = vshll.u32 %v3183_v43, 16  ;;  %v8793_v55 = vadd.f32 %v6586_v54, %v8663_v52  ;;  %v3181_v8 = vld [vmem:[#allocation2 + $0xcc] sm:$0xf]  ;;  %v8798_v44 = vadd.f32 %v6589_v0, %v8693_v28  ;;  %v6594_v16 = vpop.f32.mrb[49].mxu1  ;;  %v3562_v15 = vrot.slane %v3561_v6, 4 }
 0x1ab   : > { %v3855_v10 = vsel %vm7568_vm14, %v3853_v29, %v3854_v13  ;;  %v3545_v46 = vshrl.u32 %v3181_v8, 16  ;;  %v3548_v50 = vshll.u32 %v3181_v8, 16  ;;  %v8801_v14 = vadd.f32 %v6592_v56, %v8697_v1  ;;  %v6596_v25 = vpop.f32.mrb[50].mxu1  ;;  %v7081_v9 = vld [vmem:[#allocation2 + $0xcc] sm:$0xff]  }
 0x1ac   : > { %v6070_v24 = vcombine.low %v3852_v36, %v3855_v10  ;;  %v6595_v22 = vadd.f32 %v6594_v16, %v6593_v40  ;;  %v3566_v30 = vrot.slane %v3564_v32, 5  ;;  %v6597_v20 = vpop.f32.mrb[51].mxu1  ;;  %v9112_v0 = vld [vmem:[#allocation14_spill] sm:$0xff] }
 0x1ad   : > { %v3547_v52 = vrot.slane %v3545_v46, 4  ;;  %v3550_v31 = vrot.slane %v3548_v50, 5  ;;  %v6598_v42 = vadd.f32 %v6597_v20, %v6596_v25  ;;  %v9113_v25 = vld [vmem:[#allocation15_spill] sm:$0xff] }
 0x1ae   : > { %6934 = vmatmul.mubr.bf16.gmra.mrb[140].mxu0 %v6070_v24  ;;  %v8804_v28 = vadd.f32 %v6595_v22, %v8729_v51  ;;  %v3567_v29 = vsel %vm7248_vm9, %v3562_v15, %v3566_v30  ;;  %v9114_v15 = vld [vmem:[#allocation16_spill] sm:$0xff] }
 0x1af   : > { %v6499_v63 = vpop.f32.mrb[44].mxu0  ;;  %v3551_v21 = vor.u32 %v3550_v31, %v3547_v52  ;;  %v8807_v27 = vadd.f32 %v6598_v42, %v8733_v19 }
 0x1b0   : > { %v6500_v18 = vpop.f32.mrb[45].mxu0 }
 0x1b1   : > { %v6501_v39 = vadd.f32 %v6500_v18, %v6499_v63  ;;  %v6502_v35 = vpop.f32.mrb[46].mxu0  ;;  %v3552_v60 = vrot.slane %v3551_v21, 4 }
 0x1b2   : > { %v6503_v1 = vpop.f32.mrb[47].mxu0  ;;  %v6599_v58 = vpop.f32.mrb[52].mxu1 }
 0x1b3   : > { %v6504_v33 = vadd.f32 %v6503_v1, %v6502_v35  ;;  %v3557_v53 = vsel %vm7248_vm9, %v3552_v60, %v3556_v45  ;;  %v6600_v51 = vpop.f32.mrb[53].mxu1 }
 0x1b4   : > { %v6038_v48 = vcombine.low %v3557_v53, %v3567_v29  ;;  %v6601_v59 = vadd.f32 %v6600_v51, %v6599_v58  ;;  %v6602_v47 = vpop.f32.mrb[54].mxu1  ;;  %v9115_v53 = vld [vmem:[#allocation17_spill] sm:$0xff] }
 0x1b5   : > { %v6603_v5 = vpop.f32.mrb[55].mxu1 }
 0x1b6   : > { %5291 = vmatprep.mubr.bf16.mxu1 %v6038_v48  ;;  %v8814_v19 = vadd.f32 %v6601_v59, %v8761_v11  ;;  %v6604_v43 = vadd.f32 %v6603_v5, %v6602_v47 }
 0x1b7   : > { %v6657_v49 = vpop.f32.mrb[48].mxu0  ;;  %5292 = vmatmul.mubr.bf16.gmra.mrb[140].mxu1 %v7081_v9 }
 0x1b8   : > { %v6658_v61 = vpop.f32.mrb[49].mxu0  ;;  %v8817_v57 = vadd.f32 %v6604_v43, %v8765_v41 }
 0x1b9   : > { %v6659_v38 = vadd.f32 %v6658_v61, %v6657_v49  ;;  %v6660_v54 = vpop.f32.mrb[50].mxu0 }
 0x1ba   : > { %v6661_v36 = vpop.f32.mrb[51].mxu0  ;;  %v6605_v6 = vpop.f32.mrb[56].mxu1 }
 0x1bb   : > { %v8820_v45 = vadd.f32 %v6659_v38, %v8582_v4  ;;  %v6662_v13 = vadd.f32 %v6661_v36, %v6660_v54  ;;  %v6606_v56 = vpop.f32.mrb[57].mxu1 }
 0x1bc   : > { %v6607_v40 = vadd.f32 %v6606_v56, %v6605_v6  ;;  %v6608_v11 = vpop.f32.mrb[58].mxu1 }
 0x1bd   : > { %v8823_v32 = vadd.f32 %v6662_v13, %v9112_v0  ;;  %v6609_v8 = vpop.f32.mrb[59].mxu1  ;;  %v9116_v13 = vld [vmem:[#allocation6_spill] sm:$0xff] }
 0x1be   : > { %v8826_v46 = vadd.f32 %v6607_v40, %v8771_v34  ;;  %v6610_v50 = vadd.f32 %v6609_v8, %v6608_v11 }
 0x1bf   : > { %v6663_v10 = vpop.f32.mrb[52].mxu0 }
 0x1c0   : > { %v6664_v24 = vpop.f32.mrb[53].mxu0  ;;  %v8829_v4 = vadd.f32 %v6610_v50, %v8773_v23 }
 0x1c1   : > { %v6665_v41 = vadd.f32 %v6664_v24, %v6663_v10  ;;  %v6666_v16 = vpop.f32.mrb[54].mxu0 }
 0x1c2   : > { %v6667_v22 = vpop.f32.mrb[55].mxu0 }
 0x1c3   : > { %v8832_v52 = vadd.f32 %v6665_v41, %v9113_v25  ;;  %v6668_v31 = vadd.f32 %v6667_v22, %v6666_v16  ;;  %v6611_v63 = vpop.f32.mrb[60].mxu1 }
 0x1c4   : > { %v6612_v20 = vpop.f32.mrb[61].mxu1 }
 0x1c5   : > { %v8835_v30 = vadd.f32 %v6668_v31, %v9114_v15  ;;  %v6613_v42 = vadd.f32 %v6612_v20, %v6611_v63  ;;  %v6614_v34 = vpop.f32.mrb[62].mxu1  ;;  %v9118_v63 = vld [vmem:[#allocation8_spill] sm:$0xff] }
 0x1c6   : > { %v6615_v35 = vpop.f32.mrb[63].mxu1 }
 0x1c7   : > { %v6669_v18 = vpop.f32.mrb[56].mxu0  ;;  %v8837_v29 = vadd.f32 %v6613_v42, %v6501_v39  ;;  %v6616_v23 = vadd.f32 %v6615_v35, %v6614_v34 }
 0x1c8   : > { %v6670_v21 = vpop.f32.mrb[57].mxu0 }
 0x1c9   : > { %v6671_v1 = vadd.f32 %v6670_v21, %v6669_v18  ;;  %v6672_v60 = vpop.f32.mrb[58].mxu0  ;;  %v8842_v48 = vadd.f32 %v6616_v23, %v6504_v33 }
 0x1ca   : > { %v6673_v58 = vpop.f32.mrb[59].mxu0 }
 0x1cb   : > { %v8840_v9 = vadd.f32 %v6671_v1, %v9115_v53  ;;  %v6674_v51 = vadd.f32 %v6673_v58, %v6672_v60  ;;  %v6617_v47 = vpop.f32.mrb[64].mxu1 }
 0x1cc   : > { %v6618_v49 = vpop.f32.mrb[65].mxu1 }
 0x1cd   : > { %v8845_v59 = vadd.f32 %v6674_v51, %v8683_v3  ;;  %v6619_v61 = vadd.f32 %v6618_v49, %v6617_v47  ;;  %v6620_v43 = vpop.f32.mrb[66].mxu1  ;;  %v9117_v3 = vld [vmem:[#allocation7_spill] sm:$0xff] }
 0x1ce   : > { %v6621_v54 = vpop.f32.mrb[67].mxu1 }
 0x1cf   : > { %v6675_v5 = vpop.f32.mrb[60].mxu0  ;;  %v8848_v6 = vadd.f32 %v6619_v61, %v9116_v13  ;;  %v6622_v0 = vadd.f32 %v6621_v54, %v6620_v43  ;;  %v9120_v61 = vld [vmem:[#allocation10_spill] sm:$0xff] }
 0x1d0   : > { %v6676_v38 = vpop.f32.mrb[61].mxu0 }
 0x1d1   : > { %v6677_v39 = vadd.f32 %v6676_v38, %v6675_v5  ;;  %v6678_v36 = vpop.f32.mrb[62].mxu0  ;;  %v8854_v11 = vadd.f32 %v6622_v0, %v9117_v3 }
 0x1d2   : > { %v6679_v56 = vpop.f32.mrb[63].mxu0 }
 0x1d3   : > { %v8851_v33 = vadd.f32 %v6677_v39, %v8720_v17  ;;  %v6680_v40 = vadd.f32 %v6679_v56, %v6678_v36  ;;  %v6623_v8 = vpop.f32.mrb[68].mxu1 }
 0x1d4   : > { %v6624_v24 = vpop.f32.mrb[69].mxu1 }
 0x1d5   : > { %v8857_v10 = vadd.f32 %v6680_v40, %v8723_v26  ;;  %v6625_v41 = vadd.f32 %v6624_v24, %v6623_v8  ;;  %v6626_v16 = vpop.f32.mrb[70].mxu1  ;;  %v9119_v26 = vld [vmem:[#allocation9_spill] sm:$0xff] }
 0x1d6   : > { %v6627_v25 = vpop.f32.mrb[71].mxu1 }
 0x1d7   : > { %v6681_v50 = vpop.f32.mrb[64].mxu0  ;;  %v8860_v20 = vadd.f32 %v6625_v41, %v9118_v63  ;;  %v6628_v17 = vadd.f32 %v6627_v25, %v6626_v16 }
 0x1d8   : > { %v6682_v22 = vpop.f32.mrb[65].mxu0 }
 0x1d9   : > { %v6683_v31 = vadd.f32 %v6682_v22, %v6681_v50  ;;  %v6684_v15 = vpop.f32.mrb[66].mxu0  ;;  %v8866_v21 = vadd.f32 %v6628_v17, %v9119_v26 }
 0x1da   : > { %v6685_v18 = vpop.f32.mrb[67].mxu0 }
 0x1db   : > { %v8863_v42 = vadd.f32 %v6683_v31, %v8744_v2  ;;  %v6686_v34 = vadd.f32 %v6685_v18, %v6684_v15  ;;  %v6629_v1 = vpop.f32.mrb[72].mxu1 }
 0x1dc   : > { %v6630_v60 = vpop.f32.mrb[73].mxu1 }
 0x1dd   : > { %v8869_v35 = vadd.f32 %v6686_v34, %v8755_v62  ;;  %v6631_v58 = vadd.f32 %v6630_v60, %v6629_v1  ;;  %v6632_v53 = vpop.f32.mrb[74].mxu1  ;;  %v9121_v62 = vld [vmem:[#allocation11_spill] sm:$0xff] }
 0x1de   : > { %v6633_v47 = vpop.f32.mrb[75].mxu1 }
 0x1df   : > { %v6687_v23 = vpop.f32.mrb[68].mxu0  ;;  %v8872_v43 = vadd.f32 %v6631_v58, %v9120_v61  ;;  %v6634_v2 = vadd.f32 %v6633_v47, %v6632_v53 }
 0x1e0   : > { %v6688_v51 = vpop.f32.mrb[69].mxu0 }
 0x1e1   : > { %v6689_v49 = vadd.f32 %v6688_v51, %v6687_v23  ;;  %v6690_v5 = vpop.f32.mrb[70].mxu0  ;;  %v8878_v36 = vadd.f32 %v6634_v2, %v9121_v62 }
 0x1e2   : > { %v6691_v38 = vpop.f32.mrb[71].mxu0 }
 0x1e3   : > { %v8875_v54 = vadd.f32 %v6689_v49, %v8776_v7  ;;  %v6692_v39 = vadd.f32 %v6691_v38, %v6690_v5  ;;  %v9123_v5 = vld [vmem:[#allocation13_spill] sm:$0xff] }
 0x1e5   : > { %v8881_v13 = vadd.f32 %v6692_v39, %v8779_v37 }
 0x1e7   : > { %v6693_v0 = vpop.f32.mrb[72].mxu0 }
 0x1e8   : > { %v6694_v56 = vpop.f32.mrb[73].mxu0 }
 0x1e9   : > { %v6695_v40 = vadd.f32 %v6694_v56, %v6693_v0  ;;  %v6696_v3 = vpop.f32.mrb[74].mxu0 }
 0x1ea   : > { %v6697_v8 = vpop.f32.mrb[75].mxu0 }
 0x1eb   : > { %v8884_v24 = vadd.f32 %v6695_v40, %v8790_v12  ;;  %v6698_v50 = vadd.f32 %v6697_v8, %v6696_v3 }
 0x1ed   : > { %v8887_v41 = vadd.f32 %v6698_v50, %v8793_v55 }
 0x1ef   : > { %v6699_v7 = vpop.f32.mrb[76].mxu0 }
 0x1f0   : > { %v6700_v16 = vpop.f32.mrb[77].mxu0 }
 0x1f1   : > { %v6701_v22 = vadd.f32 %v6700_v16, %v6699_v7  ;;  %v6702_v25 = vpop.f32.mrb[78].mxu0 }
 0x1f2   : > { %v6703_v31 = vpop.f32.mrb[79].mxu0 }
 0x1f3   : > { %v8890_v37 = vadd.f32 %v6701_v22, %v8798_v44  ;;  %v6704_v15 = vadd.f32 %v6703_v31, %v6702_v25  ;;  %v9122_v44 = vld [vmem:[#allocation12_spill] sm:$0xff] }
 0x1f5   : > { %v8893_v63 = vadd.f32 %v6704_v15, %v8801_v14 }
 0x1f6   : > { %v6635_v18 = vpop.f32.mrb[76].mxu1 }
 0x1f7   : > { %v6705_v17 = vpop.f32.mrb[80].mxu0  ;;  %v6636_v34 = vpop.f32.mrb[77].mxu1 }
 0x1f8   : > { %v6706_v12 = vpop.f32.mrb[81].mxu0  ;;  %v6637_v55 = vadd.f32 %v6636_v34, %v6635_v18  ;;  %v6638_v60 = vpop.f32.mrb[78].mxu1 }
 0x1f9   : > { %v6707_v26 = vadd.f32 %v6706_v12, %v6705_v17  ;;  %v6708_v1 = vpop.f32.mrb[82].mxu0  ;;  %v6639_v53 = vpop.f32.mrb[79].mxu1 }
 0x1fa   : > { %v6709_v23 = vpop.f32.mrb[83].mxu0  ;;  %v8899_v47 = vadd.f32 %v6637_v55, %v9122_v44  ;;  %v6640_v49 = vadd.f32 %v6639_v53, %v6638_v60 }
 0x1fb   : > { %v8896_v58 = vadd.f32 %v6707_v26, %v8804_v28  ;;  %v6710_v51 = vadd.f32 %v6709_v23, %v6708_v1 }
 0x1fc   : > { %v8905_v61 = vadd.f32 %v6640_v49, %v9123_v5 }
 0x1fd   : > { %v8902_v14 = vadd.f32 %v6710_v51, %v8807_v27 }
 0x1fe   : > { %v6769_v38 = vpop.f32.mrb[80].mxu1 }
 0x1ff   : > { %v6711_v2 = vpop.f32.mrb[84].mxu0  ;;  %v6770_v0 = vpop.f32.mrb[81].mxu1 }
 0x200   : > { %v6712_v39 = vpop.f32.mrb[85].mxu0  ;;  %v6771_v28 = vadd.f32 %v6770_v0, %v6769_v38  ;;  %v6772_v40 = vpop.f32.mrb[82].mxu1 }
 0x201   : > { %v6713_v62 = vadd.f32 %v6712_v39, %v6711_v2  ;;  %v6714_v56 = vpop.f32.mrb[86].mxu0  ;;  %v6773_v7 = vpop.f32.mrb[83].mxu1 }
 0x202   : > { %v6715_v3 = vpop.f32.mrb[87].mxu0  ;;  %v6774_v16 = vadd.f32 %v6773_v7, %v6772_v40  ;;  %v8911_v27 = vadd.f32 %v6771_v28, %v8820_v45 }
 0x203   : > { %v8908_v8 = vadd.f32 %v6713_v62, %v8814_v19  ;;  %v6716_v50 = vadd.f32 %v6715_v3, %v6714_v56 }
 0x204   : > { %v8917_v25 = vadd.f32 %v6774_v16, %v8823_v32 }
 0x205   : > { %v8914_v22 = vadd.f32 %v6716_v50, %v8817_v57 }
 0x206   : > { %v6775_v15 = vpop.f32.mrb[84].mxu1 }
 0x207   : > { %v6717_v31 = vpop.f32.mrb[88].mxu0  ;;  %v6776_v12 = vpop.f32.mrb[85].mxu1 }
 0x208   : > { %v6718_v17 = vpop.f32.mrb[89].mxu0  ;;  %v6777_v19 = vadd.f32 %v6776_v12, %v6775_v15  ;;  %v6778_v26 = vpop.f32.mrb[86].mxu1 }
 0x209   : > { %v6719_v18 = vadd.f32 %v6718_v17, %v6717_v31  ;;  %v6720_v34 = vpop.f32.mrb[90].mxu0  ;;  %v6779_v60 = vpop.f32.mrb[87].mxu1 }
 0x20a   : > { %v6721_v1 = vpop.f32.mrb[91].mxu0  ;;  %v6780_v23 = vadd.f32 %v6779_v60, %v6778_v26  ;;  %v8923_v57 = vadd.f32 %v6777_v19, %v8832_v52 }
 0x20b   : > { %v8920_v55 = vadd.f32 %v6719_v18, %v8826_v46  ;;  %v6722_v45 = vadd.f32 %v6721_v1, %v6720_v34 }
 0x20c   : > { %v8929_v53 = vadd.f32 %v6780_v23, %v8835_v30 }
 0x20d   : > { %v8926_v32 = vadd.f32 %v6722_v45, %v8829_v4 }
 0x20e   : > { %v6781_v44 = vpop.f32.mrb[88].mxu1 }
 0x20f   : > { %v6723_v51 = vpop.f32.mrb[92].mxu0  ;;  %v6782_v2 = vpop.f32.mrb[89].mxu1 }
 0x210   : > { %v6724_v49 = vpop.f32.mrb[93].mxu0  ;;  %v6783_v46 = vadd.f32 %v6782_v2, %v6781_v44  ;;  %v6784_v39 = vpop.f32.mrb[90].mxu1 }
 0x211   : > { %v6725_v5 = vadd.f32 %v6724_v49, %v6723_v51  ;;  %v6726_v38 = vpop.f32.mrb[94].mxu0  ;;  %v6785_v56 = vpop.f32.mrb[91].mxu1 }
 0x212   : > { %v6727_v62 = vpop.f32.mrb[95].mxu0  ;;  %v6786_v28 = vadd.f32 %v6785_v56, %v6784_v39  ;;  %v8935_v4 = vadd.f32 %v6783_v46, %v8840_v9 }
 0x213   : > { %v8932_v0 = vadd.f32 %v6725_v5, %v8837_v29  ;;  %v6728_v52 = vadd.f32 %v6727_v62, %v6726_v38 }
 0x214   : > { %v8941_v40 = vadd.f32 %v6786_v28, %v8845_v59 }
 0x215   : > { %v8938_v30 = vadd.f32 %v6728_v52, %v8842_v48 }
 0x216   : > { %v6787_v50 = vpop.f32.mrb[92].mxu1 }
 0x217   : > { %v6729_v3 = vpop.f32.mrb[96].mxu0  ;;  %v6788_v31 = vpop.f32.mrb[93].mxu1 }
 0x218   : > { %v6730_v7 = vpop.f32.mrb[97].mxu0  ;;  %v6789_v29 = vadd.f32 %v6788_v31, %v6787_v50  ;;  %v6790_v17 = vpop.f32.mrb[94].mxu1 }
 0x219   : > { %v6731_v16 = vadd.f32 %v6730_v7, %v6729_v3  ;;  %v6732_v15 = vpop.f32.mrb[98].mxu0  ;;  %v6791_v34 = vpop.f32.mrb[95].mxu1 }
 0x21a   : > { %v6733_v18 = vpop.f32.mrb[99].mxu0  ;;  %v6792_v19 = vadd.f32 %v6791_v34, %v6790_v17  ;;  %v8947_v48 = vadd.f32 %v6789_v29, %v8851_v33 }
 0x21b   : > { %v8944_v12 = vadd.f32 %v6731_v16, %v8848_v6  ;;  %v6734_v9 = vadd.f32 %v6733_v18, %v6732_v15 }
 0x21c   : > { %v8953_v26 = vadd.f32 %v6792_v19, %v8857_v10 }
 0x21d   : > { %v8950_v59 = vadd.f32 %v6734_v9, %v8854_v11 }
 0x21e   : > { %v6793_v1 = vpop.f32.mrb[96].mxu1 }
 0x21f   : > { %v6794_v60 = vpop.f32.mrb[97].mxu1 }
 0x220   : > { %v6735_v45 = vpop.f32.mrb[100].mxu0  ;;  %v6795_v51 = vadd.f32 %v6794_v60, %v6793_v1  ;;  %v6796_v44 = vpop.f32.mrb[98].mxu1 }
 0x221   : > { %v6736_v23 = vpop.f32.mrb[101].mxu0  ;;  %v6797_v5 = vpop.f32.mrb[99].mxu1 }
 0x222   : > { %v6737_v6 = vadd.f32 %v6736_v23, %v6735_v45  ;;  %v6738_v49 = vpop.f32.mrb[102].mxu0  ;;  %v6798_v38 = vadd.f32 %v6797_v5, %v6796_v44  ;;  %v8956_v33 = vadd.f32 %v6795_v51, %v8863_v42 }
 0x223   : > { %v6739_v2 = vpop.f32.mrb[103].mxu0 }
 0x224   : > { %v8959_v11 = vadd.f32 %v6737_v6, %v8860_v20  ;;  %v6740_v46 = vadd.f32 %v6739_v2, %v6738_v49  ;;  %v8962_v10 = vadd.f32 %v6798_v38, %v8869_v35 }
 0x226   : > { %v8965_v39 = vadd.f32 %v6740_v46, %v8866_v21 }
 0x227   : > { %v6799_v62 = vpop.f32.mrb[100].mxu1 }
 0x228   : > { %v6800_v52 = vpop.f32.mrb[101].mxu1 }
 0x229   : > { %v6801_v56 = vadd.f32 %v6800_v52, %v6799_v62  ;;  %v6802_v28 = vpop.f32.mrb[102].mxu1 }
 0x22a   : > { %v6741_v3 = vpop.f32.mrb[104].mxu0  ;;  %v6803_v50 = vpop.f32.mrb[103].mxu1 }
 0x22b   : > { %v6742_v7 = vpop.f32.mrb[105].mxu0  ;;  %v6804_v16 = vadd.f32 %v6803_v50, %v6802_v28  ;;  %v8968_v42 = vadd.f32 %v6801_v56, %v8875_v54 }
 0x22c   : > { %v6743_v20 = vadd.f32 %v6742_v7, %v6741_v3  ;;  %v6744_v31 = vpop.f32.mrb[106].mxu0 }
 0x22d   : > { %v6745_v15 = vpop.f32.mrb[107].mxu0  ;;  %v8971_v35 = vadd.f32 %v6804_v16, %v8881_v13 }
 0x22e   : > { %v8974_v21 = vadd.f32 %v6743_v20, %v8872_v43  ;;  %v6746_v29 = vadd.f32 %v6745_v15, %v6744_v31 }
 0x230   : > { %v8977_v17 = vadd.f32 %v6746_v29, %v8878_v36 }
 0x232   : > { %v6805_v18 = vpop.f32.mrb[104].mxu1 }
 0x233   : > { %v6806_v9 = vpop.f32.mrb[105].mxu1 }
 0x234   : > { %v6807_v34 = vadd.f32 %v6806_v9, %v6805_v18  ;;  %v6808_v19 = vpop.f32.mrb[106].mxu1 }
 0x235   : > { %v6809_v1 = vpop.f32.mrb[107].mxu1 }
 0x236   : > { %v6810_v54 = vadd.f32 %v6809_v1, %v6808_v19  ;;  %v8980_v45 = vadd.f32 %v6807_v34, %v8884_v24 }
 0x238   : > { %v8983_v60 = vadd.f32 %v6810_v54, %v8887_v41 }
 0x23a   : > { %v6747_v13 = vpop.f32.mrb[108].mxu0  ;;  %v6811_v43 = vpop.f32.mrb[108].mxu1 }
 0x23b   : > { %v6748_v23 = vpop.f32.mrb[109].mxu0  ;;  %v6812_v6 = vpop.f32.mrb[109].mxu1 }
 0x23c   : > { %v6749_v51 = vadd.f32 %v6748_v23, %v6747_v13  ;;  %v6750_v44 = vpop.f32.mrb[110].mxu0  ;;  %v6813_v49 = vadd.f32 %v6812_v6, %v6811_v43  ;;  %v6814_v5 = vpop.f32.mrb[110].mxu1 }
 0x23d   : > { %v6751_v36 = vpop.f32.mrb[111].mxu0  ;;  %v6815_v46 = vpop.f32.mrb[111].mxu1 }
 0x23e   : > { %v8986_v2 = vadd.f32 %v6749_v51, %v8899_v47  ;;  %v6752_v38 = vadd.f32 %v6751_v36, %v6750_v44  ;;  %v6816_v24 = vadd.f32 %v6815_v46, %v6814_v5  ;;  %v8989_v62 = vadd.f32 %v6813_v49, %v8890_v37 }
 0x240   : > { %v8992_v41 = vadd.f32 %v6752_v38, %v8905_v61  ;;  %v8995_v52 = vadd.f32 %v6816_v24, %v8893_v63 }
 0x242   : > { %v6907_v56 = vpop.f32.mrb[112].mxu0 }
 0x243   : > { %v5343_v28 = vadd.f32 %v6907_v56, %v8923_v57  ;;  %v5334_v3 = vpop.f32.mrb[113].mxu0 }
 0x244   : > { %v5335_v50 = vadd.f32 %v5334_v3, %v8911_v27  ;;  %v6908_v47 = vpop.f32.mrb[114].mxu0  ;;  %v6817_v20 = vpop.f32.mrb[112].mxu1 }
 0x245   : > { %v5346_v7 = vadd.f32 %v6908_v47, %v8929_v53  ;;  %v5337_v16 = vpop.f32.mrb[115].mxu0  ;;  %v6818_v63 = vpop.f32.mrb[113].mxu1  ;;  %v5661_v19 = vmul.f32 %v5343_v28, %v5343_v28 }
 0x246   : > { %v5338_v37 = vadd.f32 %v5337_v16, %v8917_v25  ;;  %v6819_v57 = vadd.f32 %v6818_v63, %v6817_v20  ;;  %v6820_v31 = vpop.f32.mrb[114].mxu1  ;;  %v5659_v27 = vmul.f32 %v5335_v50, %v5335_v50 }
 0x247   : > { %v6315_v61 = vpack.c.bf16 %v5346_v7, %v5343_v28  ;;  %v6821_v18 = vpop.f32.mrb[115].mxu1  ;;  %v5662_v51 = vmul.f32 %v5346_v7, %v5346_v7 }
 0x248   : > { %v6310_v15 = vpack.c.bf16 %v5338_v37, %v5335_v50  ;;  %v5621_v29 = vadd.f32 %v5338_v37, %v5335_v50  ;;  %v5660_v53 = vmul.f32 %v5338_v37, %v5338_v37  ;;  %v6822_v9 = vadd.f32 %v6821_v18, %v6820_v31 }
 0x249   : > { %6402 = vst [vmem:[%s9005_s23 + $0x8] sm:$0xff] %v6315_v61   ;;  %v9010_v34 = vadd.f32 %v6819_v57, %v8896_v58 }
 0x24a   : > { %6311 = vst [vmem:[%s9005_s23] sm:$0xff] %v6310_v15   ;;  %v5622_v1 = vadd.f32 %v5621_v29, %v5343_v28  ;;  %v5691_v54 = vadd.f32 %v5660_v53, %v5659_v27  ;;  %v6911_v13 = vpop.f32.mrb[116].mxu0  ;;  %v9015_v43 = vadd.f32 %v6822_v9, %v8902_v14 }
 0x24b   : > { %v5359_v25 = vadd.f32 %v6911_v13, %v8947_v48  ;;  %v5350_v23 = vpop.f32.mrb[117].mxu0 }
 0x24c   : > { %v5692_v44 = vadd.f32 %v5691_v54, %v5661_v19  ;;  %v5351_v6 = vadd.f32 %v5350_v23, %v8935_v4  ;;  %v5623_v36 = vadd.f32 %v5622_v1, %v5346_v7  ;;  %v6912_v49 = vpop.f32.mrb[118].mxu0 }
 0x24d   : > { %v5362_v58 = vadd.f32 %v6912_v49, %v8953_v26  ;;  %v5353_v5 = vpop.f32.mrb[119].mxu0  ;;  %v6823_v56 = vpop.f32.mrb[116].mxu1  ;;  %v5665_v37 = vmul.f32 %v5359_v25, %v5359_v25 }
 0x24e   : > { %v5624_v38 = vadd.f32 %v5623_v36, %v5351_v6  ;;  %v5663_v46 = vmul.f32 %v5351_v6, %v5351_v6  ;;  %v5693_v24 = vadd.f32 %v5692_v44, %v5662_v51  ;;  %v5354_v48 = vadd.f32 %v5353_v5, %v8941_v40  ;;  %v6824_v14 = vpop.f32.mrb[117].mxu1 }
 0x24f   : > { %v6325_v28 = vpack.c.bf16 %v5362_v58, %v5359_v25  ;;  %v6826_v4 = vpop.f32.mrb[118].mxu1  ;;  %v6825_v7 = vadd.f32 %v6824_v14, %v6823_v56  ;;  %v5666_v31 = vmul.f32 %v5362_v58, %v5362_v58 }
 0x250   : > { %v5694_v3 = vadd.f32 %v5693_v24, %v5663_v46  ;;  %v6320_v50 = vpack.c.bf16 %v5354_v48, %v5351_v6  ;;  %v5625_v47 = vadd.f32 %v5624_v38, %v5354_v48  ;;  %v5664_v16 = vmul.f32 %v5354_v48, %v5354_v48  ;;  %v6827_v20 = vpop.f32.mrb[119].mxu1 }
 0x251   : > { %6404 = vst [vmem:[%s9005_s23 + $0x18] sm:$0xff] %v6325_v28   ;;  %v6828_v57 = vadd.f32 %v6827_v20, %v6826_v4  ;;  %v5246_v15 = vadd.f32 %v6825_v7, %v8908_v8 }
 0x252   : > { %6403 = vst [vmem:[%s9005_s23 + $0x10] sm:$0xff] %v6320_v50   ;;  %v5626_v26 = vadd.f32 %v5625_v47, %v5359_v25  ;;  %v5695_v63 = vadd.f32 %v5694_v3, %v5664_v16  ;;  %v6915_v61 = vpop.f32.mrb[120].mxu0 }
 0x253   : > { %v5375_v40 = vadd.f32 %v6915_v61, %v8968_v42  ;;  %v5366_v27 = vpop.f32.mrb[121].mxu0  ;;  %v9026_v19 = vadd.f32 %v6828_v57, %v8914_v22 }
 0x254   : > { %v5696_v29 = vadd.f32 %v5695_v63, %v5665_v37  ;;  %v5367_v53 = vadd.f32 %v5366_v27, %v8956_v33  ;;  %v5627_v18 = vadd.f32 %v5626_v26, %v5362_v58  ;;  %v6916_v9 = vpop.f32.mrb[122].mxu0 }
 0x255   : > { %v5378_v1 = vadd.f32 %v6916_v9, %v8971_v35  ;;  %v5369_v54 = vpop.f32.mrb[123].mxu0  ;;  %v5669_v38 = vmul.f32 %v5375_v40, %v5375_v40 }
 0x256   : > { %v5628_v13 = vadd.f32 %v5627_v18, %v5367_v53  ;;  %v5667_v25 = vmul.f32 %v5367_v53, %v5367_v53  ;;  %v5697_v23 = vadd.f32 %v5696_v29, %v5666_v31  ;;  %v5370_v42 = vadd.f32 %v5369_v54, %v8962_v10  ;;  %v6829_v51 = vpop.f32.mrb[120].mxu1 }
 0x257   : > { %v6335_v8 = vpack.c.bf16 %v5378_v1, %v5375_v40  ;;  %v6830_v44 = vpop.f32.mrb[121].mxu1  ;;  %v5670_v56 = vmul.f32 %v5378_v1, %v5378_v1 }
 0x258   : > { %v5698_v6 = vadd.f32 %v5697_v23, %v5667_v25  ;;  %v6330_v33 = vpack.c.bf16 %v5370_v42, %v5367_v53  ;;  %v5629_v36 = vadd.f32 %v5628_v13, %v5370_v42  ;;  %v5668_v49 = vmul.f32 %v5370_v42, %v5370_v42  ;;  %v6832_v58 = vpop.f32.mrb[122].mxu1 }
 0x259   : > { %6406 = vst [vmem:[%s9005_s23 + $0x28] sm:$0xff] %v6335_v8   ;;  %v6831_v22 = vadd.f32 %v6830_v44, %v6829_v51  ;;  %v6833_v5 = vpop.f32.mrb[123].mxu1 }
 0x25a   : > { %6405 = vst [vmem:[%s9005_s23 + $0x20] sm:$0xff] %v6330_v33   ;;  %v5630_v35 = vadd.f32 %v5629_v36, %v5375_v40  ;;  %v5699_v46 = vadd.f32 %v5698_v6, %v5668_v49  ;;  %v6919_v24 = vpop.f32.mrb[124].mxu0  ;;  %v6834_v48 = vadd.f32 %v6833_v5, %v6832_v58 }
 0x25b   : > { %v5391_v10 = vadd.f32 %v6919_v24, %v8989_v62  ;;  %v5382_v28 = vpop.f32.mrb[125].mxu0  ;;  %v5254_v14 = vadd.f32 %v6831_v22, %v8920_v55 }
 0x25c   : > { %v5700_v3 = vadd.f32 %v5699_v46, %v5669_v38  ;;  %v5383_v50 = vadd.f32 %v5382_v28, %v8980_v45  ;;  %v5631_v47 = vadd.f32 %v5630_v35, %v5378_v1  ;;  %v6920_v16 = vpop.f32.mrb[126].mxu0  ;;  %v9036_v4 = vadd.f32 %v6834_v48, %v8926_v32 }
 0x25d   : > { %v5394_v7 = vadd.f32 %v6920_v16, %v8995_v52  ;;  %v5385_v20 = vpop.f32.mrb[127].mxu0  ;;  %v5673_v29 = vmul.f32 %v5391_v10, %v5391_v10 }
 0x25e   : > { %v5632_v37 = vadd.f32 %v5631_v47, %v5383_v50  ;;  %v5671_v26 = vmul.f32 %v5383_v50, %v5383_v50  ;;  %v5701_v63 = vadd.f32 %v5700_v3, %v5670_v56  ;;  %v5386_v62 = vadd.f32 %v5385_v20, %v8983_v60 }
 0x25f   : > { %v6345_v61 = vpack.c.bf16 %v5394_v7, %v5391_v10  ;;  %v5674_v1 = vmul.f32 %v5394_v7, %v5394_v7 }
 0x260   : > { %v5702_v55 = vadd.f32 %v5701_v63, %v5671_v26  ;;  %v6340_v57 = vpack.c.bf16 %v5386_v62, %v5383_v50  ;;  %v5633_v31 = vadd.f32 %v5632_v37, %v5386_v62  ;;  %v5672_v45 = vmul.f32 %v5386_v62, %v5386_v62  ;;  %v6835_v40 = vpop.f32.mrb[124].mxu1 }
 0x261   : > { %6408 = vst [vmem:[%s9005_s23 + $0x38] sm:$0xff] %v6345_v61   ;;  %v6836_v27 = vpop.f32.mrb[125].mxu1 }
 0x262   : > { %6407 = vst [vmem:[%s9005_s23 + $0x30] sm:$0xff] %v6340_v57   ;;  %v5634_v32 = vadd.f32 %v5633_v31, %v5391_v10  ;;  %v5703_v53 = vadd.f32 %v5702_v55, %v5672_v45  ;;  %v6923_v18 = vpop.f32.mrb[128].mxu0  ;;  %v6837_v52 = vadd.f32 %v6836_v27, %v6835_v40  ;;  %v6838_v9 = vpop.f32.mrb[126].mxu1 }
 0x263   : > { %v5407_v54 = vadd.f32 %v6923_v18, %v5246_v15  ;;  %v5398_v13 = vpop.f32.mrb[129].mxu0  ;;  %v6839_v25 = vpop.f32.mrb[127].mxu1 }
 0x264   : > { %v5704_v60 = vadd.f32 %v5703_v53, %v5673_v29  ;;  %v5399_v23 = vadd.f32 %v5398_v13, %v9010_v34  ;;  %v5635_v42 = vadd.f32 %v5634_v32, %v5394_v7  ;;  %v6924_v51 = vpop.f32.mrb[130].mxu0  ;;  %v6840_v8 = vadd.f32 %v6839_v25, %v6838_v9 }
 0x265   : > { %v5410_v44 = vadd.f32 %v6924_v51, %v9026_v19  ;;  %v5401_v6 = vpop.f32.mrb[131].mxu0  ;;  %v5262_v33 = vadd.f32 %v6837_v52, %v8932_v0  ;;  %v5677_v24 = vmul.f32 %v5407_v54, %v5407_v54 }
 0x266   : > { %v5636_v36 = vadd.f32 %v5635_v42, %v5399_v23  ;;  %v5675_v49 = vmul.f32 %v5399_v23, %v5399_v23  ;;  %v5705_v58 = vadd.f32 %v5704_v60, %v5674_v1  ;;  %v5402_v15 = vadd.f32 %v5401_v6, %v9015_v43 }
 0x267   : > { %v6355_v22 = vpack.c.bf16 %v5410_v44, %v5407_v54  ;;  %v5265_v5 = vadd.f32 %v6840_v8, %v8938_v30  ;;  %v5678_v0 = vmul.f32 %v5410_v44, %v5410_v44 }
 0x268   : > { %v5706_v38 = vadd.f32 %v5705_v58, %v5675_v49  ;;  %v6350_v34 = vpack.c.bf16 %v5402_v15, %v5399_v23  ;;  %v5637_v35 = vadd.f32 %v5636_v36, %v5402_v15  ;;  %v5676_v46 = vmul.f32 %v5402_v15, %v5402_v15 }
 0x269   : > { %6410 = vst [vmem:[%s9005_s23 + $0x48] sm:$0xff] %v6355_v22   ;;  %v6841_v56 = vpop.f32.mrb[128].mxu1 }
 0x26a   : > { %6409 = vst [vmem:[%s9005_s23 + $0x40] sm:$0xff] %v6350_v34   ;;  %v5638_v48 = vadd.f32 %v5637_v35, %v5407_v54  ;;  %v5707_v19 = vadd.f32 %v5706_v38, %v5676_v46  ;;  %v6927_v10 = vpop.f32.mrb[132].mxu0  ;;  %v6842_v3 = vpop.f32.mrb[129].mxu1 }
 0x26b   : > { %v5423_v28 = vadd.f32 %v6927_v10, %v5262_v33  ;;  %v5414_v50 = vpop.f32.mrb[133].mxu0  ;;  %v6843_v43 = vadd.f32 %v6842_v3, %v6841_v56  ;;  %v6844_v7 = vpop.f32.mrb[130].mxu1 }
 0x26c   : > { %v5708_v47 = vadd.f32 %v5707_v19, %v5677_v24  ;;  %v5415_v16 = vadd.f32 %v5414_v50, %v5254_v14  ;;  %v5639_v30 = vadd.f32 %v5638_v48, %v5410_v44  ;;  %v6928_v20 = vpop.f32.mrb[134].mxu0  ;;  %v6845_v26 = vpop.f32.mrb[131].mxu1 }
 0x26d   : > { %v5426_v37 = vadd.f32 %v6928_v20, %v5265_v5  ;;  %v5417_v63 = vpop.f32.mrb[135].mxu0  ;;  %v6846_v57 = vadd.f32 %v6845_v26, %v6844_v7  ;;  %v5270_v40 = vadd.f32 %v6843_v43, %v8944_v12  ;;  %v5681_v9 = vmul.f32 %v5423_v28, %v5423_v28 }
 0x26e   : > { %v5640_v62 = vadd.f32 %v5639_v30, %v5415_v16  ;;  %v5679_v61 = vmul.f32 %v5415_v16, %v5415_v16  ;;  %v5709_v55 = vadd.f32 %v5708_v47, %v5678_v0  ;;  %v5418_v45 = vadd.f32 %v5417_v63, %v9036_v4 }
 0x26f   : > { %v6365_v31 = vpack.c.bf16 %v5426_v37, %v5423_v28  ;;  %v5273_v14 = vadd.f32 %v6846_v57, %v8950_v59  ;;  %v5682_v12 = vmul.f32 %v5426_v37, %v5426_v37 }
 0x270   : > { %v5710_v27 = vadd.f32 %v5709_v55, %v5679_v61  ;;  %v6360_v29 = vpack.c.bf16 %v5418_v45, %v5415_v16  ;;  %v5641_v32 = vadd.f32 %v5640_v62, %v5418_v45  ;;  %v5680_v53 = vmul.f32 %v5418_v45, %v5418_v45 }
 0x271   : > { %6412 = vst [vmem:[%s9005_s23 + $0x58] sm:$0xff] %v6365_v31  }
 0x272   : > { %v6847_v18 = vpop.f32.mrb[132].mxu1  ;;  %v6931_v52 = vpop.f32.mrb[136].mxu0  ;;  %6411 = vst [vmem:[%s9005_s23 + $0x50] sm:$0xff] %v6360_v29   ;;  %v5642_v1 = vadd.f32 %v5641_v32, %v5423_v28  ;;  %v5711_v54 = vadd.f32 %v5710_v27, %v5680_v53 }
 0x273   : > { %v6848_v13 = vpop.f32.mrb[133].mxu1  ;;  %v5430_v25 = vpop.f32.mrb[137].mxu0 }
 0x274   : > { %v6849_v60 = vadd.f32 %v6848_v13, %v6847_v18  ;;  %v5431_v23 = vadd.f32 %v5430_v25, %v5270_v40  ;;  %v6850_v4 = vpop.f32.mrb[134].mxu1  ;;  %v6932_v42 = vpop.f32.mrb[138].mxu0  ;;  %v5712_v51 = vadd.f32 %v5711_v54, %v5681_v9  ;;  %v5643_v8 = vadd.f32 %v5642_v1, %v5426_v37 }
 0x275   : > { %v6851_v59 = vpop.f32.mrb[135].mxu1  ;;  %v5433_v44 = vpop.f32.mrb[139].mxu0 }
 0x276   : > { %v5278_v6 = vadd.f32 %v6849_v60, %v8959_v11  ;;  %v5683_v33 = vmul.f32 %v5431_v23, %v5431_v23  ;;  %v6852_v36 = vadd.f32 %v6851_v59, %v6850_v4  ;;  %v5434_v49 = vadd.f32 %v5433_v44, %v5273_v14 }
 0x277   : > { %v5644_v58 = vadd.f32 %v5643_v8, %v5431_v23  ;;  %v5713_v15 = vadd.f32 %v5712_v51, %v5682_v12 }
 0x278   : > { %v5439_v22 = vadd.f32 %v6931_v52, %v5278_v6  ;;  %v5281_v5 = vadd.f32 %v6852_v36, %v8965_v39  ;;  %v6370_v38 = vpack.c.bf16 %v5434_v49, %v5431_v23  ;;  %v5684_v34 = vmul.f32 %v5434_v49, %v5434_v49 }
 0x279   : > { %v5714_v35 = vadd.f32 %v5713_v15, %v5683_v33  ;;  %v5645_v46 = vadd.f32 %v5644_v58, %v5434_v49 }
 0x27a   : > { %v5685_v24 = vmul.f32 %v5439_v22, %v5439_v22  ;;  %v5442_v48 = vadd.f32 %v6932_v42, %v5281_v5  ;;  %6413 = vst [vmem:[%s9005_s23 + $0x60] sm:$0xff] %v6370_v38  }
 0x27b   : > { %v5646_v19 = vadd.f32 %v5645_v46, %v5439_v22  ;;  %v5715_v56 = vadd.f32 %v5714_v35, %v5684_v34 }
 0x27c   : > { %v6375_v10 = vpack.c.bf16 %v5442_v48, %v5439_v22  ;;  %v5686_v11 = vmul.f32 %v5442_v48, %v5442_v48  ;;  %v6853_v0 = vpop.f32.mrb[136].mxu1 }
 0x27d   : > { %v5716_v28 = vadd.f32 %v5715_v56, %v5685_v24  ;;  %v6854_v3 = vpop.f32.mrb[137].mxu1  ;;  %v5647_v50 = vadd.f32 %v5646_v19, %v5442_v48 }
 0x27e   : > { %6414 = vst [vmem:[%s9005_s23 + $0x68] sm:$0xff] %v6375_v10   ;;  %v6855_v47 = vadd.f32 %v6854_v3, %v6853_v0  ;;  %v6856_v43 = vpop.f32.mrb[138].mxu1 }
 0x27f   : > { %v6857_v39 = vpop.f32.mrb[139].mxu1  ;;  %v5717_v16 = vadd.f32 %v5716_v28, %v5686_v11 }
 0x280   : > { %v6858_v30 = vadd.f32 %v6857_v39, %v6856_v43  ;;  %v5286_v7 = vadd.f32 %v6855_v47, %v8974_v21 }
 0x281   : > { %v6935_v20 = vpop.f32.mrb[140].mxu0 }
 0x282   : > { %v5446_v37 = vpop.f32.mrb[141].mxu0  ;;  %v5289_v26 = vadd.f32 %v6858_v30, %v8977_v17 }
 0x283   : > { %v5447_v63 = vadd.f32 %v5446_v37, %v5286_v7  ;;  %v6936_v62 = vpop.f32.mrb[142].mxu0 }
 0x284   : > { %v5449_v61 = vpop.f32.mrb[143].mxu0 }
 0x285   : > { %v5648_v55 = vadd.f32 %v5647_v50, %v5447_v63  ;;  %v5687_v57 = vmul.f32 %v5447_v63, %v5447_v63  ;;  %v5450_v31 = vadd.f32 %v5449_v61, %v5289_v26 }
 0x287   : > { %v5718_v45 = vadd.f32 %v5717_v16, %v5687_v57  ;;  %v6380_v40 = vpack.c.bf16 %v5450_v31, %v5447_v63  ;;  %v5649_v27 = vadd.f32 %v5648_v55, %v5450_v31  ;;  %v5688_v14 = vmul.f32 %v5450_v31, %v5450_v31 }
 0x289   : > { %6415 = vst [vmem:[%s9005_s23 + $0x70] sm:$0xff] %v6380_v40   ;;  %v5719_v29 = vadd.f32 %v5718_v45, %v5688_v14 }
 0x28a   : > { %v6859_v32 = vpop.f32.mrb[140].mxu1 }
 0x28b   : > { %v6860_v53 = vpop.f32.mrb[141].mxu1 }
 0x28c   : > { %v6861_v21 = vadd.f32 %v6860_v53, %v6859_v32  ;;  %v6862_v18 = vpop.f32.mrb[142].mxu1 }
 0x28d   : > { %v6863_v52 = vpop.f32.mrb[143].mxu1 }
 0x28e   : > { %v5294_v17 = vadd.f32 %v6861_v21, %v8986_v2  ;;  %v6864_v9 = vadd.f32 %v6863_v52, %v6862_v18 }
 0x290   : > { %v5455_v1 = vadd.f32 %v6935_v20, %v5294_v17  ;;  %v5297_v54 = vadd.f32 %v6864_v9, %v8992_v41 }
 0x292   : > { %v5650_v13 = vadd.f32 %v5649_v27, %v5455_v1  ;;  %v5689_v25 = vmul.f32 %v5455_v1, %v5455_v1  ;;  %v5458_v60 = vadd.f32 %v6936_v62, %v5297_v54 }
 0x294   : > { %v5720_v23 = vadd.f32 %v5719_v29, %v5689_v25  ;;  %v6385_v4 = vpack.c.bf16 %v5458_v60, %v5455_v1  ;;  %v5651_v42 = vadd.f32 %v5650_v13, %v5458_v60  ;;  %v5690_v12 = vmul.f32 %v5458_v60, %v5458_v60 }
 0x296   : > { %6416 = vst [vmem:[%s9005_s23 + $0x78] sm:$0xff] %v6385_v4   ;;  %v5652_v51 = vrot.slane %v5651_v42, 4  ;;  %v5721_v8 = vadd.f32 %v5720_v23, %v5690_v12 }
 0x298   : > { %v5653_v59 = vadd.f32 %v5652_v51, %v5651_v42  ;;  %v5722_v44 = vrot.slane %v5721_v8, 4 }
 0x29a   : > { %v5654_v6 = vrot.slane %v5653_v59, 2  ;;  %v5723_v2 = vadd.f32 %v5722_v44, %v5721_v8 }
 0x29c   : > { %v5655_v33 = vadd.f32 %v5654_v6, %v5653_v59  ;;  %v5724_v36 = vrot.slane %v5723_v2, 2 }
 0x29e   : > { %v5656_v49 = vrot.slane %v5655_v33, 1  ;;  %v5725_v41 = vadd.f32 %v5724_v36, %v5723_v2 }
 0x2a0   : > { %v5657_v58 = vadd.f32 %v5656_v49, %v5655_v33  ;;  %v5726_v15 = vrot.slane %v5725_v41, 1 }
 0x2a2   : > { %v5727_v22 = vadd.f32 %v5726_v15, %v5725_v41  ;;  %5729 = vst [vmem:[%s265_s25] sm:$0x1] %v5657_v58 }
 0x2a4   : > { %5730 = vst [vmem:[%s268_s28] sm:$0x1] %v5727_v22 }
 0x2a5 PF: > { %s17_s21 = sadd.s32 1, %s7093_s21  }
 0x2a6   : > { %p14_p4 = scmp.ge.s32.totalorder %s17_s21, 4  }
 0x2a8   :  { %16 = sbr.rel (!%p14_p4) target bundleno = 1 (0x1), region = 93 }

</bundles_post_ra>
